<compile_context>
chip_gen: v6e
topology: v6e:2x2x1
jax: 0.10.0
libtpu: 0.0.40
codegen_flags: <defaults>
</compile_context>

<pallas_src>
import functools
import math

import jax
import jax.numpy as jnp
from jax import lax
from jax.experimental import pallas as pl
from jax.experimental.pallas import tpu as pltpu

_BF16 = jnp.bfloat16


def _round_up(n, m):
    return ((n + m - 1) // m) * m


# ----------------------------------------------------------------------------
# Kernel 1: 3x3 conv (pad 1) + folded BatchNorm + ReLU + fused MaxPool2d
#           (batch & space folded into a 128-aligned lane axis)
# ----------------------------------------------------------------------------
def _conv_bn_relu_pool_kernel(x_ref, w_ref, b_ref, o_ref, *, Fp, tp, fp):
    x = x_ref[...]                                    # (Cin, NL) f32, pre-padded image
    NL = x.shape[1]
    Cout = w_ref.shape[1]
    acc = jnp.zeros((Cout, NL), jnp.float32)
    # 3x3 conv as 9 accumulated tap-dots: spatial pre-padding in the wrapper
    # means every tap is a plain in-image lane roll (no boundary masks, no
    # im2col sublane concat).
    for ky in range(3):
        for kx in range(3):
            shift = ky * Fp + kx
            tap = x if shift == 0 else jnp.roll(x, -shift, axis=1)
            acc = acc + jnp.dot(w_ref[ky * 3 + kx], tap.astype(_BF16),
                                preferred_element_type=jnp.float32)
    y = jnp.maximum(acc + b_ref[...], 0.0)            # folded BN affine + ReLU
    # fused MaxPool2d((tp, fp)): the window max lands on the window-origin lane;
    # the wrapper strided-slices those lanes out.
    m = y
    for dt in range(tp):
        for df in range(fp):
            if dt == 0 and df == 0:
                continue
            m = jnp.maximum(m, jnp.roll(y, -(dt * Fp + df), axis=1))
    o_ref[...] = m


def conv_bn_relu_pool_pallas(x, st):
    B, Cin, T, F = x.shape
    tp, fp = st['pool']
    To, Fo = T // tp, F // fp
    Tp, Fp = T + 2, F + 2
    W, b = st['w'], st['b']
    scale, shift = st['bn_s'], st['bn_t']
    Cout = W.shape[0]
    # Fold eval-mode BatchNorm into the conv weights / bias (tap-major layout).
    w_eff = (W * scale[:, None, None, None]).transpose(2, 3, 0, 1).reshape(9, Cout, Cin)
    b_eff = (b * scale + shift).reshape(Cout, 1)
    # Spatially pre-pad, flatten batch+space into lanes, pad lanes to 128.
    xp = jnp.pad(x, ((0, 0), (0, 0), (1, 1), (1, 1)))
    N = B * Tp * Fp
    NL = _round_up(N, 128)
    x2 = jnp.transpose(xp, (1, 0, 2, 3)).reshape(Cin, N)
    x2 = jnp.pad(x2, ((0, 0), (0, NL - N)))
    kernel = functools.partial(_conv_bn_relu_pool_kernel, Fp=Fp, tp=tp, fp=fp)
    # TODO(synk): at production B*T*F sizes, grid over the lane axis in
    # 128-multiple blocks and set vmem_limit_bytes instead of holding the whole
    # slab in VMEM (v7x has only 64 MiB).
    out = pl.pallas_call(
        kernel,
        out_shape=jax.ShapeDtypeStruct((Cout, NL), jnp.float32),
    )(x2, w_eff.astype(_BF16), b_eff)
    out = out[:, :N].reshape(Cout, B, Tp, Fp)[:, :, :To * tp:tp, :Fo * fp:fp]
    return jnp.transpose(out, (1, 0, 2, 3))           # (B, Cout, To, Fo)


# ----------------------------------------------------------------------------
# Kernel 2a: generic lane-dense "X @ W + b" (used for the hoisted GRU input
#            projection of all timesteps / both directions)
# ----------------------------------------------------------------------------
def _matmul_bias_kernel(x_ref, w_ref, b_ref, o_ref):
    o_ref[...] = jnp.dot(x_ref[...].astype(_BF16), w_ref[...],
                         preferred_element_type=jnp.float32) + b_ref[...]


# ----------------------------------------------------------------------------
# Kernel 2b: bidirectional GRU recurrence (gate projections precomputed),
#            the two directions run on a "parallel" grid axis
# ----------------------------------------------------------------------------
def _gru_rec_kernel(gi_ref, whh_ref, bhh_ref, o_ref, *, T, B, H):
    reverse = pl.program_id(0) == 1
    whh = whh_ref[0]                                  # (H, Gp)  f32
    bhh = bhh_ref[0]                                  # (1, Gp)

    def step(i, h):
        t = jnp.where(reverse, T - 1 - i, i)
        gi = gi_ref[0, t]                             # (B, Gp), precomputed x@Wih+bih
        gh = jnp.dot(h, whh, preferred_element_type=jnp.float32) + bhh
        r = jax.nn.sigmoid(gi[:, :H] + gh[:, :H])
        z = jax.nn.sigmoid(gi[:, H:2 * H] + gh[:, H:2 * H])
        n = jnp.tanh(gi[:, 2 * H:3 * H] + r * gh[:, 2 * H:3 * H])
        h_new = (1.0 - z) * n + z * h
        o_ref[0, t] = h_new
        return h_new

    lax.fori_loop(0, T, step, jnp.zeros((B, H), jnp.float32))


def gru_pallas(seq, gp):
    # TODO(synk): stack nb_rnn_layers > 1 by chaining this BiGRU block.
    B, T, Din = seq.shape
    H = gp['whh'].shape[1]
    G = 3 * H
    Gp = _round_up(G, 128)                            # pad gate width -> unmasked lanes
    padw = ((0, 0), (0, 0), (0, Gp - G))
    wih = jnp.pad(gp['wih'], padw)                    # (2, Din, Gp)
    whh = jnp.pad(gp['whh'], padw)                    # (2, H,   Gp)
    bih = jnp.pad(gp['bih'], padw)                    # (2, 1,   Gp)
    bhh = jnp.pad(gp['bhh'], padw)
    xs = jnp.transpose(seq, (1, 0, 2)).reshape(T * B, Din)       # time-major tokens

    # (a) hoisted input-to-hidden projection: ONE lane-dense MXU matmul covering
    #     all T timesteps and both directions (instead of 2*T tiny in-loop dots).
    w_in = jnp.concatenate([wih[0], wih[1]], axis=1).astype(_BF16)   # (Din, 2*Gp)
    b_in = jnp.concatenate([bih[0], bih[1]], axis=1)                 # (1,   2*Gp)
    gi = pl.pallas_call(
        _matmul_bias_kernel,
        out_shape=jax.ShapeDtypeStruct((T * B, 2 * Gp), jnp.float32),
    )(xs, w_in, b_in)
    gi = gi.reshape(T, B, 2, Gp).transpose(2, 0, 1, 3)               # (2, T, B, Gp)

    # (b) sequential h-recurrence, one direction per (parallel) grid step.
    kernel = functools.partial(_gru_rec_kernel, T=T, B=B, H=H)
    out = pl.pallas_call(
        kernel,
        out_shape=jax.ShapeDtypeStruct((2, T, B, H), jnp.float32),
        grid=(2,),
        in_specs=[
            pl.BlockSpec((1, T, B, Gp), lambda d: (d, 0, 0, 0)),
            pl.BlockSpec((1, H, Gp), lambda d: (d, 0, 0)),
            pl.BlockSpec((1, 1, Gp), lambda d: (d, 0, 0)),
        ],
        out_specs=pl.BlockSpec((1, T, B, H), lambda d: (d, 0, 0, 0)),
        compiler_params=pltpu.CompilerParams(dimension_semantics=("parallel",)),
    )(gi, whh, bhh)
    y = jnp.concatenate([out[0], out[1]], axis=-1)    # (T, B, 2H)
    return jnp.transpose(y, (1, 0, 2))                # (B, T, 2H)


# ----------------------------------------------------------------------------
# Kernel 3: one fused Conformer layer (FFN/MHSA/conv-module/FFN/LN),
#           batch folded into the token axis, weights packed into 5 slabs
# ----------------------------------------------------------------------------
_VEC_NAMES = ('f1_lnw', 'f1_lnb', 'f1_b2',
              'a_lnw', 'a_lnb', 'a_bq', 'a_bk', 'a_bv', 'a_bo',
              'c_lnw', 'c_lnb', 'c_ba', 'c_bg', 'c_bdw', 'c_bns', 'c_bnt', 'c_bp2',
              'f2_lnw', 'f2_lnb', 'f2_b2',
              'fl_lnw', 'fl_lnb')
_VIDX = {n: i for i, n in enumerate(_VEC_NAMES)}
_N_VEC = len(_VEC_NAMES)
_SQ_NAMES = ('a_wq', 'a_wk', 'a_wv', 'a_wo', 'c_wa', 'c_wg', 'c_wp2')


def _conformer_layer_kernel(x_ref, sq_ref, fw1_ref, fw2_ref, vec_ref, fb1_ref,
                            o_ref, *, B, T, D, NH, FFN, K):
    dk = D // NH
    x = x_ref[...]                                    # (B*T, D) f32
    sq = sq_ref[...]                                  # (D, 7D)    bf16
    fw1 = fw1_ref[...]                                # (D, 2*FFN) bf16
    fw2 = fw2_ref[...]                                # (FFN, 2*D) bf16
    vecs = vec_ref[...]                               # (22+K, D)  f32
    fb1 = fb1_ref[...]                                # (2, FFN)   f32

    def V(name):
        i = _VIDX[name]
        return vecs[i:i + 1, :]                       # (1, D)

    def mm(a, w):                                     # bf16 MXU dot, f32 accumulate
        return jnp.dot(a.astype(_BF16), w, preferred_element_type=jnp.float32)

    def ln(v, wname, bname):
        m = jnp.mean(v, axis=-1, keepdims=True)
        c = v - m
        var = jnp.mean(c * c, axis=-1, keepdims=True)
        return c * lax.rsqrt(var + 1e-5) * V(wname) + V(bname)

    def silu(v):
        return v * jax.nn.sigmoid(v)

    def ffn(v, idx, lnw, lnb, b2name):
        h = ln(v, lnw, lnb)
        h = silu(mm(h, fw1[:, idx * FFN:(idx + 1) * FFN]) + fb1[idx:idx + 1, :])
        return mm(h, fw2[:, idx * D:(idx + 1) * D]) + V(b2name)

    # --- feed-forward module 1 (half-step residual) ---
    x = x + 0.5 * ffn(x, 0, 'f1_lnw', 'f1_lnb', 'f1_b2')

    # --- multi-head self-attention: QKV for all B*T tokens in ONE dot ---
    y = ln(x, 'a_lnw', 'a_lnb')
    qkv = mm(y, sq[:, :3 * D])                        # (B*T, 3D)
    q = qkv[:, :D] + V('a_bq')
    k = qkv[:, D:2 * D] + V('a_bk')
    v = qkv[:, 2 * D:3 * D] + V('a_bv')
    wo = sq[:, 3 * D:4 * D]                           # (D, D)
    scale = 1.0 / float(dk) ** 0.5
    attn_rows = []
    for b in range(B):                                # only the (T,T) scores are batch-coupled
        r0 = b * T
        qb, kb, vb = q[r0:r0 + T, :], k[r0:r0 + T, :], v[r0:r0 + T, :]
        acc = jnp.zeros((T, D), jnp.float32)
        for h in range(NH):
            c0 = h * dk
            qh = (qb[:, c0:c0 + dk] * scale).astype(_BF16)
            kh = kb[:, c0:c0 + dk].astype(_BF16)
            vh = vb[:, c0:c0 + dk].astype(_BF16)
            s = lax.dot_general(qh, kh, (((1,), (1,)), ((), ())),
                                preferred_element_type=jnp.float32)     # (T, T)
            s = s - jnp.max(s, axis=-1, keepdims=True)
            e = jnp.exp(s)
            p = e * pl.reciprocal(jnp.sum(e, axis=-1, keepdims=True), approx=True)
            oh = jnp.dot(p.astype(_BF16), vh, preferred_element_type=jnp.float32)
            acc = acc + mm(oh, wo[c0:c0 + dk, :])     # accumulate head output proj
        attn_rows.append(acc)
    x = x + jnp.concatenate(attn_rows, axis=0) + V('a_bo')

    # --- convolution module: pointwise (+GLU) in one dot -> depthwise -> BN -> SiLU -> pw ---
    y = ln(x, 'c_lnw', 'c_lnb')
    ag = mm(y, sq[:, 4 * D:6 * D])                    # (B*T, 2D)
    y = (ag[:, :D] + V('c_ba')) * jax.nn.sigmoid(ag[:, D:2 * D] + V('c_bg'))
    half = (K - 1) // 2
    dw = vecs[_N_VEC:_N_VEC + K, :]                   # (K, D)
    zpad = jnp.zeros((half, D), jnp.float32)
    conv_rows = []
    for b in range(B):                                # depthwise conv is batch-coupled
        yb = y[b * T:(b + 1) * T, :]
        ypad = jnp.concatenate([zpad, yb, zpad], axis=0)
        acc = jnp.zeros((T, D), jnp.float32)
        for j in range(K):
            acc = acc + dw[j:j + 1, :] * ypad[j:j + T, :]
        conv_rows.append(acc)
    y = jnp.concatenate(conv_rows, axis=0) + V('c_bdw')
    y = y * V('c_bns') + V('c_bnt')                   # BatchNorm1d (eval)
    y = silu(y)
    x = x + mm(y, sq[:, 6 * D:7 * D]) + V('c_bp2')

    # --- feed-forward module 2 + final layer norm ---
    x = x + 0.5 * ffn(x, 1, 'f2_lnw', 'f2_lnb', 'f2_b2')
    o_ref[...] = ln(x, 'fl_lnw', 'fl_lnb')


def _pack_conformer_layer(lp):
    D = lp['a_wq'].shape[0]
    sq = jnp.concatenate([lp[k] for k in _SQ_NAMES], axis=1).astype(_BF16)
    fw1 = jnp.concatenate([lp['f1_w1'], lp['f2_w1']], axis=1).astype(_BF16)
    fw2 = jnp.concatenate([lp['f1_w2'], lp['f2_w2']], axis=1).astype(_BF16)
    vecs = jnp.concatenate([lp[k].reshape(1, D) for k in _VEC_NAMES] + [lp['c_wdw']],
                           axis=0)
    fb1 = jnp.concatenate([lp['f1_b1'], lp['f2_b1']], axis=0)
    return sq, fw1, fw2, vecs, fb1


def conformer_layer_pallas(seq, lp, cfg):
    B, T, D = seq.shape
    NH = cfg['num_heads']
    K = lp['c_wdw'].shape[0]
    FFN = lp['f1_w1'].shape[1]
    sq, fw1, fw2, vecs, fb1 = _pack_conformer_layer(lp)
    kernel = functools.partial(_conformer_layer_kernel,
                               B=B, T=T, D=D, NH=NH, FFN=FFN, K=K)
    # TODO(synk): on v7x, split the token axis into a size-2 "parallel" grid so
    # both TensorCores work on a layer; a single call is optimal on v5e/v6e.
    out = pl.pallas_call(
        kernel,
        out_shape=jax.ShapeDtypeStruct((B * T, D), jnp.float32),
    )(seq.reshape(B * T, D), sq, fw1, fw2, vecs, fb1)
    return out.reshape(B, T, D)


# ----------------------------------------------------------------------------
# Kernel 4: adaptive average time pool (w-tap VPU mean) fused with the output
#           linear (no block-diagonal pooling matrix)
# ----------------------------------------------------------------------------
def _pool_project_kernel(x_ref, w_ref, b_ref, o_ref, *, w):
    acc = x_ref[0]
    for j in range(1, w):
        acc = acc + x_ref[j]
    pooled = acc * (1.0 / w)
    o_ref[...] = jnp.dot(pooled.astype(_BF16), w_ref[...],
                         preferred_element_type=jnp.float32) + b_ref[...]


def pool_project_pallas(seq, T_out, w_out, b_out):
    B, T, D = seq.shape
    w = T // T_out
    xr = seq.reshape(B, T_out, w, D).transpose(2, 0, 1, 3).reshape(w, B * T_out, D)
    O = w_out.shape[1]
    out = pl.pallas_call(
        functools.partial(_pool_project_kernel, w=w),
        out_shape=jax.ShapeDtypeStruct((B * T_out, O), jnp.float32),
    )(xr, w_out.astype(_BF16), b_out)
    return out.reshape(B, T_out, O)


# ----------------------------------------------------------------------------
# Full forward pass (Pallas kernels + layout-only JAX glue)
# ----------------------------------------------------------------------------
def forward_pallas(x, params, cfg):
    h = x.astype(jnp.float32)
    for st in params['conv']:
        h = conv_bn_relu_pool_pallas(h, st)           # conv + BN + ReLU + maxpool fused
        # Dropout2d: identity in inference.
    B, C, T, F = h.shape
    seq = jnp.transpose(h, (0, 2, 1, 3)).reshape(B, T, C * F)        # (B, T, C*F)
    seq = gru_pallas(seq, params['gru'])                             # (B, T, 2H)
    for lp in params['cf']:
        seq = conformer_layer_pallas(seq, lp, cfg)
    return pool_project_pallas(seq, cfg['T_out'], params['w_out'], params['b_out'])


# ----------------------------------------------------------------------------
# Parameters
# ----------------------------------------------------------------------------
def make_params(key, cfg):
    keys = iter(jax.random.split(key, 256))

    def nrm(shape, fan_in):
        return jax.random.normal(next(keys), shape, jnp.float32) / jnp.sqrt(float(fan_in))

    def small(shape):
        return 0.02 * jax.random.normal(next(keys), shape, jnp.float32)

    def affine(shape):
        return 1.0 + 0.1 * jax.random.normal(next(keys), shape, jnp.float32)

    p = {}
    conv = []
    cin = cfg['Cin']
    for tp, fp in zip(cfg['t_pool'], cfg['f_pool']):
        cout = cfg['nb_filt']
        conv.append(dict(w=nrm((cout, cin, 3, 3), 9 * cin),
                         b=small((cout,)),
                         bn_s=affine((cout,)),
                         bn_t=small((cout,)),
                         pool=(tp, fp)))
        cin = cout
    p['conv'] = conv

    f_fin = cfg['F0'] // math.prod(cfg['f_pool'])
    din = cfg['nb_filt'] * f_fin
    H = cfg['rnn_size']
    p['gru'] = dict(wih=nrm((2, din, 3 * H), din),
                    whh=nrm((2, H, 3 * H), H),
                    bih=small((2, 1, 3 * H)),
                    bhh=small((2, 1, 3 * H)))

    D = 2 * H
    ffn = cfg['ffn_dim']
    K = cfg['dw_kernel']
    layers = []
    for _ in range(cfg['num_cf_layers']):
        lp = dict(
            f1_lnw=affine((1, D)), f1_lnb=small((1, D)),
            f1_w1=nrm((D, ffn), D), f1_b1=small((1, ffn)),
            f1_w2=nrm((ffn, D), ffn), f1_b2=small((1, D)),
            a_lnw=affine((1, D)), a_lnb=small((1, D)),
            a_wq=nrm((D, D), D), a_bq=small((1, D)),
            a_wk=nrm((D, D), D), a_bk=small((1, D)),
            a_wv=nrm((D, D), D), a_bv=small((1, D)),
            a_wo=nrm((D, D), D), a_bo=small((1, D)),
            c_lnw=affine((1, D)), c_lnb=small((1, D)),
            c_wa=nrm((D, D), D), c_ba=small((1, D)),
            c_wg=nrm((D, D), D), c_bg=small((1, D)),
            c_wdw=nrm((K, D), K), c_bdw=small((1, D)),
            c_bns=affine((1, D)), c_bnt=small((1, D)),
            c_wp2=nrm((D, D), D), c_bp2=small((1, D)),
            f2_lnw=affine((1, D)), f2_lnb=small((1, D)),
            f2_w1=nrm((D, ffn), D), f2_b1=small((1, ffn)),
            f2_w2=nrm((ffn, D), ffn), f2_b2=small((1, D)),
            fl_lnw=affine((1, D)), fl_lnb=small((1, D)),
        )
        layers.append(lp)
    p['cf'] = layers
    p['w_out'] = nrm((D, cfg['out_dim']), D)
    p['b_out'] = small((1, cfg['out_dim']))
    return p


# ----------------------------------------------------------------------------
# Pure-JAX reference mirroring the PyTorch forward (eval mode, f32)
# ----------------------------------------------------------------------------
def _gru_dir_ref(x, wih, whh, bih, bhh, reverse):
    B, _, _ = x.shape
    H = whh.shape[0]
    xs = jnp.swapaxes(x, 0, 1)
    if reverse:
        xs = xs[::-1]

    def step(h, xt):
        gi = xt @ wih + bih
        gh = h @ whh + bhh
        r = jax.nn.sigmoid(gi[:, :H] + gh[:, :H])
        z = jax.nn.sigmoid(gi[:, H:2 * H] + gh[:, H:2 * H])
        n = jnp.tanh(gi[:, 2 * H:] + r * gh[:, 2 * H:])
        h = (1.0 - z) * n + z * h
        return h, h

    _, hs = lax.scan(step, jnp.zeros((B, H), jnp.float32), xs)
    if reverse:
        hs = hs[::-1]
    return jnp.swapaxes(hs, 0, 1)


def _conformer_layer_ref(x, lp, num_heads):
    B, T, D = x.shape
    dk = D // num_heads
    K = lp['c_wdw'].shape[0]

    def ln(v, w, b):
        m = v.mean(-1, keepdims=True)
        c = v - m
        var = (c * c).mean(-1, keepdims=True)
        return c / jnp.sqrt(var + 1e-5) * w + b

    def silu(v):
        return v * jax.nn.sigmoid(v)

    def ffn(v, lnw, lnb, w1, b1, w2, b2):
        h = ln(v, lnw, lnb)
        h = silu(h @ w1 + b1)
        return h @ w2 + b2

    x = x + 0.5 * ffn(x, lp['f1_lnw'], lp['f1_lnb'], lp['f1_w1'], lp['f1_b1'],
                      lp['f1_w2'], lp['f1_b2'])

    y = ln(x, lp['a_lnw'], lp['a_lnb'])
    q = y @ lp['a_wq'] + lp['a_bq']
    k = y @ lp['a_wk'] + lp['a_bk']
    v = y @ lp['a_wv'] + lp['a_bv']

    def split(t):
        return t.reshape(B, T, num_heads, dk).transpose(0, 2, 1, 3)

    qh, kh, vh = split(q), split(k), split(v)
    s = jnp.einsum('bhtd,bhsd->bhts', qh, kh) / jnp.sqrt(float(dk))
    p = jax.nn.softmax(s, axis=-1)
    o = jnp.einsum('bhts,bhsd->bhtd', p, vh).transpose(0, 2, 1, 3).reshape(B, T, D)
    x = x + o @ lp['a_wo'] + lp['a_bo']

    y = ln(x, lp['c_lnw'], lp['c_lnb'])
    a = y @ lp['c_wa'] + lp['c_ba']
    g = y @ lp['c_wg'] + lp['c_bg']
    y = a * jax.nn.sigmoid(g)
    half = (K - 1) // 2
    yp = jnp.pad(y, ((0, 0), (half, half), (0, 0)))
    y = sum(lp['c_wdw'][j] * yp[:, j:j + T, :] for j in range(K))
    y = y + lp['c_bdw']
    y = y * lp['c_bns'] + lp['c_bnt']
    y = silu(y)
    y = y @ lp['c_wp2'] + lp['c_bp2']
    x = x + y

    x = x + 0.5 * ffn(x, lp['f2_lnw'], lp['f2_lnb'], lp['f2_w1'], lp['f2_b1'],
                      lp['f2_w2'], lp['f2_b2'])
    return ln(x, lp['fl_lnw'], lp['fl_lnb'])


def ref_forward(x, params, cfg):
    h = x.astype(jnp.float32)
    for st in params['conv']:
        y = lax.conv_general_dilated(
            h, st['w'], window_strides=(1, 1), padding=((1, 1), (1, 1)),
            dimension_numbers=('NCHW', 'OIHW', 'NCHW'))
        y = y + st['b'].reshape(1, -1, 1, 1)
        y = y * st['bn_s'].reshape(1, -1, 1, 1) + st['bn_t'].reshape(1, -1, 1, 1)
        y = jnp.maximum(y, 0.0)
        tp, fp = st['pool']
        B, C, T, F = y.shape
        h = y.reshape(B, C, T // tp, tp, F // fp, fp).max(axis=(3, 5))
    B, C, T, F = h.shape
    seq = jnp.transpose(h, (0, 2, 1, 3)).reshape(B, T, C * F)
    gp = params['gru']
    fwd = _gru_dir_ref(seq, gp['wih'][0], gp['whh'][0], gp['bih'][0], gp['bhh'][0], False)
    bwd = _gru_dir_ref(seq, gp['wih'][1], gp['whh'][1], gp['bih'][1], gp['bhh'][1], True)
    seq = jnp.concatenate([fwd, bwd], axis=-1)
    for lp in params['cf']:
        seq = _conformer_layer_ref(seq, lp, cfg['num_heads'])
    B, T, D = seq.shape
    w = T // cfg['T_out']
    pooled = seq.reshape(B, cfg['T_out'], w, D).mean(axis=2)
    return pooled @ params['w_out'] + params['b_out']


# ----------------------------------------------------------------------------
if __name__ == "__main__":
    cfg = dict(B=2, Cin=4, T0=16, F0=32, nb_filt=16,
               t_pool=(2, 1), f_pool=(2, 2), rnn_size=32,
               num_heads=4, ffn_dim=128, num_cf_layers=2, dw_kernel=5,
               T_out=4, out_dim=156)  # out_dim = 3*4*13, as the doa reshape implies

    key = jax.random.PRNGKey(0)
    kx, kp = jax.random.split(key)
    x = jax.random.normal(kx, (cfg['B'], cfg['Cin'], cfg['T0'], cfg['F0']), jnp.float32)
    params = make_params(kp, cfg)

    fwd_fn = jax.jit(lambda inp: forward_pallas(inp, params, cfg))
    out = fwd_fn(x)
    jax.block_until_ready(out)
    assert out.shape == (cfg['B'], cfg['T_out'], cfg['out_dim'])

    ref = jax.jit(lambda inp: ref_forward(inp, params, cfg))(x)
    err = float(jnp.max(jnp.abs(out - ref)))
    # Tolerance widened vs. a pure-f32 kernel: MXU operands are bf16 (with f32
    # accumulation) per the perf review; reference stays f32.
    tol = 3e-3 + 3e-2 * float(jnp.max(jnp.abs(ref)))
    if not err < tol:
        raise AssertionError(f"kernel/reference mismatch: max abs err {err} (tol {tol})")
    print("KERNEL_OK")
</pallas_src>

<mosaic_0001>
module attributes {stable_mosaic.version = 11 : i64} {
  func.func @_conv_bn_relu_pool_kernel(%arg0: memref<4x1280xf32, #tpu.memory_space<vmem>>, %arg1: memref<9x16x4xbf16, #tpu.memory_space<vmem>>, %arg2: memref<16x1xf32, #tpu.memory_space<vmem>>, %arg3: memref<16x1280xf32, #tpu.memory_space<vmem>>) attributes {dimension_semantics = [], scalar_prefetch = 0 : i64, scratch_operands = 0 : i64, tpu.core_type = #tpu.core_type<tc>} {
    %c0 = arith.constant 0 : index
    %c0_0 = arith.constant 0 : index
    %0 = vector.load %arg0[%c0, %c0_0] : memref<4x1280xf32, #tpu.memory_space<vmem>>, vector<4x1280xf32>
    %cst = arith.constant 0.000000e+00 : f32
    %1 = vector.broadcast %cst : f32 to vector<16x1280xf32>
    %c0_1 = arith.constant 0 : index
    %c0_2 = arith.constant 0 : index
    %c0_3 = arith.constant 0 : index
    %2 = vector.load %arg1[%c0_1, %c0_2, %c0_3] : memref<9x16x4xbf16, #tpu.memory_space<vmem>>, vector<1x16x4xbf16>
    %3 = vector.shape_cast %2 : vector<1x16x4xbf16> to vector<16x4xbf16>
    %4 = arith.truncf %0 : vector<4x1280xf32> to vector<4x1280xbf16>
    %cst_4 = arith.constant dense<0.000000e+00> : vector<16x1280xf32>
    %5 = tpu.matmul %3, %4, %cst_4 {dimension_numbers = #tpu.dot_dimension_numbers<[1], [0], [0], [1], [0, 0, 1, 1], [], []>} : vector<16x4xbf16>, vector<4x1280xbf16>, vector<16x1280xf32> -> vector<16x1280xf32>
    %6 = arith.addf %1, %5 : vector<16x1280xf32>
    %7 = vector.extract_strided_slice %0 {offsets = [0, 1], sizes = [4, 1279], strides = [1, 1]} : vector<4x1280xf32> to vector<4x1279xf32>
    %8 = vector.extract_strided_slice %0 {offsets = [0, 0], sizes = [4, 1], strides = [1, 1]} : vector<4x1280xf32> to vector<4x1xf32>
    %9 = tpu.concatenate %7, %8 in 1 : vector<4x1279xf32>, vector<4x1xf32> -> vector<4x1280xf32>
    %c1 = arith.constant 1 : index
    %c0_5 = arith.constant 0 : index
    %c0_6 = arith.constant 0 : index
    %10 = vector.load %arg1[%c1, %c0_5, %c0_6] : memref<9x16x4xbf16, #tpu.memory_space<vmem>>, vector<1x16x4xbf16>
    %11 = vector.shape_cast %10 : vector<1x16x4xbf16> to vector<16x4xbf16>
    %12 = arith.truncf %9 : vector<4x1280xf32> to vector<4x1280xbf16>
    %cst_7 = arith.constant dense<0.000000e+00> : vector<16x1280xf32>
    %13 = tpu.matmul %11, %12, %cst_7 {dimension_numbers = #tpu.dot_dimension_numbers<[1], [0], [0], [1], [0, 0, 1, 1], [], []>} : vector<16x4xbf16>, vector<4x1280xbf16>, vector<16x1280xf32> -> vector<16x1280xf32>
    %14 = arith.addf %6, %13 : vector<16x1280xf32>
    %15 = vector.extract_strided_slice %0 {offsets = [0, 2], sizes = [4, 1278], strides = [1, 1]} : vector<4x1280xf32> to vector<4x1278xf32>
    %16 = vector.extract_strided_slice %0 {offsets = [0, 0], sizes = [4, 2], strides = [1, 1]} : vector<4x1280xf32> to vector<4x2xf32>
    %17 = tpu.concatenate %15, %16 in 1 : vector<4x1278xf32>, vector<4x2xf32> -> vector<4x1280xf32>
    %c2 = arith.constant 2 : index
    %c0_8 = arith.constant 0 : index
    %c0_9 = arith.constant 0 : index
    %18 = vector.load %arg1[%c2, %c0_8, %c0_9] : memref<9x16x4xbf16, #tpu.memory_space<vmem>>, vector<1x16x4xbf16>
    %19 = vector.shape_cast %18 : vector<1x16x4xbf16> to vector<16x4xbf16>
    %20 = arith.truncf %17 : vector<4x1280xf32> to vector<4x1280xbf16>
    %cst_10 = arith.constant dense<0.000000e+00> : vector<16x1280xf32>
    %21 = tpu.matmul %19, %20, %cst_10 {dimension_numbers = #tpu.dot_dimension_numbers<[1], [0], [0], [1], [0, 0, 1, 1], [], []>} : vector<16x4xbf16>, vector<4x1280xbf16>, vector<16x1280xf32> -> vector<16x1280xf32>
    %22 = arith.addf %14, %21 : vector<16x1280xf32>
    %23 = vector.extract_strided_slice %0 {offsets = [0, 34], sizes = [4, 1246], strides = [1, 1]} : vector<4x1280xf32> to vector<4x1246xf32>
    %24 = vector.extract_strided_slice %0 {offsets = [0, 0], sizes = [4, 34], strides = [1, 1]} : vector<4x1280xf32> to vector<4x34xf32>
    %25 = tpu.concatenate %23, %24 in 1 : vector<4x1246xf32>, vector<4x34xf32> -> vector<4x1280xf32>
    %c3 = arith.constant 3 : index
    %c0_11 = arith.constant 0 : index
    %c0_12 = arith.constant 0 : index
    %26 = vector.load %arg1[%c3, %c0_11, %c0_12] : memref<9x16x4xbf16, #tpu.memory_space<vmem>>, vector<1x16x4xbf16>
    %27 = vector.shape_cast %26 : vector<1x16x4xbf16> to vector<16x4xbf16>
    %28 = arith.truncf %25 : vector<4x1280xf32> to vector<4x1280xbf16>
    %cst_13 = arith.constant dense<0.000000e+00> : vector<16x1280xf32>
    %29 = tpu.matmul %27, %28, %cst_13 {dimension_numbers = #tpu.dot_dimension_numbers<[1], [0], [0], [1], [0, 0, 1, 1], [], []>} : vector<16x4xbf16>, vector<4x1280xbf16>, vector<16x1280xf32> -> vector<16x1280xf32>
    %30 = arith.addf %22, %29 : vector<16x1280xf32>
    %31 = vector.extract_strided_slice %0 {offsets = [0, 35], sizes = [4, 1245], strides = [1, 1]} : vector<4x1280xf32> to vector<4x1245xf32>
    %32 = vector.extract_strided_slice %0 {offsets = [0, 0], sizes = [4, 35], strides = [1, 1]} : vector<4x1280xf32> to vector<4x35xf32>
    %33 = tpu.concatenate %31, %32 in 1 : vector<4x1245xf32>, vector<4x35xf32> -> vector<4x1280xf32>
    %c4 = arith.constant 4 : index
    %c0_14 = arith.constant 0 : index
    %c0_15 = arith.constant 0 : index
    %34 = vector.load %arg1[%c4, %c0_14, %c0_15] : memref<9x16x4xbf16, #tpu.memory_space<vmem>>, vector<1x16x4xbf16>
    %35 = vector.shape_cast %34 : vector<1x16x4xbf16> to vector<16x4xbf16>
    %36 = arith.truncf %33 : vector<4x1280xf32> to vector<4x1280xbf16>
    %cst_16 = arith.constant dense<0.000000e+00> : vector<16x1280xf32>
    %37 = tpu.matmul %35, %36, %cst_16 {dimension_numbers = #tpu.dot_dimension_numbers<[1], [0], [0], [1], [0, 0, 1, 1], [], []>} : vector<16x4xbf16>, vector<4x1280xbf16>, vector<16x1280xf32> -> vector<16x1280xf32>
    %38 = arith.addf %30, %37 : vector<16x1280xf32>
    %39 = vector.extract_strided_slice %0 {offsets = [0, 36], sizes = [4, 1244], strides = [1, 1]} : vector<4x1280xf32> to vector<4x1244xf32>
    %40 = vector.extract_strided_slice %0 {offsets = [0, 0], sizes = [4, 36], strides = [1, 1]} : vector<4x1280xf32> to vector<4x36xf32>
    %41 = tpu.concatenate %39, %40 in 1 : vector<4x1244xf32>, vector<4x36xf32> -> vector<4x1280xf32>
    %c5 = arith.constant 5 : index
    %c0_17 = arith.constant 0 : index
    %c0_18 = arith.constant 0 : index
    %42 = vector.load %arg1[%c5, %c0_17, %c0_18] : memref<9x16x4xbf16, #tpu.memory_space<vmem>>, vector<1x16x4xbf16>
    %43 = vector.shape_cast %42 : vector<1x16x4xbf16> to vector<16x4xbf16>
    %44 = arith.truncf %41 : vector<4x1280xf32> to vector<4x1280xbf16>
    %cst_19 = arith.constant dense<0.000000e+00> : vector<16x1280xf32>
    %45 = tpu.matmul %43, %44, %cst_19 {dimension_numbers = #tpu.dot_dimension_numbers<[1], [0], [0], [1], [0, 0, 1, 1], [], []>} : vector<16x4xbf16>, vector<4x1280xbf16>, vector<16x1280xf32> -> vector<16x1280xf32>
    %46 = arith.addf %38, %45 : vector<16x1280xf32>
    %47 = vector.extract_strided_slice %0 {offsets = [0, 68], sizes = [4, 1212], strides = [1, 1]} : vector<4x1280xf32> to vector<4x1212xf32>
    %48 = vector.extract_strided_slice %0 {offsets = [0, 0], sizes = [4, 68], strides = [1, 1]} : vector<4x1280xf32> to vector<4x68xf32>
    %49 = tpu.concatenate %47, %48 in 1 : vector<4x1212xf32>, vector<4x68xf32> -> vector<4x1280xf32>
    %c6 = arith.constant 6 : index
    %c0_20 = arith.constant 0 : index
    %c0_21 = arith.constant 0 : index
    %50 = vector.load %arg1[%c6, %c0_20, %c0_21] : memref<9x16x4xbf16, #tpu.memory_space<vmem>>, vector<1x16x4xbf16>
    %51 = vector.shape_cast %50 : vector<1x16x4xbf16> to vector<16x4xbf16>
    %52 = arith.truncf %49 : vector<4x1280xf32> to vector<4x1280xbf16>
    %cst_22 = arith.constant dense<0.000000e+00> : vector<16x1280xf32>
    %53 = tpu.matmul %51, %52, %cst_22 {dimension_numbers = #tpu.dot_dimension_numbers<[1], [0], [0], [1], [0, 0, 1, 1], [], []>} : vector<16x4xbf16>, vector<4x1280xbf16>, vector<16x1280xf32> -> vector<16x1280xf32>
    %54 = arith.addf %46, %53 : vector<16x1280xf32>
    %55 = vector.extract_strided_slice %0 {offsets = [0, 69], sizes = [4, 1211], strides = [1, 1]} : vector<4x1280xf32> to vector<4x1211xf32>
    %56 = vector.extract_strided_slice %0 {offsets = [0, 0], sizes = [4, 69], strides = [1, 1]} : vector<4x1280xf32> to vector<4x69xf32>
    %57 = tpu.concatenate %55, %56 in 1 : vector<4x1211xf32>, vector<4x69xf32> -> vector<4x1280xf32>
    %c7 = arith.constant 7 : index
    %c0_23 = arith.constant 0 : index
    %c0_24 = arith.constant 0 : index
    %58 = vector.load %arg1[%c7, %c0_23, %c0_24] : memref<9x16x4xbf16, #tpu.memory_space<vmem>>, vector<1x16x4xbf16>
    %59 = vector.shape_cast %58 : vector<1x16x4xbf16> to vector<16x4xbf16>
    %60 = arith.truncf %57 : vector<4x1280xf32> to vector<4x1280xbf16>
    %cst_25 = arith.constant dense<0.000000e+00> : vector<16x1280xf32>
    %61 = tpu.matmul %59, %60, %cst_25 {dimension_numbers = #tpu.dot_dimension_numbers<[1], [0], [0], [1], [0, 0, 1, 1], [], []>} : vector<16x4xbf16>, vector<4x1280xbf16>, vector<16x1280xf32> -> vector<16x1280xf32>
    %62 = arith.addf %54, %61 : vector<16x1280xf32>
    %63 = vector.extract_strided_slice %0 {offsets = [0, 70], sizes = [4, 1210], strides = [1, 1]} : vector<4x1280xf32> to vector<4x1210xf32>
    %64 = vector.extract_strided_slice %0 {offsets = [0, 0], sizes = [4, 70], strides = [1, 1]} : vector<4x1280xf32> to vector<4x70xf32>
    %65 = tpu.concatenate %63, %64 in 1 : vector<4x1210xf32>, vector<4x70xf32> -> vector<4x1280xf32>
    %c8 = arith.constant 8 : index
    %c0_26 = arith.constant 0 : index
    %c0_27 = arith.constant 0 : index
    %66 = vector.load %arg1[%c8, %c0_26, %c0_27] : memref<9x16x4xbf16, #tpu.memory_space<vmem>>, vector<1x16x4xbf16>
    %67 = vector.shape_cast %66 : vector<1x16x4xbf16> to vector<16x4xbf16>
    %68 = arith.truncf %65 : vector<4x1280xf32> to vector<4x1280xbf16>
    %cst_28 = arith.constant dense<0.000000e+00> : vector<16x1280xf32>
    %69 = tpu.matmul %67, %68, %cst_28 {dimension_numbers = #tpu.dot_dimension_numbers<[1], [0], [0], [1], [0, 0, 1, 1], [], []>} : vector<16x4xbf16>, vector<4x1280xbf16>, vector<16x1280xf32> -> vector<16x1280xf32>
    %70 = arith.addf %62, %69 : vector<16x1280xf32>
    %c0_29 = arith.constant 0 : index
    %c0_30 = arith.constant 0 : index
    %71 = vector.load %arg2[%c0_29, %c0_30] : memref<16x1xf32, #tpu.memory_space<vmem>>, vector<16x1xf32>
    %72 = vector.broadcast %71 : vector<16x1xf32> to vector<16x1280xf32>
    %73 = arith.addf %70, %72 : vector<16x1280xf32>
    %cst_31 = arith.constant 0.000000e+00 : f32
    %74 = vector.broadcast %cst_31 : f32 to vector<16x1280xf32>
    %75 = arith.maximumf %73, %74 : vector<16x1280xf32>
    %76 = vector.extract_strided_slice %75 {offsets = [0, 1], sizes = [16, 1279], strides = [1, 1]} : vector<16x1280xf32> to vector<16x1279xf32>
    %77 = vector.extract_strided_slice %75 {offsets = [0, 0], sizes = [16, 1], strides = [1, 1]} : vector<16x1280xf32> to vector<16x1xf32>
    %78 = tpu.concatenate %76, %77 in 1 : vector<16x1279xf32>, vector<16x1xf32> -> vector<16x1280xf32>
    %79 = arith.maximumf %75, %78 : vector<16x1280xf32>
    %80 = vector.extract_strided_slice %75 {offsets = [0, 34], sizes = [16, 1246], strides = [1, 1]} : vector<16x1280xf32> to vector<16x1246xf32>
    %81 = vector.extract_strided_slice %75 {offsets = [0, 0], sizes = [16, 34], strides = [1, 1]} : vector<16x1280xf32> to vector<16x34xf32>
    %82 = tpu.concatenate %80, %81 in 1 : vector<16x1246xf32>, vector<16x34xf32> -> vector<16x1280xf32>
    %83 = arith.maximumf %79, %82 : vector<16x1280xf32>
    %84 = vector.extract_strided_slice %75 {offsets = [0, 35], sizes = [16, 1245], strides = [1, 1]} : vector<16x1280xf32> to vector<16x1245xf32>
    %85 = vector.extract_strided_slice %75 {offsets = [0, 0], sizes = [16, 35], strides = [1, 1]} : vector<16x1280xf32> to vector<16x35xf32>
    %86 = tpu.concatenate %84, %85 in 1 : vector<16x1245xf32>, vector<16x35xf32> -> vector<16x1280xf32>
    %87 = arith.maximumf %83, %86 : vector<16x1280xf32>
    %c0_32 = arith.constant 0 : index
    %c0_33 = arith.constant 0 : index
    %88 = vector.load %arg3[%c0_32, %c0_33] : memref<16x1280xf32, #tpu.memory_space<vmem>>, vector<16x1280xf32>
    tpu.vector_store %arg3[%c0_32, %c0_33], %87 {strides = array<i32>} : memref<16x1280xf32, #tpu.memory_space<vmem>>, vector<16x1280xf32>,
    return
  }
}

module attributes {stable_mosaic.version = 11 : i64} {
  func.func @_conv_bn_relu_pool_kernel(%arg0: memref<16x384xf32, #tpu.memory_space<vmem>>, %arg1: memref<9x16x16xbf16, #tpu.memory_space<vmem>>, %arg2: memref<16x1xf32, #tpu.memory_space<vmem>>, %arg3: memref<16x384xf32, #tpu.memory_space<vmem>>) attributes {dimension_semantics = [], scalar_prefetch = 0 : i64, scratch_operands = 0 : i64, tpu.core_type = #tpu.core_type<tc>} {
    %c0 = arith.constant 0 : index
    %c0_0 = arith.constant 0 : index
    %0 = vector.load %arg0[%c0, %c0_0] : memref<16x384xf32, #tpu.memory_space<vmem>>, vector<16x384xf32>
    %cst = arith.constant 0.000000e+00 : f32
    %1 = vector.broadcast %cst : f32 to vector<16x384xf32>
    %c0_1 = arith.constant 0 : index
    %c0_2 = arith.constant 0 : index
    %c0_3 = arith.constant 0 : index
    %2 = vector.load %arg1[%c0_1, %c0_2, %c0_3] : memref<9x16x16xbf16, #tpu.memory_space<vmem>>, vector<1x16x16xbf16>
    %3 = vector.shape_cast %2 : vector<1x16x16xbf16> to vector<16x16xbf16>
    %4 = arith.truncf %0 : vector<16x384xf32> to vector<16x384xbf16>
    %cst_4 = arith.constant dense<0.000000e+00> : vector<16x384xf32>
    %5 = tpu.matmul %3, %4, %cst_4 {dimension_numbers = #tpu.dot_dimension_numbers<[1], [0], [0], [1], [0, 0, 1, 1], [], []>} : vector<16x16xbf16>, vector<16x384xbf16>, vector<16x384xf32> -> vector<16x384xf32>
    %6 = arith.addf %1, %5 : vector<16x384xf32>
    %7 = vector.extract_strided_slice %0 {offsets = [0, 1], sizes = [16, 383], strides = [1, 1]} : vector<16x384xf32> to vector<16x383xf32>
    %8 = vector.extract_strided_slice %0 {offsets = [0, 0], sizes = [16, 1], strides = [1, 1]} : vector<16x384xf32> to vector<16x1xf32>
    %9 = tpu.concatenate %7, %8 in 1 : vector<16x383xf32>, vector<16x1xf32> -> vector<16x384xf32>
    %c1 = arith.constant 1 : index
    %c0_5 = arith.constant 0 : index
    %c0_6 = arith.constant 0 : index
    %10 = vector.load %arg1[%c1, %c0_5, %c0_6] : memref<9x16x16xbf16, #tpu.memory_space<vmem>>, vector<1x16x16xbf16>
    %11 = vector.shape_cast %10 : vector<1x16x16xbf16> to vector<16x16xbf16>
    %12 = arith.truncf %9 : vector<16x384xf32> to vector<16x384xbf16>
    %cst_7 = arith.constant dense<0.000000e+00> : vector<16x384xf32>
    %13 = tpu.matmul %11, %12, %cst_7 {dimension_numbers = #tpu.dot_dimension_numbers<[1], [0], [0], [1], [0, 0, 1, 1], [], []>} : vector<16x16xbf16>, vector<16x384xbf16>, vector<16x384xf32> -> vector<16x384xf32>
    %14 = arith.addf %6, %13 : vector<16x384xf32>
    %15 = vector.extract_strided_slice %0 {offsets = [0, 2], sizes = [16, 382], strides = [1, 1]} : vector<16x384xf32> to vector<16x382xf32>
    %16 = vector.extract_strided_slice %0 {offsets = [0, 0], sizes = [16, 2], strides = [1, 1]} : vector<16x384xf32> to vector<16x2xf32>
    %17 = tpu.concatenate %15, %16 in 1 : vector<16x382xf32>, vector<16x2xf32> -> vector<16x384xf32>
    %c2 = arith.constant 2 : index
    %c0_8 = arith.constant 0 : index
    %c0_9 = arith.constant 0 : index
    %18 = vector.load %arg1[%c2, %c0_8, %c0_9] : memref<9x16x16xbf16, #tpu.memory_space<vmem>>, vector<1x16x16xbf16>
    %19 = vector.shape_cast %18 : vector<1x16x16xbf16> to vector<16x16xbf16>
    %20 = arith.truncf %17 : vector<16x384xf32> to vector<16x384xbf16>
    %cst_10 = arith.constant dense<0.000000e+00> : vector<16x384xf32>
    %21 = tpu.matmul %19, %20, %cst_10 {dimension_numbers = #tpu.dot_dimension_numbers<[1], [0], [0], [1], [0, 0, 1, 1], [], []>} : vector<16x16xbf16>, vector<16x384xbf16>, vector<16x384xf32> -> vector<16x384xf32>
    %22 = arith.addf %14, %21 : vector<16x384xf32>
    %23 = vector.extract_strided_slice %0 {offsets = [0, 18], sizes = [16, 366], strides = [1, 1]} : vector<16x384xf32> to vector<16x366xf32>
    %24 = vector.extract_strided_slice %0 {offsets = [0, 0], sizes = [16, 18], strides = [1, 1]} : vector<16x384xf32> to vector<16x18xf32>
    %25 = tpu.concatenate %23, %24 in 1 : vector<16x366xf32>, vector<16x18xf32> -> vector<16x384xf32>
    %c3 = arith.constant 3 : index
    %c0_11 = arith.constant 0 : index
    %c0_12 = arith.constant 0 : index
    %26 = vector.load %arg1[%c3, %c0_11, %c0_12] : memref<9x16x16xbf16, #tpu.memory_space<vmem>>, vector<1x16x16xbf16>
    %27 = vector.shape_cast %26 : vector<1x16x16xbf16> to vector<16x16xbf16>
    %28 = arith.truncf %25 : vector<16x384xf32> to vector<16x384xbf16>
    %cst_13 = arith.constant dense<0.000000e+00> : vector<16x384xf32>
    %29 = tpu.matmul %27, %28, %cst_13 {dimension_numbers = #tpu.dot_dimension_numbers<[1], [0], [0], [1], [0, 0, 1, 1], [], []>} : vector<16x16xbf16>, vector<16x384xbf16>, vector<16x384xf32> -> vector<16x384xf32>
    %30 = arith.addf %22, %29 : vector<16x384xf32>
    %31 = vector.extract_strided_slice %0 {offsets = [0, 19], sizes = [16, 365], strides = [1, 1]} : vector<16x384xf32> to vector<16x365xf32>
    %32 = vector.extract_strided_slice %0 {offsets = [0, 0], sizes = [16, 19], strides = [1, 1]} : vector<16x384xf32> to vector<16x19xf32>
    %33 = tpu.concatenate %31, %32 in 1 : vector<16x365xf32>, vector<16x19xf32> -> vector<16x384xf32>
    %c4 = arith.constant 4 : index
    %c0_14 = arith.constant 0 : index
    %c0_15 = arith.constant 0 : index
    %34 = vector.load %arg1[%c4, %c0_14, %c0_15] : memref<9x16x16xbf16, #tpu.memory_space<vmem>>, vector<1x16x16xbf16>
    %35 = vector.shape_cast %34 : vector<1x16x16xbf16> to vector<16x16xbf16>
    %36 = arith.truncf %33 : vector<16x384xf32> to vector<16x384xbf16>
    %cst_16 = arith.constant dense<0.000000e+00> : vector<16x384xf32>
    %37 = tpu.matmul %35, %36, %cst_16 {dimension_numbers = #tpu.dot_dimension_numbers<[1], [0], [0], [1], [0, 0, 1, 1], [], []>} : vector<16x16xbf16>, vector<16x384xbf16>, vector<16x384xf32> -> vector<16x384xf32>
    %38 = arith.addf %30, %37 : vector<16x384xf32>
    %39 = vector.extract_strided_slice %0 {offsets = [0, 20], sizes = [16, 364], strides = [1, 1]} : vector<16x384xf32> to vector<16x364xf32>
    %40 = vector.extract_strided_slice %0 {offsets = [0, 0], sizes = [16, 20], strides = [1, 1]} : vector<16x384xf32> to vector<16x20xf32>
    %41 = tpu.concatenate %39, %40 in 1 : vector<16x364xf32>, vector<16x20xf32> -> vector<16x384xf32>
    %c5 = arith.constant 5 : index
    %c0_17 = arith.constant 0 : index
    %c0_18 = arith.constant 0 : index
    %42 = vector.load %arg1[%c5, %c0_17, %c0_18] : memref<9x16x16xbf16, #tpu.memory_space<vmem>>, vector<1x16x16xbf16>
    %43 = vector.shape_cast %42 : vector<1x16x16xbf16> to vector<16x16xbf16>
    %44 = arith.truncf %41 : vector<16x384xf32> to vector<16x384xbf16>
    %cst_19 = arith.constant dense<0.000000e+00> : vector<16x384xf32>
    %45 = tpu.matmul %43, %44, %cst_19 {dimension_numbers = #tpu.dot_dimension_numbers<[1], [0], [0], [1], [0, 0, 1, 1], [], []>} : vector<16x16xbf16>, vector<16x384xbf16>, vector<16x384xf32> -> vector<16x384xf32>
    %46 = arith.addf %38, %45 : vector<16x384xf32>
    %47 = vector.extract_strided_slice %0 {offsets = [0, 36], sizes = [16, 348], strides = [1, 1]} : vector<16x384xf32> to vector<16x348xf32>
    %48 = vector.extract_strided_slice %0 {offsets = [0, 0], sizes = [16, 36], strides = [1, 1]} : vector<16x384xf32> to vector<16x36xf32>
    %49 = tpu.concatenate %47, %48 in 1 : vector<16x348xf32>, vector<16x36xf32> -> vector<16x384xf32>
    %c6 = arith.constant 6 : index
    %c0_20 = arith.constant 0 : index
    %c0_21 = arith.constant 0 : index
    %50 = vector.load %arg1[%c6, %c0_20, %c0_21] : memref<9x16x16xbf16, #tpu.memory_space<vmem>>, vector<1x16x16xbf16>
    %51 = vector.shape_cast %50 : vector<1x16x16xbf16> to vector<16x16xbf16>
    %52 = arith.truncf %49 : vector<16x384xf32> to vector<16x384xbf16>
    %cst_22 = arith.constant dense<0.000000e+00> : vector<16x384xf32>
    %53 = tpu.matmul %51, %52, %cst_22 {dimension_numbers = #tpu.dot_dimension_numbers<[1], [0], [0], [1], [0, 0, 1, 1], [], []>} : vector<16x16xbf16>, vector<16x384xbf16>, vector<16x384xf32> -> vector<16x384xf32>
    %54 = arith.addf %46, %53 : vector<16x384xf32>
    %55 = vector.extract_strided_slice %0 {offsets = [0, 37], sizes = [16, 347], strides = [1, 1]} : vector<16x384xf32> to vector<16x347xf32>
    %56 = vector.extract_strided_slice %0 {offsets = [0, 0], sizes = [16, 37], strides = [1, 1]} : vector<16x384xf32> to vector<16x37xf32>
    %57 = tpu.concatenate %55, %56 in 1 : vector<16x347xf32>, vector<16x37xf32> -> vector<16x384xf32>
    %c7 = arith.constant 7 : index
    %c0_23 = arith.constant 0 : index
    %c0_24 = arith.constant 0 : index
    %58 = vector.load %arg1[%c7, %c0_23, %c0_24] : memref<9x16x16xbf16, #tpu.memory_space<vmem>>, vector<1x16x16xbf16>
    %59 = vector.shape_cast %58 : vector<1x16x16xbf16> to vector<16x16xbf16>
    %60 = arith.truncf %57 : vector<16x384xf32> to vector<16x384xbf16>
    %cst_25 = arith.constant dense<0.000000e+00> : vector<16x384xf32>
    %61 = tpu.matmul %59, %60, %cst_25 {dimension_numbers = #tpu.dot_dimension_numbers<[1], [0], [0], [1], [0, 0, 1, 1], [], []>} : vector<16x16xbf16>, vector<16x384xbf16>, vector<16x384xf32> -> vector<16x384xf32>
    %62 = arith.addf %54, %61 : vector<16x384xf32>
    %63 = vector.extract_strided_slice %0 {offsets = [0, 38], sizes = [16, 346], strides = [1, 1]} : vector<16x384xf32> to vector<16x346xf32>
    %64 = vector.extract_strided_slice %0 {offsets = [0, 0], sizes = [16, 38], strides = [1, 1]} : vector<16x384xf32> to vector<16x38xf32>
    %65 = tpu.concatenate %63, %64 in 1 : vector<16x346xf32>, vector<16x38xf32> -> vector<16x384xf32>
    %c8 = arith.constant 8 : index
    %c0_26 = arith.constant 0 : index
    %c0_27 = arith.constant 0 : index
    %66 = vector.load %arg1[%c8, %c0_26, %c0_27] : memref<9x16x16xbf16, #tpu.memory_space<vmem>>, vector<1x16x16xbf16>
    %67 = vector.shape_cast %66 : vector<1x16x16xbf16> to vector<16x16xbf16>
    %68 = arith.truncf %65 : vector<16x384xf32> to vector<16x384xbf16>
    %cst_28 = arith.constant dense<0.000000e+00> : vector<16x384xf32>
    %69 = tpu.matmul %67, %68, %cst_28 {dimension_numbers = #tpu.dot_dimension_numbers<[1], [0], [0], [1], [0, 0, 1, 1], [], []>} : vector<16x16xbf16>, vector<16x384xbf16>, vector<16x384xf32> -> vector<16x384xf32>
    %70 = arith.addf %62, %69 : vector<16x384xf32>
    %c0_29 = arith.constant 0 : index
    %c0_30 = arith.constant 0 : index
    %71 = vector.load %arg2[%c0_29, %c0_30] : memref<16x1xf32, #tpu.memory_space<vmem>>, vector<16x1xf32>
    %72 = vector.broadcast %71 : vector<16x1xf32> to vector<16x384xf32>
    %73 = arith.addf %70, %72 : vector<16x384xf32>
    %cst_31 = arith.constant 0.000000e+00 : f32
    %74 = vector.broadcast %cst_31 : f32 to vector<16x384xf32>
    %75 = arith.maximumf %73, %74 : vector<16x384xf32>
    %76 = vector.extract_strided_slice %75 {offsets = [0, 1], sizes = [16, 383], strides = [1, 1]} : vector<16x384xf32> to vector<16x383xf32>
    %77 = vector.extract_strided_slice %75 {offsets = [0, 0], sizes = [16, 1], strides = [1, 1]} : vector<16x384xf32> to vector<16x1xf32>
    %78 = tpu.concatenate %76, %77 in 1 : vector<16x383xf32>, vector<16x1xf32> -> vector<16x384xf32>
    %79 = arith.maximumf %75, %78 : vector<16x384xf32>
    %c0_32 = arith.constant 0 : index
    %c0_33 = arith.constant 0 : index
    %80 = vector.load %arg3[%c0_32, %c0_33] : memref<16x384xf32, #tpu.memory_space<vmem>>, vector<16x384xf32>
    tpu.vector_store %arg3[%c0_32, %c0_33], %79 {strides = array<i32>} : memref<16x384xf32, #tpu.memory_space<vmem>>, vector<16x384xf32>,
    return
  }
}

module attributes {stable_mosaic.version = 11 : i64} {
  func.func @_matmul_bias_kernel(%arg0: memref<16x128xf32, #tpu.memory_space<vmem>>, %arg1: memref<128x256xbf16, #tpu.memory_space<vmem>>, %arg2: memref<1x256xf32, #tpu.memory_space<vmem>>, %arg3: memref<16x256xf32, #tpu.memory_space<vmem>>) attributes {dimension_semantics = [], scalar_prefetch = 0 : i64, scratch_operands = 0 : i64, tpu.core_type = #tpu.core_type<tc>} {
    %c0 = arith.constant 0 : index
    %c0_0 = arith.constant 0 : index
    %0 = vector.load %arg0[%c0, %c0_0] : memref<16x128xf32, #tpu.memory_space<vmem>>, vector<16x128xf32>
    %1 = arith.truncf %0 : vector<16x128xf32> to vector<16x128xbf16>
    %c0_1 = arith.constant 0 : index
    %c0_2 = arith.constant 0 : index
    %2 = vector.load %arg1[%c0_1, %c0_2] : memref<128x256xbf16, #tpu.memory_space<vmem>>, vector<128x256xbf16>
    %cst = arith.constant dense<0.000000e+00> : vector<16x256xf32>
    %3 = tpu.matmul %1, %2, %cst {dimension_numbers = #tpu.dot_dimension_numbers<[1], [0], [0], [1], [0, 0, 1, 1], [], []>} : vector<16x128xbf16>, vector<128x256xbf16>, vector<16x256xf32> -> vector<16x256xf32>
    %c0_3 = arith.constant 0 : index
    %c0_4 = arith.constant 0 : index
    %4 = vector.load %arg2[%c0_3, %c0_4] : memref<1x256xf32, #tpu.memory_space<vmem>>, vector<1x256xf32>
    %5 = vector.broadcast %4 : vector<1x256xf32> to vector<16x256xf32>
    %6 = arith.addf %3, %5 : vector<16x256xf32>
    %c0_5 = arith.constant 0 : index
    %c0_6 = arith.constant 0 : index
    %7 = vector.load %arg3[%c0_5, %c0_6] : memref<16x256xf32, #tpu.memory_space<vmem>>, vector<16x256xf32>
    tpu.vector_store %arg3[%c0_5, %c0_6], %6 {strides = array<i32>} : memref<16x256xf32, #tpu.memory_space<vmem>>, vector<16x256xf32>,
    return
  }
}

module attributes {stable_mosaic.version = 11 : i64} {
  func.func @_gru_rec_kernel(%arg0: i32, %arg1: memref<1x8x2x128xf32, #tpu.memory_space<vmem>>, %arg2: memref<1x32x128xf32, #tpu.memory_space<vmem>>, %arg3: memref<1x1x128xf32, #tpu.memory_space<vmem>>, %arg4: memref<1x8x2x32xf32, #tpu.memory_space<vmem>>) attributes {dimension_semantics = [#tpu.dimension_semantics<parallel>], iteration_bounds = array<i64: 2>, scalar_prefetch = 0 : i64, scratch_operands = 0 : i64, tpu.core_type = #tpu.core_type<tc>, window_params = [{transform_indices = @transform_0, window_bounds = array<i64: 1, 8, 2, 128>}, {transform_indices = @transform_1, window_bounds = array<i64: 1, 32, 128>}, {transform_indices = @transform_2, window_bounds = array<i64: 1, 1, 128>}, {transform_indices = @transform_3, window_bounds = array<i64: 1, 8, 2, 32>}]} {
    %c1_i32 = arith.constant 1 : i32
    %0 = arith.cmpi eq, %arg0, %c1_i32 : i32
    %c0 = arith.constant 0 : index
    %c0_0 = arith.constant 0 : index
    %c0_1 = arith.constant 0 : index
    %1 = vector.load %arg2[%c0, %c0_0, %c0_1] : memref<1x32x128xf32, #tpu.memory_space<vmem>>, vector<1x32x128xf32>
    %2 = vector.shape_cast %1 : vector<1x32x128xf32> to vector<32x128xf32>
    %c0_2 = arith.constant 0 : index
    %c0_3 = arith.constant 0 : index
    %c0_4 = arith.constant 0 : index
    %3 = vector.load %arg3[%c0_2, %c0_3, %c0_4] : memref<1x1x128xf32, #tpu.memory_space<vmem>>, vector<1x1x128xf32>
    %4 = vector.shape_cast %3 : vector<1x1x128xf32> to vector<1x128xf32>
    %cst = arith.constant 0.000000e+00 : f32
    %5 = vector.broadcast %cst : f32 to vector<2x32xf32>
    %c0_i32 = arith.constant 0 : i32
    %c8_i32 = arith.constant 8 : i32
    %6 = arith.addi %c0_i32, %c8_i32 : i32
    %c1_i32_5 = arith.constant 1 : i32
    %7 = scf.for %arg5 = %c0_i32 to %6 step %c1_i32_5 iter_args(%arg6 = %5) -> (vector<2x32xf32>)  : i32 {
      %c7_i32 = arith.constant 7 : i32
      %8 = arith.subi %c7_i32, %arg5 : i32
      %9 = arith.select %0, %8, %arg5 : i32
      %c0_7 = arith.constant 0 : index
      %10 = arith.index_cast %9 : i32 to index
      %c0_8 = arith.constant 0 : index
      %c0_9 = arith.constant 0 : index
      %11 = vector.load %arg1[%c0_7, %10, %c0_8, %c0_9] : memref<1x8x2x128xf32, #tpu.memory_space<vmem>>, vector<1x1x2x128xf32>
      %12 = vector.shape_cast %11 : vector<1x1x2x128xf32> to vector<2x128xf32>
      %cst_10 = arith.constant dense<0.000000e+00> : vector<2x128xf32>
      %13 = tpu.matmul %arg6, %2, %cst_10 {dimension_numbers = #tpu.dot_dimension_numbers<[1], [0], [0], [1], [0, 0, 1, 1], [], []>} : vector<2x32xf32>, vector<32x128xf32>, vector<2x128xf32> -> vector<2x128xf32>
      %14 = vector.broadcast %4 : vector<1x128xf32> to vector<2x128xf32>
      %15 = arith.addf %13, %14 : vector<2x128xf32>
      %16 = vector.extract_strided_slice %12 {offsets = [0, 0], sizes = [2, 32], strides = [1, 1]} : vector<2x128xf32> to vector<2x32xf32>
      %17 = vector.extract_strided_slice %15 {offsets = [0, 0], sizes = [2, 32], strides = [1, 1]} : vector<2x128xf32> to vector<2x32xf32>
      %18 = arith.addf %16, %17 : vector<2x32xf32>
      %19 = arith.negf %18 : vector<2x32xf32>
      %20 = math.exp %19 : vector<2x32xf32>
      %cst_11 = arith.constant 1.000000e+00 : f32
      %21 = vector.broadcast %cst_11 : f32 to vector<2x32xf32>
      %22 = arith.addf %21, %20 : vector<2x32xf32>
      %23 = arith.divf %21, %22 : vector<2x32xf32>
      %24 = vector.extract_strided_slice %12 {offsets = [0, 32], sizes = [2, 32], strides = [1, 1]} : vector<2x128xf32> to vector<2x32xf32>
      %25 = vector.extract_strided_slice %15 {offsets = [0, 32], sizes = [2, 32], strides = [1, 1]} : vector<2x128xf32> to vector<2x32xf32>
      %26 = arith.addf %24, %25 : vector<2x32xf32>
      %27 = arith.negf %26 : vector<2x32xf32>
      %28 = math.exp %27 : vector<2x32xf32>
      %cst_12 = arith.constant 1.000000e+00 : f32
      %29 = vector.broadcast %cst_12 : f32 to vector<2x32xf32>
      %30 = arith.addf %29, %28 : vector<2x32xf32>
      %31 = arith.divf %29, %30 : vector<2x32xf32>
      %32 = vector.extract_strided_slice %12 {offsets = [0, 64], sizes = [2, 32], strides = [1, 1]} : vector<2x128xf32> to vector<2x32xf32>
      %33 = vector.extract_strided_slice %15 {offsets = [0, 64], sizes = [2, 32], strides = [1, 1]} : vector<2x128xf32> to vector<2x32xf32>
      %34 = arith.mulf %23, %33 : vector<2x32xf32>
      %35 = arith.addf %32, %34 : vector<2x32xf32>
      %36 = math.tanh %35 : vector<2x32xf32>
      %cst_13 = arith.constant 1.000000e+00 : f32
      %37 = vector.broadcast %cst_13 : f32 to vector<2x32xf32>
      %38 = arith.subf %37, %31 : vector<2x32xf32>
      %39 = arith.mulf %38, %36 : vector<2x32xf32>
      %40 = arith.mulf %31, %arg6 : vector<2x32xf32>
      %41 = arith.addf %39, %40 : vector<2x32xf32>
      %c0_14 = arith.constant 0 : index
      %42 = arith.index_cast %9 : i32 to index
      %c0_15 = arith.constant 0 : index
      %c0_16 = arith.constant 0 : index
      %43 = vector.load %arg4[%c0_14, %42, %c0_15, %c0_16] : memref<1x8x2x32xf32, #tpu.memory_space<vmem>>, vector<1x1x2x32xf32>
      %44 = vector.shape_cast %43 : vector<1x1x2x32xf32> to vector<2x32xf32>
      %45 = vector.shape_cast %41 : vector<2x32xf32> to vector<1x1x2x32xf32>
      tpu.vector_store %arg4[%c0_14, %42, %c0_15, %c0_16], %45 {strides = array<i32>} : memref<1x8x2x32xf32, #tpu.memory_space<vmem>>, vector<1x1x2x32xf32>,
      scf.yield %41 : vector<2x32xf32>
    }
    %c8_i32_6 = arith.constant 8 : i32
    return
  }
  func.func @transform_0(%arg0: i32) -> (i32, i32, i32, i32) {
    %c0_i32 = arith.constant 0 : i32
    %c0_i32_0 = arith.constant 0 : i32
    %c0_i32_1 = arith.constant 0 : i32
    %c0_i32_2 = arith.constant 0 : i32
    return %arg0, %c0_i32, %c0_i32_0, %c0_i32_1 : i32, i32, i32, i32
  }
  func.func @transform_1(%arg0: i32) -> (i32, i32, i32) {
    %c0_i32 = arith.constant 0 : i32
    %c0_i32_0 = arith.constant 0 : i32
    %c0_i32_1 = arith.constant 0 : i32
    return %arg0, %c0_i32, %c0_i32_0 : i32, i32, i32
  }
  func.func @transform_2(%arg0: i32) -> (i32, i32, i32) {
    %c0_i32 = arith.constant 0 : i32
    %c0_i32_0 = arith.constant 0 : i32
    %c0_i32_1 = arith.constant 0 : i32
    return %arg0, %c0_i32, %c0_i32_0 : i32, i32, i32
  }
  func.func @transform_3(%arg0: i32) -> (i32, i32, i32, i32) {
    %c0_i32 = arith.constant 0 : i32
    %c0_i32_0 = arith.constant 0 : i32
    %c0_i32_1 = arith.constant 0 : i32
    %c0_i32_2 = arith.constant 0 : i32
    return %arg0, %c0_i32, %c0_i32_0, %c0_i32_1 : i32, i32, i32, i32
  }
}

module attributes {stable_mosaic.version = 11 : i64} {
  func.func @_pool_project_kernel(%arg0: memref<2x8x64xf32, #tpu.memory_space<vmem>>, %arg1: memref<64x156xbf16, #tpu.memory_space<vmem>>, %arg2: memref<1x156xf32, #tpu.memory_space<vmem>>, %arg3: memref<8x156xf32, #tpu.memory_space<vmem>>) attributes {dimension_semantics = [], scalar_prefetch = 0 : i64, scratch_operands = 0 : i64, tpu.core_type = #tpu.core_type<tc>} {
    %c0 = arith.constant 0 : index
    %c0_0 = arith.constant 0 : index
    %c0_1 = arith.constant 0 : index
    %0 = vector.load %arg0[%c0, %c0_0, %c0_1] : memref<2x8x64xf32, #tpu.memory_space<vmem>>, vector<1x8x64xf32>
    %1 = vector.shape_cast %0 : vector<1x8x64xf32> to vector<8x64xf32>
    %c1 = arith.constant 1 : index
    %c0_2 = arith.constant 0 : index
    %c0_3 = arith.constant 0 : index
    %2 = vector.load %arg0[%c1, %c0_2, %c0_3] : memref<2x8x64xf32, #tpu.memory_space<vmem>>, vector<1x8x64xf32>
    %3 = vector.shape_cast %2 : vector<1x8x64xf32> to vector<8x64xf32>
    %4 = arith.addf %1, %3 : vector<8x64xf32>
    %cst = arith.constant 5.000000e-01 : f32
    %5 = vector.broadcast %cst : f32 to vector<8x64xf32>
    %6 = arith.mulf %4, %5 : vector<8x64xf32>
    %7 = arith.truncf %6 : vector<8x64xf32> to vector<8x64xbf16>
    %c0_4 = arith.constant 0 : index
    %c0_5 = arith.constant 0 : index
    %8 = vector.load %arg1[%c0_4, %c0_5] : memref<64x156xbf16, #tpu.memory_space<vmem>>, vector<64x156xbf16>
    %cst_6 = arith.constant dense<0.000000e+00> : vector<8x156xf32>
    %9 = tpu.matmul %7, %8, %cst_6 {dimension_numbers = #tpu.dot_dimension_numbers<[1], [0], [0], [1], [0, 0, 1, 1], [], []>} : vector<8x64xbf16>, vector<64x156xbf16>, vector<8x156xf32> -> vector<8x156xf32>
    %c0_7 = arith.constant 0 : index
    %c0_8 = arith.constant 0 : index
    %10 = vector.load %arg2[%c0_7, %c0_8] : memref<1x156xf32, #tpu.memory_space<vmem>>, vector<1x156xf32>
    %11 = vector.broadcast %10 : vector<1x156xf32> to vector<8x156xf32>
    %12 = arith.addf %9, %11 : vector<8x156xf32>
    %c0_9 = arith.constant 0 : index
    %c0_10 = arith.constant 0 : index
    %13 = vector.load %arg3[%c0_9, %c0_10] : memref<8x156xf32, #tpu.memory_space<vmem>>, vector<8x156xf32>
    tpu.vector_store %arg3[%c0_9, %c0_10], %12 {strides = array<i32>} : memref<8x156xf32, #tpu.memory_space<vmem>>, vector<8x156xf32>,
    return
  }
}

module attributes {stable_mosaic.version = 11 : i64} {
  func.func @_conformer_layer_kernel(%arg0: memref<16x64xf32, #tpu.memory_space<vmem>>, %arg1: memref<64x448xbf16, #tpu.memory_space<vmem>>, %arg2: memref<64x256xbf16, #tpu.memory_space<vmem>>, %arg3: memref<128x128xbf16, #tpu.memory_space<vmem>>, %arg4: memref<27x64xf32, #tpu.memory_space<vmem>>, %arg5: memref<2x128xf32, #tpu.memory_space<vmem>>, %arg6: memref<16x64xf32, #tpu.memory_space<vmem>>) attributes {dimension_semantics = [], scalar_prefetch = 0 : i64, scratch_operands = 0 : i64, tpu.core_type = #tpu.core_type<tc>} {
    %c0 = arith.constant 0 : index
    %c0_0 = arith.constant 0 : index
    %0 = vector.load %arg0[%c0, %c0_0] : memref<16x64xf32, #tpu.memory_space<vmem>>, vector<16x64xf32>
    %c0_1 = arith.constant 0 : index
    %c0_2 = arith.constant 0 : index
    %1 = vector.load %arg1[%c0_1, %c0_2] : memref<64x448xbf16, #tpu.memory_space<vmem>>, vector<64x448xbf16>
    %c0_3 = arith.constant 0 : index
    %c0_4 = arith.constant 0 : index
    %2 = vector.load %arg2[%c0_3, %c0_4] : memref<64x256xbf16, #tpu.memory_space<vmem>>, vector<64x256xbf16>
    %c0_5 = arith.constant 0 : index
    %c0_6 = arith.constant 0 : index
    %3 = vector.load %arg3[%c0_5, %c0_6] : memref<128x128xbf16, #tpu.memory_space<vmem>>, vector<128x128xbf16>
    %c0_7 = arith.constant 0 : index
    %c0_8 = arith.constant 0 : index
    %4 = vector.load %arg4[%c0_7, %c0_8] : memref<27x64xf32, #tpu.memory_space<vmem>>, vector<27x64xf32>
    %c0_9 = arith.constant 0 : index
    %c0_10 = arith.constant 0 : index
    %5 = vector.load %arg5[%c0_9, %c0_10] : memref<2x128xf32, #tpu.memory_space<vmem>>, vector<2x128xf32>
    %cst = arith.constant dense<0.000000e+00> : vector<16xf32>
    %6 = vector.multi_reduction <add>, %0, %cst [1] : vector<16x64xf32> to vector<16xf32>
    %7 = vector.shape_cast %6 : vector<16xf32> to vector<16x1xf32>
    %cst_11 = arith.constant 6.400000e+01 : f32
    %8 = vector.broadcast %cst_11 : f32 to vector<16x1xf32>
    %9 = arith.divf %7, %8 : vector<16x1xf32>
    %10 = vector.broadcast %9 : vector<16x1xf32> to vector<16x64xf32>
    %11 = arith.subf %0, %10 : vector<16x64xf32>
    %12 = arith.mulf %11, %11 : vector<16x64xf32>
    %cst_12 = arith.constant dense<0.000000e+00> : vector<16xf32>
    %13 = vector.multi_reduction <add>, %12, %cst_12 [1] : vector<16x64xf32> to vector<16xf32>
    %14 = vector.shape_cast %13 : vector<16xf32> to vector<16x1xf32>
    %cst_13 = arith.constant 6.400000e+01 : f32
    %15 = vector.broadcast %cst_13 : f32 to vector<16x1xf32>
    %16 = arith.divf %14, %15 : vector<16x1xf32>
    %cst_14 = arith.constant 9.99999974E-6 : f32
    %17 = vector.broadcast %cst_14 : f32 to vector<16x1xf32>
    %18 = arith.addf %16, %17 : vector<16x1xf32>
    %19 = math.rsqrt %18 : vector<16x1xf32>
    %20 = vector.broadcast %19 : vector<16x1xf32> to vector<16x64xf32>
    %21 = arith.mulf %11, %20 : vector<16x64xf32>
    %22 = vector.extract_strided_slice %4 {offsets = [0, 0], sizes = [1, 64], strides = [1, 1]} : vector<27x64xf32> to vector<1x64xf32>
    %23 = vector.broadcast %22 : vector<1x64xf32> to vector<16x64xf32>
    %24 = arith.mulf %21, %23 : vector<16x64xf32>
    %25 = vector.extract_strided_slice %4 {offsets = [1, 0], sizes = [1, 64], strides = [1, 1]} : vector<27x64xf32> to vector<1x64xf32>
    %26 = vector.broadcast %25 : vector<1x64xf32> to vector<16x64xf32>
    %27 = arith.addf %24, %26 : vector<16x64xf32>
    %28 = vector.extract_strided_slice %2 {offsets = [0, 0], sizes = [64, 128], strides = [1, 1]} : vector<64x256xbf16> to vector<64x128xbf16>
    %29 = arith.truncf %27 : vector<16x64xf32> to vector<16x64xbf16>
    %cst_15 = arith.constant dense<0.000000e+00> : vector<16x128xf32>
    %30 = tpu.matmul %29, %28, %cst_15 {dimension_numbers = #tpu.dot_dimension_numbers<[1], [0], [0], [1], [0, 0, 1, 1], [], []>} : vector<16x64xbf16>, vector<64x128xbf16>, vector<16x128xf32> -> vector<16x128xf32>
    %31 = vector.extract_strided_slice %5 {offsets = [0, 0], sizes = [1, 128], strides = [1, 1]} : vector<2x128xf32> to vector<1x128xf32>
    %32 = vector.broadcast %31 : vector<1x128xf32> to vector<16x128xf32>
    %33 = arith.addf %30, %32 : vector<16x128xf32>
    %34 = arith.negf %33 : vector<16x128xf32>
    %35 = math.exp %34 : vector<16x128xf32>
    %cst_16 = arith.constant 1.000000e+00 : f32
    %36 = vector.broadcast %cst_16 : f32 to vector<16x128xf32>
    %37 = arith.addf %36, %35 : vector<16x128xf32>
    %38 = arith.divf %36, %37 : vector<16x128xf32>
    %39 = arith.mulf %33, %38 : vector<16x128xf32>
    %40 = vector.extract_strided_slice %3 {offsets = [0, 0], sizes = [128, 64], strides = [1, 1]} : vector<128x128xbf16> to vector<128x64xbf16>
    %41 = arith.truncf %39 : vector<16x128xf32> to vector<16x128xbf16>
    %cst_17 = arith.constant dense<0.000000e+00> : vector<16x64xf32>
    %42 = tpu.matmul %41, %40, %cst_17 {dimension_numbers = #tpu.dot_dimension_numbers<[1], [0], [0], [1], [0, 0, 1, 1], [], []>} : vector<16x128xbf16>, vector<128x64xbf16>, vector<16x64xf32> -> vector<16x64xf32>
    %43 = vector.extract_strided_slice %4 {offsets = [2, 0], sizes = [1, 64], strides = [1, 1]} : vector<27x64xf32> to vector<1x64xf32>
    %44 = vector.broadcast %43 : vector<1x64xf32> to vector<16x64xf32>
    %45 = arith.addf %42, %44 : vector<16x64xf32>
    %cst_18 = arith.constant 5.000000e-01 : f32
    %46 = vector.broadcast %cst_18 : f32 to vector<16x64xf32>
    %47 = arith.mulf %46, %45 : vector<16x64xf32>
    %48 = arith.addf %0, %47 : vector<16x64xf32>
    %cst_19 = arith.constant dense<0.000000e+00> : vector<16xf32>
    %49 = vector.multi_reduction <add>, %48, %cst_19 [1] : vector<16x64xf32> to vector<16xf32>
    %50 = vector.shape_cast %49 : vector<16xf32> to vector<16x1xf32>
    %cst_20 = arith.constant 6.400000e+01 : f32
    %51 = vector.broadcast %cst_20 : f32 to vector<16x1xf32>
    %52 = arith.divf %50, %51 : vector<16x1xf32>
    %53 = vector.broadcast %52 : vector<16x1xf32> to vector<16x64xf32>
    %54 = arith.subf %48, %53 : vector<16x64xf32>
    %55 = arith.mulf %54, %54 : vector<16x64xf32>
    %cst_21 = arith.constant dense<0.000000e+00> : vector<16xf32>
    %56 = vector.multi_reduction <add>, %55, %cst_21 [1] : vector<16x64xf32> to vector<16xf32>
    %57 = vector.shape_cast %56 : vector<16xf32> to vector<16x1xf32>
    %cst_22 = arith.constant 6.400000e+01 : f32
    %58 = vector.broadcast %cst_22 : f32 to vector<16x1xf32>
    %59 = arith.divf %57, %58 : vector<16x1xf32>
    %cst_23 = arith.constant 9.99999974E-6 : f32
    %60 = vector.broadcast %cst_23 : f32 to vector<16x1xf32>
    %61 = arith.addf %59, %60 : vector<16x1xf32>
    %62 = math.rsqrt %61 : vector<16x1xf32>
    %63 = vector.broadcast %62 : vector<16x1xf32> to vector<16x64xf32>
    %64 = arith.mulf %54, %63 : vector<16x64xf32>
    %65 = vector.extract_strided_slice %4 {offsets = [3, 0], sizes = [1, 64], strides = [1, 1]} : vector<27x64xf32> to vector<1x64xf32>
    %66 = vector.broadcast %65 : vector<1x64xf32> to vector<16x64xf32>
    %67 = arith.mulf %64, %66 : vector<16x64xf32>
    %68 = vector.extract_strided_slice %4 {offsets = [4, 0], sizes = [1, 64], strides = [1, 1]} : vector<27x64xf32> to vector<1x64xf32>
    %69 = vector.broadcast %68 : vector<1x64xf32> to vector<16x64xf32>
    %70 = arith.addf %67, %69 : vector<16x64xf32>
    %71 = vector.extract_strided_slice %1 {offsets = [0, 0], sizes = [64, 192], strides = [1, 1]} : vector<64x448xbf16> to vector<64x192xbf16>
    %72 = arith.truncf %70 : vector<16x64xf32> to vector<16x64xbf16>
    %cst_24 = arith.constant dense<0.000000e+00> : vector<16x192xf32>
    %73 = tpu.matmul %72, %71, %cst_24 {dimension_numbers = #tpu.dot_dimension_numbers<[1], [0], [0], [1], [0, 0, 1, 1], [], []>} : vector<16x64xbf16>, vector<64x192xbf16>, vector<16x192xf32> -> vector<16x192xf32>
    %74 = vector.extract_strided_slice %73 {offsets = [0, 0], sizes = [16, 64], strides = [1, 1]} : vector<16x192xf32> to vector<16x64xf32>
    %75 = vector.extract_strided_slice %4 {offsets = [5, 0], sizes = [1, 64], strides = [1, 1]} : vector<27x64xf32> to vector<1x64xf32>
    %76 = vector.broadcast %75 : vector<1x64xf32> to vector<16x64xf32>
    %77 = arith.addf %74, %76 : vector<16x64xf32>
    %78 = vector.extract_strided_slice %73 {offsets = [0, 64], sizes = [16, 64], strides = [1, 1]} : vector<16x192xf32> to vector<16x64xf32>
    %79 = vector.extract_strided_slice %4 {offsets = [6, 0], sizes = [1, 64], strides = [1, 1]} : vector<27x64xf32> to vector<1x64xf32>
    %80 = vector.broadcast %79 : vector<1x64xf32> to vector<16x64xf32>
    %81 = arith.addf %78, %80 : vector<16x64xf32>
    %82 = vector.extract_strided_slice %73 {offsets = [0, 128], sizes = [16, 64], strides = [1, 1]} : vector<16x192xf32> to vector<16x64xf32>
    %83 = vector.extract_strided_slice %4 {offsets = [7, 0], sizes = [1, 64], strides = [1, 1]} : vector<27x64xf32> to vector<1x64xf32>
    %84 = vector.broadcast %83 : vector<1x64xf32> to vector<16x64xf32>
    %85 = arith.addf %82, %84 : vector<16x64xf32>
    %86 = vector.extract_strided_slice %1 {offsets = [0, 192], sizes = [64, 64], strides = [1, 1]} : vector<64x448xbf16> to vector<64x64xbf16>
    %87 = vector.extract_strided_slice %77 {offsets = [0, 0], sizes = [8, 64], strides = [1, 1]} : vector<16x64xf32> to vector<8x64xf32>
    %88 = vector.extract_strided_slice %81 {offsets = [0, 0], sizes = [8, 64], strides = [1, 1]} : vector<16x64xf32> to vector<8x64xf32>
    %89 = vector.extract_strided_slice %85 {offsets = [0, 0], sizes = [8, 64], strides = [1, 1]} : vector<16x64xf32> to vector<8x64xf32>
    %cst_25 = arith.constant 0.000000e+00 : f32
    %90 = vector.broadcast %cst_25 : f32 to vector<8x64xf32>
    %91 = vector.extract_strided_slice %87 {offsets = [0, 0], sizes = [8, 16], strides = [1, 1]} : vector<8x64xf32> to vector<8x16xf32>
    %cst_26 = arith.constant 2.500000e-01 : f32
    %92 = vector.broadcast %cst_26 : f32 to vector<8x16xf32>
    %93 = arith.mulf %91, %92 : vector<8x16xf32>
    %94 = arith.truncf %93 : vector<8x16xf32> to vector<8x16xbf16>
    %95 = vector.extract_strided_slice %88 {offsets = [0, 0], sizes = [8, 16], strides = [1, 1]} : vector<8x64xf32> to vector<8x16xf32>
    %96 = arith.truncf %95 : vector<8x16xf32> to vector<8x16xbf16>
    %97 = vector.extract_strided_slice %89 {offsets = [0, 0], sizes = [8, 16], strides = [1, 1]} : vector<8x64xf32> to vector<8x16xf32>
    %98 = arith.truncf %97 : vector<8x16xf32> to vector<8x16xbf16>
    %cst_27 = arith.constant dense<0.000000e+00> : vector<8x8xf32>
    %99 = tpu.matmul %94, %96, %cst_27 {dimension_numbers = #tpu.dot_dimension_numbers<[1], [1], [0], [0], [0, 0, 1, 0], [], []>} : vector<8x16xbf16>, vector<8x16xbf16>, vector<8x8xf32> -> vector<8x8xf32>
    %cst_28 = arith.constant dense<0xFF800000> : vector<8xf32>
    %100 = vector.multi_reduction <maximumf>, %99, %cst_28 [1] : vector<8x8xf32> to vector<8xf32>
    %101 = vector.shape_cast %100 : vector<8xf32> to vector<8x1xf32>
    %102 = vector.broadcast %101 : vector<8x1xf32> to vector<8x8xf32>
    %103 = arith.subf %99, %102 : vector<8x8xf32>
    %104 = math.exp %103 : vector<8x8xf32>
    %cst_29 = arith.constant dense<0.000000e+00> : vector<8xf32>
    %105 = vector.multi_reduction <add>, %104, %cst_29 [1] : vector<8x8xf32> to vector<8xf32>
    %106 = vector.shape_cast %105 : vector<8xf32> to vector<8x1xf32>
    %107 = tpu.reciprocal %106 {approx = true} : vector<8x1xf32> -> vector<8x1xf32>
    %108 = vector.broadcast %107 : vector<8x1xf32> to vector<8x8xf32>
    %109 = arith.mulf %104, %108 : vector<8x8xf32>
    %110 = arith.truncf %109 : vector<8x8xf32> to vector<8x8xbf16>
    %cst_30 = arith.constant dense<0.000000e+00> : vector<8x16xf32>
    %111 = tpu.matmul %110, %98, %cst_30 {dimension_numbers = #tpu.dot_dimension_numbers<[1], [0], [0], [1], [0, 0, 1, 1], [], []>} : vector<8x8xbf16>, vector<8x16xbf16>, vector<8x16xf32> -> vector<8x16xf32>
    %112 = vector.extract_strided_slice %86 {offsets = [0, 0], sizes = [16, 64], strides = [1, 1]} : vector<64x64xbf16> to vector<16x64xbf16>
    %113 = arith.truncf %111 : vector<8x16xf32> to vector<8x16xbf16>
    %cst_31 = arith.constant dense<0.000000e+00> : vector<8x64xf32>
    %114 = tpu.matmul %113, %112, %cst_31 {dimension_numbers = #tpu.dot_dimension_numbers<[1], [0], [0], [1], [0, 0, 1, 1], [], []>} : vector<8x16xbf16>, vector<16x64xbf16>, vector<8x64xf32> -> vector<8x64xf32>
    %115 = arith.addf %90, %114 : vector<8x64xf32>
    %116 = vector.extract_strided_slice %87 {offsets = [0, 16], sizes = [8, 16], strides = [1, 1]} : vector<8x64xf32> to vector<8x16xf32>
    %cst_32 = arith.constant 2.500000e-01 : f32
    %117 = vector.broadcast %cst_32 : f32 to vector<8x16xf32>
    %118 = arith.mulf %116, %117 : vector<8x16xf32>
    %119 = arith.truncf %118 : vector<8x16xf32> to vector<8x16xbf16>
    %120 = vector.extract_strided_slice %88 {offsets = [0, 16], sizes = [8, 16], strides = [1, 1]} : vector<8x64xf32> to vector<8x16xf32>
    %121 = arith.truncf %120 : vector<8x16xf32> to vector<8x16xbf16>
    %122 = vector.extract_strided_slice %89 {offsets = [0, 16], sizes = [8, 16], strides = [1, 1]} : vector<8x64xf32> to vector<8x16xf32>
    %123 = arith.truncf %122 : vector<8x16xf32> to vector<8x16xbf16>
    %cst_33 = arith.constant dense<0.000000e+00> : vector<8x8xf32>
    %124 = tpu.matmul %119, %121, %cst_33 {dimension_numbers = #tpu.dot_dimension_numbers<[1], [1], [0], [0], [0, 0, 1, 0], [], []>} : vector<8x16xbf16>, vector<8x16xbf16>, vector<8x8xf32> -> vector<8x8xf32>
    %cst_34 = arith.constant dense<0xFF800000> : vector<8xf32>
    %125 = vector.multi_reduction <maximumf>, %124, %cst_34 [1] : vector<8x8xf32> to vector<8xf32>
    %126 = vector.shape_cast %125 : vector<8xf32> to vector<8x1xf32>
    %127 = vector.broadcast %126 : vector<8x1xf32> to vector<8x8xf32>
    %128 = arith.subf %124, %127 : vector<8x8xf32>
    %129 = math.exp %128 : vector<8x8xf32>
    %cst_35 = arith.constant dense<0.000000e+00> : vector<8xf32>
    %130 = vector.multi_reduction <add>, %129, %cst_35 [1] : vector<8x8xf32> to vector<8xf32>
    %131 = vector.shape_cast %130 : vector<8xf32> to vector<8x1xf32>
    %132 = tpu.reciprocal %131 {approx = true} : vector<8x1xf32> -> vector<8x1xf32>
    %133 = vector.broadcast %132 : vector<8x1xf32> to vector<8x8xf32>
    %134 = arith.mulf %129, %133 : vector<8x8xf32>
    %135 = arith.truncf %134 : vector<8x8xf32> to vector<8x8xbf16>
    %cst_36 = arith.constant dense<0.000000e+00> : vector<8x16xf32>
    %136 = tpu.matmul %135, %123, %cst_36 {dimension_numbers = #tpu.dot_dimension_numbers<[1], [0], [0], [1], [0, 0, 1, 1], [], []>} : vector<8x8xbf16>, vector<8x16xbf16>, vector<8x16xf32> -> vector<8x16xf32>
    %137 = vector.extract_strided_slice %86 {offsets = [16, 0], sizes = [16, 64], strides = [1, 1]} : vector<64x64xbf16> to vector<16x64xbf16>
    %138 = arith.truncf %136 : vector<8x16xf32> to vector<8x16xbf16>
    %cst_37 = arith.constant dense<0.000000e+00> : vector<8x64xf32>
    %139 = tpu.matmul %138, %137, %cst_37 {dimension_numbers = #tpu.dot_dimension_numbers<[1], [0], [0], [1], [0, 0, 1, 1], [], []>} : vector<8x16xbf16>, vector<16x64xbf16>, vector<8x64xf32> -> vector<8x64xf32>
    %140 = arith.addf %115, %139 : vector<8x64xf32>
    %141 = vector.extract_strided_slice %87 {offsets = [0, 32], sizes = [8, 16], strides = [1, 1]} : vector<8x64xf32> to vector<8x16xf32>
    %cst_38 = arith.constant 2.500000e-01 : f32
    %142 = vector.broadcast %cst_38 : f32 to vector<8x16xf32>
    %143 = arith.mulf %141, %142 : vector<8x16xf32>
    %144 = arith.truncf %143 : vector<8x16xf32> to vector<8x16xbf16>
    %145 = vector.extract_strided_slice %88 {offsets = [0, 32], sizes = [8, 16], strides = [1, 1]} : vector<8x64xf32> to vector<8x16xf32>
    %146 = arith.truncf %145 : vector<8x16xf32> to vector<8x16xbf16>
    %147 = vector.extract_strided_slice %89 {offsets = [0, 32], sizes = [8, 16], strides = [1, 1]} : vector<8x64xf32> to vector<8x16xf32>
    %148 = arith.truncf %147 : vector<8x16xf32> to vector<8x16xbf16>
    %cst_39 = arith.constant dense<0.000000e+00> : vector<8x8xf32>
    %149 = tpu.matmul %144, %146, %cst_39 {dimension_numbers = #tpu.dot_dimension_numbers<[1], [1], [0], [0], [0, 0, 1, 0], [], []>} : vector<8x16xbf16>, vector<8x16xbf16>, vector<8x8xf32> -> vector<8x8xf32>
    %cst_40 = arith.constant dense<0xFF800000> : vector<8xf32>
    %150 = vector.multi_reduction <maximumf>, %149, %cst_40 [1] : vector<8x8xf32> to vector<8xf32>
    %151 = vector.shape_cast %150 : vector<8xf32> to vector<8x1xf32>
    %152 = vector.broadcast %151 : vector<8x1xf32> to vector<8x8xf32>
    %153 = arith.subf %149, %152 : vector<8x8xf32>
    %154 = math.exp %153 : vector<8x8xf32>
    %cst_41 = arith.constant dense<0.000000e+00> : vector<8xf32>
    %155 = vector.multi_reduction <add>, %154, %cst_41 [1] : vector<8x8xf32> to vector<8xf32>
    %156 = vector.shape_cast %155 : vector<8xf32> to vector<8x1xf32>
    %157 = tpu.reciprocal %156 {approx = true} : vector<8x1xf32> -> vector<8x1xf32>
    %158 = vector.broadcast %157 : vector<8x1xf32> to vector<8x8xf32>
    %159 = arith.mulf %154, %158 : vector<8x8xf32>
    %160 = arith.truncf %159 : vector<8x8xf32> to vector<8x8xbf16>
    %cst_42 = arith.constant dense<0.000000e+00> : vector<8x16xf32>
    %161 = tpu.matmul %160, %148, %cst_42 {dimension_numbers = #tpu.dot_dimension_numbers<[1], [0], [0], [1], [0, 0, 1, 1], [], []>} : vector<8x8xbf16>, vector<8x16xbf16>, vector<8x16xf32> -> vector<8x16xf32>
    %162 = vector.extract_strided_slice %86 {offsets = [32, 0], sizes = [16, 64], strides = [1, 1]} : vector<64x64xbf16> to vector<16x64xbf16>
    %163 = arith.truncf %161 : vector<8x16xf32> to vector<8x16xbf16>
    %cst_43 = arith.constant dense<0.000000e+00> : vector<8x64xf32>
    %164 = tpu.matmul %163, %162, %cst_43 {dimension_numbers = #tpu.dot_dimension_numbers<[1], [0], [0], [1], [0, 0, 1, 1], [], []>} : vector<8x16xbf16>, vector<16x64xbf16>, vector<8x64xf32> -> vector<8x64xf32>
    %165 = arith.addf %140, %164 : vector<8x64xf32>
    %166 = vector.extract_strided_slice %87 {offsets = [0, 48], sizes = [8, 16], strides = [1, 1]} : vector<8x64xf32> to vector<8x16xf32>
    %cst_44 = arith.constant 2.500000e-01 : f32
    %167 = vector.broadcast %cst_44 : f32 to vector<8x16xf32>
    %168 = arith.mulf %166, %167 : vector<8x16xf32>
    %169 = arith.truncf %168 : vector<8x16xf32> to vector<8x16xbf16>
    %170 = vector.extract_strided_slice %88 {offsets = [0, 48], sizes = [8, 16], strides = [1, 1]} : vector<8x64xf32> to vector<8x16xf32>
    %171 = arith.truncf %170 : vector<8x16xf32> to vector<8x16xbf16>
    %172 = vector.extract_strided_slice %89 {offsets = [0, 48], sizes = [8, 16], strides = [1, 1]} : vector<8x64xf32> to vector<8x16xf32>
    %173 = arith.truncf %172 : vector<8x16xf32> to vector<8x16xbf16>
    %cst_45 = arith.constant dense<0.000000e+00> : vector<8x8xf32>
    %174 = tpu.matmul %169, %171, %cst_45 {dimension_numbers = #tpu.dot_dimension_numbers<[1], [1], [0], [0], [0, 0, 1, 0], [], []>} : vector<8x16xbf16>, vector<8x16xbf16>, vector<8x8xf32> -> vector<8x8xf32>
    %cst_46 = arith.constant dense<0xFF800000> : vector<8xf32>
    %175 = vector.multi_reduction <maximumf>, %174, %cst_46 [1] : vector<8x8xf32> to vector<8xf32>
    %176 = vector.shape_cast %175 : vector<8xf32> to vector<8x1xf32>
    %177 = vector.broadcast %176 : vector<8x1xf32> to vector<8x8xf32>
    %178 = arith.subf %174, %177 : vector<8x8xf32>
    %179 = math.exp %178 : vector<8x8xf32>
    %cst_47 = arith.constant dense<0.000000e+00> : vector<8xf32>
    %180 = vector.multi_reduction <add>, %179, %cst_47 [1] : vector<8x8xf32> to vector<8xf32>
    %181 = vector.shape_cast %180 : vector<8xf32> to vector<8x1xf32>
    %182 = tpu.reciprocal %181 {approx = true} : vector<8x1xf32> -> vector<8x1xf32>
    %183 = vector.broadcast %182 : vector<8x1xf32> to vector<8x8xf32>
    %184 = arith.mulf %179, %183 : vector<8x8xf32>
    %185 = arith.truncf %184 : vector<8x8xf32> to vector<8x8xbf16>
    %cst_48 = arith.constant dense<0.000000e+00> : vector<8x16xf32>
    %186 = tpu.matmul %185, %173, %cst_48 {dimension_numbers = #tpu.dot_dimension_numbers<[1], [0], [0], [1], [0, 0, 1, 1], [], []>} : vector<8x8xbf16>, vector<8x16xbf16>, vector<8x16xf32> -> vector<8x16xf32>
    %187 = vector.extract_strided_slice %86 {offsets = [48, 0], sizes = [16, 64], strides = [1, 1]} : vector<64x64xbf16> to vector<16x64xbf16>
    %188 = arith.truncf %186 : vector<8x16xf32> to vector<8x16xbf16>
    %cst_49 = arith.constant dense<0.000000e+00> : vector<8x64xf32>
    %189 = tpu.matmul %188, %187, %cst_49 {dimension_numbers = #tpu.dot_dimension_numbers<[1], [0], [0], [1], [0, 0, 1, 1], [], []>} : vector<8x16xbf16>, vector<16x64xbf16>, vector<8x64xf32> -> vector<8x64xf32>
    %190 = arith.addf %165, %189 : vector<8x64xf32>
    %191 = vector.extract_strided_slice %77 {offsets = [8, 0], sizes = [8, 64], strides = [1, 1]} : vector<16x64xf32> to vector<8x64xf32>
    %192 = vector.extract_strided_slice %81 {offsets = [8, 0], sizes = [8, 64], strides = [1, 1]} : vector<16x64xf32> to vector<8x64xf32>
    %193 = vector.extract_strided_slice %85 {offsets = [8, 0], sizes = [8, 64], strides = [1, 1]} : vector<16x64xf32> to vector<8x64xf32>
    %cst_50 = arith.constant 0.000000e+00 : f32
    %194 = vector.broadcast %cst_50 : f32 to vector<8x64xf32>
    %195 = vector.extract_strided_slice %191 {offsets = [0, 0], sizes = [8, 16], strides = [1, 1]} : vector<8x64xf32> to vector<8x16xf32>
    %cst_51 = arith.constant 2.500000e-01 : f32
    %196 = vector.broadcast %cst_51 : f32 to vector<8x16xf32>
    %197 = arith.mulf %195, %196 : vector<8x16xf32>
    %198 = arith.truncf %197 : vector<8x16xf32> to vector<8x16xbf16>
    %199 = vector.extract_strided_slice %192 {offsets = [0, 0], sizes = [8, 16], strides = [1, 1]} : vector<8x64xf32> to vector<8x16xf32>
    %200 = arith.truncf %199 : vector<8x16xf32> to vector<8x16xbf16>
    %201 = vector.extract_strided_slice %193 {offsets = [0, 0], sizes = [8, 16], strides = [1, 1]} : vector<8x64xf32> to vector<8x16xf32>
    %202 = arith.truncf %201 : vector<8x16xf32> to vector<8x16xbf16>
    %cst_52 = arith.constant dense<0.000000e+00> : vector<8x8xf32>
    %203 = tpu.matmul %198, %200, %cst_52 {dimension_numbers = #tpu.dot_dimension_numbers<[1], [1], [0], [0], [0, 0, 1, 0], [], []>} : vector<8x16xbf16>, vector<8x16xbf16>, vector<8x8xf32> -> vector<8x8xf32>
    %cst_53 = arith.constant dense<0xFF800000> : vector<8xf32>
    %204 = vector.multi_reduction <maximumf>, %203, %cst_53 [1] : vector<8x8xf32> to vector<8xf32>
    %205 = vector.shape_cast %204 : vector<8xf32> to vector<8x1xf32>
    %206 = vector.broadcast %205 : vector<8x1xf32> to vector<8x8xf32>
    %207 = arith.subf %203, %206 : vector<8x8xf32>
    %208 = math.exp %207 : vector<8x8xf32>
    %cst_54 = arith.constant dense<0.000000e+00> : vector<8xf32>
    %209 = vector.multi_reduction <add>, %208, %cst_54 [1] : vector<8x8xf32> to vector<8xf32>
    %210 = vector.shape_cast %209 : vector<8xf32> to vector<8x1xf32>
    %211 = tpu.reciprocal %210 {approx = true} : vector<8x1xf32> -> vector<8x1xf32>
    %212 = vector.broadcast %211 : vector<8x1xf32> to vector<8x8xf32>
    %213 = arith.mulf %208, %212 : vector<8x8xf32>
    %214 = arith.truncf %213 : vector<8x8xf32> to vector<8x8xbf16>
    %cst_55 = arith.constant dense<0.000000e+00> : vector<8x16xf32>
    %215 = tpu.matmul %214, %202, %cst_55 {dimension_numbers = #tpu.dot_dimension_numbers<[1], [0], [0], [1], [0, 0, 1, 1], [], []>} : vector<8x8xbf16>, vector<8x16xbf16>, vector<8x16xf32> -> vector<8x16xf32>
    %216 = vector.extract_strided_slice %86 {offsets = [0, 0], sizes = [16, 64], strides = [1, 1]} : vector<64x64xbf16> to vector<16x64xbf16>
    %217 = arith.truncf %215 : vector<8x16xf32> to vector<8x16xbf16>
    %cst_56 = arith.constant dense<0.000000e+00> : vector<8x64xf32>
    %218 = tpu.matmul %217, %216, %cst_56 {dimension_numbers = #tpu.dot_dimension_numbers<[1], [0], [0], [1], [0, 0, 1, 1], [], []>} : vector<8x16xbf16>, vector<16x64xbf16>, vector<8x64xf32> -> vector<8x64xf32>
    %219 = arith.addf %194, %218 : vector<8x64xf32>
    %220 = vector.extract_strided_slice %191 {offsets = [0, 16], sizes = [8, 16], strides = [1, 1]} : vector<8x64xf32> to vector<8x16xf32>
    %cst_57 = arith.constant 2.500000e-01 : f32
    %221 = vector.broadcast %cst_57 : f32 to vector<8x16xf32>
    %222 = arith.mulf %220, %221 : vector<8x16xf32>
    %223 = arith.truncf %222 : vector<8x16xf32> to vector<8x16xbf16>
    %224 = vector.extract_strided_slice %192 {offsets = [0, 16], sizes = [8, 16], strides = [1, 1]} : vector<8x64xf32> to vector<8x16xf32>
    %225 = arith.truncf %224 : vector<8x16xf32> to vector<8x16xbf16>
    %226 = vector.extract_strided_slice %193 {offsets = [0, 16], sizes = [8, 16], strides = [1, 1]} : vector<8x64xf32> to vector<8x16xf32>
    %227 = arith.truncf %226 : vector<8x16xf32> to vector<8x16xbf16>
    %cst_58 = arith.constant dense<0.000000e+00> : vector<8x8xf32>
    %228 = tpu.matmul %223, %225, %cst_58 {dimension_numbers = #tpu.dot_dimension_numbers<[1], [1], [0], [0], [0, 0, 1, 0], [], []>} : vector<8x16xbf16>, vector<8x16xbf16>, vector<8x8xf32> -> vector<8x8xf32>
    %cst_59 = arith.constant dense<0xFF800000> : vector<8xf32>
    %229 = vector.multi_reduction <maximumf>, %228, %cst_59 [1] : vector<8x8xf32> to vector<8xf32>
    %230 = vector.shape_cast %229 : vector<8xf32> to vector<8x1xf32>
    %231 = vector.broadcast %230 : vector<8x1xf32> to vector<8x8xf32>
    %232 = arith.subf %228, %231 : vector<8x8xf32>
    %233 = math.exp %232 : vector<8x8xf32>
    %cst_60 = arith.constant dense<0.000000e+00> : vector<8xf32>
    %234 = vector.multi_reduction <add>, %233, %cst_60 [1] : vector<8x8xf32> to vector<8xf32>
    %235 = vector.shape_cast %234 : vector<8xf32> to vector<8x1xf32>
    %236 = tpu.reciprocal %235 {approx = true} : vector<8x1xf32> -> vector<8x1xf32>
    %237 = vector.broadcast %236 : vector<8x1xf32> to vector<8x8xf32>
    %238 = arith.mulf %233, %237 : vector<8x8xf32>
    %239 = arith.truncf %238 : vector<8x8xf32> to vector<8x8xbf16>
    %cst_61 = arith.constant dense<0.000000e+00> : vector<8x16xf32>
    %240 = tpu.matmul %239, %227, %cst_61 {dimension_numbers = #tpu.dot_dimension_numbers<[1], [0], [0], [1], [0, 0, 1, 1], [], []>} : vector<8x8xbf16>, vector<8x16xbf16>, vector<8x16xf32> -> vector<8x16xf32>
    %241 = vector.extract_strided_slice %86 {offsets = [16, 0], sizes = [16, 64], strides = [1, 1]} : vector<64x64xbf16> to vector<16x64xbf16>
    %242 = arith.truncf %240 : vector<8x16xf32> to vector<8x16xbf16>
    %cst_62 = arith.constant dense<0.000000e+00> : vector<8x64xf32>
    %243 = tpu.matmul %242, %241, %cst_62 {dimension_numbers = #tpu.dot_dimension_numbers<[1], [0], [0], [1], [0, 0, 1, 1], [], []>} : vector<8x16xbf16>, vector<16x64xbf16>, vector<8x64xf32> -> vector<8x64xf32>
    %244 = arith.addf %219, %243 : vector<8x64xf32>
    %245 = vector.extract_strided_slice %191 {offsets = [0, 32], sizes = [8, 16], strides = [1, 1]} : vector<8x64xf32> to vector<8x16xf32>
    %cst_63 = arith.constant 2.500000e-01 : f32
    %246 = vector.broadcast %cst_63 : f32 to vector<8x16xf32>
    %247 = arith.mulf %245, %246 : vector<8x16xf32>
    %248 = arith.truncf %247 : vector<8x16xf32> to vector<8x16xbf16>
    %249 = vector.extract_strided_slice %192 {offsets = [0, 32], sizes = [8, 16], strides = [1, 1]} : vector<8x64xf32> to vector<8x16xf32>
    %250 = arith.truncf %249 : vector<8x16xf32> to vector<8x16xbf16>
    %251 = vector.extract_strided_slice %193 {offsets = [0, 32], sizes = [8, 16], strides = [1, 1]} : vector<8x64xf32> to vector<8x16xf32>
    %252 = arith.truncf %251 : vector<8x16xf32> to vector<8x16xbf16>
    %cst_64 = arith.constant dense<0.000000e+00> : vector<8x8xf32>
    %253 = tpu.matmul %248, %250, %cst_64 {dimension_numbers = #tpu.dot_dimension_numbers<[1], [1], [0], [0], [0, 0, 1, 0], [], []>} : vector<8x16xbf16>, vector<8x16xbf16>, vector<8x8xf32> -> vector<8x8xf32>
    %cst_65 = arith.constant dense<0xFF800000> : vector<8xf32>
    %254 = vector.multi_reduction <maximumf>, %253, %cst_65 [1] : vector<8x8xf32> to vector<8xf32>
    %255 = vector.shape_cast %254 : vector<8xf32> to vector<8x1xf32>
    %256 = vector.broadcast %255 : vector<8x1xf32> to vector<8x8xf32>
    %257 = arith.subf %253, %256 : vector<8x8xf32>
    %258 = math.exp %257 : vector<8x8xf32>
    %cst_66 = arith.constant dense<0.000000e+00> : vector<8xf32>
    %259 = vector.multi_reduction <add>, %258, %cst_66 [1] : vector<8x8xf32> to vector<8xf32>
    %260 = vector.shape_cast %259 : vector<8xf32> to vector<8x1xf32>
    %261 = tpu.reciprocal %260 {approx = true} : vector<8x1xf32> -> vector<8x1xf32>
    %262 = vector.broadcast %261 : vector<8x1xf32> to vector<8x8xf32>
    %263 = arith.mulf %258, %262 : vector<8x8xf32>
    %264 = arith.truncf %263 : vector<8x8xf32> to vector<8x8xbf16>
    %cst_67 = arith.constant dense<0.000000e+00> : vector<8x16xf32>
    %265 = tpu.matmul %264, %252, %cst_67 {dimension_numbers = #tpu.dot_dimension_numbers<[1], [0], [0], [1], [0, 0, 1, 1], [], []>} : vector<8x8xbf16>, vector<8x16xbf16>, vector<8x16xf32> -> vector<8x16xf32>
    %266 = vector.extract_strided_slice %86 {offsets = [32, 0], sizes = [16, 64], strides = [1, 1]} : vector<64x64xbf16> to vector<16x64xbf16>
    %267 = arith.truncf %265 : vector<8x16xf32> to vector<8x16xbf16>
    %cst_68 = arith.constant dense<0.000000e+00> : vector<8x64xf32>
    %268 = tpu.matmul %267, %266, %cst_68 {dimension_numbers = #tpu.dot_dimension_numbers<[1], [0], [0], [1], [0, 0, 1, 1], [], []>} : vector<8x16xbf16>, vector<16x64xbf16>, vector<8x64xf32> -> vector<8x64xf32>
    %269 = arith.addf %244, %268 : vector<8x64xf32>
    %270 = vector.extract_strided_slice %191 {offsets = [0, 48], sizes = [8, 16], strides = [1, 1]} : vector<8x64xf32> to vector<8x16xf32>
    %cst_69 = arith.constant 2.500000e-01 : f32
    %271 = vector.broadcast %cst_69 : f32 to vector<8x16xf32>
    %272 = arith.mulf %270, %271 : vector<8x16xf32>
    %273 = arith.truncf %272 : vector<8x16xf32> to vector<8x16xbf16>
    %274 = vector.extract_strided_slice %192 {offsets = [0, 48], sizes = [8, 16], strides = [1, 1]} : vector<8x64xf32> to vector<8x16xf32>
    %275 = arith.truncf %274 : vector<8x16xf32> to vector<8x16xbf16>
    %276 = vector.extract_strided_slice %193 {offsets = [0, 48], sizes = [8, 16], strides = [1, 1]} : vector<8x64xf32> to vector<8x16xf32>
    %277 = arith.truncf %276 : vector<8x16xf32> to vector<8x16xbf16>
    %cst_70 = arith.constant dense<0.000000e+00> : vector<8x8xf32>
    %278 = tpu.matmul %273, %275, %cst_70 {dimension_numbers = #tpu.dot_dimension_numbers<[1], [1], [0], [0], [0, 0, 1, 0], [], []>} : vector<8x16xbf16>, vector<8x16xbf16>, vector<8x8xf32> -> vector<8x8xf32>
    %cst_71 = arith.constant dense<0xFF800000> : vector<8xf32>
    %279 = vector.multi_reduction <maximumf>, %278, %cst_71 [1] : vector<8x8xf32> to vector<8xf32>
    %280 = vector.shape_cast %279 : vector<8xf32> to vector<8x1xf32>
    %281 = vector.broadcast %280 : vector<8x1xf32> to vector<8x8xf32>
    %282 = arith.subf %278, %281 : vector<8x8xf32>
    %283 = math.exp %282 : vector<8x8xf32>
    %cst_72 = arith.constant dense<0.000000e+00> : vector<8xf32>
    %284 = vector.multi_reduction <add>, %283, %cst_72 [1] : vector<8x8xf32> to vector<8xf32>
    %285 = vector.shape_cast %284 : vector<8xf32> to vector<8x1xf32>
    %286 = tpu.reciprocal %285 {approx = true} : vector<8x1xf32> -> vector<8x1xf32>
    %287 = vector.broadcast %286 : vector<8x1xf32> to vector<8x8xf32>
    %288 = arith.mulf %283, %287 : vector<8x8xf32>
    %289 = arith.truncf %288 : vector<8x8xf32> to vector<8x8xbf16>
    %cst_73 = arith.constant dense<0.000000e+00> : vector<8x16xf32>
    %290 = tpu.matmul %289, %277, %cst_73 {dimension_numbers = #tpu.dot_dimension_numbers<[1], [0], [0], [1], [0, 0, 1, 1], [], []>} : vector<8x8xbf16>, vector<8x16xbf16>, vector<8x16xf32> -> vector<8x16xf32>
    %291 = vector.extract_strided_slice %86 {offsets = [48, 0], sizes = [16, 64], strides = [1, 1]} : vector<64x64xbf16> to vector<16x64xbf16>
    %292 = arith.truncf %290 : vector<8x16xf32> to vector<8x16xbf16>
    %cst_74 = arith.constant dense<0.000000e+00> : vector<8x64xf32>
    %293 = tpu.matmul %292, %291, %cst_74 {dimension_numbers = #tpu.dot_dimension_numbers<[1], [0], [0], [1], [0, 0, 1, 1], [], []>} : vector<8x16xbf16>, vector<16x64xbf16>, vector<8x64xf32> -> vector<8x64xf32>
    %294 = arith.addf %269, %293 : vector<8x64xf32>
    %295 = tpu.concatenate %190, %294 in 0 : vector<8x64xf32>, vector<8x64xf32> -> vector<16x64xf32>
    %296 = arith.addf %48, %295 : vector<16x64xf32>
    %297 = vector.extract_strided_slice %4 {offsets = [8, 0], sizes = [1, 64], strides = [1, 1]} : vector<27x64xf32> to vector<1x64xf32>
    %298 = vector.broadcast %297 : vector<1x64xf32> to vector<16x64xf32>
    %299 = arith.addf %296, %298 : vector<16x64xf32>
    %cst_75 = arith.constant dense<0.000000e+00> : vector<16xf32>
    %300 = vector.multi_reduction <add>, %299, %cst_75 [1] : vector<16x64xf32> to vector<16xf32>
    %301 = vector.shape_cast %300 : vector<16xf32> to vector<16x1xf32>
    %cst_76 = arith.constant 6.400000e+01 : f32
    %302 = vector.broadcast %cst_76 : f32 to vector<16x1xf32>
    %303 = arith.divf %301, %302 : vector<16x1xf32>
    %304 = vector.broadcast %303 : vector<16x1xf32> to vector<16x64xf32>
    %305 = arith.subf %299, %304 : vector<16x64xf32>
    %306 = arith.mulf %305, %305 : vector<16x64xf32>
    %cst_77 = arith.constant dense<0.000000e+00> : vector<16xf32>
    %307 = vector.multi_reduction <add>, %306, %cst_77 [1] : vector<16x64xf32> to vector<16xf32>
    %308 = vector.shape_cast %307 : vector<16xf32> to vector<16x1xf32>
    %cst_78 = arith.constant 6.400000e+01 : f32
    %309 = vector.broadcast %cst_78 : f32 to vector<16x1xf32>
    %310 = arith.divf %308, %309 : vector<16x1xf32>
    %cst_79 = arith.constant 9.99999974E-6 : f32
    %311 = vector.broadcast %cst_79 : f32 to vector<16x1xf32>
    %312 = arith.addf %310, %311 : vector<16x1xf32>
    %313 = math.rsqrt %312 : vector<16x1xf32>
    %314 = vector.broadcast %313 : vector<16x1xf32> to vector<16x64xf32>
    %315 = arith.mulf %305, %314 : vector<16x64xf32>
    %316 = vector.extract_strided_slice %4 {offsets = [9, 0], sizes = [1, 64], strides = [1, 1]} : vector<27x64xf32> to vector<1x64xf32>
    %317 = vector.broadcast %316 : vector<1x64xf32> to vector<16x64xf32>
    %318 = arith.mulf %315, %317 : vector<16x64xf32>
    %319 = vector.extract_strided_slice %4 {offsets = [10, 0], sizes = [1, 64], strides = [1, 1]} : vector<27x64xf32> to vector<1x64xf32>
    %320 = vector.broadcast %319 : vector<1x64xf32> to vector<16x64xf32>
    %321 = arith.addf %318, %320 : vector<16x64xf32>
    %322 = vector.extract_strided_slice %1 {offsets = [0, 256], sizes = [64, 128], strides = [1, 1]} : vector<64x448xbf16> to vector<64x128xbf16>
    %323 = arith.truncf %321 : vector<16x64xf32> to vector<16x64xbf16>
    %cst_80 = arith.constant dense<0.000000e+00> : vector<16x128xf32>
    %324 = tpu.matmul %323, %322, %cst_80 {dimension_numbers = #tpu.dot_dimension_numbers<[1], [0], [0], [1], [0, 0, 1, 1], [], []>} : vector<16x64xbf16>, vector<64x128xbf16>, vector<16x128xf32> -> vector<16x128xf32>
    %325 = vector.extract_strided_slice %324 {offsets = [0, 0], sizes = [16, 64], strides = [1, 1]} : vector<16x128xf32> to vector<16x64xf32>
    %326 = vector.extract_strided_slice %4 {offsets = [11, 0], sizes = [1, 64], strides = [1, 1]} : vector<27x64xf32> to vector<1x64xf32>
    %327 = vector.broadcast %326 : vector<1x64xf32> to vector<16x64xf32>
    %328 = arith.addf %325, %327 : vector<16x64xf32>
    %329 = vector.extract_strided_slice %324 {offsets = [0, 64], sizes = [16, 64], strides = [1, 1]} : vector<16x128xf32> to vector<16x64xf32>
    %330 = vector.extract_strided_slice %4 {offsets = [12, 0], sizes = [1, 64], strides = [1, 1]} : vector<27x64xf32> to vector<1x64xf32>
    %331 = vector.broadcast %330 : vector<1x64xf32> to vector<16x64xf32>
    %332 = arith.addf %329, %331 : vector<16x64xf32>
    %333 = arith.negf %332 : vector<16x64xf32>
    %334 = math.exp %333 : vector<16x64xf32>
    %cst_81 = arith.constant 1.000000e+00 : f32
    %335 = vector.broadcast %cst_81 : f32 to vector<16x64xf32>
    %336 = arith.addf %335, %334 : vector<16x64xf32>
    %337 = arith.divf %335, %336 : vector<16x64xf32>
    %338 = arith.mulf %328, %337 : vector<16x64xf32>
    %339 = vector.extract_strided_slice %4 {offsets = [22, 0], sizes = [5, 64], strides = [1, 1]} : vector<27x64xf32> to vector<5x64xf32>
    %cst_82 = arith.constant 0.000000e+00 : f32
    %340 = vector.broadcast %cst_82 : f32 to vector<2x64xf32>
    %341 = vector.extract_strided_slice %338 {offsets = [0, 0], sizes = [8, 64], strides = [1, 1]} : vector<16x64xf32> to vector<8x64xf32>
    %342 = tpu.concatenate %340, %341, %340 in 0 : vector<2x64xf32>, vector<8x64xf32>, vector<2x64xf32> -> vector<12x64xf32>
    %cst_83 = arith.constant 0.000000e+00 : f32
    %343 = vector.broadcast %cst_83 : f32 to vector<8x64xf32>
    %344 = vector.extract_strided_slice %339 {offsets = [0, 0], sizes = [1, 64], strides = [1, 1]} : vector<5x64xf32> to vector<1x64xf32>
    %345 = vector.extract_strided_slice %342 {offsets = [0, 0], sizes = [8, 64], strides = [1, 1]} : vector<12x64xf32> to vector<8x64xf32>
    %346 = vector.broadcast %344 : vector<1x64xf32> to vector<8x64xf32>
    %347 = arith.mulf %346, %345 : vector<8x64xf32>
    %348 = arith.addf %343, %347 : vector<8x64xf32>
    %349 = vector.extract_strided_slice %339 {offsets = [1, 0], sizes = [1, 64], strides = [1, 1]} : vector<5x64xf32> to vector<1x64xf32>
    %350 = vector.extract_strided_slice %342 {offsets = [1, 0], sizes = [8, 64], strides = [1, 1]} : vector<12x64xf32> to vector<8x64xf32>
    %351 = vector.broadcast %349 : vector<1x64xf32> to vector<8x64xf32>
    %352 = arith.mulf %351, %350 : vector<8x64xf32>
    %353 = arith.addf %348, %352 : vector<8x64xf32>
    %354 = vector.extract_strided_slice %339 {offsets = [2, 0], sizes = [1, 64], strides = [1, 1]} : vector<5x64xf32> to vector<1x64xf32>
    %355 = vector.extract_strided_slice %342 {offsets = [2, 0], sizes = [8, 64], strides = [1, 1]} : vector<12x64xf32> to vector<8x64xf32>
    %356 = vector.broadcast %354 : vector<1x64xf32> to vector<8x64xf32>
    %357 = arith.mulf %356, %355 : vector<8x64xf32>
    %358 = arith.addf %353, %357 : vector<8x64xf32>
    %359 = vector.extract_strided_slice %339 {offsets = [3, 0], sizes = [1, 64], strides = [1, 1]} : vector<5x64xf32> to vector<1x64xf32>
    %360 = vector.extract_strided_slice %342 {offsets = [3, 0], sizes = [8, 64], strides = [1, 1]} : vector<12x64xf32> to vector<8x64xf32>
    %361 = vector.broadcast %359 : vector<1x64xf32> to vector<8x64xf32>
    %362 = arith.mulf %361, %360 : vector<8x64xf32>
    %363 = arith.addf %358, %362 : vector<8x64xf32>
    %364 = vector.extract_strided_slice %339 {offsets = [4, 0], sizes = [1, 64], strides = [1, 1]} : vector<5x64xf32> to vector<1x64xf32>
    %365 = vector.extract_strided_slice %342 {offsets = [4, 0], sizes = [8, 64], strides = [1, 1]} : vector<12x64xf32> to vector<8x64xf32>
    %366 = vector.broadcast %364 : vector<1x64xf32> to vector<8x64xf32>
    %367 = arith.mulf %366, %365 : vector<8x64xf32>
    %368 = arith.addf %363, %367 : vector<8x64xf32>
    %369 = vector.extract_strided_slice %338 {offsets = [8, 0], sizes = [8, 64], strides = [1, 1]} : vector<16x64xf32> to vector<8x64xf32>
    %370 = tpu.concatenate %340, %369, %340 in 0 : vector<2x64xf32>, vector<8x64xf32>, vector<2x64xf32> -> vector<12x64xf32>
    %cst_84 = arith.constant 0.000000e+00 : f32
    %371 = vector.broadcast %cst_84 : f32 to vector<8x64xf32>
    %372 = vector.extract_strided_slice %339 {offsets = [0, 0], sizes = [1, 64], strides = [1, 1]} : vector<5x64xf32> to vector<1x64xf32>
    %373 = vector.extract_strided_slice %370 {offsets = [0, 0], sizes = [8, 64], strides = [1, 1]} : vector<12x64xf32> to vector<8x64xf32>
    %374 = vector.broadcast %372 : vector<1x64xf32> to vector<8x64xf32>
    %375 = arith.mulf %374, %373 : vector<8x64xf32>
    %376 = arith.addf %371, %375 : vector<8x64xf32>
    %377 = vector.extract_strided_slice %339 {offsets = [1, 0], sizes = [1, 64], strides = [1, 1]} : vector<5x64xf32> to vector<1x64xf32>
    %378 = vector.extract_strided_slice %370 {offsets = [1, 0], sizes = [8, 64], strides = [1, 1]} : vector<12x64xf32> to vector<8x64xf32>
    %379 = vector.broadcast %377 : vector<1x64xf32> to vector<8x64xf32>
    %380 = arith.mulf %379, %378 : vector<8x64xf32>
    %381 = arith.addf %376, %380 : vector<8x64xf32>
    %382 = vector.extract_strided_slice %339 {offsets = [2, 0], sizes = [1, 64], strides = [1, 1]} : vector<5x64xf32> to vector<1x64xf32>
    %383 = vector.extract_strided_slice %370 {offsets = [2, 0], sizes = [8, 64], strides = [1, 1]} : vector<12x64xf32> to vector<8x64xf32>
    %384 = vector.broadcast %382 : vector<1x64xf32> to vector<8x64xf32>
    %385 = arith.mulf %384, %383 : vector<8x64xf32>
    %386 = arith.addf %381, %385 : vector<8x64xf32>
    %387 = vector.extract_strided_slice %339 {offsets = [3, 0], sizes = [1, 64], strides = [1, 1]} : vector<5x64xf32> to vector<1x64xf32>
    %388 = vector.extract_strided_slice %370 {offsets = [3, 0], sizes = [8, 64], strides = [1, 1]} : vector<12x64xf32> to vector<8x64xf32>
    %389 = vector.broadcast %387 : vector<1x64xf32> to vector<8x64xf32>
    %390 = arith.mulf %389, %388 : vector<8x64xf32>
    %391 = arith.addf %386, %390 : vector<8x64xf32>
    %392 = vector.extract_strided_slice %339 {offsets = [4, 0], sizes = [1, 64], strides = [1, 1]} : vector<5x64xf32> to vector<1x64xf32>
    %393 = vector.extract_strided_slice %370 {offsets = [4, 0], sizes = [8, 64], strides = [1, 1]} : vector<12x64xf32> to vector<8x64xf32>
    %394 = vector.broadcast %392 : vector<1x64xf32> to vector<8x64xf32>
    %395 = arith.mulf %394, %393 : vector<8x64xf32>
    %396 = arith.addf %391, %395 : vector<8x64xf32>
    %397 = tpu.concatenate %368, %396 in 0 : vector<8x64xf32>, vector<8x64xf32> -> vector<16x64xf32>
    %398 = vector.extract_strided_slice %4 {offsets = [13, 0], sizes = [1, 64], strides = [1, 1]} : vector<27x64xf32> to vector<1x64xf32>
    %399 = vector.broadcast %398 : vector<1x64xf32> to vector<16x64xf32>
    %400 = arith.addf %397, %399 : vector<16x64xf32>
    %401 = vector.extract_strided_slice %4 {offsets = [14, 0], sizes = [1, 64], strides = [1, 1]} : vector<27x64xf32> to vector<1x64xf32>
    %402 = vector.broadcast %401 : vector<1x64xf32> to vector<16x64xf32>
    %403 = arith.mulf %400, %402 : vector<16x64xf32>
    %404 = vector.extract_strided_slice %4 {offsets = [15, 0], sizes = [1, 64], strides = [1, 1]} : vector<27x64xf32> to vector<1x64xf32>
    %405 = vector.broadcast %404 : vector<1x64xf32> to vector<16x64xf32>
    %406 = arith.addf %403, %405 : vector<16x64xf32>
    %407 = arith.negf %406 : vector<16x64xf32>
    %408 = math.exp %407 : vector<16x64xf32>
    %cst_85 = arith.constant 1.000000e+00 : f32
    %409 = vector.broadcast %cst_85 : f32 to vector<16x64xf32>
    %410 = arith.addf %409, %408 : vector<16x64xf32>
    %411 = arith.divf %409, %410 : vector<16x64xf32>
    %412 = arith.mulf %406, %411 : vector<16x64xf32>
    %413 = vector.extract_strided_slice %1 {offsets = [0, 384], sizes = [64, 64], strides = [1, 1]} : vector<64x448xbf16> to vector<64x64xbf16>
    %414 = arith.truncf %412 : vector<16x64xf32> to vector<16x64xbf16>
    %cst_86 = arith.constant dense<0.000000e+00> : vector<16x64xf32>
    %415 = tpu.matmul %414, %413, %cst_86 {dimension_numbers = #tpu.dot_dimension_numbers<[1], [0], [0], [1], [0, 0, 1, 1], [], []>} : vector<16x64xbf16>, vector<64x64xbf16>, vector<16x64xf32> -> vector<16x64xf32>
    %416 = arith.addf %299, %415 : vector<16x64xf32>
    %417 = vector.extract_strided_slice %4 {offsets = [16, 0], sizes = [1, 64], strides = [1, 1]} : vector<27x64xf32> to vector<1x64xf32>
    %418 = vector.broadcast %417 : vector<1x64xf32> to vector<16x64xf32>
    %419 = arith.addf %416, %418 : vector<16x64xf32>
    %cst_87 = arith.constant dense<0.000000e+00> : vector<16xf32>
    %420 = vector.multi_reduction <add>, %419, %cst_87 [1] : vector<16x64xf32> to vector<16xf32>
    %421 = vector.shape_cast %420 : vector<16xf32> to vector<16x1xf32>
    %cst_88 = arith.constant 6.400000e+01 : f32
    %422 = vector.broadcast %cst_88 : f32 to vector<16x1xf32>
    %423 = arith.divf %421, %422 : vector<16x1xf32>
    %424 = vector.broadcast %423 : vector<16x1xf32> to vector<16x64xf32>
    %425 = arith.subf %419, %424 : vector<16x64xf32>
    %426 = arith.mulf %425, %425 : vector<16x64xf32>
    %cst_89 = arith.constant dense<0.000000e+00> : vector<16xf32>
    %427 = vector.multi_reduction <add>, %426, %cst_89 [1] : vector<16x64xf32> to vector<16xf32>
    %428 = vector.shape_cast %427 : vector<16xf32> to vector<16x1xf32>
    %cst_90 = arith.constant 6.400000e+01 : f32
    %429 = vector.broadcast %cst_90 : f32 to vector<16x1xf32>
    %430 = arith.divf %428, %429 : vector<16x1xf32>
    %cst_91 = arith.constant 9.99999974E-6 : f32
    %431 = vector.broadcast %cst_91 : f32 to vector<16x1xf32>
    %432 = arith.addf %430, %431 : vector<16x1xf32>
    %433 = math.rsqrt %432 : vector<16x1xf32>
    %434 = vector.broadcast %433 : vector<16x1xf32> to vector<16x64xf32>
    %435 = arith.mulf %425, %434 : vector<16x64xf32>
    %436 = vector.extract_strided_slice %4 {offsets = [17, 0], sizes = [1, 64], strides = [1, 1]} : vector<27x64xf32> to vector<1x64xf32>
    %437 = vector.broadcast %436 : vector<1x64xf32> to vector<16x64xf32>
    %438 = arith.mulf %435, %437 : vector<16x64xf32>
    %439 = vector.extract_strided_slice %4 {offsets = [18, 0], sizes = [1, 64], strides = [1, 1]} : vector<27x64xf32> to vector<1x64xf32>
    %440 = vector.broadcast %439 : vector<1x64xf32> to vector<16x64xf32>
    %441 = arith.addf %438, %440 : vector<16x64xf32>
    %442 = vector.extract_strided_slice %2 {offsets = [0, 128], sizes = [64, 128], strides = [1, 1]} : vector<64x256xbf16> to vector<64x128xbf16>
    %443 = arith.truncf %441 : vector<16x64xf32> to vector<16x64xbf16>
    %cst_92 = arith.constant dense<0.000000e+00> : vector<16x128xf32>
    %444 = tpu.matmul %443, %442, %cst_92 {dimension_numbers = #tpu.dot_dimension_numbers<[1], [0], [0], [1], [0, 0, 1, 1], [], []>} : vector<16x64xbf16>, vector<64x128xbf16>, vector<16x128xf32> -> vector<16x128xf32>
    %445 = vector.extract_strided_slice %5 {offsets = [1, 0], sizes = [1, 128], strides = [1, 1]} : vector<2x128xf32> to vector<1x128xf32>
    %446 = vector.broadcast %445 : vector<1x128xf32> to vector<16x128xf32>
    %447 = arith.addf %444, %446 : vector<16x128xf32>
    %448 = arith.negf %447 : vector<16x128xf32>
    %449 = math.exp %448 : vector<16x128xf32>
    %cst_93 = arith.constant 1.000000e+00 : f32
    %450 = vector.broadcast %cst_93 : f32 to vector<16x128xf32>
    %451 = arith.addf %450, %449 : vector<16x128xf32>
    %452 = arith.divf %450, %451 : vector<16x128xf32>
    %453 = arith.mulf %447, %452 : vector<16x128xf32>
    %454 = vector.extract_strided_slice %3 {offsets = [0, 64], sizes = [128, 64], strides = [1, 1]} : vector<128x128xbf16> to vector<128x64xbf16>
    %455 = arith.truncf %453 : vector<16x128xf32> to vector<16x128xbf16>
    %cst_94 = arith.constant dense<0.000000e+00> : vector<16x64xf32>
    %456 = tpu.matmul %455, %454, %cst_94 {dimension_numbers = #tpu.dot_dimension_numbers<[1], [0], [0], [1], [0, 0, 1, 1], [], []>} : vector<16x128xbf16>, vector<128x64xbf16>, vector<16x64xf32> -> vector<16x64xf32>
    %457 = vector.extract_strided_slice %4 {offsets = [19, 0], sizes = [1, 64], strides = [1, 1]} : vector<27x64xf32> to vector<1x64xf32>
    %458 = vector.broadcast %457 : vector<1x64xf32> to vector<16x64xf32>
    %459 = arith.addf %456, %458 : vector<16x64xf32>
    %cst_95 = arith.constant 5.000000e-01 : f32
    %460 = vector.broadcast %cst_95 : f32 to vector<16x64xf32>
    %461 = arith.mulf %460, %459 : vector<16x64xf32>
    %462 = arith.addf %419, %461 : vector<16x64xf32>
    %cst_96 = arith.constant dense<0.000000e+00> : vector<16xf32>
    %463 = vector.multi_reduction <add>, %462, %cst_96 [1] : vector<16x64xf32> to vector<16xf32>
    %464 = vector.shape_cast %463 : vector<16xf32> to vector<16x1xf32>
    %cst_97 = arith.constant 6.400000e+01 : f32
    %465 = vector.broadcast %cst_97 : f32 to vector<16x1xf32>
    %466 = arith.divf %464, %465 : vector<16x1xf32>
    %467 = vector.broadcast %466 : vector<16x1xf32> to vector<16x64xf32>
    %468 = arith.subf %462, %467 : vector<16x64xf32>
    %469 = arith.mulf %468, %468 : vector<16x64xf32>
    %cst_98 = arith.constant dense<0.000000e+00> : vector<16xf32>
    %470 = vector.multi_reduction <add>, %469, %cst_98 [1] : vector<16x64xf32> to vector<16xf32>
    %471 = vector.shape_cast %470 : vector<16xf32> to vector<16x1xf32>
    %cst_99 = arith.constant 6.400000e+01 : f32
    %472 = vector.broadcast %cst_99 : f32 to vector<16x1xf32>
    %473 = arith.divf %471, %472 : vector<16x1xf32>
    %cst_100 = arith.constant 9.99999974E-6 : f32
    %474 = vector.broadcast %cst_100 : f32 to vector<16x1xf32>
    %475 = arith.addf %473, %474 : vector<16x1xf32>
    %476 = math.rsqrt %475 : vector<16x1xf32>
    %477 = vector.broadcast %476 : vector<16x1xf32> to vector<16x64xf32>
    %478 = arith.mulf %468, %477 : vector<16x64xf32>
    %479 = vector.extract_strided_slice %4 {offsets = [20, 0], sizes = [1, 64], strides = [1, 1]} : vector<27x64xf32> to vector<1x64xf32>
    %480 = vector.broadcast %479 : vector<1x64xf32> to vector<16x64xf32>
    %481 = arith.mulf %478, %480 : vector<16x64xf32>
    %482 = vector.extract_strided_slice %4 {offsets = [21, 0], sizes = [1, 64], strides = [1, 1]} : vector<27x64xf32> to vector<1x64xf32>
    %483 = vector.broadcast %482 : vector<1x64xf32> to vector<16x64xf32>
    %484 = arith.addf %481, %483 : vector<16x64xf32>
    %c0_101 = arith.constant 0 : index
    %c0_102 = arith.constant 0 : index
    %485 = vector.load %arg6[%c0_101, %c0_102] : memref<16x64xf32, #tpu.memory_space<vmem>>, vector<16x64xf32>
    tpu.vector_store %arg6[%c0_101, %c0_102], %484 {strides = array<i32>} : memref<16x64xf32, #tpu.memory_space<vmem>>, vector<16x64xf32>,
    return
  }
}

</mosaic_0001>

<bundles_post_ra>
// kernel: _lambda_.9
= control target key start
LH: loop header
LB: loop body
LE: loop exit
PB: predicated region body
PF: predicated region fallthrough
CT: control target
= control target key end

     0   :  { %v218_v1 = vmov 0   ;;  %v36_v20 = vlaneseq  ;;  %s308_s1 = inlined_call_operand.vmem [shape: bf16[128,256], index: 1, kind: input, shape index: {}]   ;;  %s309_s0 = inlined_call_operand.vmem [shape: f32[16,128], index: 0, kind: input, shape index: {}]   ;;  %s310_s2 = inlined_call_operand.vmem [shape: f32[1,256], index: 2, kind: input, shape index: {}]   ;;  %s311_s3 = inlined_call_operand.vmem [shape: f32[16,256], index: 3, kind: output, shape index: {}]  }
   0x1   :  { %v194_v0 = vld [vmem:[%s308_s1 + $0x74] ss:$8 sps:$4 sm:$0xff]   ;;  %158 = vmatprep.mubr.bf16.mxu0 %v218_v1  ;;  %v196_v2 = vld [vmem:[%s308_s1 + $0x70] ss:$8 sps:$4 sm:$0xff]   ;;  %v197_v3 = vld [vmem:[%s308_s1 + $0x64] ss:$8 sps:$4 sm:$0xff]  }
   0x2   :  { %126 = vmatprep.subr.bf16.mxu0 %v194_v0  ;;  %v199_v4 = vld [vmem:[%s308_s1 + $0x60] ss:$8 sps:$4 sm:$0xff]   ;;  %v200_v5 = vld [vmem:[%s308_s1 + $0x54] ss:$8 sps:$4 sm:$0xff]   ;;  %v202_v6 = vld [vmem:[%s308_s1 + $0x50] ss:$8 sps:$4 sm:$0xff]  }
   0x3   :  { %127 = vmatpush1.bf16.msra.mxu0 %v196_v2  ;;  %v203_v7 = vld [vmem:[%s308_s1 + $0x44] ss:$8 sps:$4 sm:$0xff]   ;;  %v205_v8 = vld [vmem:[%s308_s1 + $0x40] ss:$8 sps:$4 sm:$0xff]   ;;  %v206_v9 = vld [vmem:[%s308_s1 + $0x34] ss:$8 sps:$4 sm:$0xff]  }
   0x4   :  { %128 = vmatprep.subr.bf16.mxu0 %v197_v3  ;;  %v208_v10 = vld [vmem:[%s308_s1 + $0x30] ss:$8 sps:$4 sm:$0xff]   ;;  %v209_v11 = vld [vmem:[%s308_s1 + $0x24] ss:$8 sps:$4 sm:$0xff]   ;;  %v211_v12 = vld [vmem:[%s308_s1 + $0x20] ss:$8 sps:$4 sm:$0xff]  }
   0x5   :  { %v212_v13 = vld [vmem:[%s308_s1 + $0x14] ss:$8 sps:$4 sm:$0xff]   ;;  %v214_v14 = vld [vmem:[%s308_s1 + $0x10] ss:$8 sps:$4 sm:$0xff]   ;;  %v215_v15 = vld [vmem:[%s308_s1 + $0x4] ss:$8 sps:$4 sm:$0xff]  }
   0x6   :  { %v217_v16 = vld [vmem:[%s308_s1] ss:$8 sps:$4 sm:$0xff]   ;;  %v37_v21 = vshrl.u32 %v36_v20, 7 }
   0x7   :  { %129 = vmatpush1.bf16.msra.mxu0 %v199_v4  ;;  %v15_v17 = vld [vmem:[%s309_s0] sm:$0xff]  ;;  %v16_v18 = vld [vmem:[%s309_s0 + $0x8] sm:$0xff] }
   0x8   :  { %130 = vmatprep.subr.bf16.mxu0 %v200_v5  ;;  %v17_v19 = vpack.c.bf16 %v16_v18, %v15_v17  ;;  %v38_v22 = vsub.s32 0, %v37_v21  ;;  %v34_v23 = vld [vmem:[%s310_s2] sm:$0x3]  ;;  %v42_v24 = vsub.s32 1, %v37_v21 }
   0xa   :  { %v39_v25 = vrot.slane %v34_v23, %v38_v22  ;;  %v43_v26 = vrot.slane %v34_v23, %v42_v24 }
   0xb   :  { %131 = vmatpush1.bf16.msra.mxu0 %v202_v6 }
   0xc   :  { %132 = vmatprep.subr.bf16.mxu0 %v203_v7 }
   0xf   :  { %133 = vmatpush1.bf16.msra.mxu0 %v205_v8 }
  0x10   :  { %134 = vmatprep.subr.bf16.mxu0 %v206_v9 }
  0x13   :  { %135 = vmatpush1.bf16.msra.mxu0 %v208_v10 }
  0x14   :  { %136 = vmatprep.subr.bf16.mxu0 %v209_v11 }
  0x17   :  { %137 = vmatpush1.bf16.msra.mxu0 %v211_v12 }
  0x18   :  { %138 = vmatprep.subr.bf16.mxu0 %v212_v13 }
  0x1b   :  { %139 = vmatpush1.bf16.msra.mxu0 %v214_v14 }
  0x1c   :  { %140 = vmatprep.subr.bf16.mxu0 %v215_v15 }
  0x1f   :  { %141 = vmatpush1.bf16.msra.mxu0 %v217_v16 }
  0x22   :  { %159 = vmatmul.mubr.bf16.vlgmr.msra.gmra.mxu0 %v17_v19 }
  0xe2   :  { %v160_v27 = vpop.f32.mrf.mxu0 }
  0xe3   :  { %v161_v28 = vadd.f32 %v160_v27, %v39_v25 }
  0xe4   :  { %v162_v29 = vpop.f32.mrf.mxu0 }
  0xe5   :  { %169 = vst [vmem:[%s311_s3] sm:$0xff] %v161_v28  ;;  %v163_v30 = vadd.f32 %v162_v29, %v43_v26 }
  0xe6   :  { %v164_v31 = vpop.f32.mrf.mxu0 }
  0xe7   :  { %170 = vst [vmem:[%s311_s3 + $0x8] sm:$0xff] %v163_v30  ;;  %v165_v32 = vadd.f32 %v164_v31, %v39_v25 }
  0xe8   :  { %v166_v33 = vpop.f32.mrf.mxu0 }
  0xe9   :  { %171 = vst [vmem:[%s311_s3 + $0x10] sm:$0xff] %v165_v32  ;;  %v167_v34 = vadd.f32 %v166_v33, %v43_v26 }
  0xeb   :  { %172 = vst [vmem:[%s311_s3 + $0x18] sm:$0xff] %v167_v34 }

// kernel: _lambda_.8
= control target key start
LH: loop header
LB: loop body
LE: loop exit
PB: predicated region body
PF: predicated region fallthrough
CT: control target
= control target key end

     0   :  { %v1496_v3 = vmov 0.0   ;;  %vm1497_vm0 = vmmov 0   ;;  %s1498_s24 = smov 127   ;;  %v1500_v11 = vmov 0   ;;  %s1501_s25 = smov 110   ;;  %vm44_vm1 = vcmask 1039360   ;;  %s1748_s0 = inlined_call_operand.vmem [shape: f32[16,384], index: 0, kind: input, shape index: {}]   ;;  %s1749_s1 = inlined_call_operand.vmem [shape: bf16[9,16,16], index: 1, kind: input, shape index: {}]   ;;  %s1750_s2 = inlined_call_operand.vmem [shape: f32[16,1], index: 2, kind: input, shape index: {}]   ;;  %s1751_s3 = inlined_call_operand.vmem [shape: f32[16,384], index: 3, kind: output, shape index: {}]  }
   0x1   :  { %v1530_v0 = vld [vmem:[%s1748_s0 + $0x8] sm:$0xff]  ;;  %v1535_v1 = vld [vmem:[%s1748_s0 + $0x10] sm:$0xff]  ;;  %v1540_v2 = vld [vmem:[%s1748_s0] sm:$0xff]  ;;  %1300 = vmatprep.subr.bf16.mxu1 %v1496_v3  ;;  %1302 = vmatprep.mubr.msk.bf16.mxu1 %vm1497_vm0, %v1496_v3  ;;  %s1502_s26 = smov 109   ;;  %s1503_s27 = smov 108   ;;  %vm262_vm2 = vcmask 1031168  }
   0x2   :  { %v1365_v4 = vpack.i.bf16 %v1535_v1, %v1530_v0  ;;  %v1548_v5 = vld [vmem:[%s1748_s0 + $0x18] sm:$0xff]  ;;  %v1553_v6 = vld [vmem:[%s1748_s0 + $0x20] sm:$0xff]  ;;  %v1558_v7 = vld [vmem:[%s1748_s0 + $0x28] sm:$0xff]  ;;  %s1499_s0 = smov 126   ;;  %106 = vmatprep.mubr.bf16.mxu0 %v1500_v11  ;;  %1485 = vset.pattern.permute.xlu0 %v1500_v11  ;;  %s1504_s28 = smov 92   ;;  %vm70_vm3 = vcmask 130048  }
   0x3   :  { %v1375_v8 = vpack.i.bf16 %v1548_v5, %v1540_v2  ;;  %v1370_v9 = vpack.i.bf16 %v1558_v7, %v1553_v6  ;;  %v24_v10 = vpack.c.bf16 %v1553_v6, %v1530_v0  ;;  %v23_v12 = vpack.c.bf16 %v1548_v5, %v1540_v2  ;;  %1486 = vset.pattern.permute.xlu1 %v1500_v11  ;;  %s1505_s29 = smov 91   ;;  %s1506_s30 = smov 90   ;;  %v1167_v14 = vld [vmem:[%s1750_s2] sm:$0xff]  ;;  %v1168_v15 = vld [vmem:[%s1750_s2 + $0x8] sm:$0xff] }
   0x4   :  { %1366 = vrot.lane.b32.xlu0 %v1365_v4, %s1498_s24  ;;  %v25_v13 = vpack.c.bf16 %v1558_v7, %v1535_v1  ;;  %v1487_v41 = vld [vmem:[%s1749_s1 + $0x8] sm:$0xff]   ;;  %vm393_vm4 = vcmask 900096   ;;  %v1488_v58 = vld [vmem:[%s1749_s1] sm:$0xff]   ;;  %vm524_vm5 = vcmask 891904   ;;  %vm655_vm6 = vcmask 883712  }
   0x5   :  { %1376 = vrot.lane.b32.xlu1 %v1375_v8, %s1498_s24  ;;  %vm786_vm7 = vcmask 752640   ;;  %vm917_vm8 = vcmask 744448   ;;  %vm1048_vm9 = vcmask 736256  }
   0x8   :  { %1371 = vrot.lane.b32.xlu0 %v1370_v9, %s1498_s24 }
   0x9   :  { %1381 = vrot.lane.b32.xlu1 %v1365_v4, %s1499_s0 }
   0xc   :  { %1386 = vrot.lane.b32.xlu0 %v1370_v9, %s1499_s0 }
   0xd   :  { %1391 = vrot.lane.b32.xlu1 %v1375_v8, %s1499_s0 }
  0x10   :  { %1396 = vrot.lane.b32.xlu0 %v1365_v4, %s1501_s25 }
  0x11   :  { %1401 = vrot.lane.b32.xlu1 %v1370_v9, %s1501_s25 }
  0x14   :  { %1406 = vrot.lane.b32.xlu0 %v1375_v8, %s1501_s25 }
  0x15   :  { %1411 = vrot.lane.b32.xlu1 %v1365_v4, %s1502_s26 }
  0x18   :  { %1416 = vrot.lane.b32.xlu0 %v1370_v9, %s1502_s26 }
  0x19   :  { %1421 = vrot.lane.b32.xlu1 %v1375_v8, %s1502_s26 }
  0x1c   :  { %1426 = vrot.lane.b32.xlu0 %v1365_v4, %s1503_s27 }
  0x1d   :  { %1431 = vrot.lane.b32.xlu1 %v1370_v9, %s1503_s27 }
  0x20   :  { %1436 = vrot.lane.b32.xlu0 %v1375_v8, %s1503_s27 }
  0x21   :  { %1441 = vrot.lane.b32.xlu1 %v1365_v4, %s1504_s28 }
  0x24   :  { %1446 = vrot.lane.b32.xlu0 %v1370_v9, %s1504_s28 }
  0x25   :  { %1451 = vrot.lane.b32.xlu1 %v1375_v8, %s1504_s28 }
  0x28   :  { %1456 = vrot.lane.b32.xlu0 %v1365_v4, %s1505_s29 }
  0x29   :  { %1461 = vrot.lane.b32.xlu1 %v1370_v9, %s1505_s29 }
  0x2c   :  { %1466 = vrot.lane.b32.xlu0 %v1375_v8, %s1505_s29 }
  0x2d   :  { %1471 = vrot.lane.b32.xlu1 %v1365_v4, %s1506_s30 }
  0x30   :  { %1476 = vrot.lane.b32.xlu0 %v1370_v9, %s1506_s30 }
  0x31   :  { %1481 = vrot.lane.b32.xlu1 %v1375_v8, %s1506_s30 }
  0x34   :  { %1171 = vperm.xlu0 %1485, %v1167_v14  }
  0x35   :  { %1176 = vperm.xlu1 %1486, %v1168_v15  }
  0x76   :  { %v1367_v16 = vpop.permute.xlu0 %1366 }
  0x77   :  { %v1377_v17 = vpop.permute.xlu1 %1376  ;;  %v1369_v18 = vunpack.i.h.bf16 %v1367_v16  ;;  %v1368_v19 = vunpack.i.l.bf16 %v1367_v16  ;;  %v1489_v16 = vld [vmem:[%s1749_s1 + $0x10] sm:$0xff]  }
  0x78   :  { %v1378_v20 = vunpack.i.l.bf16 %v1377_v17  ;;  %v1379_v21 = vunpack.i.h.bf16 %v1377_v17 }
  0x79   :  { %v46_v27 = vsel %vm44_vm1, %v1368_v19, %v1369_v18 }
  0x7a   :  { %v1372_v22 = vpop.permute.xlu0 %1371  ;;  %v57_v28 = vsel %vm44_vm1, %v1369_v18, %v1378_v20  ;;  %v45_v29 = vsel %vm44_vm1, %v1378_v20, %v1368_v19 }
  0x7b   :  { %v1374_v23 = vunpack.i.h.bf16 %v1372_v22  ;;  %v1373_v24 = vunpack.i.l.bf16 %v1372_v22  ;;  %v1382_v25 = vpop.permute.xlu1 %1381 }
  0x7c   :  { %v1384_v26 = vunpack.i.h.bf16 %v1382_v25  ;;  %v1383_v30 = vunpack.i.l.bf16 %v1382_v25 }
  0x7d   :  { %v48_v31 = vsel %vm44_vm1, %v1373_v24, %v1374_v23  ;;  %v58_v32 = vsel %vm44_vm1, %v1374_v23, %v1379_v21  ;;  %v47_v33 = vsel %vm44_vm1, %v1379_v21, %v1373_v24 }
  0x7e   :  { %v63_v34 = vpack.c.bf16 %v48_v31, %v46_v27  ;;  %v64_v35 = vpack.c.bf16 %v58_v32, %v57_v28  ;;  %v62_v36 = vpack.c.bf16 %v47_v33, %v45_v29  ;;  %v1387_v37 = vpop.permute.xlu0 %1386  ;;  %v264_v44 = vsel %vm262_vm2, %v1383_v30, %v1384_v26 }
  0x7f   :  { %v1389_v38 = vunpack.i.h.bf16 %v1387_v37  ;;  %v1388_v39 = vunpack.i.l.bf16 %v1387_v37  ;;  %v1392_v40 = vpop.permute.xlu1 %1391 }
  0x80   :  { %88 = vmatprep.subr.bf16.mxu0 %v63_v34  ;;  %1301 = vmatpush3.bf16.msra.mxu1 %v64_v35  ;;  %v1394_v42 = vunpack.i.h.bf16 %v1392_v40  ;;  %v1393_v43 = vunpack.i.l.bf16 %v1392_v40  ;;  %v1490_v35 = vld [vmem:[%s1749_s1 + $0x18] sm:$0xff]  }
  0x81   :  { %89 = vmatpush1.bf16.msra.mxu0 %v62_v36  ;;  %1306 = vmatprep.subr.bf16.mxu1 %v1496_v3  ;;  %v266_v45 = vsel %vm262_vm2, %v1388_v39, %v1389_v38 }
  0x82   :  { %180 = vmatprep.subr.bf16.mxu0 %v24_v10  ;;  %v1397_v46 = vpop.permute.xlu0 %1396  ;;  %v281_v50 = vpack.c.bf16 %v266_v45, %v264_v44  ;;  %v276_v53 = vsel %vm262_vm2, %v1389_v38, %v1394_v42  ;;  %v275_v54 = vsel %vm262_vm2, %v1384_v26, %v1393_v43  ;;  %v265_v55 = vsel %vm262_vm2, %v1394_v42, %v1388_v39 }
  0x83   :  { %1303 = vmatmul.mubr.msk.bf16.vlgmr.msra.gmra.mxu1 %vm70_vm3, %v1487_v41  ;;  %v1399_v47 = vunpack.i.h.bf16 %v1397_v46  ;;  %v1398_v48 = vunpack.i.l.bf16 %v1397_v46  ;;  %v1402_v49 = vpop.permute.xlu1 %1401  ;;  %v263_v56 = vsel %vm262_vm2, %v1393_v43, %v1383_v30  ;;  %v282_v62 = vpack.c.bf16 %v276_v53, %v275_v54  ;;  %v1491_v54 = vld [vmem:[%s1749_s1 + $0x20] sm:$0xff]  }
  0x84   :  { %1242 = vmatmul.mubr.msk.bf16.vlgmr.msra.gmra.mxu0 %vm70_vm3, %v1487_v41  ;;  %1307 = vmatpush3.bf16.msra.mxu1 %v25_v13  ;;  %v1404_v51 = vunpack.i.h.bf16 %v1402_v49  ;;  %v1403_v52 = vunpack.i.l.bf16 %v1402_v49  ;;  %v280_v63 = vpack.c.bf16 %v265_v55, %v263_v56 }
  0x85   :  { %181 = vmatpush1.bf16.msra.mxu0 %v23_v12  ;;  %1308 = vmatprep.mubr.msk.bf16.mxu1 %vm1497_vm0, %v1496_v3  ;;  %v395_v60 = vsel %vm393_vm4, %v1398_v48, %v1399_v47 }
  0x86   :  { %305 = vmatprep.subr.bf16.mxu0 %v281_v50  ;;  %1312 = vmatprep.subr.bf16.mxu1 %v1496_v3  ;;  %v1407_v57 = vpop.permute.xlu0 %1406  ;;  %v397_v61 = vsel %vm393_vm4, %v1403_v52, %v1404_v51 }
  0x87   :  { %198 = vmatprep.mubr.bf16.mxu0 %v1500_v11  ;;  %v1412_v59 = vpop.permute.xlu1 %1411  ;;  %v1409_v0 = vunpack.i.h.bf16 %v1407_v57  ;;  %v1408_v1 = vunpack.i.l.bf16 %v1407_v57  ;;  %v412_v2 = vpack.c.bf16 %v397_v61, %v395_v60 }
  0x88   :  { %v1414_v5 = vunpack.i.h.bf16 %v1412_v59  ;;  %v1413_v6 = vunpack.i.l.bf16 %v1412_v59 }
  0x89   :  { %v406_v10 = vsel %vm393_vm4, %v1399_v47, %v1408_v1  ;;  %v407_v12 = vsel %vm393_vm4, %v1404_v51, %v1409_v0  ;;  %v394_v13 = vsel %vm393_vm4, %v1408_v1, %v1398_v48  ;;  %v396_v14 = vsel %vm393_vm4, %v1409_v0, %v1403_v52 }
  0x8a   :  { %v1417_v4 = vpop.permute.xlu0 %1416  ;;  %v526_v17 = vsel %vm524_vm5, %v1413_v6, %v1414_v5  ;;  %v413_v19 = vpack.c.bf16 %v407_v12, %v406_v10  ;;  %v411_v21 = vpack.c.bf16 %v396_v14, %v394_v13 }
  0x8b   :  { %1309 = vmatmul.mubr.msk.bf16.vlgmr.msra.gmra.mxu1 %vm70_vm3, %v1488_v58  ;;  %v1419_v7 = vunpack.i.h.bf16 %v1417_v4  ;;  %v1418_v8 = vunpack.i.l.bf16 %v1417_v4  ;;  %v1422_v9 = vpop.permute.xlu1 %1421 }
  0x8c   :  { %1313 = vmatpush3.bf16.msra.mxu1 %v282_v62  ;;  %1245 = vmatmul.mubr.msk.bf16.vlgmr.msra.gmra.mxu0 %vm70_vm3, %v1488_v58  ;;  %v1424_v22 = vunpack.i.h.bf16 %v1422_v9  ;;  %v1423_v23 = vunpack.i.l.bf16 %v1422_v9  ;;  %v1492_v9 = vld [vmem:[%s1749_s1 + $0x28] sm:$0xff]  }
  0x8d   :  { %306 = vmatpush1.bf16.msra.mxu0 %v280_v63  ;;  %1314 = vmatprep.mubr.msk.bf16.mxu1 %vm1497_vm0, %v1496_v3  ;;  %v528_v18 = vsel %vm524_vm5, %v1418_v8, %v1419_v7 }
  0x8e   :  { %436 = vmatprep.subr.bf16.mxu0 %v412_v2  ;;  %1318 = vmatprep.subr.bf16.mxu1 %v1496_v3  ;;  %v1427_v15 = vpop.permute.xlu0 %1426  ;;  %v543_v24 = vpack.c.bf16 %v528_v18, %v526_v17  ;;  %v538_v30 = vsel %vm524_vm5, %v1419_v7, %v1424_v22  ;;  %v537_v31 = vsel %vm524_vm5, %v1414_v5, %v1423_v23 }
  0x8f   :  { %323 = vmatprep.mubr.bf16.mxu0 %v1500_v11  ;;  %v1432_v20 = vpop.permute.xlu1 %1431  ;;  %v1429_v25 = vunpack.i.h.bf16 %v1427_v15  ;;  %v1428_v26 = vunpack.i.l.bf16 %v1427_v15  ;;  %v527_v32 = vsel %vm524_vm5, %v1424_v22, %v1418_v8  ;;  %v525_v33 = vsel %vm524_vm5, %v1423_v23, %v1413_v6 }
  0x90   :  { %v1434_v27 = vunpack.i.h.bf16 %v1432_v20  ;;  %v1433_v28 = vunpack.i.l.bf16 %v1432_v20  ;;  %v544_v38 = vpack.c.bf16 %v538_v30, %v537_v31  ;;  %v542_v40 = vpack.c.bf16 %v527_v32, %v525_v33 }
  0x91   :  { %v657_v36 = vsel %vm655_vm6, %v1428_v26, %v1429_v25 }
  0x92   :  { %v1437_v29 = vpop.permute.xlu0 %1436  ;;  %v659_v37 = vsel %vm655_vm6, %v1433_v28, %v1434_v27 }
  0x93   :  { %1315 = vmatmul.mubr.msk.bf16.vlgmr.msra.gmra.mxu1 %vm70_vm3, %v1489_v16  ;;  %v1442_v34 = vpop.permute.xlu1 %1441  ;;  %v1439_v41 = vunpack.i.h.bf16 %v1437_v29  ;;  %v1438_v42 = vunpack.i.l.bf16 %v1437_v29  ;;  %v674_v43 = vpack.c.bf16 %v659_v37, %v657_v36  ;;  %v1493_v29 = vld [vmem:[%s1749_s1 + $0x30] sm:$0xff]  }
  0x94   :  { %1319 = vmatpush3.bf16.msra.mxu1 %v413_v19  ;;  %1250 = vmatmul.mubr.msk.bf16.vlgmr.msra.gmra.mxu0 %vm70_vm3, %v1489_v16  ;;  %v1444_v44 = vunpack.i.h.bf16 %v1442_v34  ;;  %v1443_v45 = vunpack.i.l.bf16 %v1442_v34 }
  0x95   :  { %437 = vmatpush1.bf16.msra.mxu0 %v411_v21  ;;  %1320 = vmatprep.mubr.msk.bf16.mxu1 %vm1497_vm0, %v1496_v3  ;;  %v668_v49 = vsel %vm655_vm6, %v1429_v25, %v1438_v42  ;;  %v669_v50 = vsel %vm655_vm6, %v1434_v27, %v1439_v41  ;;  %v656_v51 = vsel %vm655_vm6, %v1438_v42, %v1428_v26 }
  0x96   :  { %567 = vmatprep.subr.bf16.mxu0 %v543_v24  ;;  %1324 = vmatprep.subr.bf16.mxu1 %v1496_v3  ;;  %v1447_v39 = vpop.permute.xlu0 %1446  ;;  %v658_v52 = vsel %vm655_vm6, %v1439_v41, %v1433_v28  ;;  %v788_v55 = vsel %vm786_vm7, %v1443_v45, %v1444_v44  ;;  %v675_v57 = vpack.c.bf16 %v669_v50, %v668_v49  ;;  %v1494_v41 = vld [vmem:[%s1749_s1 + $0x38] sm:$0xff]  }
  0x97   :  { %454 = vmatprep.mubr.bf16.mxu0 %v1500_v11  ;;  %v1449_v46 = vunpack.i.h.bf16 %v1447_v39  ;;  %v1448_v47 = vunpack.i.l.bf16 %v1447_v39  ;;  %v1452_v48 = vpop.permute.xlu1 %1451  ;;  %v673_v59 = vpack.c.bf16 %v658_v52, %v656_v51 }
  0x98   :  { %v1454_v60 = vunpack.i.h.bf16 %v1452_v48  ;;  %v1453_v61 = vunpack.i.l.bf16 %v1452_v48 }
  0x99   :  { %v790_v56 = vsel %vm786_vm7, %v1448_v47, %v1449_v46 }
  0x9a   :  { %v1457_v53 = vpop.permute.xlu0 %1456  ;;  %v805_v62 = vpack.c.bf16 %v790_v56, %v788_v55  ;;  %v800_v5 = vsel %vm786_vm7, %v1449_v46, %v1454_v60  ;;  %v799_v6 = vsel %vm786_vm7, %v1444_v44, %v1453_v61  ;;  %v789_v7 = vsel %vm786_vm7, %v1454_v60, %v1448_v47  ;;  %v1495_v44 = vld [vmem:[%s1749_s1 + $0x40] sm:$0xff]  }
  0x9b   :  { %1321 = vmatmul.mubr.msk.bf16.vlgmr.msra.gmra.mxu1 %vm70_vm3, %v1490_v35  ;;  %v1462_v58 = vpop.permute.xlu1 %1461  ;;  %v1459_v63 = vunpack.i.h.bf16 %v1457_v53  ;;  %v1458_v0 = vunpack.i.l.bf16 %v1457_v53  ;;  %v787_v8 = vsel %vm786_vm7, %v1453_v61, %v1443_v45  ;;  %v806_v13 = vpack.c.bf16 %v800_v5, %v799_v6 }
  0x9c   :  { %1325 = vmatpush3.bf16.msra.mxu1 %v544_v38  ;;  %1255 = vmatmul.mubr.msk.bf16.vlgmr.msra.gmra.mxu0 %vm70_vm3, %v1490_v35  ;;  %v1464_v1 = vunpack.i.h.bf16 %v1462_v58  ;;  %v1463_v2 = vunpack.i.l.bf16 %v1462_v58  ;;  %v804_v16 = vpack.c.bf16 %v789_v7, %v787_v8 }
  0x9d   :  { %568 = vmatpush1.bf16.msra.mxu0 %v542_v40  ;;  %1326 = vmatprep.mubr.msk.bf16.mxu1 %vm1497_vm0, %v1496_v3  ;;  %v919_v10 = vsel %vm917_vm8, %v1458_v0, %v1459_v63 }
  0x9e   :  { %698 = vmatprep.subr.bf16.mxu0 %v674_v43  ;;  %1330 = vmatprep.subr.bf16.mxu1 %v1496_v3  ;;  %v1467_v4 = vpop.permute.xlu0 %1466  ;;  %v921_v12 = vsel %vm917_vm8, %v1463_v2, %v1464_v1 }
  0x9f   :  { %585 = vmatprep.mubr.bf16.mxu0 %v1500_v11  ;;  %v1472_v14 = vpop.permute.xlu1 %1471  ;;  %v1469_v17 = vunpack.i.h.bf16 %v1467_v4  ;;  %v1468_v18 = vunpack.i.l.bf16 %v1467_v4  ;;  %v936_v19 = vpack.c.bf16 %v921_v12, %v919_v10 }
  0xa0   :  { %v1474_v20 = vunpack.i.h.bf16 %v1472_v14  ;;  %v1473_v21 = vunpack.i.l.bf16 %v1472_v14 }
  0xa1   :  { %v930_v24 = vsel %vm917_vm8, %v1459_v63, %v1468_v18  ;;  %v931_v25 = vsel %vm917_vm8, %v1464_v1, %v1469_v17  ;;  %v918_v26 = vsel %vm917_vm8, %v1468_v18, %v1458_v0  ;;  %v920_v27 = vsel %vm917_vm8, %v1469_v17, %v1463_v2 }
  0xa2   :  { %v1477_v15 = vpop.permute.xlu0 %1476  ;;  %v1050_v30 = vsel %vm1048_vm9, %v1473_v21, %v1474_v20  ;;  %v937_v32 = vpack.c.bf16 %v931_v25, %v930_v24  ;;  %v935_v33 = vpack.c.bf16 %v920_v27, %v918_v26 }
  0xa3   :  { %1327 = vmatmul.mubr.msk.bf16.vlgmr.msra.gmra.mxu1 %vm70_vm3, %v1491_v54  ;;  %v1479_v22 = vunpack.i.h.bf16 %v1477_v15  ;;  %v1478_v23 = vunpack.i.l.bf16 %v1477_v15  ;;  %v1482_v28 = vpop.permute.xlu1 %1481 }
  0xa4   :  { %1331 = vmatpush3.bf16.msra.mxu1 %v675_v57  ;;  %1260 = vmatmul.mubr.msk.bf16.vlgmr.msra.gmra.mxu0 %vm70_vm3, %v1491_v54  ;;  %v1484_v34 = vunpack.i.h.bf16 %v1482_v28  ;;  %v1483_v35 = vunpack.i.l.bf16 %v1482_v28 }
  0xa5   :  { %699 = vmatpush1.bf16.msra.mxu0 %v673_v59  ;;  %1332 = vmatprep.mubr.msk.bf16.mxu1 %vm1497_vm0, %v1496_v3  ;;  %v1052_v31 = vsel %vm1048_vm9, %v1478_v23, %v1479_v22 }
  0xa6   :  { %829 = vmatprep.subr.bf16.mxu0 %v805_v62  ;;  %1336 = vmatprep.subr.bf16.mxu1 %v1496_v3  ;;  %v1067_v36 = vpack.c.bf16 %v1052_v31, %v1050_v30  ;;  %v1062_v37 = vsel %vm1048_vm9, %v1479_v22, %v1484_v34  ;;  %v1061_v38 = vsel %vm1048_vm9, %v1474_v20, %v1483_v35 }
  0xa7   :  { %716 = vmatprep.mubr.bf16.mxu0 %v1500_v11  ;;  %v1051_v39 = vsel %vm1048_vm9, %v1484_v34, %v1478_v23  ;;  %v1049_v40 = vsel %vm1048_vm9, %v1483_v35, %v1473_v21  ;;  %v1068_v42 = vpack.c.bf16 %v1062_v37, %v1061_v38 }
  0xa8   :  { %v1066_v43 = vpack.c.bf16 %v1051_v39, %v1049_v40 }
  0xab   :  { %1333 = vmatmul.mubr.msk.bf16.vlgmr.msra.gmra.mxu1 %vm70_vm3, %v1492_v9 }
  0xac   :  { %1337 = vmatpush3.bf16.msra.mxu1 %v806_v13  ;;  %1265 = vmatmul.mubr.msk.bf16.vlgmr.msra.gmra.mxu0 %vm70_vm3, %v1492_v9 }
  0xad   :  { %830 = vmatpush1.bf16.msra.mxu0 %v804_v16  ;;  %1338 = vmatprep.mubr.msk.bf16.mxu1 %vm1497_vm0, %v1496_v3 }
  0xae   :  { %960 = vmatprep.subr.bf16.mxu0 %v936_v19  ;;  %1342 = vmatprep.subr.bf16.mxu1 %v1496_v3 }
  0xaf   :  { %847 = vmatprep.mubr.bf16.mxu0 %v1500_v11 }
  0xb3   :  { %1339 = vmatmul.mubr.msk.bf16.vlgmr.msra.gmra.mxu1 %vm70_vm3, %v1493_v29 }
  0xb4   :  { %1343 = vmatpush3.bf16.msra.mxu1 %v937_v32  ;;  %1270 = vmatmul.mubr.msk.bf16.vlgmr.msra.gmra.mxu0 %vm70_vm3, %v1493_v29 }
  0xb5   :  { %961 = vmatpush1.bf16.msra.mxu0 %v935_v33  ;;  %1344 = vmatprep.mubr.msk.bf16.mxu1 %vm1497_vm0, %v1496_v3 }
  0xb6   :  { %1091 = vmatprep.subr.bf16.mxu0 %v1067_v36  ;;  %1348 = vmatprep.subr.bf16.mxu1 %v1496_v3 }
  0xb7   :  { %978 = vmatprep.mubr.bf16.mxu0 %v1500_v11 }
  0xbb   :  { %1345 = vmatmul.mubr.msk.bf16.vlgmr.msra.gmra.mxu1 %vm70_vm3, %v1494_v41 }
  0xbc   :  { %1349 = vmatpush3.bf16.msra.mxu1 %v1068_v42  ;;  %1275 = vmatmul.mubr.msk.bf16.vlgmr.msra.gmra.mxu0 %vm70_vm3, %v1494_v41 }
  0xbd   :  { %1092 = vmatpush1.bf16.msra.mxu0 %v1066_v43  ;;  %1350 = vmatprep.mubr.msk.bf16.mxu1 %vm1497_vm0, %v1496_v3 }
  0xbe   :  { %1109 = vmatprep.mubr.bf16.mxu0 %v1500_v11 }
  0xc3   :  { %1351 = vmatmul.mubr.msk.bf16.vlgmr.msra.gmra.mxu1 %vm70_vm3, %v1495_v44 }
  0xc4   :  { %1280 = vmatmul.mubr.msk.bf16.vlgmr.msra.gmra.mxu0 %vm70_vm3, %v1495_v44 }
 0x143   :  { %v151_v45 = vpop.f32.mrf.mxu1 }
 0x144   :  { %v108_v46 = vpop.f32.mrf.mxu0 }
 0x145   :  { %v1304_v47 = vpop.f32.mrf.mxu1 }
 0x146   :  { %v110_v48 = vpop.f32.mrf.mxu0 }
 0x147   :  { %v154_v49 = vpop.f32.mrf.mxu1 }
 0x148   :  { %v112_v50 = vpop.f32.mrf.mxu0 }
 0x149   :  { %v1305_v51 = vpop.f32.mrf.mxu1 }
 0x14a   :  { %v114_v52 = vpop.f32.mrf.mxu0 }
 0x14b   :  { %v243_v53 = vpop.f32.mrf.mxu1 }
 0x14c   :  { %v200_v3 = vpop.f32.mrf.mxu0  ;;  %v244_v32 = vadd.f32 %v243_v53, %v151_v45 }
 0x14d   :  { %v1310_v54 = vpop.f32.mrf.mxu1  ;;  %v201_v34 = vadd.f32 %v200_v3, %v108_v46 }
 0x14e   :  { %v202_v11 = vpop.f32.mrf.mxu0 }
 0x14f   :  { %v246_v55 = vpop.f32.mrf.mxu1  ;;  %v203_v38 = vadd.f32 %v202_v11, %v110_v48 }
 0x150   :  { %v204_v56 = vpop.f32.mrf.mxu0  ;;  %v247_v54 = vadd.f32 %v246_v55, %v154_v49 }
 0x151   :  { %v1311_v57 = vpop.f32.mrf.mxu1  ;;  %v205_v43 = vadd.f32 %v204_v56, %v112_v50 }
 0x152   :  { %v206_v58 = vpop.f32.mrf.mxu0 }
 0x153   :  { %v368_v59 = vpop.f32.mrf.mxu1 }
 0x154   :  { %v325_v60 = vpop.f32.mrf.mxu0  ;;  %v377_v36 = vadd.f32 %v368_v59, %v244_v32 }
 0x155   :  { %v1316_v61 = vpop.f32.mrf.mxu1  ;;  %v375_v39 = vadd.f32 %v325_v60, %v201_v34 }
 0x156   :  { %v327_v62 = vpop.f32.mrf.mxu0 }
 0x157   :  { %v371_v63 = vpop.f32.mrf.mxu1  ;;  %v376_v44 = vadd.f32 %v327_v62, %v203_v38 }
 0x158   :  { %v329_v0 = vpop.f32.mrf.mxu0  ;;  %v380_v3 = vadd.f32 %v371_v63, %v247_v54 }
 0x159   :  { %v1317_v1 = vpop.f32.mrf.mxu1 }
 0x15a   :  { %v331_v2 = vpop.f32.mrf.mxu0  ;;  %v207_v1 = vadd.f32 %v206_v58, %v114_v52 }
 0x15b   :  { %v499_v4 = vpop.f32.mrf.mxu1 }
 0x15c   :  { %v456_v5 = vpop.f32.mrf.mxu0  ;;  %v508_v41 = vadd.f32 %v499_v4, %v377_v36  ;;  %v379_v48 = vadd.f32 %v331_v2, %v207_v1  ;;  %v1177_v36 = vpop.permute.xlu1 %1176 }
 0x15d   :  { %v1322_v6 = vpop.f32.mrf.mxu1  ;;  %v506_v47 = vadd.f32 %v456_v5, %v375_v39 }
 0x15e   :  { %v458_v7 = vpop.f32.mrf.mxu0  ;;  %v378_v6 = vadd.f32 %v329_v0, %v205_v43 }
 0x15f   :  { %v502_v8 = vpop.f32.mrf.mxu1  ;;  %v507_v45 = vadd.f32 %v458_v7, %v376_v44 }
 0x160   :  { %v460_v9 = vpop.f32.mrf.mxu0  ;;  %v511_v50 = vadd.f32 %v502_v8, %v380_v3 }
 0x161   :  { %v1323_v10 = vpop.f32.mrf.mxu1  ;;  %v509_v11 = vadd.f32 %v460_v9, %v378_v6  ;;  %v1172_v9 = vpop.permute.xlu0 %1171 }
 0x162   :  { %v462_v12 = vpop.f32.mrf.mxu0 }
 0x163   :  { %v630_v13 = vpop.f32.mrf.mxu1  ;;  %v510_v5 = vadd.f32 %v462_v12, %v379_v48 }
 0x164   :  { %v587_v14 = vpop.f32.mrf.mxu0  ;;  %v639_v57 = vadd.f32 %v630_v13, %v508_v41 }
 0x165   :  { %v1328_v15 = vpop.f32.mrf.mxu1  ;;  %v637_v53 = vadd.f32 %v587_v14, %v506_v47 }
 0x166   :  { %v589_v16 = vpop.f32.mrf.mxu0 }
 0x167   :  { %v633_v17 = vpop.f32.mrf.mxu1  ;;  %v638_v60 = vadd.f32 %v589_v16, %v507_v45 }
 0x168   :  { %v591_v18 = vpop.f32.mrf.mxu0  ;;  %v642_v58 = vadd.f32 %v633_v17, %v511_v50 }
 0x169   :  { %v1329_v19 = vpop.f32.mrf.mxu1  ;;  %v640_v49 = vadd.f32 %v591_v18, %v509_v11 }
 0x16a   :  { %v593_v20 = vpop.f32.mrf.mxu0 }
 0x16b   :  { %v761_v21 = vpop.f32.mrf.mxu1  ;;  %v641_v14 = vadd.f32 %v593_v20, %v510_v5 }
 0x16c   :  { %v718_v22 = vpop.f32.mrf.mxu0  ;;  %v770_v59 = vadd.f32 %v761_v21, %v639_v57 }
 0x16d   :  { %v1334_v23 = vpop.f32.mrf.mxu1  ;;  %v768_v4 = vadd.f32 %v718_v22, %v637_v53 }
 0x16e   :  { %v720_v24 = vpop.f32.mrf.mxu0 }
 0x16f   :  { %v764_v25 = vpop.f32.mrf.mxu1  ;;  %v769_v55 = vadd.f32 %v720_v24, %v638_v60 }
 0x170   :  { %v722_v26 = vpop.f32.mrf.mxu0  ;;  %v773_v16 = vadd.f32 %v764_v25, %v642_v58 }
 0x171   :  { %v1335_v27 = vpop.f32.mrf.mxu1  ;;  %v771_v63 = vadd.f32 %v722_v26, %v640_v49 }
 0x172   :  { %v724_v28 = vpop.f32.mrf.mxu0 }
 0x173   :  { %v892_v29 = vpop.f32.mrf.mxu1  ;;  %v772_v8 = vadd.f32 %v724_v28, %v641_v14 }
 0x174   :  { %v849_v30 = vpop.f32.mrf.mxu0  ;;  %v901_v56 = vadd.f32 %v892_v29, %v770_v59 }
 0x175   :  { %v1340_v31 = vpop.f32.mrf.mxu1  ;;  %v899_v13 = vadd.f32 %v849_v30, %v768_v4 }
 0x176   :  { %v851_v33 = vpop.f32.mrf.mxu0 }
 0x177   :  { %v895_v35 = vpop.f32.mrf.mxu1  ;;  %v900_v19 = vadd.f32 %v851_v33, %v769_v55 }
 0x178   :  { %v853_v37 = vpop.f32.mrf.mxu0  ;;  %v904_v31 = vadd.f32 %v895_v35, %v773_v16 }
 0x179   :  { %v1341_v40 = vpop.f32.mrf.mxu1  ;;  %v902_v27 = vadd.f32 %v853_v37, %v771_v63 }
 0x17a   :  { %v855_v42 = vpop.f32.mrf.mxu0 }
 0x17b   :  { %v1023_v51 = vpop.f32.mrf.mxu1  ;;  %v903_v17 = vadd.f32 %v855_v42, %v772_v8 }
 0x17c   :  { %v980_v61 = vpop.f32.mrf.mxu0  ;;  %v1032_v0 = vadd.f32 %v1023_v51, %v901_v56 }
 0x17d   :  { %v1346_v46 = vpop.f32.mrf.mxu1  ;;  %v1030_v21 = vadd.f32 %v980_v61, %v899_v13 }
 0x17e   :  { %v982_v10 = vpop.f32.mrf.mxu0 }
 0x17f   :  { %v1026_v15 = vpop.f32.mrf.mxu1  ;;  %v1031_v29 = vadd.f32 %v982_v10, %v900_v19 }
 0x180   :  { %v984_v62 = vpop.f32.mrf.mxu0  ;;  %v1035_v39 = vadd.f32 %v1026_v15, %v904_v31 }
 0x181   :  { %v1347_v52 = vpop.f32.mrf.mxu1  ;;  %v1033_v32 = vadd.f32 %v984_v62, %v902_v27 }
 0x182   :  { %v986_v7 = vpop.f32.mrf.mxu0 }
 0x183   :  { %v1154_v2 = vpop.f32.mrf.mxu1  ;;  %v1034_v25 = vadd.f32 %v986_v7, %v903_v17 }
 0x184   :  { %v1163_v22 = vadd.f32 %v1154_v2, %v1032_v0  ;;  %v1111_v23 = vpop.f32.mrf.mxu0 }
 0x185   :  { %v1161_v12 = vadd.f32 %v1111_v23, %v1030_v21  ;;  %v1352_v18 = vpop.f32.mrf.mxu1 }
 0x186   :  { %v1181_v24 = vadd.f32 %v1172_v9, %v1163_v22  ;;  %v1113_v30 = vpop.f32.mrf.mxu0 }
 0x187   :  { %v1162_v34 = vadd.f32 %v1113_v30, %v1031_v29  ;;  %v1157_v20 = vpop.f32.mrf.mxu1  ;;  %v1179_v26 = vadd.f32 %v1172_v9, %v1161_v12 }
 0x188   :  { %v1115_v33 = vpop.f32.mrf.mxu0  ;;  %v1187_v38 = vmax.f32 %v1181_v24, 0.0  ;;  %v1166_v44 = vadd.f32 %v1157_v20, %v1035_v39 }
 0x189   :  { %v1180_v40 = vadd.f32 %v1172_v9, %v1162_v34  ;;  %v1164_v41 = vadd.f32 %v1115_v33, %v1033_v32  ;;  %v1353_v28 = vpop.f32.mrf.mxu1  ;;  %v1185_v42 = vmax.f32 %v1179_v26, 0.0 }
 0x18a   :  { %1201 = vrot.lane.b32.xlu1 %v1187_v38, %s1498_s24  ;;  %v1117_v37 = vpop.f32.mrf.mxu0  ;;  %v1184_v54 = vadd.f32 %v1177_v36, %v1166_v44 }
 0x18b   :  { %v1186_v43 = vmax.f32 %v1180_v40, 0.0  ;;  %v1182_v47 = vadd.f32 %v1177_v36, %v1164_v41  ;;  %v1165_v35 = vadd.f32 %v1117_v37, %v1034_v25 }
 0x18c   :  { %v1190_v1 = vmax.f32 %v1184_v54, 0.0 }
 0x18d   :  { %v1183_v51 = vadd.f32 %v1177_v36, %v1165_v35  ;;  %1199 = vrot.lane.b32.xlu0 %v1186_v43, %s1498_s24  ;;  %v1188_v61 = vmax.f32 %v1182_v47, 0.0 }
 0x18e   :  { %1197 = vrot.lane.b32.xlu1 %v1185_v42, %s1498_s24 }
 0x18f   :  { %v1189_v57 = vmax.f32 %v1183_v51, 0.0 }
 0x191   :  { %1203 = vrot.lane.b32.xlu0 %v1188_v61, %s1498_s24 }
 0x192   :  { %1205 = vrot.lane.b32.xlu1 %v1189_v57, %s1498_s24 }
 0x195   :  { %1207 = vrot.lane.b32.xlu0 %v1190_v1, %s1498_s24 }
 0x1fc   :  { %v1202_v6 = vpop.permute.xlu1 %1201 }
 0x1ff   :  { %v1200_v45 = vpop.permute.xlu0 %1199 }
 0x200   :  { %v1210_v53 = vsel %vm44_vm1, %v1200_v45, %v1202_v6  ;;  %v1198_v46 = vpop.permute.xlu1 %1197 }
 0x201   :  { %v1224_v3 = vmax.f32 %v1186_v43, %v1210_v53  ;;  %v1209_v59 = vsel %vm44_vm1, %v1198_v46, %v1200_v45  ;;  %v1221_v10 = vsel %vm44_vm1, %v1202_v6, %v1198_v46 }
 0x202   :  { %v1223_v48 = vmax.f32 %v1185_v42, %v1209_v59  ;;  %v1225_v11 = vmax.f32 %v1187_v38, %v1221_v10 }
 0x203   :  { %1230 = vst [vmem:[%s1751_s3 + $0x8] sm:$0xff] %v1224_v3  ;;  %v1204_v60 = vpop.permute.xlu0 %1203 }
 0x204   :  { %1229 = vst [vmem:[%s1751_s3] sm:$0xff] %v1223_v48  ;;  %1231 = vst [vmem:[%s1751_s3 + $0x10] sm:$0xff] %v1225_v11  ;;  %v1206_v4 = vpop.permute.xlu1 %1205 }
 0x205   :  { %v1211_v15 = vsel %vm44_vm1, %v1204_v60, %v1206_v4 }
 0x206   :  { %v1226_v50 = vmax.f32 %v1188_v61, %v1211_v15 }
 0x207   :  { %v1208_v56 = vpop.permute.xlu0 %1207 }
 0x208   :  { %1232 = vst [vmem:[%s1751_s3 + $0x18] sm:$0xff] %v1226_v50  ;;  %v1212_v62 = vsel %vm44_vm1, %v1206_v4, %v1208_v56  ;;  %v1222_v5 = vsel %vm44_vm1, %v1208_v56, %v1204_v60 }
 0x209   :  { %v1227_v49 = vmax.f32 %v1189_v57, %v1212_v62  ;;  %v1228_v55 = vmax.f32 %v1190_v1, %v1222_v5 }
 0x20b   :  { %1233 = vst [vmem:[%s1751_s3 + $0x20] sm:$0xff] %v1227_v49  ;;  %1234 = vst [vmem:[%s1751_s3 + $0x28] sm:$0xff] %v1228_v55 }

// kernel: _lambda_.10
= control target key start
LH: loop header
LB: loop body
LE: loop exit
PB: predicated region body
PF: predicated region fallthrough
CT: control target
= control target key end

     0   :  { %s544_s12 = smov 0   ;;  %s605_s0 = inlined_call_operand.vmem [shape: f32[2,8,2,128], index: 0, kind: input, shape index: {}]   ;;  %s606_s1 = inlined_call_operand.vmem [shape: f32[2,32,128], index: 1, kind: input, shape index: {}]   ;;  %s607_s2 = inlined_call_operand.vmem [shape: f32[2,1,128], index: 2, kind: input, shape index: {}]   ;;  %s608_s3 = inlined_call_operand.vmem [shape: f32[2,8,2,32], index: 3, kind: output, shape index: {}]  }
   0x1 LB: > { %s550_s13 = sadd.s32 4294967295, %s510_s12   ;;  %p430_p0 = scmp.ge.s32.totalorder %s510_s12, 1  ;;  %s510_s12 = sphi %s544_s12, %s13_s12  }
   0x2   : > { %p155_p1 = scmp.lt.s32.totalorder %s510_s12, 3 }
   0x4   : > { %p156_p2 = pnand %p430_p0, %p155_p1 }
   0x5   : > { %p187_p3 = scmp.lt.s32.totalorder (!%p156_p2), %s550_s13, 1  ;;  %p205_p4 = scmp.eq.s32.totalorder (!%p156_p2), %s550_s13, 1 }
   0x6   : > { %159 = sbr.rel (%p156_p2) target bundleno = 812 (0x32c), region = 32  ;;  %s581_s29 = smov (!%p156_p2), 0  }
   0xb   : > { %s188_s14 = scalar_select %p187_p3, %s550_s13, 1  ;;  %v512_v5 = vmov 0.0  }
   0xd   : > { %s443_s15 = sshll.u32 %s188_s14, 4  ;;  %s444_s16 = sshll.u32 %s188_s14, 5 }
   0xe   : > { %s560_s19 = scalar_lea.vmem %s605_s0, %s443_s15  ;;  %s196_s22 = scalar_lea.vmem %s606_s1, %s444_s16 }
   0xf   : > { %s199_s25 = scalar_lea.vmem %s607_s2, %s188_s14  ;;  %s571_s28 = scalar_lea.vmem %s608_s3, %s443_s15  ;;  %v573_v0 = vld [vmem:[%s196_s22] sm:$0xff]  ;;  %v575_v1 = vld [vmem:[%s196_s22 + $0x8] sm:$0xff]  ;;  %v577_v2 = vld [vmem:[%s196_s22 + $0x10] sm:$0xff] }
  0x10   : > { %v579_v3 = vld [vmem:[%s196_s22 + $0x18] sm:$0xff]  ;;  %v438_v4 = vld [vmem:[%s199_s25] ss:$0 sm:$0xff] }
  0x11 LB: >> { %v520_v6 = vmov 0.0   ;;  %vm521_vm0 = vmmov 0   ;;  %s522_s30 = smov 96   ;;  %vm232_vm1 = vcmask 261120   ;;  %s523_s4 = smov 64   ;;  %vm336_vm2 = vcmask 254976   ;;  %s518_s29 = sphi %s581_s29, %s216_s29   ;;  %v514_v5 = vphi %v512_v5, %v330_v5  }
  0x12   : >> { %451 = vmatprep.subr.mxu0 %v520_v6  ;;  %459 = vmatprep.mubr.msk.f32.mxu0 %vm521_vm0, %v520_v6  ;;  %s218_s5 = ssub.s32 7, %s518_s29 }
  0x13   : >> { %230 = vrot.lane.b32.xlu0 %v514_v5, %s522_s30  ;;  %452 = vmatpush3.msra.mxu0 %v579_v3  ;;  %s610_s5 = smov (!%p205_p4, %s218_s5), %s518_s29  ;;  %s216_s29 = sadd.s32 1, %s518_s29  }
  0x14   : >> { %453 = vmatprep.subr.mxu0 %v520_v6  ;;  %s437_s6 = sshll.u32 %s610_s5, 1  ;;  %p213_p5 = scmp.ge.s32.totalorder %s216_s29, 8  }
  0x15   : >> { %454 = vmatpush3.msra.mxu0 %v577_v2  ;;  %s221_s7 = scalar_lea.vmem %s560_s19, %s437_s6  ;;  %s335_s8 = scalar_lea.vmem %s571_s28, %s437_s6 }
  0x16   : >> { %455 = vmatprep.subr.mxu0 %v520_v6  ;;  %v222_v11 = vld [vmem:[%s221_s7] sm:$0x3] }
  0x17   : >> { %456 = vmatpush3.msra.mxu0 %v575_v1 }
  0x18   : >> { %457 = vmatprep.subr.mxu0 %v520_v6 }
  0x19   : >> { %458 = vmatpush3.msra.mxu0 %v573_v0 }
  0x85   : >> { %v231_v7 = vpop.permute.xlu0 %230 }
  0x86   : >> { %460 = vmatmul.mubr.msk.f32.vlgmr.msra.gmra.mxu0 %vm232_vm1, %v231_v7 }
 0x146   : >> { %v301_v8 = vpop.f32.mrf.mxu0 }
 0x147   : >> { %v302_v9 = vadd.f32 %v438_v4, %v301_v8 }
 0x148   : >> { %v461_v10 = vpop.f32.mrf.mxu0 }
 0x149   : >> { %313 = vrot.lane.b32.xlu0 %v302_v9, %s523_s4  ;;  %v305_v12 = vadd.f32 %v302_v9, %v222_v11 }
 0x14b   : >> { %v440_v13 = vmul.f32 -1.442695, %v305_v12 }
 0x14d   : >> { %490 = vpow2.f32 %v440_v13 }
 0x15a   : >> { %v491_v14 = vpop.eup %490 }
 0x15b   : >> { %v309_v15 = vadd.f32 1.0, %v491_v14 }
 0x15d   : >> { %492 = vrcp.f32 %v309_v15 }
 0x16a   : >> { %v493_v16 = vpop.eup %492 }
 0x16b   : >> { %v323_v22 = vsub.f32 1.0, %v493_v16  ;;  %v329_v24 = vmul.f32 %v514_v5, %v493_v16 }
 0x1bb   : >> { %v314_v17 = vpop.permute.xlu0 %313 }
 0x1bc   : >> { %v316_v18 = vmul.f32 %v493_v16, %v314_v17 }
 0x1be   : >> { %318 = vrot.lane.b32.xlu1 %v316_v18, %s523_s4 }
 0x230   : >> { %v319_v19 = vpop.permute.xlu1 %318 }
 0x231   : >> { %v321_v20 = vadd.f32 %v319_v19, %v222_v11 }
 0x233   : >> { %494 = vtanh.f32 %v321_v20 }
 0x240   : >> { %v495_v21 = vpop.eup %494 }
 0x241   : >> { %325 = vrot.lane.b32.xlu1 %v495_v21, %s522_s30 }
 0x2b3   : >> { %v326_v23 = vpop.permute.xlu1 %325 }
 0x2b4   : >> { %v328_v25 = vmul.f32 %v326_v23, %v323_v22 }
 0x2b6   : >> { %v330_v5 = vadd.f32 %v329_v24, %v328_v25  }
 0x2b8   : >> { %332 = vrot.lane.b32.xlu0 %v330_v5, %s522_s30 }
 0x327   : > { %215 = sbr.rel (!%p213_p5) target bundleno = 17 (0x11), region = 77 }
 0x32a   : >> { %v333_v26 = vpop.permute.xlu0 %332 }
 0x32b   : >> { %337 = vst.msk [vmem:[%s335_s8] sm:$0x3] %vm336_vm2, %v333_v26 }
 0x32c PF: > { %s13_s12 = sadd.s32 1, %s510_s12  }
 0x32d   : > { %p10_p6 = scmp.ge.s32.totalorder %s13_s12, 4  }
 0x32f   :  { %12 = sbr.rel (!%p10_p6) target bundleno = 1 (0x1), region = 88 }

// kernel: _lambda_.7
= control target key start
LH: loop header
LB: loop body
LE: loop exit
PB: predicated region body
PF: predicated region fallthrough
CT: control target
= control target key end

     0   :  { %v3608_v7 = vmov 0   ;;  %s3609_s22 = smov 127   ;;  %s3611_s23 = smov 94   ;;  %vm67_vm0 = vcmask 1039360   ;;  %vm111_vm1 = vcmask 1041408   ;;  %vm107_vm2 = vcmask 31744   ;;  %s4572_s0 = inlined_call_operand.vmem [shape: f32[4,1280], index: 0, kind: input, shape index: {}]   ;;  %s4573_s1 = inlined_call_operand.vmem [shape: bf16[9,16,4], index: 1, kind: input, shape index: {}]   ;;  %s4574_s2 = inlined_call_operand.vmem [shape: f32[16,1], index: 2, kind: input, shape index: {}]   ;;  %s4575_s3 = inlined_call_operand.vmem [shape: f32[16,1280], index: 3, kind: output, shape index: {}]  }
   0x1   :  { %v3640_v0 = vld [vmem:[%s4572_s0 + $0x8] sm:$0xff]  ;;  %v3645_v1 = vld [vmem:[%s4572_s0 + $0x10] sm:$0xff]  ;;  %v3654_v3 = vld [vmem:[%s4572_s0] sm:$0xff]  ;;  %174 = vmatprep.mubr.bf16.mxu0 %v3608_v7  ;;  %217 = vmatprep.mubr.bf16.mxu1 %v3608_v7  ;;  %s3612_s24 = smov 93   ;;  %s3613_s25 = smov 92   ;;  %vm630_vm3 = vcmask 1031168  }
   0x2   :  { %v3649_v2 = vcombine.high %v3640_v0, %v3640_v0  ;;  %v3658_v4 = vcombine.high %v3645_v1, %v3645_v1  ;;  %v3662_v5 = vcombine.high %v3654_v3, %v3654_v3  ;;  %v3667_v6 = vld [vmem:[%s4572_s0 + $0x18] sm:$0xff]  ;;  %3592 = vset.pattern.permute.xlu0 %v3608_v7  ;;  %v3677_v9 = vld [vmem:[%s4572_s0 + $0x20] sm:$0xff]  ;;  %3593 = vset.pattern.permute.xlu1 %v3608_v7  ;;  %s3610_s0 = smov 126   ;;  %s3614_s26 = smov 60   ;;  %v3599_v41 = vld [vmem:[%s4573_s1 + $0x8] sm:$0xff]   ;;  %vm958_vm4 = vcmask 769024  }
   0x3   :  { %v3688_v12 = vcombine.high %v3667_v6, %v3667_v6  ;;  %v3693_v13 = vcombine.high %v3677_v9, %v3677_v9  ;;  %s3615_s27 = smov 59   ;;  %s3616_s28 = smov 58   ;;  %v37_v56 = vpack.c.bf16 %v3654_v3, %v3654_v3  ;;  %v39_v62 = vpack.c.bf16 %v3640_v0, %v3640_v0 }
   0x4   :  { %v3437_v8 = vpack.i.bf16 %v3645_v1, %v3649_v2  ;;  %v3432_v10 = vpack.i.bf16 %v3662_v5, %v3654_v3  ;;  %v3442_v11 = vpack.i.bf16 %v3667_v6, %v3658_v4  ;;  %v3477_v15 = vpack.i.bf16 %v3649_v2, %v3640_v0 }
   0x5   :  { %v3447_v14 = vpack.i.bf16 %v3677_v9, %v3688_v12  ;;  %v38_v50 = vpack.c.bf16 %v3662_v5, %v3662_v5  ;;  %v366_v58 = vsel %vm111_vm1, %v37_v56, 0  ;;  %v40_v59 = vpack.c.bf16 %v3649_v2, %v3649_v2  ;;  %v3600_v2 = vld [vmem:[%s4573_s1] sm:$0xff]  }
   0x6   :  { %3438 = vrot.lane.b32.xlu1 %v3437_v8, %s3609_s22  ;;  %3433 = vrot.lane.b32.xlu0 %v3432_v10, %s3609_s22  ;;  %v42_v60 = vpack.c.bf16 %v3658_v4, %v3658_v4  ;;  %v41_v63 = vpack.c.bf16 %v3645_v1, %v3645_v1  ;;  %v372_v5 = vsel %vm111_vm1, %v39_v62, 0  ;;  %vm1286_vm5 = vcmask 760832  }
   0x7   :  { %vm1614_vm6 = vcmask 752640   ;;  %vm1942_vm7 = vcmask 490496   ;;  %vm2270_vm8 = vcmask 482304   ;;  %vm2598_vm9 = vcmask 474112  }
   0xa   :  { %3443 = vrot.lane.b32.xlu1 %v3442_v11, %s3609_s22  ;;  %51 = vrot.lane.b32.xlu0 %v3640_v0, %s3609_s22 }
   0xe   :  { %65 = vrot.lane.b32.xlu1 %v3693_v13, %s3609_s22  ;;  %3448 = vrot.lane.b32.xlu0 %v3447_v14, %s3609_s22 }
  0x12   :  { %614 = vrot.lane.b32.xlu1 %v3640_v0, %s3610_s0  ;;  %3453 = vrot.lane.b32.xlu0 %v3432_v10, %s3610_s0 }
  0x16   :  { %3463 = vrot.lane.b32.xlu1 %v3442_v11, %s3610_s0  ;;  %3458 = vrot.lane.b32.xlu0 %v3437_v8, %s3610_s0 }
  0x1a   :  { %628 = vrot.lane.b32.xlu1 %v3693_v13, %s3610_s0  ;;  %3468 = vrot.lane.b32.xlu0 %v3447_v14, %s3610_s0 }
  0x1e   :  { %3478 = vrot.lane.b32.xlu1 %v3477_v15, %s3611_s23  ;;  %3473 = vrot.lane.b32.xlu0 %v3432_v10, %s3611_s23 }
  0x22   :  { %3483 = vrot.lane.b32.xlu1 %v3442_v11, %s3611_s23  ;;  %946 = vrot.lane.b32.xlu0 %v3645_v1, %s3611_s23 }
  0x26   :  { %956 = vrot.lane.b32.xlu1 %v3693_v13, %s3611_s23  ;;  %3488 = vrot.lane.b32.xlu0 %v3447_v14, %s3611_s23 }
  0x2a   :  { %1270 = vrot.lane.b32.xlu1 %v3640_v0, %s3612_s24  ;;  %3493 = vrot.lane.b32.xlu0 %v3432_v10, %s3612_s24 }
  0x2e   :  { %3503 = vrot.lane.b32.xlu1 %v3442_v11, %s3612_s24  ;;  %3498 = vrot.lane.b32.xlu0 %v3437_v8, %s3612_s24 }
  0x32   :  { %1284 = vrot.lane.b32.xlu1 %v3693_v13, %s3612_s24  ;;  %3508 = vrot.lane.b32.xlu0 %v3447_v14, %s3612_s24 }
  0x36   :  { %3518 = vrot.lane.b32.xlu1 %v3477_v15, %s3613_s25  ;;  %3513 = vrot.lane.b32.xlu0 %v3432_v10, %s3613_s25 }
  0x3a   :  { %3523 = vrot.lane.b32.xlu1 %v3442_v11, %s3613_s25  ;;  %1602 = vrot.lane.b32.xlu0 %v3645_v1, %s3613_s25 }
  0x3e   :  { %1612 = vrot.lane.b32.xlu1 %v3693_v13, %s3613_s25  ;;  %3528 = vrot.lane.b32.xlu0 %v3447_v14, %s3613_s25 }
  0x42   :  { %1926 = vrot.lane.b32.xlu1 %v3640_v0, %s3614_s26  ;;  %3533 = vrot.lane.b32.xlu0 %v3432_v10, %s3614_s26 }
  0x46   :  { %3543 = vrot.lane.b32.xlu1 %v3442_v11, %s3614_s26  ;;  %3538 = vrot.lane.b32.xlu0 %v3437_v8, %s3614_s26 }
  0x4a   :  { %1940 = vrot.lane.b32.xlu1 %v3693_v13, %s3614_s26  ;;  %3548 = vrot.lane.b32.xlu0 %v3447_v14, %s3614_s26 }
  0x4e   :  { %3558 = vrot.lane.b32.xlu1 %v3477_v15, %s3615_s27  ;;  %3553 = vrot.lane.b32.xlu0 %v3432_v10, %s3615_s27 }
  0x52   :  { %3563 = vrot.lane.b32.xlu1 %v3442_v11, %s3615_s27  ;;  %2258 = vrot.lane.b32.xlu0 %v3645_v1, %s3615_s27  ;;  %v46_v1 = vpack.c.bf16 %v3693_v13, %v3693_v13 }
  0x56   :  { %2268 = vrot.lane.b32.xlu1 %v3693_v13, %s3615_s27  ;;  %3568 = vrot.lane.b32.xlu0 %v3447_v14, %s3615_s27 }
  0x5a   :  { %2582 = vrot.lane.b32.xlu1 %v3640_v0, %s3616_s28  ;;  %3573 = vrot.lane.b32.xlu0 %v3432_v10, %s3616_s28  ;;  %v44_v0 = vpack.c.bf16 %v3688_v12, %v3688_v12  ;;  %v43_v12 = vpack.c.bf16 %v3667_v6, %v3667_v6 }
  0x5e   :  { %3583 = vrot.lane.b32.xlu1 %v3442_v11, %s3616_s28  ;;  %3578 = vrot.lane.b32.xlu0 %v3437_v8, %s3616_s28  ;;  %v378_v8 = vsel %vm111_vm1, %v41_v63, 0 }
  0x62   :  { %2596 = vrot.lane.b32.xlu1 %v3693_v13, %s3616_s28  ;;  %3588 = vrot.lane.b32.xlu0 %v3447_v14, %s3616_s28  ;;  %v45_v13 = vpack.c.bf16 %v3677_v9, %v3677_v9 }
  0x78   :  { %v3439_v16 = vpop.permute.xlu1 %3438  ;;  %v3434_v19 = vpop.permute.xlu0 %3433 }
  0x79   :  { %v3441_v17 = vunpack.i.h.bf16 %v3439_v16  ;;  %v3440_v18 = vunpack.i.l.bf16 %v3439_v16  ;;  %v3436_v20 = vunpack.i.h.bf16 %v3434_v19  ;;  %v3435_v21 = vunpack.i.l.bf16 %v3434_v19 }
  0x7b   :  { %v71_v22 = vsel %vm67_vm0, %v3440_v18, %v3441_v17  ;;  %v68_v25 = vsel %vm67_vm0, %v3435_v21, %v3436_v20 }
  0x7c   :  { %v3444_v23 = vpop.permute.xlu1 %3443  ;;  %v95_v24 = vpack.c.bf16 %v71_v22, %v71_v22  ;;  %v52_v28 = vpop.permute.xlu0 %51  ;;  %v92_v29 = vpack.c.bf16 %v68_v25, %v68_v25 }
  0x7d   :  { %v3446_v26 = vunpack.i.h.bf16 %v3444_v23  ;;  %v3445_v27 = vunpack.i.l.bf16 %v3444_v23  ;;  %v69_v30 = vsel %vm67_vm0, %v3436_v20, %v52_v28  ;;  %v70_v31 = vsel %vm67_vm0, %v52_v28, %v3440_v18 }
  0x7e   :  { %3313 = vmatprep.subr.msk.bf16.mxu1 %vm111_vm1, %v95_v24  ;;  %v93_v32 = vpack.c.bf16 %v69_v30, %v69_v30  ;;  %v94_v33 = vpack.c.bf16 %v70_v31, %v70_v31  ;;  %v113_v39 = vsel %vm111_vm1, %v92_v29, 0  ;;  %v384_v20 = vsel %vm111_vm1, %v43_v12, 0 }
  0x7f   :  { %v73_v34 = vsel %vm67_vm0, %v3445_v27, %v3446_v26  ;;  %v72_v37 = vsel %vm67_vm0, %v3441_v17, %v3445_v27 }
  0x80   :  { %v66_v35 = vpop.permute.xlu1 %65  ;;  %v97_v36 = vpack.c.bf16 %v73_v34, %v73_v34  ;;  %v3449_v38 = vpop.permute.xlu0 %3448  ;;  %3311 = vmatprep.subr.msk.bf16.mxu0 %vm111_vm1, %v93_v32  ;;  %v119_v40 = vsel %vm111_vm1, %v94_v33, 0  ;;  %v96_v42 = vpack.c.bf16 %v72_v37, %v72_v37 }
  0x81   :  { %v88_v43 = vsel %vm67_vm0, %v66_v35, %v3435_v21  ;;  %v3451_v44 = vunpack.i.h.bf16 %v3449_v38  ;;  %v3450_v45 = vunpack.i.l.bf16 %v3449_v38  ;;  %157 = vmatpush1.bf16.msra.mxu0 %v113_v39  ;;  %200 = vmatpush1.bf16.msra.mxu1 %v119_v40  ;;  %v390_v21 = vsel %vm111_vm1, %v45_v13, 0 }
  0x82   :  { %3315 = vmatprep.subr.msk.bf16.mxu0 %vm111_vm1, %v97_v36  ;;  %v125_v46 = vsel %vm111_vm1, %v96_v42, 0  ;;  %v101_v51 = vpack.c.bf16 %v88_v43, %v88_v43 }
  0x83   :  { %v75_v47 = vsel %vm67_vm0, %v3450_v45, %v3451_v44  ;;  %v74_v48 = vsel %vm67_vm0, %v3446_v26, %v3450_v45  ;;  %v76_v49 = vsel %vm67_vm0, %v3451_v44, %v66_v35 }
  0x84   :  { %3312 = vmatmul.mubr.msk.bf16.vlgmr.msra.gmra.mxu0 %vm107_vm2, %v3599_v41  ;;  %3314 = vmatmul.mubr.msk.bf16.vlgmr.msra.gmra.mxu1 %vm107_vm2, %v3599_v41  ;;  %v99_v52 = vpack.c.bf16 %v75_v47, %v75_v47  ;;  %v98_v53 = vpack.c.bf16 %v74_v48, %v74_v48  ;;  %v100_v55 = vpack.c.bf16 %v76_v49, %v76_v49  ;;  %v3767_v61 = vpop.permute.xlu0 %3453  ;;  %v615_v3 = vpop.permute.xlu1 %614 }
  0x85   :  { %243 = vmatpush1.bf16.msra.mxu0 %v125_v46  ;;  %260 = vmatprep.mubr.bf16.mxu0 %v3608_v7  ;;  %v3456_v10 = vunpack.i.h.bf16 %v3767_v61  ;;  %v3455_v15 = vunpack.i.l.bf16 %v3767_v61  ;;  %v3601_v46 = vld [vmem:[%s4573_s1 + $0x10] sm:$0xff]  }
  0x86   :  { %3317 = vmatprep.subr.msk.bf16.mxu1 %vm111_vm1, %v99_v52  ;;  %3319 = vmatprep.subr.msk.bf16.mxu0 %vm111_vm1, %v101_v51  ;;  %v131_v54 = vsel %vm111_vm1, %v98_v53, 0  ;;  %v137_v57 = vsel %vm111_vm1, %v100_v55, 0 }
  0x87   :  { %286 = vmatpush1.bf16.msra.mxu1 %v131_v54  ;;  %303 = vmatprep.mubr.bf16.mxu1 %v3608_v7  ;;  %v632_v17 = vsel %vm630_vm3, %v3456_v10, %v615_v3  ;;  %v631_v9 = vsel %vm630_vm3, %v3455_v15, %v3456_v10 }
  0x88   :  { %3322 = vmatprep.subr.msk.bf16.mxu1 %vm111_vm1, %v38_v50  ;;  %v3459_v4 = vpop.permute.xlu0 %3458  ;;  %v3464_v16 = vpop.permute.xlu1 %3463  ;;  %v656_v6 = vpack.c.bf16 %v632_v17, %v632_v17  ;;  %v655_v29 = vpack.c.bf16 %v631_v9, %v631_v9 }
  0x89   :  { %v3461_v11 = vunpack.i.h.bf16 %v3459_v4  ;;  %v3460_v14 = vunpack.i.l.bf16 %v3459_v4  ;;  %v3466_v24 = vunpack.i.h.bf16 %v3464_v16  ;;  %v3465_v25 = vunpack.i.l.bf16 %v3464_v16 }
  0x8a   :  { %v674_v35 = vsel %vm111_vm1, %v655_v29, 0 }
  0x8b   :  { %v634_v18 = vsel %vm630_vm3, %v3460_v14, %v3461_v11  ;;  %v633_v23 = vsel %vm630_vm3, %v615_v3, %v3460_v14  ;;  %v636_v31 = vsel %vm630_vm3, %v3465_v25, %v3466_v24  ;;  %v635_v38 = vsel %vm630_vm3, %v3461_v11, %v3465_v25 }
  0x8c   :  { %3316 = vmatmul.mubr.msk.bf16.vlgmr.msra.gmra.mxu0 %vm107_vm2, %v3599_v41  ;;  %3318 = vmatmul.mubr.msk.bf16.vlgmr.msra.gmra.mxu1 %vm107_vm2, %v3599_v41  ;;  %v3469_v19 = vpop.permute.xlu0 %3468  ;;  %v658_v22 = vpack.c.bf16 %v634_v18, %v634_v18  ;;  %v629_v28 = vpop.permute.xlu1 %628  ;;  %v657_v30 = vpack.c.bf16 %v633_v23, %v633_v23  ;;  %v660_v37 = vpack.c.bf16 %v636_v31, %v636_v31  ;;  %v3602_v18 = vld [vmem:[%s4573_s1 + $0x18] sm:$0xff]  }
  0x8d   :  { %329 = vmatpush1.bf16.msra.mxu0 %v137_v57  ;;  %410 = vmatpush1.bf16.msra.mxu1 %v366_v58  ;;  %v3471_v26 = vunpack.i.h.bf16 %v3469_v19  ;;  %v3470_v27 = vunpack.i.l.bf16 %v3469_v19  ;;  %v659_v43 = vpack.c.bf16 %v635_v38, %v635_v38  ;;  %v651_v48 = vsel %vm630_vm3, %v629_v28, %v3455_v15 }
  0x8e   :  { %346 = vmatprep.mubr.bf16.mxu0 %v3608_v7  ;;  %427 = vmatprep.mubr.bf16.mxu1 %v3608_v7  ;;  %v680_v36 = vsel %vm111_vm1, %v657_v30, 0  ;;  %v664_v57 = vpack.c.bf16 %v651_v48, %v651_v48 }
  0x8f   :  { %3324 = vmatprep.subr.msk.bf16.mxu0 %vm111_vm1, %v40_v59  ;;  %3326 = vmatprep.subr.msk.bf16.mxu1 %vm111_vm1, %v42_v60  ;;  %v638_v32 = vsel %vm630_vm3, %v3470_v27, %v3471_v26  ;;  %v637_v40 = vsel %vm630_vm3, %v3466_v24, %v3470_v27  ;;  %v686_v50 = vsel %vm111_vm1, %v659_v43, 0  ;;  %v639_v55 = vsel %vm630_vm3, %v3471_v26, %v629_v28 }
  0x90   :  { %v3479_v33 = vpop.permute.xlu1 %3478  ;;  %v3814_v34 = vpop.permute.xlu0 %3473  ;;  %v662_v39 = vpack.c.bf16 %v638_v32, %v638_v32  ;;  %v661_v44 = vpack.c.bf16 %v637_v40, %v637_v40  ;;  %v663_v60 = vpack.c.bf16 %v639_v55, %v639_v55 }
  0x91   :  { %v3476_v42 = vunpack.i.h.bf16 %v3814_v34  ;;  %v3475_v45 = vunpack.i.l.bf16 %v3814_v34  ;;  %v3481_v52 = vunpack.i.h.bf16 %v3479_v33 }
  0x92   :  { %v692_v51 = vsel %vm111_vm1, %v661_v44, 0  ;;  %v698_v4 = vsel %vm111_vm1, %v663_v60, 0 }
  0x93   :  { %v959_v56 = vsel %vm958_vm4, %v3475_v45, %v3476_v42 }
  0x94   :  { %3320 = vmatmul.mubr.msk.bf16.vlgmr.msra.gmra.mxu0 %vm107_vm2, %v3599_v41  ;;  %3323 = vmatmul.mubr.msk.bf16.vlgmr.msra.gmra.mxu1 %vm107_vm2, %v3600_v2  ;;  %v3480_v41 = vunpack.i.l.bf16 %v3479_v33  ;;  %v3484_v49 = vpop.permute.xlu1 %3483  ;;  %v947_v54 = vpop.permute.xlu0 %946  ;;  %v983_v61 = vpack.c.bf16 %v959_v56, %v959_v56 }
  0x95   :  { %453 = vmatpush1.bf16.msra.mxu0 %v372_v5  ;;  %496 = vmatpush1.bf16.msra.mxu1 %v378_v8  ;;  %v3486_v58 = vunpack.i.h.bf16 %v3484_v49  ;;  %v3485_v59 = vunpack.i.l.bf16 %v3484_v49  ;;  %v962_v62 = vsel %vm958_vm4, %v3481_v52, %v947_v54 }
  0x96   :  { %470 = vmatprep.mubr.bf16.mxu0 %v3608_v7  ;;  %513 = vmatprep.mubr.bf16.mxu1 %v3608_v7  ;;  %v960_v47 = vsel %vm958_vm4, %v3476_v42, %v3480_v41  ;;  %v986_v3 = vpack.c.bf16 %v962_v62, %v962_v62  ;;  %v1002_v5 = vsel %vm111_vm1, %v983_v61, 0 }
  0x97   :  { %3328 = vmatprep.subr.msk.bf16.mxu0 %vm111_vm1, %v44_v0  ;;  %3330 = vmatprep.subr.msk.bf16.mxu1 %vm111_vm1, %v46_v1  ;;  %v984_v53 = vpack.c.bf16 %v960_v47, %v960_v47  ;;  %v963_v0 = vsel %vm958_vm4, %v947_v54, %v3485_v59  ;;  %v961_v1 = vsel %vm958_vm4, %v3480_v41, %v3481_v52 }
  0x98   :  { %v3489_v63 = vpop.permute.xlu0 %3488  ;;  %v957_v11 = vpop.permute.xlu1 %956  ;;  %v987_v13 = vpack.c.bf16 %v963_v0, %v963_v0  ;;  %v985_v15 = vpack.c.bf16 %v961_v1, %v961_v1 }
  0x99   :  { %v3491_v14 = vunpack.i.h.bf16 %v3489_v63  ;;  %v3490_v12 = vunpack.i.l.bf16 %v3489_v63  ;;  %v979_v16 = vsel %vm958_vm4, %v957_v11, %v3475_v45  ;;  %v3603_v63 = vld [vmem:[%s4573_s1 + $0x20] sm:$0xff]  }
  0x9b   :  { %v966_v17 = vsel %vm958_vm4, %v3490_v12, %v3491_v14  ;;  %v965_v23 = vsel %vm958_vm4, %v3486_v58, %v3490_v12  ;;  %v967_v24 = vsel %vm958_vm4, %v3491_v14, %v957_v11 }
  0x9c   :  { %3325 = vmatmul.mubr.msk.bf16.vlgmr.msra.gmra.mxu0 %vm107_vm2, %v3600_v2  ;;  %3327 = vmatmul.mubr.msk.bf16.vlgmr.msra.gmra.mxu1 %vm107_vm2, %v3600_v2  ;;  %v3849_v10 = vpop.permute.xlu0 %3493  ;;  %v1271_v19 = vpop.permute.xlu1 %1270  ;;  %v990_v9 = vpack.c.bf16 %v966_v17, %v966_v17  ;;  %v989_v28 = vpack.c.bf16 %v965_v23, %v965_v23  ;;  %v991_v29 = vpack.c.bf16 %v967_v24, %v967_v24 }
  0x9d   :  { %539 = vmatpush1.bf16.msra.mxu0 %v384_v20  ;;  %582 = vmatpush1.bf16.msra.mxu1 %v390_v21  ;;  %v992_v21 = vpack.c.bf16 %v979_v16, %v979_v16  ;;  %v3496_v25 = vunpack.i.h.bf16 %v3849_v10  ;;  %v3495_v30 = vunpack.i.l.bf16 %v3849_v10 }
  0x9e   :  { %556 = vmatprep.mubr.bf16.mxu0 %v3608_v7  ;;  %599 = vmatprep.mubr.bf16.mxu1 %v3608_v7 }
  0x9f   :  { %3335 = vmatprep.subr.msk.bf16.mxu0 %vm111_vm1, %v656_v6  ;;  %3337 = vmatprep.subr.msk.bf16.mxu1 %vm111_vm1, %v658_v22  ;;  %v1008_v6 = vsel %vm111_vm1, %v985_v15, 0  ;;  %v1014_v22 = vsel %vm111_vm1, %v987_v13, 0  ;;  %v1288_v32 = vsel %vm1286_vm5, %v3496_v25, %v1271_v19 }
  0xa0   :  { %v3499_v20 = vpop.permute.xlu0 %3498  ;;  %v3504_v31 = vpop.permute.xlu1 %3503 }
  0xa1   :  { %v3501_v26 = vunpack.i.h.bf16 %v3499_v20  ;;  %v3500_v27 = vunpack.i.l.bf16 %v3499_v20  ;;  %v3506_v41 = vunpack.i.h.bf16 %v3504_v31  ;;  %v3505_v42 = vunpack.i.l.bf16 %v3504_v31 }
  0xa3   :  { %v1290_v33 = vsel %vm1286_vm5, %v3500_v27, %v3501_v26  ;;  %v1289_v40 = vsel %vm1286_vm5, %v1271_v19, %v3500_v27  ;;  %v1292_v48 = vsel %vm1286_vm5, %v3505_v42, %v3506_v41  ;;  %v1291_v56 = vsel %vm1286_vm5, %v3501_v26, %v3505_v42 }
  0xa4   :  { %3329 = vmatmul.mubr.msk.bf16.vlgmr.msra.gmra.mxu0 %vm107_vm2, %v3600_v2  ;;  %3331 = vmatmul.mubr.msk.bf16.vlgmr.msra.gmra.mxu1 %vm107_vm2, %v3600_v2  ;;  %v964_v2 = vsel %vm958_vm4, %v3485_v59, %v3486_v58  ;;  %v3509_v34 = vpop.permute.xlu0 %3508  ;;  %v1314_v38 = vpack.c.bf16 %v1290_v33, %v1290_v33  ;;  %v1285_v45 = vpop.permute.xlu1 %1284  ;;  %v1313_v47 = vpack.c.bf16 %v1289_v40, %v1289_v40  ;;  %v3936_v33 = vld [vmem:[%s4573_s1 + $0x28] sm:$0xff]  }
  0xa5   :  { %718 = vmatpush1.bf16.msra.mxu0 %v674_v35  ;;  %761 = vmatpush1.bf16.msra.mxu1 %v680_v36  ;;  %v988_v8 = vpack.c.bf16 %v964_v2, %v964_v2  ;;  %v1020_v35 = vsel %vm111_vm1, %v989_v28, 0  ;;  %v1026_v36 = vsel %vm111_vm1, %v991_v29, 0  ;;  %v3511_v43 = vunpack.i.h.bf16 %v3509_v34 }
  0xa6   :  { %735 = vmatprep.mubr.bf16.mxu0 %v3608_v7  ;;  %778 = vmatprep.mubr.bf16.mxu1 %v3608_v7  ;;  %v3510_v44 = vunpack.i.l.bf16 %v3509_v34  ;;  %v1316_v54 = vpack.c.bf16 %v1292_v48, %v1292_v48  ;;  %v1315_v60 = vpack.c.bf16 %v1291_v56, %v1291_v56 }
  0xa7   :  { %3339 = vmatprep.subr.msk.bf16.mxu0 %vm111_vm1, %v660_v37  ;;  %3341 = vmatprep.subr.msk.bf16.mxu1 %vm111_vm1, %v662_v39  ;;  %v1312_v37 = vpack.c.bf16 %v1288_v32, %v1288_v32  ;;  %v1287_v39 = vsel %vm1286_vm5, %v3495_v30, %v3496_v25  ;;  %v1295_v11 = vsel %vm1286_vm5, %v3511_v43, %v1285_v45 }
  0xa8   :  { %v1294_v49 = vsel %vm1286_vm5, %v3510_v44, %v3511_v43  ;;  %v1319_v16 = vpack.c.bf16 %v1295_v11, %v1295_v11 }
  0xa9   :  { %v1318_v55 = vpack.c.bf16 %v1294_v49, %v1294_v49 }
  0xac   :  { %3336 = vmatmul.mubr.msk.bf16.vlgmr.msra.gmra.mxu0 %vm107_vm2, %v3601_v46  ;;  %3338 = vmatmul.mubr.msk.bf16.vlgmr.msra.gmra.mxu1 %vm107_vm2, %v3601_v46 }
  0xad   :  { %804 = vmatpush1.bf16.msra.mxu0 %v686_v50  ;;  %847 = vmatpush1.bf16.msra.mxu1 %v692_v51  ;;  %v3519_v50 = vpop.permute.xlu1 %3518  ;;  %v3888_v51 = vpop.permute.xlu0 %3513 }
  0xae   :  { %3343 = vmatprep.subr.msk.bf16.mxu0 %vm111_vm1, %v664_v57  ;;  %821 = vmatprep.mubr.bf16.mxu0 %v3608_v7  ;;  %v1293_v57 = vsel %vm1286_vm5, %v3506_v41, %v3510_v44  ;;  %v3520_v58 = vunpack.i.l.bf16 %v3519_v50  ;;  %v3516_v59 = vunpack.i.h.bf16 %v3888_v51  ;;  %v3515_v62 = vunpack.i.l.bf16 %v3888_v51 }
  0xaf   :  { %864 = vmatprep.mubr.bf16.mxu1 %v3608_v7  ;;  %3348 = vmatprep.subr.msk.bf16.mxu1 %vm111_vm1, %v984_v53  ;;  %v1336_v53 = vsel %vm111_vm1, %v1313_v47, 0  ;;  %v1317_v61 = vpack.c.bf16 %v1293_v57, %v1293_v57  ;;  %v3521_v0 = vunpack.i.h.bf16 %v3519_v50 }
  0xb0   :  { %v1616_v2 = vsel %vm1614_vm6, %v3516_v59, %v3520_v58  ;;  %v1615_v14 = vsel %vm1614_vm6, %v3515_v62, %v3516_v59 }
  0xb1   :  { %v1640_v1 = vpack.c.bf16 %v1616_v2, %v1616_v2  ;;  %v1603_v10 = vpop.permute.xlu0 %1602  ;;  %v1639_v17 = vpack.c.bf16 %v1615_v14, %v1615_v14  ;;  %v1617_v24 = vsel %vm1614_vm6, %v3520_v58, %v3521_v0 }
  0xb4   :  { %3340 = vmatmul.mubr.msk.bf16.vlgmr.msra.gmra.mxu0 %vm107_vm2, %v3601_v46  ;;  %3342 = vmatmul.mubr.msk.bf16.vlgmr.msra.gmra.mxu1 %vm107_vm2, %v3601_v46 }
  0xb5   :  { %890 = vmatpush1.bf16.msra.mxu0 %v698_v4  ;;  %1046 = vmatpush1.bf16.msra.mxu1 %v1002_v5  ;;  %v3524_v4 = vpop.permute.xlu1 %3523  ;;  %v1342_v5 = vsel %vm111_vm1, %v1315_v60, 0  ;;  %v3529_v19 = vpop.permute.xlu0 %3528 }
  0xb6   :  { %3350 = vmatprep.subr.msk.bf16.mxu0 %vm111_vm1, %v986_v3  ;;  %907 = vmatprep.mubr.bf16.mxu0 %v3608_v7  ;;  %v1307_v3 = vsel %vm1286_vm5, %v1285_v45, %v3495_v30  ;;  %v3526_v13 = vunpack.i.h.bf16 %v3524_v4  ;;  %v3525_v15 = vunpack.i.l.bf16 %v3524_v4  ;;  %v3531_v27 = vunpack.i.h.bf16 %v3529_v19  ;;  %v2907_v4 = vld [vmem:[%s4574_s2 + $0x8] sm:$0xff] }
  0xb7   :  { %1063 = vmatprep.mubr.bf16.mxu1 %v3608_v7  ;;  %3352 = vmatprep.subr.msk.bf16.mxu1 %vm111_vm1, %v988_v8  ;;  %v1348_v8 = vsel %vm111_vm1, %v1317_v61, 0  ;;  %v1320_v12 = vpack.c.bf16 %v1307_v3, %v1307_v3  ;;  %v3530_v28 = vunpack.i.l.bf16 %v3529_v19  ;;  %v1641_v30 = vpack.c.bf16 %v1617_v24, %v1617_v24 }
  0xb8   :  { %v1620_v20 = vsel %vm1614_vm6, %v3525_v15, %v3526_v13  ;;  %v1619_v23 = vsel %vm1614_vm6, %v1603_v10, %v3525_v15  ;;  %2915 = vperm.xlu1 %3593, %v2907_v4  }
  0xb9   :  { %v3923_v25 = vpop.permute.xlu0 %3533  ;;  %v1613_v26 = vpop.permute.xlu1 %1612  ;;  %v1643_v29 = vpack.c.bf16 %v1619_v23, %v1619_v23  ;;  %v1622_v32 = vsel %vm1614_vm6, %v3530_v28, %v3531_v27  ;;  %v1621_v40 = vsel %vm1614_vm6, %v3526_v13, %v3530_v28 }
  0xba   :  { %v1635_v31 = vsel %vm1614_vm6, %v1613_v26, %v3515_v62  ;;  %v1623_v41 = vsel %vm1614_vm6, %v3531_v27, %v1613_v26  ;;  %v3536_v42 = vunpack.i.h.bf16 %v3923_v25  ;;  %v1645_v45 = vpack.c.bf16 %v1621_v40, %v1621_v40 }
  0xbb   :  { %v3535_v47 = vunpack.i.l.bf16 %v3923_v25 }
  0xbc   :  { %3344 = vmatmul.mubr.msk.bf16.vlgmr.msra.gmra.mxu0 %vm107_vm2, %v3601_v46  ;;  %3349 = vmatmul.mubr.msk.bf16.vlgmr.msra.gmra.mxu1 %vm107_vm2, %v3602_v18  ;;  %v1311_v46 = vpack.c.bf16 %v1287_v39, %v1287_v39  ;;  %v1646_v39 = vpack.c.bf16 %v1622_v32, %v1622_v32 }
  0xbd   :  { %1089 = vmatpush1.bf16.msra.mxu0 %v1008_v6  ;;  %1132 = vmatpush1.bf16.msra.mxu1 %v1014_v22  ;;  %v1354_v6 = vsel %vm111_vm1, %v1319_v16, 0  ;;  %v1658_v22 = vsel %vm111_vm1, %v1639_v17, 0  ;;  %v1927_v34 = vpop.permute.xlu1 %1926  ;;  %v1943_v56 = vsel %vm1942_vm7, %v3535_v47, %v3536_v42 }
  0xbe   :  { %3356 = vmatprep.subr.msk.bf16.mxu1 %vm111_vm1, %v992_v21  ;;  %1106 = vmatprep.mubr.bf16.mxu0 %v3608_v7  ;;  %v1330_v52 = vsel %vm111_vm1, %v1311_v46, 0  ;;  %v1647_v46 = vpack.c.bf16 %v1623_v41, %v1623_v41  ;;  %v1944_v49 = vsel %vm1942_vm7, %v3536_v42, %v1927_v34  ;;  %v1967_v2 = vpack.c.bf16 %v1943_v56, %v1943_v56 }
  0xbf   :  { %1149 = vmatprep.mubr.bf16.mxu1 %v3608_v7  ;;  %3354 = vmatprep.subr.msk.bf16.mxu0 %vm111_vm1, %v990_v9  ;;  %v1644_v9 = vpack.c.bf16 %v1620_v20, %v1620_v20 }
  0xc1   :  { %v3544_v48 = vpop.permute.xlu1 %3543 }
  0xc2   :  { %v3546_v58 = vunpack.i.h.bf16 %v3544_v48  ;;  %v3545_v59 = vunpack.i.l.bf16 %v3544_v48 }
  0xc4   :  { %3351 = vmatmul.mubr.msk.bf16.vlgmr.msra.gmra.mxu0 %vm107_vm2, %v3602_v18  ;;  %3353 = vmatmul.mubr.msk.bf16.vlgmr.msra.gmra.mxu1 %vm107_vm2, %v3602_v18 }
  0xc5   :  { %1175 = vmatpush1.bf16.msra.mxu0 %v1020_v35  ;;  %1218 = vmatpush1.bf16.msra.mxu1 %v1026_v36  ;;  %v3539_v35 = vpop.permute.xlu0 %3538  ;;  %v1648_v36 = vpack.c.bf16 %v1635_v31, %v1635_v31  ;;  %v1941_v62 = vpop.permute.xlu1 %1940 }
  0xc6   :  { %1192 = vmatprep.mubr.bf16.mxu0 %v3608_v7  ;;  %1235 = vmatprep.mubr.bf16.mxu1 %v3608_v7  ;;  %v3541_v43 = vunpack.i.h.bf16 %v3539_v35  ;;  %v3540_v44 = vunpack.i.l.bf16 %v3539_v35 }
  0xc7   :  { %3361 = vmatprep.subr.msk.bf16.mxu0 %vm111_vm1, %v1312_v37  ;;  %3363 = vmatprep.subr.msk.bf16.mxu1 %vm111_vm1, %v1314_v38  ;;  %v1664_v37 = vsel %vm111_vm1, %v1641_v30, 0  ;;  %v1670_v38 = vsel %vm111_vm1, %v1643_v29, 0 }
  0xc8   :  { %v1946_v50 = vsel %vm1942_vm7, %v3540_v44, %v3541_v43  ;;  %v1945_v57 = vsel %vm1942_vm7, %v1927_v34, %v3540_v44  ;;  %v1947_v13 = vsel %vm1942_vm7, %v3541_v43, %v3545_v59 }
  0xc9   :  { %v3549_v51 = vpop.permute.xlu0 %3548  ;;  %v1969_v3 = vpack.c.bf16 %v1945_v57, %v1945_v57 }
  0xca   :  { %v3551_v60 = vunpack.i.h.bf16 %v3549_v51  ;;  %v3550_v61 = vunpack.i.l.bf16 %v3549_v51 }
  0xcb   :  { %v1992_v11 = vsel %vm111_vm1, %v1969_v3, 0 }
  0xcc   :  { %3355 = vmatmul.mubr.msk.bf16.vlgmr.msra.gmra.mxu0 %vm107_vm2, %v3602_v18  ;;  %3357 = vmatmul.mubr.msk.bf16.vlgmr.msra.gmra.mxu1 %vm107_vm2, %v3602_v18  ;;  %v1618_v18 = vsel %vm1614_vm6, %v3521_v0, %v1603_v10  ;;  %v3559_v0 = vpop.permute.xlu1 %3558  ;;  %v1986_v10 = vsel %vm111_vm1, %v1967_v2, 0  ;;  %v1949_v15 = vsel %vm1942_vm7, %v3546_v58, %v3550_v61  ;;  %v1951_v28 = vsel %vm1942_vm7, %v3551_v60, %v1941_v62 }
  0xcd   :  { %1374 = vmatpush1.bf16.msra.mxu0 %v1330_v52  ;;  %1417 = vmatpush1.bf16.msra.mxu1 %v1336_v53  ;;  %v1642_v21 = vpack.c.bf16 %v1618_v18, %v1618_v18  ;;  %v1676_v52 = vsel %vm111_vm1, %v1645_v45, 0  ;;  %v1682_v53 = vsel %vm111_vm1, %v1647_v46, 0  ;;  %v3560_v16 = vunpack.i.l.bf16 %v3559_v0 }
  0xce   :  { %1391 = vmatprep.mubr.bf16.mxu0 %v3608_v7  ;;  %1434 = vmatprep.mubr.bf16.mxu1 %v3608_v7  ;;  %v1971_v18 = vpack.c.bf16 %v1947_v13, %v1947_v13  ;;  %v1973_v19 = vpack.c.bf16 %v1949_v15, %v1949_v15  ;;  %v3561_v25 = vunpack.i.h.bf16 %v3559_v0 }
  0xcf   :  { %3365 = vmatprep.subr.msk.bf16.mxu0 %vm111_vm1, %v1316_v54  ;;  %3367 = vmatprep.subr.msk.bf16.mxu1 %vm111_vm1, %v1318_v55  ;;  %v1968_v54 = vpack.c.bf16 %v1944_v49, %v1944_v49  ;;  %v1970_v55 = vpack.c.bf16 %v1946_v50, %v1946_v50 }
  0xd0   :  { %v1998_v23 = vsel %vm111_vm1, %v1971_v18, 0  ;;  %v2004_v24 = vsel %vm111_vm1, %v1973_v19, 0  ;;  %v2273_v43 = vsel %vm2270_vm8, %v3560_v16, %v3561_v25 }
  0xd1   :  { %v2297_v49 = vpack.c.bf16 %v2273_v43, %v2273_v43 }
  0xd4   :  { %3362 = vmatmul.mubr.msk.bf16.vlgmr.msra.gmra.mxu0 %vm107_vm2, %v3603_v63  ;;  %3364 = vmatmul.mubr.msk.bf16.vlgmr.msra.gmra.mxu1 %vm107_vm2, %v3603_v63 }
  0xd5   :  { %1460 = vmatpush1.bf16.msra.mxu0 %v1342_v5  ;;  %1503 = vmatpush1.bf16.msra.mxu1 %v1348_v8  ;;  %v1948_v5 = vsel %vm1942_vm7, %v3545_v59, %v3546_v58  ;;  %v1950_v8 = vsel %vm1942_vm7, %v3550_v61, %v3551_v60 }
  0xd6   :  { %3369 = vmatprep.subr.msk.bf16.mxu0 %vm111_vm1, %v1320_v12  ;;  %1477 = vmatprep.mubr.bf16.mxu0 %v3608_v7  ;;  %v1972_v14 = vpack.c.bf16 %v1948_v5, %v1948_v5  ;;  %v1974_v12 = vpack.c.bf16 %v1950_v8, %v1950_v8 }
  0xd7   :  { %1520 = vmatprep.mubr.bf16.mxu1 %v3608_v7  ;;  %3374 = vmatprep.subr.msk.bf16.mxu1 %vm111_vm1, %v1640_v1  ;;  %v3973_v1 = vpop.permute.xlu0 %3553 }
  0xd8   :  { %v3556_v17 = vunpack.i.h.bf16 %v3973_v1  ;;  %v3555_v20 = vunpack.i.l.bf16 %v3973_v1 }
  0xda   :  { %v2271_v29 = vsel %vm2270_vm8, %v3555_v20, %v3556_v17 }
  0xdb   :  { %v2259_v27 = vpop.permute.xlu0 %2258  ;;  %v2295_v34 = vpack.c.bf16 %v2271_v29, %v2271_v29 }
  0xdc   :  { %3366 = vmatmul.mubr.msk.bf16.vlgmr.msra.gmra.mxu0 %vm107_vm2, %v3603_v63  ;;  %3368 = vmatmul.mubr.msk.bf16.vlgmr.msra.gmra.mxu1 %vm107_vm2, %v3603_v63  ;;  %v2274_v35 = vsel %vm2270_vm8, %v3561_v25, %v2259_v27 }
  0xdd   :  { %1546 = vmatpush1.bf16.msra.mxu0 %v1354_v6  ;;  %1702 = vmatpush1.bf16.msra.mxu1 %v1658_v22  ;;  %v2272_v6 = vsel %vm2270_vm8, %v3556_v17, %v3560_v16  ;;  %v1963_v22 = vsel %vm1942_vm7, %v1941_v62, %v3535_v47  ;;  %v2314_v40 = vsel %vm111_vm1, %v2295_v34, 0 }
  0xde   :  { %3376 = vmatprep.subr.msk.bf16.mxu0 %vm111_vm1, %v1642_v21  ;;  %1563 = vmatprep.mubr.bf16.mxu0 %v3608_v7  ;;  %v3605_v21 = vld [vmem:[%s4573_s1 + $0x30] sm:$0xff]   ;;  %v2296_v26 = vpack.c.bf16 %v2272_v6, %v2272_v6  ;;  %v1976_v30 = vpack.c.bf16 %v1963_v22, %v1963_v22 }
  0xdf   :  { %1719 = vmatprep.mubr.bf16.mxu1 %v3608_v7  ;;  %3378 = vmatprep.subr.msk.bf16.mxu1 %vm111_vm1, %v1644_v9  ;;  %v3564_v9 = vpop.permute.xlu1 %3563 }
  0xe0   :  { %v3566_v31 = vunpack.i.h.bf16 %v3564_v9  ;;  %v3565_v32 = vunpack.i.l.bf16 %v3564_v9 }
  0xe2   :  { %v2275_v42 = vsel %vm2270_vm8, %v2259_v27, %v3565_v32 }
  0xe3   :  { %v2269_v45 = vpop.permute.xlu1 %2268  ;;  %v2299_v48 = vpack.c.bf16 %v2275_v42, %v2275_v42 }
  0xe4   :  { %3370 = vmatmul.mubr.msk.bf16.vlgmr.msra.gmra.mxu0 %vm107_vm2, %v3603_v63  ;;  %3375 = vmatmul.mubr.msk.bf16.vlgmr.msra.gmra.mxu1 %vm107_vm2, %v3936_v33  ;;  %v2906_v63 = vld [vmem:[%s4574_s2] sm:$0xff]  ;;  %v2291_v50 = vsel %vm2270_vm8, %v2269_v45, %v3555_v20 }
  0xe5   :  { %1745 = vmatpush1.bf16.msra.mxu0 %v1664_v37  ;;  %1788 = vmatpush1.bf16.msra.mxu1 %v1670_v38  ;;  %v2276_v37 = vsel %vm2270_vm8, %v3565_v32, %v3566_v31  ;;  %v2298_v38 = vpack.c.bf16 %v2274_v35, %v2274_v35  ;;  %v2326_v56 = vsel %vm111_vm1, %v2299_v48, 0 }
  0xe6   :  { %3382 = vmatprep.subr.msk.bf16.mxu1 %vm111_vm1, %v1648_v36  ;;  %1762 = vmatprep.mubr.bf16.mxu0 %v3608_v7  ;;  %v3569_v36 = vpop.permute.xlu0 %3568  ;;  %v2300_v41 = vpack.c.bf16 %v2276_v37, %v2276_v37 }
  0xe7   :  { %1805 = vmatprep.mubr.bf16.mxu1 %v3608_v7  ;;  %3380 = vmatprep.subr.msk.bf16.mxu0 %vm111_vm1, %v1646_v39  ;;  %v3571_v46 = vunpack.i.h.bf16 %v3569_v36  ;;  %v3570_v47 = vunpack.i.l.bf16 %v3569_v36 }
  0xe8   :  { %2910 = vperm.xlu0 %3592, %v2906_v63   ;;  %v2583_v63 = vpop.permute.xlu1 %2582 }
  0xe9   :  { %v2278_v51 = vsel %vm2270_vm8, %v3570_v47, %v3571_v46  ;;  %v2277_v58 = vsel %vm2270_vm8, %v3566_v31, %v3570_v47  ;;  %v2279_v59 = vsel %vm2270_vm8, %v3571_v46, %v2269_v45  ;;  %v3607_v31 = vld [vmem:[%s4573_s1 + $0x40] sm:$0xff]  }
  0xea   :  { %v4010_v44 = vpop.permute.xlu0 %3573  ;;  %v2302_v57 = vpack.c.bf16 %v2278_v51, %v2278_v51  ;;  %v2301_v2 = vpack.c.bf16 %v2277_v58, %v2277_v58  ;;  %v2303_v3 = vpack.c.bf16 %v2279_v59, %v2279_v59 }
  0xeb   :  { %v3576_v60 = vunpack.i.h.bf16 %v4010_v44  ;;  %v3575_v4 = vunpack.i.l.bf16 %v4010_v44 }
  0xec   :  { %3377 = vmatmul.mubr.msk.bf16.vlgmr.msra.gmra.mxu0 %vm107_vm2, %v3936_v33  ;;  %3379 = vmatmul.mubr.msk.bf16.vlgmr.msra.gmra.mxu1 %vm107_vm2, %v3936_v33  ;;  %v2332_v1 = vsel %vm111_vm1, %v2301_v2, 0 }
  0xed   :  { %1831 = vmatpush1.bf16.msra.mxu0 %v1676_v52  ;;  %1874 = vmatpush1.bf16.msra.mxu1 %v1682_v53  ;;  %v3606_v52 = vld [vmem:[%s4573_s1 + $0x38] sm:$0xff]   ;;  %v2600_v5 = vsel %vm2598_vm9, %v3576_v60, %v2583_v63  ;;  %v2599_v13 = vsel %vm2598_vm9, %v3575_v4, %v3576_v60 }
  0xee   :  { %1848 = vmatprep.mubr.bf16.mxu0 %v3608_v7  ;;  %1891 = vmatprep.mubr.bf16.mxu1 %v3608_v7  ;;  %v3579_v53 = vpop.permute.xlu0 %3578  ;;  %v2623_v20 = vpack.c.bf16 %v2599_v13, %v2599_v13 }
  0xef   :  { %3387 = vmatprep.subr.msk.bf16.mxu0 %vm111_vm1, %v1968_v54  ;;  %3389 = vmatprep.subr.msk.bf16.mxu1 %vm111_vm1, %v1970_v55  ;;  %v2304_v54 = vpack.c.bf16 %v2291_v50, %v2291_v50  ;;  %v2320_v55 = vsel %vm111_vm1, %v2297_v49, 0  ;;  %v3581_v61 = vunpack.i.h.bf16 %v3579_v53  ;;  %v3580_v62 = vunpack.i.l.bf16 %v3579_v53 }
  0xf0   :  { %v2642_v9 = vsel %vm111_vm1, %v2623_v20, 0 }
  0xf1   :  { %v2602_v8 = vsel %vm2598_vm9, %v3580_v62, %v3581_v61  ;;  %v2601_v15 = vsel %vm2598_vm9, %v2583_v63, %v3580_v62 }
  0xf2   :  { %v3589_v0 = vpop.permute.xlu0 %3588 }
  0xf3   :  { %v3591_v18 = vunpack.i.h.bf16 %v3589_v0  ;;  %v3590_v19 = vunpack.i.l.bf16 %v3589_v0 }
  0xf4   :  { %3381 = vmatmul.mubr.msk.bf16.vlgmr.msra.gmra.mxu0 %vm107_vm2, %v3936_v33  ;;  %3383 = vmatmul.mubr.msk.bf16.vlgmr.msra.gmra.mxu1 %vm107_vm2, %v3936_v33  ;;  %v1975_v33 = vpack.c.bf16 %v1951_v28, %v1951_v28 }
  0xf5   :  { %2030 = vmatpush1.bf16.msra.mxu0 %v1986_v10  ;;  %2073 = vmatpush1.bf16.msra.mxu1 %v1992_v11  ;;  %v2338_v10 = vsel %vm111_vm1, %v2303_v3, 0  ;;  %v2624_v11 = vpack.c.bf16 %v2600_v5, %v2600_v5  ;;  %v2606_v22 = vsel %vm2598_vm9, %v3590_v19, %v3591_v18 }
  0xf6   :  { %2047 = vmatprep.mubr.bf16.mxu0 %v3608_v7  ;;  %2090 = vmatprep.mubr.bf16.mxu1 %v3608_v7  ;;  %v2010_v39 = vsel %vm111_vm1, %v1975_v33, 0  ;;  %v2630_v25 = vpack.c.bf16 %v2606_v22, %v2606_v22 }
  0xf7   :  { %3391 = vmatprep.subr.msk.bf16.mxu0 %vm111_vm1, %v1972_v14  ;;  %3393 = vmatprep.subr.msk.bf16.mxu1 %vm111_vm1, %v1974_v12  ;;  %v3584_v14 = vpop.permute.xlu1 %3583  ;;  %v2626_v12 = vpack.c.bf16 %v2602_v8, %v2602_v8 }
  0xf8   :  { %v3586_v16 = vunpack.i.h.bf16 %v3584_v14  ;;  %v3585_v17 = vunpack.i.l.bf16 %v3584_v14 }
  0xfa   :  { %v2604_v6 = vsel %vm2598_vm9, %v3585_v17, %v3586_v16  ;;  %v2605_v27 = vsel %vm2598_vm9, %v3586_v16, %v3590_v19 }
  0xfb   :  { %v2597_v28 = vpop.permute.xlu1 %2596 }
  0xfc   :  { %3388 = vmatmul.mubr.msk.bf16.vlgmr.msra.gmra.mxu0 %vm107_vm2, %v3605_v21  ;;  %3390 = vmatmul.mubr.msk.bf16.vlgmr.msra.gmra.mxu1 %vm107_vm2, %v3605_v21  ;;  %v2619_v32 = vsel %vm2598_vm9, %v2597_v28, %v3575_v4  ;;  %v2607_v35 = vsel %vm2598_vm9, %v3591_v18, %v2597_v28 }
  0xfd   :  { %2116 = vmatpush1.bf16.msra.mxu0 %v1998_v23  ;;  %2159 = vmatpush1.bf16.msra.mxu1 %v2004_v24  ;;  %v2628_v24 = vpack.c.bf16 %v2604_v6, %v2604_v6  ;;  %v2632_v36 = vpack.c.bf16 %v2619_v32, %v2619_v32  ;;  %v2631_v37 = vpack.c.bf16 %v2607_v35, %v2607_v35 }
  0xfe   :  { %3395 = vmatprep.subr.msk.bf16.mxu0 %vm111_vm1, %v1976_v30  ;;  %2133 = vmatprep.mubr.bf16.mxu0 %v3608_v7  ;;  %v2629_v30 = vpack.c.bf16 %v2605_v27, %v2605_v27 }
  0xff   :  { %2176 = vmatprep.mubr.bf16.mxu1 %v3608_v7  ;;  %3400 = vmatprep.subr.msk.bf16.mxu1 %vm111_vm1, %v2296_v26  ;;  %v2603_v26 = vsel %vm2598_vm9, %v3581_v61, %v3585_v17 }
 0x100   :  { %v2627_v29 = vpack.c.bf16 %v2603_v26, %v2603_v26  ;;  %v2660_v34 = vsel %vm111_vm1, %v2629_v30, 0 }
 0x102   :  { %v2654_v33 = vsel %vm111_vm1, %v2627_v29, 0 }
 0x104   :  { %3392 = vmatmul.mubr.msk.bf16.vlgmr.msra.gmra.mxu0 %vm107_vm2, %v3605_v21  ;;  %3394 = vmatmul.mubr.msk.bf16.vlgmr.msra.gmra.mxu1 %vm107_vm2, %v3605_v21 }
 0x105   :  { %2202 = vmatpush1.bf16.msra.mxu0 %v2010_v39  ;;  %2358 = vmatpush1.bf16.msra.mxu1 %v2314_v40 }
 0x106   :  { %3402 = vmatprep.subr.msk.bf16.mxu0 %vm111_vm1, %v2298_v38  ;;  %2219 = vmatprep.mubr.bf16.mxu0 %v3608_v7  ;;  %v2666_v38 = vsel %vm111_vm1, %v2631_v37, 0 }
 0x107   :  { %2375 = vmatprep.mubr.bf16.mxu1 %v3608_v7  ;;  %3404 = vmatprep.subr.msk.bf16.mxu1 %vm111_vm1, %v2300_v41 }
 0x10c   :  { %3396 = vmatmul.mubr.msk.bf16.vlgmr.msra.gmra.mxu0 %vm107_vm2, %v3605_v21  ;;  %3401 = vmatmul.mubr.msk.bf16.vlgmr.msra.gmra.mxu1 %vm107_vm2, %v3606_v52  ;;  %v2625_v21 = vpack.c.bf16 %v2601_v15, %v2601_v15 }
 0x10d   :  { %2401 = vmatpush1.bf16.msra.mxu0 %v2320_v55  ;;  %2444 = vmatpush1.bf16.msra.mxu1 %v2326_v56 }
 0x10e   :  { %3408 = vmatprep.subr.msk.bf16.mxu1 %vm111_vm1, %v2304_v54  ;;  %2418 = vmatprep.mubr.bf16.mxu0 %v3608_v7  ;;  %v2648_v23 = vsel %vm111_vm1, %v2625_v21, 0 }
 0x10f   :  { %2461 = vmatprep.mubr.bf16.mxu1 %v3608_v7  ;;  %3406 = vmatprep.subr.msk.bf16.mxu0 %vm111_vm1, %v2302_v57 }
 0x114   :  { %3403 = vmatmul.mubr.msk.bf16.vlgmr.msra.gmra.mxu0 %vm107_vm2, %v3606_v52  ;;  %3405 = vmatmul.mubr.msk.bf16.vlgmr.msra.gmra.mxu1 %vm107_vm2, %v3606_v52 }
 0x115   :  { %2487 = vmatpush1.bf16.msra.mxu0 %v2332_v1  ;;  %2530 = vmatpush1.bf16.msra.mxu1 %v2338_v10 }
 0x116   :  { %2504 = vmatprep.mubr.bf16.mxu0 %v3608_v7  ;;  %2547 = vmatprep.mubr.bf16.mxu1 %v3608_v7 }
 0x117   :  { %3413 = vmatprep.subr.msk.bf16.mxu0 %vm111_vm1, %v2624_v11  ;;  %3415 = vmatprep.subr.msk.bf16.mxu1 %vm111_vm1, %v2626_v12 }
 0x11c   :  { %3407 = vmatmul.mubr.msk.bf16.vlgmr.msra.gmra.mxu0 %vm107_vm2, %v3606_v52  ;;  %3409 = vmatmul.mubr.msk.bf16.vlgmr.msra.gmra.mxu1 %vm107_vm2, %v3606_v52 }
 0x11d   :  { %2686 = vmatpush1.bf16.msra.mxu0 %v2642_v9  ;;  %2729 = vmatpush1.bf16.msra.mxu1 %v2648_v23 }
 0x11e   :  { %2703 = vmatprep.mubr.bf16.mxu0 %v3608_v7  ;;  %2746 = vmatprep.mubr.bf16.mxu1 %v3608_v7 }
 0x11f   :  { %3417 = vmatprep.subr.msk.bf16.mxu0 %vm111_vm1, %v2628_v24  ;;  %3419 = vmatprep.subr.msk.bf16.mxu1 %vm111_vm1, %v2630_v25 }
 0x124   :  { %3414 = vmatmul.mubr.msk.bf16.vlgmr.msra.gmra.mxu0 %vm107_vm2, %v3607_v31  ;;  %3416 = vmatmul.mubr.msk.bf16.vlgmr.msra.gmra.mxu1 %vm107_vm2, %v3607_v31 }
 0x125   :  { %2772 = vmatpush1.bf16.msra.mxu0 %v2654_v33  ;;  %2815 = vmatpush1.bf16.msra.mxu1 %v2660_v34 }
 0x126   :  { %3421 = vmatprep.subr.msk.bf16.mxu0 %vm111_vm1, %v2632_v36  ;;  %2789 = vmatprep.mubr.bf16.mxu0 %v3608_v7 }
 0x127   :  { %2832 = vmatprep.mubr.bf16.mxu1 %v3608_v7 }
 0x12c   :  { %3418 = vmatmul.mubr.msk.bf16.vlgmr.msra.gmra.mxu0 %vm107_vm2, %v3607_v31  ;;  %3420 = vmatmul.mubr.msk.bf16.vlgmr.msra.gmra.mxu1 %vm107_vm2, %v3607_v31 }
 0x12d   :  { %2858 = vmatpush1.bf16.msra.mxu0 %v2666_v38  ;;  %2875 = vmatprep.mubr.bf16.mxu0 %v3608_v7 }
 0x134   :  { %3422 = vmatmul.mubr.msk.bf16.vlgmr.msra.gmra.mxu0 %vm107_vm2, %v3607_v31 }
 0x144   :  { %v176_v39 = vpop.f32.mrf.mxu0  ;;  %v219_v40 = vpop.f32.mrf.mxu1 }
 0x146   :  { %v178_v41 = vpop.f32.mrf.mxu0  ;;  %v221_v42 = vpop.f32.mrf.mxu1 }
 0x148   :  { %v180_v43 = vpop.f32.mrf.mxu0  ;;  %v223_v44 = vpop.f32.mrf.mxu1 }
 0x14a   :  { %v182_v45 = vpop.f32.mrf.mxu0  ;;  %v225_v46 = vpop.f32.mrf.mxu1 }
 0x14c   :  { %v262_v47 = vpop.f32.mrf.mxu0  ;;  %v305_v48 = vpop.f32.mrf.mxu1 }
 0x14e   :  { %v264_v49 = vpop.f32.mrf.mxu0  ;;  %v307_v50 = vpop.f32.mrf.mxu1 }
 0x150   :  { %v266_v51 = vpop.f32.mrf.mxu0  ;;  %v309_v52 = vpop.f32.mrf.mxu1 }
 0x152   :  { %v268_v53 = vpop.f32.mrf.mxu0  ;;  %v311_v54 = vpop.f32.mrf.mxu1 }
 0x154   :  { %v348_v55 = vpop.f32.mrf.mxu0  ;;  %v429_v7 = vpop.f32.mrf.mxu1 }
 0x155   :  { %v430_v56 = vadd.f32 %v429_v7, %v176_v39 }
 0x156   :  { %v350_v57 = vpop.f32.mrf.mxu0  ;;  %v431_v58 = vpop.f32.mrf.mxu1 }
 0x157   :  { %v432_v59 = vadd.f32 %v431_v58, %v178_v41 }
 0x158   :  { %v352_v60 = vpop.f32.mrf.mxu0  ;;  %v433_v61 = vpop.f32.mrf.mxu1 }
 0x159   :  { %v434_v62 = vadd.f32 %v433_v61, %v180_v43 }
 0x15a   :  { %v354_v63 = vpop.f32.mrf.mxu0  ;;  %v435_v2 = vpop.f32.mrf.mxu1 }
 0x15b   :  { %v436_v3 = vadd.f32 %v435_v2, %v182_v45 }
 0x15c   :  { %v472_v4 = vpop.f32.mrf.mxu0  ;;  %v515_v5 = vpop.f32.mrf.mxu1 }
 0x15d   :  { %v473_v8 = vadd.f32 %v472_v4, %v219_v40  ;;  %v516_v0 = vadd.f32 %v515_v5, %v262_v47 }
 0x15e   :  { %v474_v1 = vpop.f32.mrf.mxu0  ;;  %v517_v10 = vpop.f32.mrf.mxu1 }
 0x15f   :  { %v475_v11 = vadd.f32 %v474_v1, %v221_v42  ;;  %v518_v14 = vadd.f32 %v517_v10, %v264_v49 }
 0x160   :  { %v476_v12 = vpop.f32.mrf.mxu0  ;;  %v519_v13 = vpop.f32.mrf.mxu1 }
 0x161   :  { %v477_v15 = vadd.f32 %v476_v12, %v223_v44  ;;  %v520_v16 = vadd.f32 %v519_v13, %v266_v51 }
 0x162   :  { %v478_v17 = vpop.f32.mrf.mxu0  ;;  %v521_v18 = vpop.f32.mrf.mxu1 }
 0x163   :  { %v479_v19 = vadd.f32 %v478_v17, %v225_v46  ;;  %v522_v20 = vadd.f32 %v521_v18, %v268_v53 }
 0x164   :  { %v558_v21 = vpop.f32.mrf.mxu0  ;;  %v601_v6 = vpop.f32.mrf.mxu1 }
 0x165   :  { %v559_v22 = vadd.f32 %v558_v21, %v305_v48  ;;  %v602_v9 = vadd.f32 %v601_v6, %v348_v55 }
 0x166   :  { %v560_v23 = vpop.f32.mrf.mxu0  ;;  %v603_v24 = vpop.f32.mrf.mxu1 }
 0x167   :  { %v561_v25 = vadd.f32 %v560_v23, %v307_v50  ;;  %v604_v26 = vadd.f32 %v603_v24, %v350_v57 }
 0x168   :  { %v562_v27 = vpop.f32.mrf.mxu0  ;;  %v605_v28 = vpop.f32.mrf.mxu1 }
 0x169   :  { %v563_v29 = vadd.f32 %v562_v27, %v309_v52  ;;  %v606_v30 = vadd.f32 %v605_v28, %v352_v60 }
 0x16a   :  { %v564_v31 = vpop.f32.mrf.mxu0  ;;  %v607_v32 = vpop.f32.mrf.mxu1 }
 0x16b   :  { %v565_v33 = vadd.f32 %v564_v31, %v311_v54  ;;  %v608_v34 = vadd.f32 %v607_v32, %v354_v63 }
 0x16c   :  { %v737_v35 = vpop.f32.mrf.mxu0  ;;  %v780_v36 = vpop.f32.mrf.mxu1 }
 0x16d   :  { %v918_v37 = vadd.f32 %v737_v35, %v430_v56  ;;  %v920_v38 = vadd.f32 %v780_v36, %v473_v8 }
 0x16e   :  { %v739_v39 = vpop.f32.mrf.mxu0  ;;  %v782_v40 = vpop.f32.mrf.mxu1 }
 0x16f   :  { %v919_v41 = vadd.f32 %v739_v39, %v432_v59  ;;  %v921_v42 = vadd.f32 %v782_v40, %v475_v11 }
 0x170   :  { %v741_v43 = vpop.f32.mrf.mxu0  ;;  %v784_v44 = vpop.f32.mrf.mxu1 }
 0x171   :  { %v928_v45 = vadd.f32 %v741_v43, %v434_v62  ;;  %v930_v46 = vadd.f32 %v784_v44, %v477_v15 }
 0x172   :  { %v743_v47 = vpop.f32.mrf.mxu0  ;;  %v786_v48 = vpop.f32.mrf.mxu1 }
 0x173   :  { %v929_v49 = vadd.f32 %v743_v47, %v436_v3  ;;  %v931_v50 = vadd.f32 %v786_v48, %v479_v19 }
 0x174   :  { %v823_v51 = vpop.f32.mrf.mxu0  ;;  %v866_v52 = vpop.f32.mrf.mxu1 }
 0x175   :  { %v922_v53 = vadd.f32 %v823_v51, %v516_v0  ;;  %v924_v54 = vadd.f32 %v866_v52, %v559_v22 }
 0x176   :  { %v825_v55 = vpop.f32.mrf.mxu0  ;;  %v868_v7 = vpop.f32.mrf.mxu1 }
 0x177   :  { %v923_v56 = vadd.f32 %v825_v55, %v518_v14  ;;  %v925_v57 = vadd.f32 %v868_v7, %v561_v25 }
 0x178   :  { %v827_v58 = vpop.f32.mrf.mxu0  ;;  %v870_v60 = vpop.f32.mrf.mxu1 }
 0x179   :  { %v932_v59 = vadd.f32 %v827_v58, %v520_v16  ;;  %v934_v61 = vadd.f32 %v870_v60, %v563_v29 }
 0x17a   :  { %v829_v63 = vpop.f32.mrf.mxu0  ;;  %v872_v2 = vpop.f32.mrf.mxu1 }
 0x17b   :  { %v933_v62 = vadd.f32 %v829_v63, %v522_v20  ;;  %v935_v4 = vadd.f32 %v872_v2, %v565_v33 }
 0x17c   :  { %v909_v5 = vpop.f32.mrf.mxu0  ;;  %v1065_v8 = vpop.f32.mrf.mxu1 }
 0x17d   :  { %v926_v3 = vadd.f32 %v909_v5, %v602_v9  ;;  %v1246_v1 = vadd.f32 %v1065_v8, %v918_v37 }
 0x17e   :  { %v911_v10 = vpop.f32.mrf.mxu0  ;;  %v1067_v11 = vpop.f32.mrf.mxu1 }
 0x17f   :  { %v927_v0 = vadd.f32 %v911_v10, %v604_v26  ;;  %v1247_v12 = vadd.f32 %v1067_v11, %v919_v41 }
 0x180   :  { %v913_v13 = vpop.f32.mrf.mxu0  ;;  %v1069_v15 = vpop.f32.mrf.mxu1 }
 0x181   :  { %v936_v14 = vadd.f32 %v913_v13, %v606_v30  ;;  %v1256_v17 = vadd.f32 %v1069_v15, %v928_v45 }
 0x182   :  { %v915_v18 = vpop.f32.mrf.mxu0  ;;  %v1071_v19 = vpop.f32.mrf.mxu1 }
 0x183   :  { %v937_v16 = vadd.f32 %v915_v18, %v608_v34  ;;  %v1257_v21 = vadd.f32 %v1071_v19, %v929_v49 }
 0x184   :  { %v1108_v6 = vpop.f32.mrf.mxu0  ;;  %v1151_v22 = vpop.f32.mrf.mxu1 }
 0x185   :  { %v1248_v20 = vadd.f32 %v1108_v6, %v920_v38  ;;  %v1250_v23 = vadd.f32 %v1151_v22, %v922_v53 }
 0x186   :  { %v1110_v24 = vpop.f32.mrf.mxu0  ;;  %v1153_v25 = vpop.f32.mrf.mxu1 }
 0x187   :  { %v1249_v9 = vadd.f32 %v1110_v24, %v921_v42  ;;  %v1251_v27 = vadd.f32 %v1153_v25, %v923_v56 }
 0x188   :  { %v1112_v28 = vpop.f32.mrf.mxu0  ;;  %v1155_v29 = vpop.f32.mrf.mxu1 }
 0x189   :  { %v1258_v26 = vadd.f32 %v1112_v28, %v930_v46  ;;  %v1260_v31 = vadd.f32 %v1155_v29, %v932_v59 }
 0x18a   :  { %v1114_v32 = vpop.f32.mrf.mxu0  ;;  %v1157_v33 = vpop.f32.mrf.mxu1 }
 0x18b   :  { %v1259_v30 = vadd.f32 %v1114_v32, %v931_v50  ;;  %v1261_v35 = vadd.f32 %v1157_v33, %v933_v62 }
 0x18c   :  { %v1194_v36 = vpop.f32.mrf.mxu0  ;;  %v1237_v37 = vpop.f32.mrf.mxu1 }
 0x18d   :  { %v1252_v34 = vadd.f32 %v1194_v36, %v924_v54  ;;  %v1254_v39 = vadd.f32 %v1237_v37, %v926_v3 }
 0x18e   :  { %v1196_v40 = vpop.f32.mrf.mxu0  ;;  %v1239_v41 = vpop.f32.mrf.mxu1 }
 0x18f   :  { %v1253_v38 = vadd.f32 %v1196_v40, %v925_v57  ;;  %v1255_v43 = vadd.f32 %v1239_v41, %v927_v0 }
 0x190   :  { %v1198_v44 = vpop.f32.mrf.mxu0  ;;  %v1241_v45 = vpop.f32.mrf.mxu1 }
 0x191   :  { %v1262_v42 = vadd.f32 %v1198_v44, %v934_v61  ;;  %v1264_v47 = vadd.f32 %v1241_v45, %v936_v14 }
 0x192   :  { %v1200_v48 = vpop.f32.mrf.mxu0  ;;  %v1243_v49 = vpop.f32.mrf.mxu1 }
 0x193   :  { %v1263_v46 = vadd.f32 %v1200_v48, %v935_v4  ;;  %v1265_v51 = vadd.f32 %v1243_v49, %v937_v16 }
 0x194   :  { %v1393_v52 = vpop.f32.mrf.mxu0  ;;  %v1436_v53 = vpop.f32.mrf.mxu1 }
 0x195   :  { %v4076_v50 = vadd.f32 %v1393_v52, %v1246_v1  ;;  %v4078_v55 = vadd.f32 %v1436_v53, %v1248_v20 }
 0x196   :  { %v1395_v54 = vpop.f32.mrf.mxu0  ;;  %v1438_v7 = vpop.f32.mrf.mxu1 }
 0x197   :  { %v4080_v56 = vadd.f32 %v1395_v54, %v1247_v12  ;;  %v4082_v57 = vadd.f32 %v1438_v7, %v1249_v9 }
 0x198   :  { %v1397_v58 = vpop.f32.mrf.mxu0  ;;  %v1440_v60 = vpop.f32.mrf.mxu1 }
 0x199   :  { %v1584_v59 = vadd.f32 %v1397_v58, %v1256_v17  ;;  %v1586_v61 = vadd.f32 %v1440_v60, %v1258_v26 }
 0x19a   :  { %v1399_v63 = vpop.f32.mrf.mxu0  ;;  %v1442_v2 = vpop.f32.mrf.mxu1 }
 0x19b   :  { %v1585_v62 = vadd.f32 %v1399_v63, %v1257_v21  ;;  %v1587_v4 = vadd.f32 %v1442_v2, %v1259_v30 }
 0x19c   :  { %v1479_v5 = vpop.f32.mrf.mxu0  ;;  %v1522_v8 = vpop.f32.mrf.mxu1 }
 0x19d   :  { %v1578_v3 = vadd.f32 %v1479_v5, %v1250_v23  ;;  %v1580_v1 = vadd.f32 %v1522_v8, %v1252_v34 }
 0x19e   :  { %v1481_v10 = vpop.f32.mrf.mxu0  ;;  %v1524_v11 = vpop.f32.mrf.mxu1 }
 0x19f   :  { %v1579_v0 = vadd.f32 %v1481_v10, %v1251_v27  ;;  %v1581_v13 = vadd.f32 %v1524_v11, %v1253_v38 }
 0x1a0   :  { %v1483_v12 = vpop.f32.mrf.mxu0  ;;  %v1526_v15 = vpop.f32.mrf.mxu1 }
 0x1a1   :  { %v1588_v14 = vadd.f32 %v1483_v12, %v1260_v31  ;;  %v1590_v18 = vadd.f32 %v1526_v15, %v1262_v42 }
 0x1a2   :  { %v1485_v19 = vpop.f32.mrf.mxu0  ;;  %v1528_v16 = vpop.f32.mrf.mxu1 }
 0x1a3   :  { %v1589_v17 = vadd.f32 %v1485_v19, %v1261_v35  ;;  %v1591_v6 = vadd.f32 %v1528_v16, %v1263_v46 }
 0x1a4   :  { %v1565_v22 = vpop.f32.mrf.mxu0  ;;  %v4084_v20 = vpop.f32.mrf.mxu1 }
 0x1a5   :  { %v1582_v21 = vadd.f32 %v1565_v22, %v1254_v39 }
 0x1a6   :  { %v1567_v24 = vpop.f32.mrf.mxu0  ;;  %v4086_v25 = vpop.f32.mrf.mxu1 }
 0x1a7   :  { %v1583_v23 = vadd.f32 %v1567_v24, %v1255_v43 }
 0x1a8   :  { %v1569_v9 = vpop.f32.mrf.mxu0  ;;  %v1725_v28 = vpop.f32.mrf.mxu1 }
 0x1a9   :  { %v1592_v27 = vadd.f32 %v1569_v9, %v1264_v47  ;;  %v4088_v29 = vadd.f32 %v1725_v28, %v1584_v59 }
 0x1aa   :  { %v1571_v26 = vpop.f32.mrf.mxu0  ;;  %v1727_v31 = vpop.f32.mrf.mxu1 }
 0x1ab   :  { %v1593_v32 = vadd.f32 %v1571_v26, %v1265_v51  ;;  %v4090_v33 = vadd.f32 %v1727_v31, %v1585_v62 }
 0x1ac   :  { %v4092_v30 = vpop.f32.mrf.mxu0  ;;  %v1807_v35 = vpop.f32.mrf.mxu1 }
 0x1ad   :  { %v1906_v36 = vadd.f32 %v1807_v35, %v1578_v3 }
 0x1ae   :  { %v4094_v37 = vpop.f32.mrf.mxu0  ;;  %v1809_v34 = vpop.f32.mrf.mxu1 }
 0x1af   :  { %v1907_v39 = vadd.f32 %v1809_v34, %v1579_v0 }
 0x1b0   :  { %v1768_v40 = vpop.f32.mrf.mxu0  ;;  %v1811_v41 = vpop.f32.mrf.mxu1 }
 0x1b1   :  { %v4096_v38 = vadd.f32 %v1768_v40, %v1586_v61  ;;  %v1916_v43 = vadd.f32 %v1811_v41, %v1588_v14 }
 0x1b2   :  { %v1770_v44 = vpop.f32.mrf.mxu0  ;;  %v1813_v45 = vpop.f32.mrf.mxu1 }
 0x1b3   :  { %v4098_v42 = vadd.f32 %v1770_v44, %v1587_v4  ;;  %v1917_v47 = vadd.f32 %v1813_v45, %v1589_v17 }
 0x1b4   :  { %v1850_v48 = vpop.f32.mrf.mxu0  ;;  %v1893_v49 = vpop.f32.mrf.mxu1 }
 0x1b5   :  { %v1908_v46 = vadd.f32 %v1850_v48, %v1580_v1  ;;  %v1910_v51 = vadd.f32 %v1893_v49, %v1582_v21 }
 0x1b6   :  { %v1852_v52 = vpop.f32.mrf.mxu0  ;;  %v1895_v53 = vpop.f32.mrf.mxu1 }
 0x1b7   :  { %v1909_v54 = vadd.f32 %v1852_v52, %v1581_v13  ;;  %v1911_v7 = vadd.f32 %v1895_v53, %v1583_v23 }
 0x1b8   :  { %v1854_v58 = vpop.f32.mrf.mxu0  ;;  %v1897_v60 = vpop.f32.mrf.mxu1 }
 0x1b9   :  { %v1918_v59 = vadd.f32 %v1854_v58, %v1590_v18  ;;  %v1920_v63 = vadd.f32 %v1897_v60, %v1592_v27 }
 0x1ba   :  { %v1856_v61 = vpop.f32.mrf.mxu0  ;;  %v1899_v2 = vpop.f32.mrf.mxu1 }
 0x1bb   :  { %v1919_v62 = vadd.f32 %v1856_v61, %v1591_v6  ;;  %v1921_v5 = vadd.f32 %v1899_v2, %v1593_v32 }
 0x1bc   :  { %v2049_v8 = vpop.f32.mrf.mxu0  ;;  %v2092_v4 = vpop.f32.mrf.mxu1 }
 0x1be   :  { %v2051_v3 = vpop.f32.mrf.mxu0  ;;  %v2094_v10 = vpop.f32.mrf.mxu1 }
 0x1c0   :  { %v4100_v11 = vpop.f32.mrf.mxu0  ;;  %v4102_v1 = vpop.f32.mrf.mxu1 }
 0x1c2   :  { %v4104_v0 = vpop.f32.mrf.mxu0  ;;  %v4106_v13 = vpop.f32.mrf.mxu1 }
 0x1c4   :  { %v2135_v12 = vpop.f32.mrf.mxu0  ;;  %v2178_v15 = vpop.f32.mrf.mxu1 }
 0x1c5   :  { %v4108_v14 = vadd.f32 %v2135_v12, %v1906_v36  ;;  %v4110_v18 = vadd.f32 %v2178_v15, %v1908_v46  ;;  %v1903_v15 = vadd.f32 %v4086_v25, %v4080_v56 }
 0x1c6   :  { %v2137_v19 = vpop.f32.mrf.mxu0  ;;  %v2180_v16 = vpop.f32.mrf.mxu1 }
 0x1c7   :  { %v4112_v17 = vadd.f32 %v2137_v19, %v1907_v39  ;;  %v4114_v6 = vadd.f32 %v2180_v16, %v1909_v54  ;;  %v1904_v19 = vadd.f32 %v4092_v30, %v4078_v55  ;;  %v4156_v55 = vpop.permute.xlu0 %2910 }
 0x1c8   :  { %v2139_v22 = vpop.f32.mrf.mxu0  ;;  %v2182_v21 = vpop.f32.mrf.mxu1 }
 0x1c9   :  { %v2244_v24 = vadd.f32 %v2139_v22, %v1916_v43  ;;  %v2246_v23 = vadd.f32 %v2182_v21, %v1918_v59  ;;  %v1905_v21 = vadd.f32 %v4094_v37, %v4082_v57 }
 0x1ca   :  { %v2141_v9 = vpop.f32.mrf.mxu0  ;;  %v2184_v28 = vpop.f32.mrf.mxu1 }
 0x1cb   :  { %v2245_v27 = vadd.f32 %v2141_v9, %v1917_v47  ;;  %v2247_v26 = vadd.f32 %v2184_v28, %v1919_v62 }
 0x1cc   :  { %v2221_v31 = vpop.f32.mrf.mxu0  ;;  %v2377_v32 = vpop.f32.mrf.mxu1 }
 0x1cd   :  { %v2238_v35 = vadd.f32 %v2221_v31, %v1910_v51 }
 0x1ce   :  { %v2223_v36 = vpop.f32.mrf.mxu0  ;;  %v2379_v34 = vpop.f32.mrf.mxu1 }
 0x1cf   :  { %v2239_v40 = vadd.f32 %v2223_v36, %v1911_v7 }
 0x1d0   :  { %v2225_v41 = vpop.f32.mrf.mxu0  ;;  %v4116_v44 = vpop.f32.mrf.mxu1 }
 0x1d1   :  { %v2248_v39 = vadd.f32 %v2225_v41, %v1920_v63 }
 0x1d2   :  { %v2227_v45 = vpop.f32.mrf.mxu0  ;;  %v4118_v48 = vpop.f32.mrf.mxu1 }
 0x1d3   :  { %v2249_v49 = vadd.f32 %v2227_v45, %v1921_v5  ;;  %v1902_v5 = vadd.f32 %v4084_v20, %v4076_v50  ;;  %v2231_v50 = vadd.f32 %v2051_v3, %v1903_v15 }
 0x1d4   :  { %v2420_v43 = vpop.f32.mrf.mxu0  ;;  %v4120_v46 = vpop.f32.mrf.mxu1 }
 0x1d5   :  { %v2559_v37 = vadd.f32 %v2379_v34, %v2231_v50 }
 0x1d6   :  { %v2422_v52 = vpop.f32.mrf.mxu0  ;;  %v4122_v47 = vpop.f32.mrf.mxu1 }
 0x1d8   :  { %v4124_v53 = vpop.f32.mrf.mxu0  ;;  %v2467_v51 = vpop.f32.mrf.mxu1 }
 0x1d9   :  { %v4126_v54 = vadd.f32 %v2467_v51, %v2244_v24  ;;  %v2230_v24 = vadd.f32 %v2049_v8, %v1902_v5 }
 0x1da   :  { %v4128_v7 = vpop.f32.mrf.mxu0  ;;  %v2469_v58 = vpop.f32.mrf.mxu1 }
 0x1db   :  { %v4130_v60 = vadd.f32 %v2469_v58, %v2245_v27  ;;  %v2232_v27 = vadd.f32 %v2092_v4, %v1904_v19  ;;  %v2558_v36 = vadd.f32 %v2377_v32, %v2230_v24 }
 0x1dc   :  { %v4132_v59 = vpop.f32.mrf.mxu0  ;;  %v2549_v63 = vpop.f32.mrf.mxu1 }
 0x1dd   :  { %v4134_v61 = vadd.f32 %v2549_v63, %v2238_v35  ;;  %v2233_v35 = vadd.f32 %v2094_v10, %v1905_v21  ;;  %v2560_v30 = vadd.f32 %v2420_v43, %v2232_v27  ;;  %v2240_v63 = vadd.f32 %v4100_v11, %v4088_v29 }
 0x1de   :  { %v4136_v2 = vpop.f32.mrf.mxu0  ;;  %v2551_v62 = vpop.f32.mrf.mxu1  ;;  %v2243_v29 = vadd.f32 %v4106_v13, %v4098_v42 }
 0x1df   :  { %v4140_v12 = vadd.f32 %v2551_v62, %v2239_v40  ;;  %v2561_v8 = vadd.f32 %v2422_v52, %v2233_v35  ;;  %v2241_v62 = vadd.f32 %v4104_v0, %v4090_v33  ;;  %v2568_v5 = vadd.f32 %v4116_v44, %v2240_v63  ;;  %v4196_v33 = vpop.permute.xlu1 %2915 }
 0x1e0   :  { %v2510_v16 = vpop.f32.mrf.mxu0  ;;  %v2553_v22 = vpop.f32.mrf.mxu1  ;;  %v2562_v35 = vadd.f32 %v4120_v46, %v4108_v14  ;;  %v2565_v14 = vadd.f32 %v4136_v2, %v4114_v6 }
 0x1e1   :  { %v4148_v9 = vadd.f32 %v2510_v16, %v2246_v23  ;;  %v4150_v28 = vadd.f32 %v2553_v22, %v2248_v39  ;;  %v2569_v16 = vadd.f32 %v4118_v48, %v2241_v62  ;;  %v2242_v22 = vadd.f32 %v4102_v1, %v4096_v38 }
 0x1e2   :  { %v2512_v20 = vpop.f32.mrf.mxu0  ;;  %v2555_v31 = vpop.f32.mrf.mxu1  ;;  %v2571_v48 = vadd.f32 %v4128_v7, %v2243_v29 }
 0x1e3   :  { %v4152_v56 = vadd.f32 %v2512_v20, %v2247_v26  ;;  %v4154_v25 = vadd.f32 %v2555_v31, %v2249_v49  ;;  %v2570_v0 = vadd.f32 %v4124_v53, %v2242_v22 }
 0x1e4   :  { %v2705_v40 = vpop.f32.mrf.mxu0  ;;  %v2748_v57 = vpop.f32.mrf.mxu1 }
 0x1e5   :  { %v2886_v23 = vadd.f32 %v2705_v40, %v2558_v36  ;;  %v2888_v41 = vadd.f32 %v2748_v57, %v2560_v30  ;;  %v2563_v40 = vadd.f32 %v4122_v47, %v4112_v17 }
 0x1e6   :  { %v2707_v39 = vpop.f32.mrf.mxu0  ;;  %v2750_v4 = vpop.f32.mrf.mxu1 }
 0x1e7   :  { %v2887_v3 = vadd.f32 %v2707_v39, %v2559_v37  ;;  %v2889_v45 = vadd.f32 %v2750_v4, %v2561_v8  ;;  %v2918_v10 = vadd.f32 %v4156_v55, %v2886_v23  ;;  %v2920_v49 = vadd.f32 %v4156_v55, %v2888_v41 }
 0x1e8   :  { %v2709_v58 = vpop.f32.mrf.mxu0  ;;  %v2752_v15 = vpop.f32.mrf.mxu1  ;;  %v2564_v8 = vadd.f32 %v4132_v59, %v4110_v18 }
 0x1e9   :  { %v2919_v26 = vadd.f32 %v4156_v55, %v2887_v3  ;;  %v4160_v32 = vmax.f32 %v2918_v10, 0.0  ;;  %v2921_v43 = vadd.f32 %v4156_v55, %v2889_v45  ;;  %v4170_v34 = vmax.f32 %v2920_v49, 0.0 }
 0x1ea   :  { %v2711_v19 = vpop.f32.mrf.mxu0  ;;  %v2896_v21 = vadd.f32 %v2709_v58, %v2568_v5  ;;  %v2754_v44 = vpop.f32.mrf.mxu1  ;;  %v2898_v24 = vadd.f32 %v2752_v15, %v2570_v0 }
 0x1eb   :  { %v4163_v51 = vmax.f32 %v2919_v26, 0.0  ;;  %2978 = vrot.lane.b32.xlu1 %v4160_v32, %s3609_s22  ;;  %v4172_v52 = vmax.f32 %v2921_v43, 0.0  ;;  %v2897_v11 = vadd.f32 %v2711_v19, %v2569_v16  ;;  %v2899_v42 = vadd.f32 %v2754_v44, %v2571_v48 }
 0x1ec   :  { %v2928_v38 = vadd.f32 %v4196_v33, %v2896_v21  ;;  %v2930_v53 = vadd.f32 %v4196_v33, %v2898_v24  ;;  %v2791_v31 = vpop.f32.mrf.mxu0  ;;  %v2834_v36 = vpop.f32.mrf.mxu1 }
 0x1ed   :  { %2980 = vrot.lane.b32.xlu0 %v4163_v51, %s3609_s22  ;;  %v2929_v1 = vadd.f32 %v4196_v33, %v2897_v11  ;;  %v2931_v27 = vadd.f32 %v4196_v33, %v2899_v42  ;;  %v2890_v57 = vadd.f32 %v2791_v31, %v2562_v35  ;;  %v2892_v46 = vadd.f32 %v2834_v36, %v2564_v8 }
 0x1ee   :  { %v4210_v13 = vmax.f32 %v2928_v38, 0.0  ;;  %v4220_v50 = vmax.f32 %v2930_v53, 0.0  ;;  %v2793_v30 = vpop.f32.mrf.mxu0  ;;  %v2836_v23 = vpop.f32.mrf.mxu1 }
 0x1ef   :  { %2982 = vrot.lane.b32.xlu1 %v4170_v34, %s3609_s22  ;;  %v4213_v7 = vmax.f32 %v2929_v1, 0.0  ;;  %v4222_v20 = vmax.f32 %v2931_v27, 0.0  ;;  %v2891_v37 = vadd.f32 %v2793_v30, %v2563_v40  ;;  %v2922_v17 = vadd.f32 %v4156_v55, %v2890_v57 }
 0x1f0   :  { %v2893_v41 = vadd.f32 %v2836_v23, %v2565_v14  ;;  %v2924_v59 = vadd.f32 %v4156_v55, %v2892_v46  ;;  %v2795_v3 = vpop.f32.mrf.mxu0  ;;  %v2838_v45 = vpop.f32.mrf.mxu1 }
 0x1f1   :  { %2984 = vrot.lane.b32.xlu0 %v4172_v52, %s3609_s22  ;;  %v2923_v47 = vadd.f32 %v4156_v55, %v2891_v37  ;;  %v4254_v18 = vmax.f32 %v2922_v17, 0.0  ;;  %v2900_v26 = vadd.f32 %v2795_v3, %v4126_v54  ;;  %v2902_v63 = vadd.f32 %v2838_v45, %v4148_v9 }
 0x1f2   :  { %v2925_v2 = vadd.f32 %v4156_v55, %v2893_v41  ;;  %v4264_v39 = vmax.f32 %v2924_v59, 0.0  ;;  %v2797_v10 = vpop.f32.mrf.mxu0  ;;  %v2840_v43 = vpop.f32.mrf.mxu1 }
 0x1f3   :  { %3080 = vrot.lane.b32.xlu1 %v4160_v32, %s3611_s23  ;;  %v4257_v6 = vmax.f32 %v2923_v47, 0.0  ;;  %v2901_v49 = vadd.f32 %v2797_v10, %v4130_v60  ;;  %v2932_v58 = vadd.f32 %v4196_v33, %v2900_v26  ;;  %v2903_v5 = vadd.f32 %v2840_v43, %v4152_v56 }
 0x1f4   :  { %v4266_v4 = vmax.f32 %v2925_v2, 0.0  ;;  %v2934_v60 = vadd.f32 %v4196_v33, %v2902_v63  ;;  %v2877_v16 = vpop.f32.mrf.mxu0 }
 0x1f5   :  { %3082 = vrot.lane.b32.xlu0 %v4163_v51, %s3611_s23  ;;  %v2933_v62 = vadd.f32 %v4196_v33, %v2901_v49  ;;  %v4294_v54 = vmax.f32 %v2932_v58, 0.0  ;;  %v2935_v19 = vadd.f32 %v4196_v33, %v2903_v5  ;;  %v2894_v21 = vadd.f32 %v2877_v16, %v4134_v61 }
 0x1f6   :  { %v4304_v9 = vmax.f32 %v2934_v60, 0.0  ;;  %v2879_v22 = vpop.f32.mrf.mxu0 }
 0x1f7   :  { %3084 = vrot.lane.b32.xlu1 %v4170_v34, %s3611_s23  ;;  %v4297_v15 = vmax.f32 %v2933_v62, 0.0  ;;  %v4306_v56 = vmax.f32 %v2935_v19, 0.0  ;;  %v2895_v29 = vadd.f32 %v2879_v22, %v4140_v12  ;;  %v2926_v11 = vadd.f32 %v4156_v55, %v2894_v21 }
 0x1f8   :  { %v2881_v44 = vpop.f32.mrf.mxu0 }
 0x1f9   :  { %3086 = vrot.lane.b32.xlu0 %v4172_v52, %s3611_s23  ;;  %v2927_v0 = vadd.f32 %v4156_v55, %v2895_v29  ;;  %v4332_v61 = vmax.f32 %v2926_v11, 0.0  ;;  %v2904_v55 = vadd.f32 %v2881_v44, %v4150_v28 }
 0x1fa   :  { %v2883_v48 = vpop.f32.mrf.mxu0 }
 0x1fb   :  { %3182 = vrot.lane.b32.xlu1 %v4160_v32, %s3612_s24  ;;  %v4334_v12 = vmax.f32 %v2927_v0, 0.0  ;;  %v2905_v24 = vadd.f32 %v2883_v48, %v4154_v25  ;;  %v2936_v38 = vadd.f32 %v4196_v33, %v2904_v55 }
 0x1fd   :  { %3184 = vrot.lane.b32.xlu0 %v4163_v51, %s3612_s24  ;;  %v2937_v1 = vadd.f32 %v4196_v33, %v2905_v24  ;;  %v4352_v42 = vmax.f32 %v2936_v38, 0.0 }
 0x1ff   :  { %3186 = vrot.lane.b32.xlu1 %v4170_v34, %s3612_s24  ;;  %v4354_v28 = vmax.f32 %v2937_v1, 0.0 }
 0x201   :  { %3188 = vrot.lane.b32.xlu0 %v4172_v52, %s3612_s24 }
 0x203   :  { %2998 = vrot.lane.b32.xlu1 %v4210_v13, %s3609_s22 }
 0x205   :  { %3000 = vrot.lane.b32.xlu0 %v4213_v7, %s3609_s22 }
 0x207   :  { %3002 = vrot.lane.b32.xlu1 %v4220_v50, %s3609_s22 }
 0x209   :  { %3004 = vrot.lane.b32.xlu0 %v4222_v20, %s3609_s22 }
 0x20b   :  { %3100 = vrot.lane.b32.xlu1 %v4210_v13, %s3611_s23 }
 0x20d   :  { %3102 = vrot.lane.b32.xlu0 %v4213_v7, %s3611_s23 }
 0x20f   :  { %3104 = vrot.lane.b32.xlu1 %v4220_v50, %s3611_s23 }
 0x211   :  { %3106 = vrot.lane.b32.xlu0 %v4222_v20, %s3611_s23 }
 0x213   :  { %3202 = vrot.lane.b32.xlu1 %v4210_v13, %s3612_s24 }
 0x215   :  { %3204 = vrot.lane.b32.xlu0 %v4213_v7, %s3612_s24 }
 0x217   :  { %3206 = vrot.lane.b32.xlu1 %v4220_v50, %s3612_s24 }
 0x219   :  { %3208 = vrot.lane.b32.xlu0 %v4222_v20, %s3612_s24 }
 0x21b   :  { %2986 = vrot.lane.b32.xlu1 %v4254_v18, %s3609_s22 }
 0x21d   :  { %2988 = vrot.lane.b32.xlu0 %v4257_v6, %s3609_s22 }
 0x21f   :  { %2990 = vrot.lane.b32.xlu1 %v4264_v39, %s3609_s22 }
 0x221   :  { %2992 = vrot.lane.b32.xlu0 %v4266_v4, %s3609_s22 }
 0x223   :  { %3088 = vrot.lane.b32.xlu1 %v4254_v18, %s3611_s23 }
 0x225   :  { %3090 = vrot.lane.b32.xlu0 %v4257_v6, %s3611_s23 }
 0x227   :  { %3092 = vrot.lane.b32.xlu1 %v4264_v39, %s3611_s23 }
 0x229   :  { %3094 = vrot.lane.b32.xlu0 %v4266_v4, %s3611_s23 }
 0x22b   :  { %3190 = vrot.lane.b32.xlu1 %v4254_v18, %s3612_s24 }
 0x22d   :  { %3192 = vrot.lane.b32.xlu0 %v4257_v6, %s3612_s24 }
 0x22f   :  { %3194 = vrot.lane.b32.xlu1 %v4264_v39, %s3612_s24 }
 0x231   :  { %3196 = vrot.lane.b32.xlu0 %v4266_v4, %s3612_s24 }
 0x233   :  { %3006 = vrot.lane.b32.xlu1 %v4294_v54, %s3609_s22 }
 0x235   :  { %3008 = vrot.lane.b32.xlu0 %v4297_v15, %s3609_s22 }
 0x237   :  { %3010 = vrot.lane.b32.xlu1 %v4304_v9, %s3609_s22 }
 0x239   :  { %3012 = vrot.lane.b32.xlu0 %v4306_v56, %s3609_s22 }
 0x23b   :  { %3108 = vrot.lane.b32.xlu1 %v4294_v54, %s3611_s23 }
 0x23d   :  { %3110 = vrot.lane.b32.xlu0 %v4297_v15, %s3611_s23 }
 0x23f   :  { %3112 = vrot.lane.b32.xlu1 %v4304_v9, %s3611_s23 }
 0x241   :  { %3114 = vrot.lane.b32.xlu0 %v4306_v56, %s3611_s23 }
 0x243   :  { %3210 = vrot.lane.b32.xlu1 %v4294_v54, %s3612_s24 }
 0x245   :  { %3212 = vrot.lane.b32.xlu0 %v4297_v15, %s3612_s24 }
 0x247   :  { %3214 = vrot.lane.b32.xlu1 %v4304_v9, %s3612_s24 }
 0x249   :  { %3216 = vrot.lane.b32.xlu0 %v4306_v56, %s3612_s24 }
 0x24b   :  { %2994 = vrot.lane.b32.xlu1 %v4332_v61, %s3609_s22 }
 0x24d   :  { %2996 = vrot.lane.b32.xlu0 %v4334_v12, %s3609_s22 }
 0x24f   :  { %3096 = vrot.lane.b32.xlu1 %v4332_v61, %s3611_s23 }
 0x251   :  { %3098 = vrot.lane.b32.xlu0 %v4334_v12, %s3611_s23 }
 0x253   :  { %3198 = vrot.lane.b32.xlu1 %v4332_v61, %s3612_s24 }
 0x255   :  { %3200 = vrot.lane.b32.xlu0 %v4334_v12, %s3612_s24 }
 0x257   :  { %3014 = vrot.lane.b32.xlu1 %v4352_v42, %s3609_s22 }
 0x259   :  { %3016 = vrot.lane.b32.xlu0 %v4354_v28, %s3609_s22 }
 0x25b   :  { %3116 = vrot.lane.b32.xlu1 %v4352_v42, %s3611_s23 }
 0x25d   :  { %3118 = vrot.lane.b32.xlu0 %v4354_v28, %s3611_s23  ;;  %v4364_v25 = vpop.permute.xlu1 %2978 }
 0x25f   :  { %v2981_v33 = vpop.permute.xlu0 %2980  ;;  %3218 = vrot.lane.b32.xlu1 %v4352_v42, %s3612_s24 }
 0x260   :  { %v3018_v36 = vsel %vm67_vm0, %v4364_v25, %v2981_v33 }
 0x261   :  { %3220 = vrot.lane.b32.xlu0 %v4354_v28, %s3612_s24  ;;  %v2983_v53 = vpop.permute.xlu1 %2982  ;;  %v3060_v37 = vmax.f32 %v4160_v32, %v3018_v36 }
 0x262   :  { %v3019_v8 = vsel %vm67_vm0, %v2981_v33, %v2983_v53 }
 0x263   :  { %v4370_v27 = vpop.permute.xlu0 %2984  ;;  %v3061_v41 = vmax.f32 %v4163_v51, %v3019_v8 }
 0x264   :  { %v3020_v23 = vsel %vm67_vm0, %v2983_v53, %v4370_v27 }
 0x265   :  { %v4372_v31 = vpop.permute.xlu1 %3080  ;;  %v3062_v32 = vmax.f32 %v4170_v34, %v3020_v23 }
 0x267   :  { %v3083_v35 = vpop.permute.xlu0 %3082 }
 0x268   :  { %v3120_v57 = vsel %vm958_vm4, %v4372_v31, %v3083_v35 }
 0x269   :  { %v3085_v30 = vpop.permute.xlu1 %3084  ;;  %v3162_v17 = vmax.f32 %v3060_v37, %v3120_v57 }
 0x26a   :  { %v3121_v46 = vsel %vm958_vm4, %v3083_v35, %v3085_v30 }
 0x26b   :  { %v4376_v40 = vpop.permute.xlu0 %3086  ;;  %v3163_v45 = vmax.f32 %v3061_v41, %v3121_v46 }
 0x26c   :  { %v3122_v59 = vsel %vm958_vm4, %v3085_v30, %v4376_v40 }
 0x26d   :  { %v4384_v14 = vpop.permute.xlu1 %3182  ;;  %v3164_v26 = vmax.f32 %v3062_v32, %v3122_v59 }
 0x26f   :  { %v3185_v47 = vpop.permute.xlu0 %3184 }
 0x270   :  { %v3222_v2 = vsel %vm1286_vm5, %v4384_v14, %v3185_v47 }
 0x271   :  { %v3264_v3 = vmax.f32 %v3162_v17, %v3222_v2  ;;  %v3187_v10 = vpop.permute.xlu1 %3186 }
 0x272   :  { %v3223_v49 = vsel %vm1286_vm5, %v3185_v47, %v3187_v10 }
 0x273   :  { %3284 = vst [vmem:[%s4575_s3] sm:$0xff] %v3264_v3  ;;  %v3189_v43 = vpop.permute.xlu0 %3188  ;;  %v3265_v51 = vmax.f32 %v3163_v45, %v3223_v49 }
 0x274   :  { %v3224_v58 = vsel %vm1286_vm5, %v3187_v10, %v3189_v43 }
 0x275   :  { %v3266_v63 = vmax.f32 %v3164_v26, %v3224_v58  ;;  %3285 = vst [vmem:[%s4575_s3 + $0x8] sm:$0xff] %v3265_v51  ;;  %v4401_v34 = vpop.permute.xlu1 %2998 }
 0x277   :  { %3286 = vst [vmem:[%s4575_s3 + $0x10] sm:$0xff] %v3266_v63  ;;  %v3001_v62 = vpop.permute.xlu0 %3000 }
 0x278   :  { %v3027_v22 = vsel %vm67_vm0, %v4401_v34, %v3001_v62 }
 0x279   :  { %v3003_v5 = vpop.permute.xlu1 %3002  ;;  %v3070_v0 = vmax.f32 %v4210_v13, %v3027_v22 }
 0x27a   :  { %v3028_v44 = vsel %vm67_vm0, %v3001_v62, %v3003_v5 }
 0x27b   :  { %v4406_v60 = vpop.permute.xlu0 %3004  ;;  %v3071_v33 = vmax.f32 %v4213_v7, %v3028_v44 }
 0x27c   :  { %v3029_v48 = vsel %vm67_vm0, %v3003_v5, %v4406_v60 }
 0x27d   :  { %v4408_v19 = vpop.permute.xlu1 %3100  ;;  %v3072_v13 = vmax.f32 %v4220_v50, %v3029_v48 }
 0x27f   :  { %v3103_v16 = vpop.permute.xlu0 %3102 }
 0x280   :  { %v3129_v11 = vsel %vm958_vm4, %v4408_v19, %v3103_v16 }
 0x281   :  { %v3105_v21 = vpop.permute.xlu1 %3104  ;;  %v3172_v24 = vmax.f32 %v3070_v0, %v3129_v11 }
 0x282   :  { %v3130_v38 = vsel %vm958_vm4, %v3103_v16, %v3105_v21 }
 0x283   :  { %v4412_v29 = vpop.permute.xlu0 %3106  ;;  %v3173_v30 = vmax.f32 %v3071_v33, %v3130_v38 }
 0x284   :  { %v3131_v53 = vsel %vm958_vm4, %v3105_v21, %v4412_v29 }
 0x285   :  { %v4420_v55 = vpop.permute.xlu1 %3202  ;;  %v3174_v37 = vmax.f32 %v3072_v13, %v3131_v53 }
 0x287   :  { %v3205_v1 = vpop.permute.xlu0 %3204 }
 0x288   :  { %v3231_v35 = vsel %vm1286_vm5, %v4420_v55, %v3205_v1 }
 0x289   :  { %v3274_v36 = vmax.f32 %v3172_v24, %v3231_v35  ;;  %v3207_v57 = vpop.permute.xlu1 %3206 }
 0x28a   :  { %v3232_v8 = vsel %vm1286_vm5, %v3205_v1, %v3207_v57 }
 0x28b   :  { %3294 = vst [vmem:[%s4575_s3 + $0x50] sm:$0xff] %v3274_v36  ;;  %v4433_v23 = vpop.permute.xlu0 %3208  ;;  %v3275_v7 = vmax.f32 %v3173_v30, %v3232_v8 }
 0x28c   :  { %v3233_v17 = vsel %vm1286_vm5, %v3207_v57, %v4433_v23 }
 0x28d   :  { %v3276_v46 = vmax.f32 %v3174_v37, %v3233_v17  ;;  %3295 = vst [vmem:[%s4575_s3 + $0x58] sm:$0xff] %v3275_v7  ;;  %v2987_v50 = vpop.permute.xlu1 %2986 }
 0x28e   :  { %v3021_v3 = vsel %vm67_vm0, %v4370_v27, %v2987_v50 }
 0x28f   :  { %3296 = vst [vmem:[%s4575_s3 + $0x60] sm:$0xff] %v3276_v46  ;;  %v2989_v47 = vpop.permute.xlu0 %2988  ;;  %v3063_v51 = vmax.f32 %v4172_v52, %v3021_v3 }
 0x290   :  { %v3022_v45 = vsel %vm67_vm0, %v2987_v50, %v2989_v47 }
 0x291   :  { %v2991_v41 = vpop.permute.xlu1 %2990  ;;  %v3064_v63 = vmax.f32 %v4254_v18, %v3022_v45 }
 0x292   :  { %v3023_v62 = vsel %vm67_vm0, %v2989_v47, %v2991_v41 }
 0x293   :  { %v4443_v59 = vpop.permute.xlu0 %2992  ;;  %v3065_v0 = vmax.f32 %v4257_v6, %v3023_v62 }
 0x294   :  { %v3024_v5 = vsel %vm67_vm0, %v2991_v41, %v4443_v59 }
 0x295   :  { %v3089_v2 = vpop.permute.xlu1 %3088  ;;  %v3066_v48 = vmax.f32 %v4264_v39, %v3024_v5 }
 0x296   :  { %v3123_v26 = vsel %vm958_vm4, %v4376_v40, %v3089_v2 }
 0x297   :  { %v3091_v32 = vpop.permute.xlu0 %3090  ;;  %v3165_v27 = vmax.f32 %v3063_v51, %v3123_v26 }
 0x298   :  { %v3124_v58 = vsel %vm958_vm4, %v3089_v2, %v3091_v32 }
 0x299   :  { %v3093_v10 = vpop.permute.xlu1 %3092  ;;  %v3166_v22 = vmax.f32 %v3064_v63, %v3124_v58 }
 0x29a   :  { %v3125_v21 = vsel %vm958_vm4, %v3091_v32, %v3093_v10 }
 0x29b   :  { %v4450_v49 = vpop.permute.xlu0 %3094  ;;  %v3167_v38 = vmax.f32 %v3065_v0, %v3125_v21 }
 0x29c   :  { %v3126_v52 = vsel %vm958_vm4, %v3093_v10, %v4450_v49 }
 0x29d   :  { %v3191_v16 = vpop.permute.xlu1 %3190  ;;  %v3168_v33 = vmax.f32 %v3066_v48, %v3126_v52 }
 0x29e   :  { %v3225_v40 = vsel %vm1286_vm5, %v3189_v43, %v3191_v16 }
 0x29f   :  { %v3193_v11 = vpop.permute.xlu0 %3192  ;;  %v3267_v44 = vmax.f32 %v3165_v27, %v3225_v40 }
 0x2a0   :  { %v3226_v18 = vsel %vm1286_vm5, %v3191_v16, %v3193_v11 }
 0x2a1   :  { %v3268_v24 = vmax.f32 %v3166_v22, %v3226_v18  ;;  %3287 = vst [vmem:[%s4575_s3 + $0x18] sm:$0xff] %v3267_v44  ;;  %v3195_v1 = vpop.permute.xlu1 %3194 }
 0x2a2   :  { %v3227_v6 = vsel %vm1286_vm5, %v3193_v11, %v3195_v1 }
 0x2a3   :  { %3288 = vst [vmem:[%s4575_s3 + $0x20] sm:$0xff] %v3268_v24  ;;  %v4472_v43 = vpop.permute.xlu0 %3196  ;;  %v3269_v53 = vmax.f32 %v3167_v38, %v3227_v6 }
 0x2a4   :  { %v3228_v39 = vsel %vm1286_vm5, %v3195_v1, %v4472_v43 }
 0x2a5   :  { %v3270_v35 = vmax.f32 %v3168_v33, %v3228_v39  ;;  %3289 = vst [vmem:[%s4575_s3 + $0x28] sm:$0xff] %v3269_v53  ;;  %v3007_v13 = vpop.permute.xlu1 %3006 }
 0x2a6   :  { %v3030_v7 = vsel %vm67_vm0, %v4406_v60, %v3007_v13 }
 0x2a7   :  { %3290 = vst [vmem:[%s4575_s3 + $0x30] sm:$0xff] %v3270_v35  ;;  %v3009_v36 = vpop.permute.xlu0 %3008  ;;  %v3073_v41 = vmax.f32 %v4222_v20, %v3030_v7 }
 0x2a8   :  { %v3031_v17 = vsel %vm67_vm0, %v3007_v13, %v3009_v36 }
 0x2a9   :  { %v3011_v30 = vpop.permute.xlu1 %3010  ;;  %v3074_v32 = vmax.f32 %v4294_v54, %v3031_v17 }
 0x2aa   :  { %v3032_v3 = vsel %vm67_vm0, %v3009_v36, %v3011_v30 }
 0x2ab   :  { %v4482_v57 = vpop.permute.xlu0 %3012  ;;  %v3075_v20 = vmax.f32 %v4297_v15, %v3032_v3 }
 0x2ac   :  { %v3033_v45 = vsel %vm67_vm0, %v3011_v30, %v4482_v57 }
 0x2ad   :  { %v3109_v37 = vpop.permute.xlu1 %3108  ;;  %v3076_v5 = vmax.f32 %v4304_v9, %v3033_v45 }
 0x2ae   :  { %v3132_v50 = vsel %vm958_vm4, %v4412_v29, %v3109_v37 }
 0x2af   :  { %v3111_v8 = vpop.permute.xlu0 %3110  ;;  %v3175_v60 = vmax.f32 %v3073_v41, %v3132_v50 }
 0x2b0   :  { %v3133_v2 = vsel %vm958_vm4, %v3109_v37, %v3111_v8 }
 0x2b1   :  { %v3113_v46 = vpop.permute.xlu1 %3112  ;;  %v3176_v26 = vmax.f32 %v3074_v32, %v3133_v2 }
 0x2b2   :  { %v3134_v51 = vsel %vm958_vm4, %v3111_v8, %v3113_v46 }
 0x2b3   :  { %v4489_v47 = vpop.permute.xlu0 %3114  ;;  %v3177_v16 = vmax.f32 %v3075_v20, %v3134_v51 }
 0x2b4   :  { %v3135_v63 = vsel %vm958_vm4, %v3113_v46, %v4489_v47 }
 0x2b5   :  { %v3211_v10 = vpop.permute.xlu1 %3210  ;;  %v3178_v21 = vmax.f32 %v3076_v5, %v3135_v63 }
 0x2b6   :  { %v3234_v29 = vsel %vm1286_vm5, %v4433_v23, %v3211_v10 }
 0x2b7   :  { %v3213_v58 = vpop.permute.xlu0 %3212  ;;  %v3277_v54 = vmax.f32 %v3175_v60, %v3234_v29 }
 0x2b8   :  { %v3235_v62 = vsel %vm1286_vm5, %v3211_v10, %v3213_v58 }
 0x2b9   :  { %v3278_v27 = vmax.f32 %v3176_v26, %v3235_v62  ;;  %3297 = vst [vmem:[%s4575_s3 + $0x68] sm:$0xff] %v3277_v54  ;;  %v3215_v22 = vpop.permute.xlu1 %3214 }
 0x2ba   :  { %v3236_v15 = vsel %vm1286_vm5, %v3213_v58, %v3215_v22 }
 0x2bb   :  { %3298 = vst [vmem:[%s4575_s3 + $0x70] sm:$0xff] %v3278_v27  ;;  %v3217_v23 = vpop.permute.xlu0 %3216  ;;  %v3279_v40 = vmax.f32 %v3177_v16, %v3236_v15 }
 0x2bc   :  { %v3237_v11 = vsel %vm1286_vm5, %v3215_v22, %v3217_v23 }
 0x2bd   :  { %v3280_v0 = vmax.f32 %v3178_v21, %v3237_v11  ;;  %3299 = vst [vmem:[%s4575_s3 + $0x78] sm:$0xff] %v3279_v40  ;;  %v2995_v9 = vpop.permute.xlu1 %2994 }
 0x2be   :  { %v3025_v44 = vsel %vm67_vm0, %v4443_v59, %v2995_v9 }
 0x2bf   :  { %3300 = vst [vmem:[%s4575_s3 + $0x80] sm:$0xff] %v3280_v0  ;;  %v2997_v52 = vpop.permute.xlu0 %2996  ;;  %v3067_v33 = vmax.f32 %v4266_v4, %v3025_v44 }
 0x2c0   :  { %v3026_v18 = vsel %vm67_vm0, %v2995_v9, %v2997_v52  ;;  %v3058_v48 = vsel %vm67_vm0, %v2997_v52, %v4364_v25 }
 0x2c1   :  { %v3097_v24 = vpop.permute.xlu1 %3096  ;;  %v3068_v39 = vmax.f32 %v4332_v61, %v3026_v18  ;;  %v3069_v59 = vmax.f32 %v4334_v12, %v3058_v48 }
 0x2c2   :  { %v3127_v38 = vsel %vm958_vm4, %v4450_v49, %v3097_v24 }
 0x2c3   :  { %v3099_v1 = vpop.permute.xlu0 %3098  ;;  %v3169_v35 = vmax.f32 %v3067_v33, %v3127_v38 }
 0x2c4   :  { %v3128_v6 = vsel %vm958_vm4, %v3097_v24, %v3099_v1  ;;  %v3160_v53 = vsel %vm958_vm4, %v3099_v1, %v4372_v31 }
 0x2c5   :  { %v3199_v13 = vpop.permute.xlu1 %3198  ;;  %v3170_v36 = vmax.f32 %v3068_v39, %v3128_v6  ;;  %v3171_v25 = vmax.f32 %v3069_v59, %v3160_v53 }
 0x2c6   :  { %v3229_v30 = vsel %vm1286_vm5, %v4472_v43, %v3199_v13 }
 0x2c7   :  { %v3201_v49 = vpop.permute.xlu0 %3200  ;;  %v3271_v37 = vmax.f32 %v3169_v35, %v3229_v30 }
 0x2c8   :  { %v3230_v4 = vsel %vm1286_vm5, %v3199_v13, %v3201_v49  ;;  %v3262_v8 = vsel %vm1286_vm5, %v3201_v49, %v4384_v14 }
 0x2c9   :  { %v3272_v7 = vmax.f32 %v3170_v36, %v3230_v4  ;;  %v3273_v31 = vmax.f32 %v3171_v25, %v3262_v8  ;;  %3291 = vst [vmem:[%s4575_s3 + $0x38] sm:$0xff] %v3271_v37  ;;  %v3015_v61 = vpop.permute.xlu1 %3014 }
 0x2ca   :  { %v3034_v43 = vsel %vm67_vm0, %v4482_v57, %v3015_v61 }
 0x2cb   :  { %3292 = vst [vmem:[%s4575_s3 + $0x40] sm:$0xff] %v3272_v7  ;;  %3293 = vst [vmem:[%s4575_s3 + $0x48] sm:$0xff] %v3273_v31  ;;  %v3017_v12 = vpop.permute.xlu0 %3016  ;;  %v3077_v2 = vmax.f32 %v4306_v56, %v3034_v43 }
 0x2cc   :  { %v3035_v14 = vsel %vm67_vm0, %v3015_v61, %v3017_v12  ;;  %v3059_v17 = vsel %vm67_vm0, %v3017_v12, %v4401_v34 }
 0x2cd   :  { %v3117_v46 = vpop.permute.xlu1 %3116  ;;  %v3078_v45 = vmax.f32 %v4352_v42, %v3035_v14  ;;  %v3079_v57 = vmax.f32 %v4354_v28, %v3059_v17 }
 0x2ce   :  { %v3136_v50 = vsel %vm958_vm4, %v4489_v47, %v3117_v46 }
 0x2cf   :  { %v3119_v41 = vpop.permute.xlu0 %3118  ;;  %v3179_v60 = vmax.f32 %v3077_v2, %v3136_v50 }
 0x2d0   :  { %v3137_v32 = vsel %vm958_vm4, %v3117_v46, %v3119_v41  ;;  %v3161_v3 = vsel %vm958_vm4, %v3119_v41, %v4408_v19 }
 0x2d1   :  { %v3219_v10 = vpop.permute.xlu1 %3218  ;;  %v3180_v26 = vmax.f32 %v3078_v45, %v3137_v32  ;;  %v3181_v34 = vmax.f32 %v3079_v57, %v3161_v3 }
 0x2d2   :  { %v3238_v51 = vsel %vm1286_vm5, %v3217_v23, %v3219_v10 }
 0x2d3   :  { %v3221_v29 = vpop.permute.xlu0 %3220  ;;  %v3281_v47 = vmax.f32 %v3179_v60, %v3238_v51 }
 0x2d4   :  { %v3239_v58 = vsel %vm1286_vm5, %v3219_v10, %v3221_v29  ;;  %v3263_v56 = vsel %vm1286_vm5, %v3221_v29, %v4420_v55 }
 0x2d5   :  { %v3282_v20 = vmax.f32 %v3180_v26, %v3239_v58  ;;  %v3283_v63 = vmax.f32 %v3181_v34, %v3263_v56  ;;  %3301 = vst [vmem:[%s4575_s3 + $0x88] sm:$0xff] %v3281_v47 }
 0x2d7   :  { %3302 = vst [vmem:[%s4575_s3 + $0x90] sm:$0xff] %v3282_v20  ;;  %3303 = vst [vmem:[%s4575_s3 + $0x98] sm:$0xff] %v3283_v63 }

// kernel: _lambda_.13
= control target key start
LH: loop header
LB: loop body
LE: loop exit
PB: predicated region body
PF: predicated region fallthrough
CT: control target
= control target key end

     0   :  { %v156_v1 = vmov 0   ;;  %vm81_vm0 = vcmask 523264   ;;  %v31_v14 = vlaneseq  ;;  %vm127_vm1 = vcmask 228352   ;;  %s216_s1 = inlined_call_operand.vmem [shape: bf16[64,156], index: 1, kind: input, shape index: {}]   ;;  %s217_s0 = inlined_call_operand.vmem [shape: f32[2,8,64], index: 0, kind: input, shape index: {}]   ;;  %s218_s2 = inlined_call_operand.vmem [shape: f32[1,156], index: 2, kind: input, shape index: {}]   ;;  %s219_s3 = inlined_call_operand.vmem [shape: f32[8,156], index: 3, kind: output, shape index: {}]  }
   0x1   :  { %v144_v0 = vld [vmem:[%s216_s1 + $0x34] ss:$8 sps:$4 sm:$0xff]   ;;  %117 = vmatprep.mubr.bf16.mxu0 %v156_v1  ;;  %v146_v2 = vld [vmem:[%s216_s1 + $0x30] ss:$8 sps:$4 sm:$0xff]   ;;  %v147_v3 = vld [vmem:[%s216_s1 + $0x24] ss:$8 sps:$4 sm:$0xff]  }
   0x2   :  { %93 = vmatprep.subr.bf16.mxu0 %v144_v0  ;;  %v149_v4 = vld [vmem:[%s216_s1 + $0x20] ss:$8 sps:$4 sm:$0xff]   ;;  %v150_v5 = vld [vmem:[%s216_s1 + $0x14] ss:$8 sps:$4 sm:$0xff]   ;;  %v152_v9 = vld [vmem:[%s216_s1 + $0x10] ss:$8 sps:$4 sm:$0xff]  }
   0x3   :  { %94 = vmatpush1.bf16.msra.mxu0 %v146_v2  ;;  %v15_v6 = vld [vmem:[%s217_s0] sm:$0xff]  ;;  %v133_v7 = vld [vmem:[%s217_s0 + $0x8] sm:$0xff]  ;;  %v32_v15 = vshrl.u32 %v31_v14, 7 }
   0x4   :  { %95 = vmatprep.subr.bf16.mxu0 %v147_v3  ;;  %v18_v8 = vadd.f32 %v133_v7, %v15_v6  ;;  %v153_v10 = vld [vmem:[%s216_s1 + $0x4] ss:$8 sps:$4 sm:$0xff]   ;;  %v155_v12 = vld [vmem:[%s216_s1] ss:$8 sps:$4 sm:$0xff]  }
   0x5   :  { %v33_v16 = vsub.s32 0, %v32_v15  ;;  %v29_v17 = vld [vmem:[%s218_s2] sm:$0x3]  ;;  %v37_v18 = vsub.s32 1, %v32_v15 }
   0x6   :  { %v19_v11 = vmul.f32 0.5, %v18_v8 }
   0x7   :  { %96 = vmatpush1.bf16.msra.mxu0 %v149_v4  ;;  %v34_v19 = vrot.slane %v29_v17, %v33_v16  ;;  %v38_v20 = vrot.slane %v29_v17, %v37_v18 }
   0x8   :  { %97 = vmatprep.subr.bf16.mxu0 %v150_v5  ;;  %v20_v13 = vpack.c.bf16 %v19_v11, %v19_v11 }
   0xb   :  { %98 = vmatpush1.bf16.msra.mxu0 %v152_v9 }
   0xc   :  { %99 = vmatprep.subr.bf16.mxu0 %v153_v10 }
   0xf   :  { %100 = vmatpush1.bf16.msra.mxu0 %v155_v12 }
  0x12   :  { %142 = vmatmul.mubr.msk.bf16.vlgmr.msra.gmra.mxu0 %vm81_vm0, %v20_v13 }
  0xd2   :  { %v119_v21 = vpop.f32.mrf.mxu0 }
  0xd3   :  { %v120_v22 = vadd.f32 %v119_v21, %v34_v19 }
  0xd4   :  { %v121_v23 = vpop.f32.mrf.mxu0 }
  0xd5   :  { %126 = vst [vmem:[%s219_s3] sm:$0xff] %v120_v22  ;;  %v122_v24 = vadd.f32 %v121_v23, %v38_v20 }
  0xd6   :  { %v123_v25 = vpop.f32.mrf.mxu0 }
  0xd7   :  { %128 = vst.msk [vmem:[%s219_s3 + $0x8] sm:$0xff] %vm127_vm1, %v122_v24 }
  0xd8   :  { %v124_v26 = vpop.f32.mrf.mxu0 }

// kernel: _lambda_.11
= control target key start
LH: loop header
LB: loop body
LE: loop exit
PB: predicated region body
PF: predicated region fallthrough
CT: control target
= control target key end

     0   :  { %vm71_vm0 = vcmask 523264   ;;  %v2833_v14 = vmov 0.0   ;;  %vm2834_vm1 = vmmov 0   ;;  %v99_v25 = vlaneseq  ;;  %s2836_s19 = smov 64   ;;  %s2837_s20 = smov 112   ;;  %s3502_s0 = inlined_call_operand.vmem [shape: f32[16,64], index: 0, kind: input, shape index: {}]   ;;  %s3503_s2 = inlined_call_operand.vmem [shape: bf16[64,256], index: 2, kind: input, shape index: {}]   ;;  %s3504_s4 = inlined_call_operand.vmem [shape: f32[27,64], index: 4, kind: input, shape index: {}]   ;;  %s3505_s3 = inlined_call_operand.vmem [shape: bf16[128,128], index: 3, kind: input, shape index: {}]   ;;  %s3506_s5 = inlined_call_operand.vmem [shape: f32[2,128], index: 5, kind: input, shape index: {}]   ;;  %s3507_s1 = inlined_call_operand.vmem [shape: bf16[64,448], index: 1, kind: input, shape index: {}]   ;;  %s3508_s6 = inlined_call_operand.vmem [shape: f32[16,64], index: 6, kind: output, shape index: {}]  }
   0x1   :  { %v2881_v0 = vld [vmem:[%s3502_s0] sm:$0xff]  ;;  %v2886_v1 = vld [vmem:[%s3502_s0 + $0x8] sm:$0xff]  ;;  %2454 = vmatprep.subr.bf16.mxu0 %v2833_v14  ;;  %v2696_v15 = vld [vmem:[%s3503_s2 + $0x30] ss:$8 sps:$4 sm:$0xff]   ;;  %2462 = vmatprep.mubr.msk.bf16.mxu0 %vm2834_vm1, %v2833_v14  ;;  %vm450_vm2 = vcmask 130048   ;;  %vm513_vm3 = vcmask 1043456  }
   0x2   :  { %v72_v2 = vsel %vm71_vm0, %v2881_v0, 0.0  ;;  %v75_v3 = vsel %vm71_vm0, %v2886_v1, 0.0  ;;  %2466 = vmatprep.subr.bf16.mxu1 %v2833_v14  ;;  %2482 = vmatprep.mubr.msk.bf16.mxu1 %vm2834_vm1, %v2833_v14  ;;  %v2699_v16 = vld [vmem:[%s3503_s2 + $0x20] ss:$8 sps:$4 sm:$0xff]   ;;  %v2702_v17 = vld [vmem:[%s3503_s2 + $0x10] ss:$8 sps:$4 sm:$0xff]  }
   0x3   :  { %73 = vadd.xlane.f32.xlu0 %v72_v2  ;;  %2455 = vmatpush3.bf16.msra.mxu0 %v2696_v15  ;;  %v2705_v18 = vld [vmem:[%s3503_s2] ss:$8 sps:$4 sm:$0xff]   ;;  %v2917_v26 = vshrl.u32 %v99_v25, 7  ;;  %v2708_v41 = vld [vmem:[%s3505_s3 + $0x38] sm:$0xff]   ;;  %v2709_v42 = vld [vmem:[%s3505_s3 + $0x30] sm:$0xff]   ;;  %vm497_vm4 = vcmask 64512  }
   0x4   :  { %2456 = vmatprep.subr.bf16.mxu0 %v2833_v14  ;;  %v2925_v28 = vld [vmem:[%s3504_s4] sm:$0xff]  ;;  %2467 = vmatpush3.bf16.msra.mxu1 %v2708_v41  ;;  %v2710_v43 = vld [vmem:[%s3505_s3 + $0x28] sm:$0xff]   ;;  %v2712_v45 = vld [vmem:[%s3505_s3 + $0x18] sm:$0xff]   ;;  %v2835_v41 = vmov 0   ;;  %s2838_s21 = smov 48   ;;  %s2839_s22 = smov 32  }
   0x5   :  { %v2920_v27 = vsub.s32 0, %v2917_v26  ;;  %v2930_v32 = vsub.s32 1, %v2917_v26  ;;  %2468 = vmatprep.subr.bf16.mxu1 %v2833_v14  ;;  %v2711_v44 = vld [vmem:[%s3505_s3 + $0x20] sm:$0xff]   ;;  %v2713_v46 = vld [vmem:[%s3505_s3 + $0x10] sm:$0xff]   ;;  %v2714_v47 = vld [vmem:[%s3505_s3 + $0x8] sm:$0xff]   ;;  %s2840_s23 = smov 96  }
   0x6   :  { %v2715_v48 = vld [vmem:[%s3505_s3] sm:$0xff]   ;;  %s2841_s24 = smov 16   ;;  %s2842_s0 = smov 80   ;;  %vm1856_vm5 = vcmask 1041408   ;;  %vm1873_vm6 = vcmask 1046528   ;;  %vm1887_vm7 = vcmask 1045504  }
   0x7   :  { %76 = vadd.xlane.f32.xlu0 %v75_v3  ;;  %2457 = vmatpush3.bf16.msra.mxu0 %v2699_v16  ;;  %v102_v31 = vrot.slane %v2925_v28, %v2920_v27  ;;  %v108_v36 = vrot.slane %v2925_v28, %v2930_v32  ;;  %v70_v49 = vld [vmem:[%s3506_s5] sm:$0x3]  ;;  %vm1901_vm8 = vcmask 1044480  }
   0x8   :  { %2458 = vmatprep.subr.bf16.mxu0 %v2833_v14  ;;  %2469 = vmatpush3.bf16.msra.mxu1 %v2709_v42  ;;  %v115_v50 = vrot.slane %v70_v49, %v2920_v27  ;;  %v3030_v42 = vsub.s32 6, %v2917_v26 }
   0x9   :  { %2470 = vmatprep.subr.bf16.mxu1 %v2833_v14 }
   0xb   :  { %2459 = vmatpush3.bf16.msra.mxu0 %v2702_v17 }
   0xc   :  { %2460 = vmatprep.subr.bf16.mxu0 %v2833_v14  ;;  %2471 = vmatpush3.bf16.msra.mxu1 %v2710_v43  ;;  %v430_v43 = vrot.slane %v2925_v28, %v3030_v42 }
   0xd   :  { %2472 = vmatprep.subr.bf16.mxu1 %v2833_v14 }
   0xf   :  { %2461 = vmatpush3.bf16.msra.mxu0 %v2705_v18 }
  0x10   :  { %2473 = vmatpush3.bf16.msra.mxu1 %v2711_v44 }
  0x11   :  { %2474 = vmatprep.subr.bf16.mxu1 %v2833_v14 }
  0x14   :  { %2475 = vmatpush3.bf16.msra.mxu1 %v2712_v45 }
  0x15   :  { %2476 = vmatprep.subr.bf16.mxu1 %v2833_v14 }
  0x18   :  { %2477 = vmatpush3.bf16.msra.mxu1 %v2713_v46 }
  0x19   :  { %2478 = vmatprep.subr.bf16.mxu1 %v2833_v14 }
  0x1c   :  { %2479 = vmatpush3.bf16.msra.mxu1 %v2714_v47 }
  0x1d   :  { %2480 = vmatprep.subr.bf16.mxu1 %v2833_v14 }
  0x20   :  { %2481 = vmatpush3.bf16.msra.mxu1 %v2715_v48 }
  0x21   :  { %2504 = vmatprep.subr.bf16.mxu1 %v2833_v14 }
  0x8c   :  { %v74_v4 = vpop.xlane.xlu0 %73 }
  0x8d   :  { %v79_v5 = vmul.f32 0.015625, %v74_v4 }
  0x8f   :  { %v81_v6 = vsub.f32 %v2881_v0, %v79_v5 }
  0x90   :  { %v77_v7 = vpop.xlane.xlu0 %76 }
  0x91   :  { %v80_v8 = vmul.f32 0.015625, %v77_v7  ;;  %v83_v9 = vmul.f32 %v81_v6, %v81_v6 }
  0x93   :  { %v82_v10 = vsub.f32 %v2886_v1, %v80_v8  ;;  %v85_v11 = vsel %vm71_vm0, %v83_v9, 0.0 }
  0x94   :  { %86 = vadd.xlane.f32.xlu1 %v85_v11 }
  0x95   :  { %v84_v12 = vmul.f32 %v82_v10, %v82_v10 }
  0x97   :  { %v88_v13 = vsel %vm71_vm0, %v84_v12, 0.0 }
  0x98   :  { %89 = vadd.xlane.f32.xlu1 %v88_v13 }
 0x11d   :  { %v87_v19 = vpop.xlane.xlu1 %86 }
 0x11e   :  { %v91_v20 = vmul.f32 0.015625, %v87_v19 }
 0x120   :  { %v93_v21 = vadd.f32 1e-05, %v91_v20 }
 0x121   :  { %v90_v22 = vpop.xlane.xlu1 %89 }
 0x122   :  { %2740 = vrsqrt.f32 %v93_v21  ;;  %v92_v23 = vmul.f32 0.015625, %v90_v22 }
 0x124   :  { %v94_v24 = vadd.f32 1e-05, %v92_v23 }
 0x126   :  { %2742 = vrsqrt.f32 %v94_v24 }
 0x12f   :  { %v2741_v29 = vpop.eup %2740 }
 0x130   :  { %v97_v30 = vmul.f32 %v2741_v29, %v81_v6  ;;  %v2974_v6 = vsub.s32 2, %v2917_v26 }
 0x132   :  { %v103_v35 = vmul.f32 %v102_v31, %v97_v30  ;;  %v202_v7 = vrot.slane %v2925_v28, %v2974_v6 }
 0x133   :  { %v2743_v33 = vpop.eup %2742 }
 0x134   :  { %v98_v34 = vmul.f32 %v2743_v33, %v82_v10  ;;  %v109_v38 = vadd.f32 %v108_v36, %v103_v35  ;;  %v2995_v33 = vld [vmem:[%s3507_s1 + $0x64] ss:$16 sps:$4 sm:$0xff]  }
 0x135   :  { %386 = vmatprep.subr.bf16.mxu0 %v2995_v33  ;;  %v3004_v35 = vld [vmem:[%s3507_s1 + $0x44] ss:$16 sps:$4 sm:$0xff]  }
 0x136   :  { %v104_v37 = vmul.f32 %v102_v31, %v98_v34  ;;  %v2716_v34 = vld [vmem:[%s3507_s1 + $0x60] ss:$16 sps:$4 sm:$0xff]  }
 0x138   :  { %v110_v39 = vadd.f32 %v108_v36, %v104_v37  ;;  %v2719_v36 = vld [vmem:[%s3507_s1 + $0x40] ss:$16 sps:$4 sm:$0xff]   ;;  %v3013_v37 = vld [vmem:[%s3507_s1 + $0x24] ss:$16 sps:$4 sm:$0xff]  }
 0x13a   :  { %v111_v40 = vpack.c.bf16 %v110_v39, %v109_v38  ;;  %v2722_v38 = vld [vmem:[%s3507_s1 + $0x20] ss:$16 sps:$4 sm:$0xff]   ;;  %v3022_v39 = vld [vmem:[%s3507_s1 + $0x4] ss:$16 sps:$4 sm:$0xff]  }
 0x13c   :  { %2463 = vmatmul.mubr.msk.bf16.vlgmr.msra.gmra.mxu0 %vm71_vm0, %v111_v40  ;;  %v2725_v40 = vld [vmem:[%s3507_s1] ss:$16 sps:$4 sm:$0xff]  }
 0x13d   :  { %387 = vmatpush1.bf16.msra.mxu0 %v2716_v34  ;;  %410 = vmatprep.mubr.bf16.mxu0 %v2835_v41 }
 0x13e   :  { %388 = vmatprep.subr.bf16.mxu0 %v3004_v35 }
 0x141   :  { %389 = vmatpush1.bf16.msra.mxu0 %v2719_v36 }
 0x142   :  { %390 = vmatprep.subr.bf16.mxu0 %v3013_v37 }
 0x145   :  { %391 = vmatpush1.bf16.msra.mxu0 %v2722_v38 }
 0x146   :  { %392 = vmatprep.subr.bf16.mxu0 %v3022_v39 }
 0x149   :  { %393 = vmatpush1.bf16.msra.mxu0 %v2725_v40 }
 0x14a   :  { %2486 = vmatprep.subr.bf16.mxu0 %v2833_v14 }
 0x1fc   :  { %v177_v51 = vpop.f32.mrf.mxu0 }
 0x1fd   :  { %v178_v52 = vadd.f32 %v177_v51, %v115_v50 }
 0x1fe   :  { %v2464_v53 = vpop.f32.mrf.mxu0 }
 0x1ff   :  { %v2304_v54 = vmul.f32 -1.442695, %v178_v52 }
 0x200   :  { %v180_v55 = vpop.f32.mrf.mxu0 }
 0x201   :  { %2744 = vpow2.f32 %v2304_v54  ;;  %v181_v56 = vadd.f32 %v180_v55, %v115_v50  ;;  %v3036_v50 = vsub.s32 3, %v2917_v26  ;;  %v3041_v54 = vsub.s32 4, %v2917_v26 }
 0x202   :  { %v2465_v57 = vpop.f32.mrf.mxu0 }
 0x203   :  { %v2305_v58 = vmul.f32 -1.442695, %v181_v56  ;;  %v325_v53 = vrot.slane %v2925_v28, %v3036_v50 }
 0x205   :  { %2746 = vpow2.f32 %v2305_v58  ;;  %v331_v58 = vrot.slane %v2925_v28, %v3041_v54 }
 0x20e   :  { %v2745_v59 = vpop.eup %2744 }
 0x20f   :  { %v190_v60 = vadd.f32 1.0, %v2745_v59 }
 0x211   :  { %2748 = vrcp.f32 %v190_v60 }
 0x212   :  { %v2747_v61 = vpop.eup %2746 }
 0x213   :  { %v191_v62 = vadd.f32 1.0, %v2747_v61 }
 0x215   :  { %2750 = vrcp.f32 %v191_v62 }
 0x21e   :  { %v2749_v63 = vpop.eup %2748 }
 0x21f   :  { %v196_v3 = vmul.f32 %v2749_v63, %v178_v52 }
 0x222   :  { %v2751_v2 = vpop.eup %2750 }
 0x223   :  { %v197_v4 = vmul.f32 %v2751_v2, %v181_v56  ;;  %v3051_v2 = vsub.s32 5, %v2917_v26 }
 0x225   :  { %v198_v5 = vpack.c.bf16 %v197_v4, %v196_v3 }
 0x227   :  { %2483 = vmatmul.mubr.bf16.vlgmr.msra.gmra.mxu1 %v198_v5 }
 0x228   :  { %2506 = vmatprep.mubr.msk.bf16.mxu1 %vm2834_vm1, %v2833_v14 }
 0x2e7   :  { %v285_v8 = vpop.f32.mrf.mxu1 }
 0x2e8   :  { %v286_v9 = vadd.f32 %v285_v8, %v202_v7 }
 0x2e9   :  { %v2484_v10 = vpop.f32.mrf.mxu1 }
 0x2ea   :  { %v292_v11 = vmul.f32 0.5, %v286_v9 }
 0x2eb   :  { %v288_v12 = vpop.f32.mrf.mxu1 }
 0x2ec   :  { %v2979_v13 = vadd.f32 %v292_v11, %v2881_v0  ;;  %v289_v15 = vadd.f32 %v288_v12, %v202_v7  ;;  %v424_v7 = vrot.slane %v2925_v28, %v3051_v2  ;;  %v3066_v11 = vsub.s32 7, %v2917_v26 }
 0x2ed   :  { %v2485_v16 = vpop.f32.mrf.mxu1 }
 0x2ee   :  { %v293_v17 = vmul.f32 0.5, %v289_v15  ;;  %v296_v18 = vsel %vm71_vm0, %v2979_v13, 0.0  ;;  %v3070_v12 = vrot.slane %v2925_v28, %v3066_v11 }
 0x2ef   :  { %297 = vadd.xlane.f32.xlu0 %v296_v18 }
 0x2f0   :  { %v2984_v19 = vadd.f32 %v293_v17, %v2886_v1 }
 0x2f2   :  { %v299_v20 = vsel %vm71_vm0, %v2984_v19, 0.0 }
 0x2f3   :  { %300 = vadd.xlane.f32.xlu1 %v299_v20 }
 0x378   :  { %v298_v21 = vpop.xlane.xlu0 %297 }
 0x379   :  { %v302_v22 = vmul.f32 0.015625, %v298_v21 }
 0x37b   :  { %v304_v23 = vsub.f32 %v2979_v13, %v302_v22 }
 0x37c   :  { %v301_v0 = vpop.xlane.xlu1 %300 }
 0x37d   :  { %v303_v24 = vmul.f32 0.015625, %v301_v0  ;;  %v306_v25 = vmul.f32 %v304_v23, %v304_v23 }
 0x37f   :  { %v305_v29 = vsub.f32 %v2984_v19, %v303_v24  ;;  %v308_v30 = vsel %vm71_vm0, %v306_v25, 0.0 }
 0x380   :  { %309 = vadd.xlane.f32.xlu0 %v308_v30 }
 0x381   :  { %v307_v31 = vmul.f32 %v305_v29, %v305_v29 }
 0x383   :  { %v311_v1 = vsel %vm71_vm0, %v307_v31, 0.0 }
 0x384   :  { %312 = vadd.xlane.f32.xlu1 %v311_v1 }
 0x396   :  { %432 = vrot.lane.b32.xlu0 %v430_v43, %s2836_s19 }
 0x409   :  { %v310_v44 = vpop.xlane.xlu0 %309 }
 0x40a   :  { %v314_v45 = vmul.f32 0.015625, %v310_v44 }
 0x40c   :  { %v316_v46 = vadd.f32 1e-05, %v314_v45 }
 0x40d   :  { %v313_v47 = vpop.xlane.xlu1 %312  ;;  %v3048_v63 = vpop.permute.xlu0 %432 }
 0x40e   :  { %2752 = vrsqrt.f32 %v316_v46  ;;  %v315_v48 = vmul.f32 0.015625, %v313_v47 }
 0x410   :  { %v317_v49 = vadd.f32 1e-05, %v315_v48 }
 0x412   :  { %2754 = vrsqrt.f32 %v317_v49 }
 0x41b   :  { %v2753_v51 = vpop.eup %2752 }
 0x41c   :  { %v320_v52 = vmul.f32 %v2753_v51, %v304_v23 }
 0x41e   :  { %v326_v57 = vmul.f32 %v325_v53, %v320_v52 }
 0x41f   :  { %v2755_v55 = vpop.eup %2754 }
 0x420   :  { %v321_v56 = vmul.f32 %v2755_v55, %v305_v29  ;;  %v332_v60 = vadd.f32 %v331_v58, %v326_v57 }
 0x422   :  { %v327_v59 = vmul.f32 %v325_v53, %v321_v56 }
 0x424   :  { %v333_v61 = vadd.f32 %v331_v58, %v327_v59 }
 0x426   :  { %v334_v62 = vpack.c.bf16 %v333_v61, %v332_v60 }
 0x428   :  { %2322 = vmatmul.mubr.msk.bf16.vlgmr.msra.gmra.mxu0 %vm71_vm0, %v334_v62 }
 0x429   :  { %2488 = vmatprep.mubr.msk.bf16.mxu0 %vm2834_vm1, %v2833_v14 }
 0x4e8   :  { %v412_v3 = vpop.f32.mrf.mxu0 }
 0x4e9   :  { %v435_v4 = vadd.f32 %v3048_v63, %v412_v3  ;;  %v425_v15 = vadd.f32 %v424_v7, %v412_v3 }
 0x4ea   :  { %v414_v5 = vpop.f32.mrf.mxu0 }
 0x4eb   :  { %v3056_v8 = vpack.c.bf16 %v435_v4, %v435_v4  ;;  %v441_v17 = vadd.f32 %v3070_v12, %v414_v5  ;;  %v443_v20 = vmul.f32 0.25, %v425_v15 }
 0x4ec   :  { %v3058_v9 = vpop.f32.mrf.mxu0 }
 0x4ed   :  { %v3061_v10 = vadd.f32 %v424_v7, %v3058_v9  ;;  %448 = vrot.lane.b32.xlu1 %v3056_v8, %s2836_s19  ;;  %v3075_v21 = vpack.c.bf16 %v441_v17, %v441_v17  ;;  %v3077_v26 = vpack.c.bf16 %v443_v20, %v443_v20 }
 0x4ee   :  { %v3086_v22 = vpop.f32.mrf.mxu0 }
 0x4ef   :  { %v515_v28 = vsel %vm513_vm3, %v3075_v21, 0 }
 0x55f   :  { %v449_v16 = vpop.permute.xlu1 %448 }
 0x560   :  { %v455_v18 = vsel %vm450_vm2, %v449_v16, 0 }
 0x561   :  { %2487 = vmatpush3.bf16.xpose.msra.mxu0 %v455_v18 }
 0x562   :  { %2492 = vmatprep.subr.bf16.mxu0 %v2833_v14 }
 0x568   :  { %2489 = vmatmul.mubr.msk.bf16.vlgmr.msra.gmra.mxu0 %vm450_vm2, %v3077_v26 }
 0x569   :  { %2493 = vmatpush3.bf16.msra.mxu0 %v515_v28  ;;  %2494 = vmatprep.mubr.msk.bf16.mxu0 %vm2834_vm1, %v2833_v14 }
 0x56a   :  { %2498 = vmatprep.subr.bf16.mxu0 %v2833_v14 }
 0x628   :  { %v491_v23 = vpop.f32.mrf.mxu0 }
 0x629   :  { %v498_v0 = vsel %vm497_vm4, %v491_v23, -inf }
 0x62a   :  { %499 = vmax.xlane.f32.xlu1 %v498_v0  ;;  %v2490_v24 = vpop.f32.mrf.mxu0 }
 0x62c   :  { %v494_v25 = vpop.f32.mrf.mxu0 }
 0x62e   :  { %v2491_v29 = vpop.f32.mrf.mxu0 }
 0x63b   :  { %559 = vrot.lane.b32.xlu1 %v3077_v26, %s2837_s20 }
 0x6b3   :  { %v500_v30 = vpop.xlane.xlu1 %499 }
 0x6b4   :  { %v501_v31 = vsub.f32 %v491_v23, %v500_v30 }
 0x6b6   :  { %v502_v1 = vmul.f32 1.442695, %v501_v31 }
 0x6b7   :  { %v560_v46 = vpop.permute.xlu1 %559 }
 0x6b8   :  { %2756 = vpow2.f32 %v502_v1 }
 0x6c5   :  { %v2757_v34 = vpop.eup %2756 }
 0x6c6   :  { %v504_v36 = vsel %vm497_vm4, %v2757_v34, 0.0 }
 0x6c7   :  { %505 = vadd.xlane.f32.xlu0 %v504_v36 }
 0x6dd   :  { %561 = vrot.lane.b32.xlu0 %v3056_v8, %s2838_s21 }
 0x750   :  { %v506_v38 = vpop.xlane.xlu0 %505 }
 0x751   :  { %2758 = vrcp.f32 %v506_v38 }
 0x754   :  { %v562_v43 = vpop.permute.xlu0 %561 }
 0x755   :  { %v567_v45 = vsel %vm450_vm2, %v562_v43, 0 }
 0x75e   :  { %v2759_v40 = vpop.eup %2758 }
 0x75f   :  { %v508_v41 = vmul.f32 %v2759_v40, %v2757_v34 }
 0x761   :  { %v509_v44 = vpack.c.bf16 %v508_v41, %v508_v41 }
 0x763   :  { %2495 = vmatmul.mubr.msk.bf16.vlgmr.msra.gmra.mxu0 %vm497_vm4, %v509_v44 }
 0x764   :  { %2499 = vmatpush3.bf16.xpose.msra.mxu0 %v567_v45  ;;  %2500 = vmatprep.mubr.msk.bf16.mxu0 %vm2834_vm1, %v2833_v14 }
 0x765   :  { %2510 = vmatprep.subr.bf16.mxu0 %v2833_v14 }
 0x76b   :  { %2501 = vmatmul.mubr.msk.bf16.vlgmr.msra.gmra.mxu0 %vm450_vm2, %v560_v46 }
 0x76c   :  { %2512 = vmatprep.mubr.msk.bf16.mxu0 %vm2834_vm1, %v2833_v14 }
 0x823   :  { %v3102_v47 = vpop.f32.mrf.mxu0 }
 0x825   :  { %v2496_v48 = vpop.f32.mrf.mxu0 }
 0x826   :  { %v557_v48 = vpack.c.bf16 %v3102_v47, %v3102_v47 }
 0x827   :  { %v554_v49 = vpop.f32.mrf.mxu0 }
 0x829   :  { %v2497_v51 = vpop.f32.mrf.mxu0 }
 0x82b   :  { %v603_v52 = vpop.f32.mrf.mxu0 }
 0x82c   :  { %v609_v53 = vsel %vm497_vm4, %v603_v52, -inf }
 0x82d   :  { %610 = vmax.xlane.f32.xlu1 %v609_v53  ;;  %v2502_v55 = vpop.f32.mrf.mxu0 }
 0x82f   :  { %v606_v56 = vpop.f32.mrf.mxu0 }
 0x831   :  { %v2503_v57 = vpop.f32.mrf.mxu0 }
 0x83e   :  { %671 = vrot.lane.b32.xlu1 %v3013_v37, %s2836_s19 }
 0x842   :  { %765 = vrot.lane.b32.xlu1 %v3056_v8, %s2839_s22 }
 0x846   :  { %763 = vrot.lane.b32.xlu1 %v3077_v26, %s2840_s23 }
 0x8b6   :  { %v611_v58 = vpop.xlane.xlu1 %610 }
 0x8b7   :  { %v612_v59 = vsub.f32 %v603_v52, %v611_v58 }
 0x8b9   :  { %v613_v60 = vmul.f32 1.442695, %v612_v59 }
 0x8ba   :  { %v3111_v61 = vpop.permute.xlu1 %671 }
 0x8bb   :  { %2760 = vpow2.f32 %v613_v60  ;;  %2511 = vmatpush3.bf16.msra.mxu0 %v3111_v61 }
 0x8bc   :  { %2522 = vmatprep.subr.bf16.mxu0 %v2833_v14 }
 0x8be   :  { %v766_v17 = vpop.permute.xlu1 %765 }
 0x8bf   :  { %v771_v23 = vsel %vm450_vm2, %v766_v17, 0 }
 0x8c2   :  { %v764_v25 = vpop.permute.xlu1 %763 }
 0x8c8   :  { %v2761_v62 = vpop.eup %2760 }
 0x8c9   :  { %v615_v37 = vsel %vm497_vm4, %v2761_v62, 0.0 }
 0x8ca   :  { %616 = vadd.xlane.f32.xlu0 %v615_v37 }
 0x8e0   :  { %622 = vrot.lane.b32.xlu0 %v3075_v21, %s2837_s20 }
 0x953   :  { %v617_v3 = vpop.xlane.xlu0 %616 }
 0x954   :  { %2762 = vrcp.f32 %v617_v3 }
 0x957   :  { %v623_v4 = vpop.permute.xlu0 %622 }
 0x958   :  { %v628_v5 = vsel %vm513_vm3, %v623_v4, 0 }
 0x959   :  { %2505 = vmatpush3.bf16.msra.mxu1 %v628_v5 }
 0x95a   :  { %2516 = vmatprep.subr.bf16.mxu1 %v2833_v14 }
 0x961   :  { %v2763_v7 = vpop.eup %2762 }
 0x962   :  { %v619_v15 = vmul.f32 %v2763_v7, %v2761_v62 }
 0x964   :  { %v620_v16 = vpack.c.bf16 %v619_v15, %v619_v15 }
 0x966   :  { %2507 = vmatmul.mubr.msk.bf16.vlgmr.msra.gmra.mxu1 %vm497_vm4, %v620_v16 }
 0x967   :  { %2518 = vmatprep.mubr.msk.bf16.mxu1 %vm2834_vm1, %v2833_v14 }
 0xa26   :  { %v664_v18 = vpop.f32.mrf.mxu1 }
 0xa27   :  { %v670_v20 = vpack.c.bf16 %v664_v18, %v664_v18 }
 0xa28   :  { %v2508_v28 = vpop.f32.mrf.mxu1 }
 0xa29   :  { %2513 = vmatmul.mubr.msk.bf16.vlgmr.msra.gmra.mxu0 %vm450_vm2, %v670_v20  ;;  %v436_v20 = vadd.f32 %v3048_v63, %v3058_v9  ;;  %v1079_v28 = vmul.f32 0.25, %v3061_v10 }
 0xa2a   :  { %2523 = vmatpush3.bf16.xpose.msra.mxu0 %v771_v23  ;;  %v667_v0 = vpop.f32.mrf.mxu1  ;;  %2524 = vmatprep.mubr.msk.bf16.mxu0 %vm2834_vm1, %v2833_v14 }
 0xa2b   :  { %2534 = vmatprep.subr.bf16.mxu0 %v2833_v14  ;;  %v3168_v23 = vpack.c.bf16 %v436_v20, %v436_v20  ;;  %v3172_v0 = vpack.c.bf16 %v1079_v28, %v1079_v28 }
 0xa2c   :  { %v2509_v24 = vpop.f32.mrf.mxu1 }
 0xa31   :  { %2525 = vmatmul.mubr.msk.bf16.vlgmr.msra.gmra.mxu0 %vm450_vm2, %v764_v25 }
 0xa32   :  { %2536 = vmatprep.mubr.msk.bf16.mxu0 %vm2834_vm1, %v2833_v14 }
 0xae9   :  { %v3131_v29 = vpop.f32.mrf.mxu0 }
 0xaeb   :  { %v2514_v30 = vpop.f32.mrf.mxu0 }
 0xaed   :  { %v714_v31 = vpop.f32.mrf.mxu0 }
 0xaef   :  { %v2515_v1 = vpop.f32.mrf.mxu0 }
 0xaf1   :  { %v807_v34 = vpop.f32.mrf.mxu0 }
 0xaf2   :  { %v813_v36 = vsel %vm497_vm4, %v807_v34, -inf }
 0xaf3   :  { %814 = vmax.xlane.f32.xlu0 %v813_v36  ;;  %v2526_v38 = vpop.f32.mrf.mxu0 }
 0xaf5   :  { %v810_v40 = vpop.f32.mrf.mxu0 }
 0xaf7   :  { %v2527_v41 = vpop.f32.mrf.mxu0 }
 0xb09   :  { %717 = vrot.lane.b32.xlu0 %v3022_v39, %s2836_s19 }
 0xb0d   :  { %923 = vrot.lane.b32.xlu0 %v3056_v8, %s2841_s24 }
 0xb7c   :  { %v815_v43 = vpop.xlane.xlu0 %814 }
 0xb7d   :  { %v816_v44 = vsub.f32 %v807_v34, %v815_v43 }
 0xb7f   :  { %v817_v45 = vmul.f32 1.442695, %v816_v44 }
 0xb80   :  { %v3138_v46 = vpop.permute.xlu0 %717 }
 0xb81   :  { %2764 = vpow2.f32 %v817_v45  ;;  %2517 = vmatpush3.bf16.msra.mxu1 %v3138_v46 }
 0xb82   :  { %2528 = vmatprep.subr.bf16.mxu1 %v2833_v14 }
 0xb84   :  { %2519 = vmatmul.mubr.msk.bf16.vlgmr.msra.gmra.mxu1 %vm450_vm2, %v557_v48  ;;  %v924_v55 = vpop.permute.xlu0 %923 }
 0xb85   :  { %2530 = vmatprep.mubr.msk.bf16.mxu1 %vm2834_vm1, %v2833_v14  ;;  %v929_v57 = vsel %vm450_vm2, %v924_v55, 0 }
 0xb8e   :  { %v2765_v39 = vpop.eup %2764 }
 0xb8f   :  { %v819_v8 = vsel %vm497_vm4, %v2765_v39, 0.0 }
 0xb90   :  { %820 = vadd.xlane.f32.xlu1 %v819_v8 }
 0xba1   :  { %825 = vrot.lane.b32.xlu1 %v3075_v21, %s2840_s23 }
 0xba5   :  { %921 = vrot.lane.b32.xlu1 %v3077_v26, %s2842_s0 }
 0xc19   :  { %v821_v49 = vpop.xlane.xlu1 %820 }
 0xc1a   :  { %2766 = vrcp.f32 %v821_v49 }
 0xc1d   :  { %v826_v47 = vpop.permute.xlu1 %825 }
 0xc1e   :  { %v831_v51 = vsel %vm513_vm3, %v826_v47, 0 }
 0xc1f   :  { %2529 = vmatpush3.bf16.msra.mxu1 %v831_v51 }
 0xc20   :  { %2540 = vmatprep.subr.bf16.mxu1 %v2833_v14 }
 0xc21   :  { %v922_v26 = vpop.permute.xlu1 %921 }
 0xc27   :  { %v2767_v52 = vpop.eup %2766 }
 0xc28   :  { %v823_v53 = vmul.f32 %v2767_v52, %v2765_v39 }
 0xc2a   :  { %v824_v56 = vpack.c.bf16 %v823_v53, %v823_v53 }
 0xc2c   :  { %2531 = vmatmul.mubr.msk.bf16.vlgmr.msra.gmra.mxu1 %vm497_vm4, %v824_v56 }
 0xc2d   :  { %2541 = vmatpush3.bf16.xpose.msra.mxu1 %v929_v57  ;;  %2542 = vmatprep.mubr.msk.bf16.mxu1 %vm2834_vm1, %v2833_v14 }
 0xc2e   :  { %2552 = vmatprep.subr.bf16.mxu1 %v2833_v14 }
 0xc34   :  { %2543 = vmatmul.mubr.msk.bf16.vlgmr.msra.gmra.mxu1 %vm450_vm2, %v922_v26 }
 0xc35   :  { %2554 = vmatprep.mubr.msk.bf16.mxu1 %vm2834_vm1, %v2833_v14 }
 0xc44   :  { %v757_v58 = vpop.f32.mrf.mxu1 }
 0xc45   :  { %v758_v48 = vadd.f32 %v757_v58, %v3131_v29 }
 0xc46   :  { %v2520_v59 = vpop.f32.mrf.mxu1 }
 0xc48   :  { %v760_v60 = vpop.f32.mrf.mxu1 }
 0xc4a   :  { %v2521_v62 = vpop.f32.mrf.mxu1 }
 0xcec   :  { %v867_v37 = vpop.f32.mrf.mxu1 }
 0xcee   :  { %v2532_v3 = vpop.f32.mrf.mxu1 }
 0xcf0   :  { %v870_v4 = vpop.f32.mrf.mxu1 }
 0xcf1   :  { %v442_v4 = vadd.f32 %v3070_v12, %v3086_v22 }
 0xcf2   :  { %v2533_v5 = vpop.f32.mrf.mxu1 }
 0xcf4   :  { %v965_v7 = vpop.f32.mrf.mxu1 }
 0xcf5   :  { %v971_v15 = vsel %vm497_vm4, %v965_v7, -inf }
 0xcf6   :  { %972 = vmax.xlane.f32.xlu0 %v971_v15  ;;  %v2544_v16 = vpop.f32.mrf.mxu1 }
 0xcf7   :  { %v3219_v16 = vpack.c.bf16 %v442_v4, %v442_v4 }
 0xcf8   :  { %v968_v17 = vpop.f32.mrf.mxu1 }
 0xcf9   :  { %v1148_v20 = vsel %vm513_vm3, %v3219_v16, 0 }
 0xcfa   :  { %v2545_v18 = vpop.f32.mrf.mxu1 }
 0xd0c   :  { %874 = vrot.lane.b32.xlu0 %v3004_v35, %s2836_s19  ;;  %v873_v35 = vpack.c.bf16 %v867_v37, %v867_v37 }
 0xd10   :  { %1084 = vrot.lane.b32.xlu0 %v3168_v23, %s2836_s19 }
 0xd14   :  { %1192 = vrot.lane.b32.xlu0 %v3172_v0, %s2837_s20 }
 0xd7f   :  { %v973_v24 = vpop.xlane.xlu0 %972 }
 0xd80   :  { %v974_v25 = vsub.f32 %v965_v7, %v973_v24 }
 0xd82   :  { %v975_v30 = vmul.f32 1.442695, %v974_v25 }
 0xd83   :  { %v3176_v31 = vpop.permute.xlu0 %874 }
 0xd84   :  { %2768 = vpow2.f32 %v975_v30  ;;  %2535 = vmatpush3.bf16.msra.mxu0 %v3176_v31 }
 0xd85   :  { %2546 = vmatprep.subr.bf16.mxu0 %v2833_v14 }
 0xd87   :  { %2537 = vmatmul.mubr.msk.bf16.vlgmr.msra.gmra.mxu0 %vm450_vm2, %v873_v35  ;;  %v1085_v40 = vpop.permute.xlu0 %1084 }
 0xd88   :  { %2548 = vmatprep.mubr.msk.bf16.mxu0 %vm2834_vm1, %v2833_v14  ;;  %v1090_v43 = vsel %vm450_vm2, %v1085_v40, 0 }
 0xd8b   :  { %v1193_v45 = vpop.permute.xlu0 %1192 }
 0xd91   :  { %v2769_v63 = vpop.eup %2768 }
 0xd92   :  { %v977_v9 = vsel %vm497_vm4, %v2769_v63, 0.0 }
 0xd93   :  { %978 = vadd.xlane.f32.xlu1 %v977_v9 }
 0xda4   :  { %983 = vrot.lane.b32.xlu1 %v3075_v21, %s2842_s0 }
 0xda8   :  { %1194 = vrot.lane.b32.xlu1 %v3168_v23, %s2838_s21 }
 0xe1c   :  { %v979_v10 = vpop.xlane.xlu1 %978 }
 0xe1d   :  { %2770 = vrcp.f32 %v979_v10 }
 0xe20   :  { %v984_v1 = vpop.permute.xlu1 %983 }
 0xe21   :  { %v989_v34 = vsel %vm513_vm3, %v984_v1, 0 }
 0xe22   :  { %2547 = vmatpush3.bf16.msra.mxu0 %v989_v34 }
 0xe23   :  { %2558 = vmatprep.subr.bf16.mxu0 %v2833_v14 }
 0xe24   :  { %v1195_v21 = vpop.permute.xlu1 %1194 }
 0xe25   :  { %v1200_v44 = vsel %vm450_vm2, %v1195_v21, 0 }
 0xe2a   :  { %v2771_v36 = vpop.eup %2770 }
 0xe2b   :  { %v981_v38 = vmul.f32 %v2771_v36, %v2769_v63 }
 0xe2d   :  { %v982_v41 = vpack.c.bf16 %v981_v38, %v981_v38 }
 0xe2f   :  { %2549 = vmatmul.mubr.msk.bf16.vlgmr.msra.gmra.mxu0 %vm497_vm4, %v982_v41 }
 0xe30   :  { %2559 = vmatpush3.bf16.xpose.msra.mxu0 %v1090_v43  ;;  %2560 = vmatprep.mubr.msk.bf16.mxu0 %vm2834_vm1, %v2833_v14 }
 0xe31   :  { %2570 = vmatprep.subr.bf16.mxu0 %v2833_v14 }
 0xe37   :  { %2561 = vmatmul.mubr.msk.bf16.vlgmr.msra.gmra.mxu0 %vm450_vm2, %v3172_v0 }
 0xe38   :  { %2571 = vmatpush3.bf16.xpose.msra.mxu0 %v1200_v44  ;;  %2572 = vmatprep.mubr.msk.bf16.mxu0 %vm2834_vm1, %v2833_v14 }
 0xe39   :  { %2582 = vmatprep.subr.bf16.mxu0 %v2833_v14 }
 0xe3f   :  { %2573 = vmatmul.mubr.msk.bf16.vlgmr.msra.gmra.mxu0 %vm450_vm2, %v1193_v45 }
 0xe40   :  { %2583 = vmatpush3.bf16.msra.mxu0 %v3111_v61  ;;  %2584 = vmatprep.mubr.msk.bf16.mxu0 %vm2834_vm1, %v2833_v14 }
 0xe41   :  { %2594 = vmatprep.subr.bf16.mxu0 %v2833_v14 }
 0xe47   :  { %v914_v39 = vpop.f32.mrf.mxu0 }
 0xe48   :  { %v3207_v8 = vadd.f32 %v914_v39, %v758_v48 }
 0xe49   :  { %v2538_v49 = vpop.f32.mrf.mxu0 }
 0xe4b   :  { %v917_v47 = vpop.f32.mrf.mxu0 }
 0xe4d   :  { %v2539_v51 = vpop.f32.mrf.mxu0 }
 0xeef   :  { %v1025_v52 = vpop.f32.mrf.mxu0 }
 0xef1   :  { %v2550_v53 = vpop.f32.mrf.mxu0 }
 0xef3   :  { %v1028_v55 = vpop.f32.mrf.mxu0 }
 0xef5   :  { %v2551_v56 = vpop.f32.mrf.mxu0 }
 0xef7   :  { %v1126_v57 = vpop.f32.mrf.mxu0 }
 0xef8   :  { %v1132_v61 = vsel %vm497_vm4, %v1126_v57, -inf }
 0xef9   :  { %1133 = vmax.xlane.f32.xlu1 %v1132_v61  ;;  %v2562_v26 = vpop.f32.mrf.mxu0 }
 0xefb   :  { %v1129_v59 = vpop.f32.mrf.mxu0 }
 0xefd   :  { %v2563_v60 = vpop.f32.mrf.mxu0 }
 0xeff   :  { %v1236_v62 = vpop.f32.mrf.mxu0 }
 0xf00   :  { %v1242_v29 = vsel %vm497_vm4, %v1236_v62, -inf }
 0xf01   :  { %1243 = vmax.xlane.f32.xlu0 %v1242_v29  ;;  %v2574_v58 = vpop.f32.mrf.mxu0 }
 0xf03   :  { %v1239_v37 = vpop.f32.mrf.mxu0 }
 0xf05   :  { %v2575_v3 = vpop.f32.mrf.mxu0 }
 0xf0a   :  { %1032 = vrot.lane.b32.xlu1 %v2995_v33, %s2836_s19  ;;  %v1031_v33 = vpack.c.bf16 %v1025_v52, %v1025_v52 }
 0xf0e   :  { %1392 = vrot.lane.b32.xlu1 %v3168_v23, %s2839_s22 }
 0xf12   :  { %1390 = vrot.lane.b32.xlu1 %v3172_v0, %s2840_s23 }
 0xf82   :  { %v1134_v5 = vpop.xlane.xlu1 %1133 }
 0xf83   :  { %v1135_v7 = vsub.f32 %v1126_v57, %v1134_v5 }
 0xf85   :  { %v1136_v15 = vmul.f32 1.442695, %v1135_v7 }
 0xf86   :  { %v3221_v17 = vpop.permute.xlu1 %1032 }
 0xf87   :  { %2772 = vpow2.f32 %v1136_v15  ;;  %2553 = vmatpush3.bf16.msra.mxu1 %v3221_v17 }
 0xf88   :  { %2564 = vmatprep.subr.bf16.mxu1 %v2833_v14 }
 0xf8a   :  { %2555 = vmatmul.mubr.msk.bf16.vlgmr.msra.gmra.mxu1 %vm450_vm2, %v1031_v33  ;;  %v1244_v18 = vpop.xlane.xlu0 %1243  ;;  %v1393_v52 = vpop.permute.xlu1 %1392 }
 0xf8b   :  { %v1245_v12 = vsub.f32 %v1236_v62, %v1244_v18  ;;  %2565 = vmatpush3.bf16.msra.mxu1 %v1148_v20  ;;  %2566 = vmatprep.mubr.msk.bf16.mxu1 %vm2834_vm1, %v2833_v14 }
 0xf8c   :  { %2576 = vmatprep.subr.bf16.mxu1 %v2833_v14 }
 0xf8d   :  { %v1246_v22 = vmul.f32 1.442695, %v1245_v12 }
 0xf8e   :  { %v1391_v26 = vpop.permute.xlu1 %1390 }
 0xf8f   :  { %2774 = vpow2.f32 %v1246_v22 }
 0xf94   :  { %v2773_v28 = vpop.eup %2772 }
 0xf95   :  { %v1138_v24 = vsel %vm497_vm4, %v2773_v28, 0.0 }
 0xf96   :  { %1139 = vadd.xlane.f32.xlu0 %v1138_v24 }
 0xf9c   :  { %v2775_v25 = vpop.eup %2774 }
 0xf9d   :  { %v1248_v30 = vsel %vm497_vm4, %v2775_v25, 0.0 }
 0xf9e   :  { %1249 = vadd.xlane.f32.xlu0 %v1248_v30 }
 0xfb4   :  { %1255 = vrot.lane.b32.xlu0 %v3219_v16, %s2837_s20 }
0x101f   :  { %v1140_v35 = vpop.xlane.xlu0 %1139 }
0x1020   :  { %2776 = vrcp.f32 %v1140_v35 }
0x1027   :  { %v1250_v63 = vpop.xlane.xlu0 %1249 }
0x1028   :  { %2778 = vrcp.f32 %v1250_v63 }
0x102b   :  { %v1256_v1 = vpop.permute.xlu0 %1255 }
0x102c   :  { %v1261_v36 = vsel %vm513_vm3, %v1256_v1, 0 }
0x102d   :  { %v2777_v9 = vpop.eup %2776 }
0x102e   :  { %v1142_v10 = vmul.f32 %v2777_v9, %v2773_v28 }
0x1030   :  { %v1143_v34 = vpack.c.bf16 %v1142_v10, %v1142_v10 }
0x1032   :  { %2567 = vmatmul.mubr.msk.bf16.vlgmr.msra.gmra.mxu1 %vm497_vm4, %v1143_v34 }
0x1033   :  { %2577 = vmatpush3.bf16.msra.mxu1 %v1261_v36  ;;  %2578 = vmatprep.mubr.msk.bf16.mxu1 %vm2834_vm1, %v2833_v14 }
0x1034   :  { %2588 = vmatprep.subr.bf16.mxu1 %v2833_v14 }
0x1035   :  { %v2779_v38 = vpop.eup %2778 }
0x1036   :  { %v1252_v40 = vmul.f32 %v2779_v38, %v2775_v25 }
0x1038   :  { %v1253_v41 = vpack.c.bf16 %v1252_v40, %v1252_v40 }
0x103a   :  { %2579 = vmatmul.mubr.msk.bf16.vlgmr.msra.gmra.mxu1 %vm497_vm4, %v1253_v41 }
0x103b   :  { %2589 = vmatpush3.bf16.msra.mxu1 %v3138_v46  ;;  %2590 = vmatprep.mubr.msk.bf16.mxu1 %vm2834_vm1, %v2833_v14 }
0x103c   :  { %2600 = vmatprep.subr.bf16.mxu1 %v2833_v14 }
0x104a   :  { %v1072_v43 = vpop.f32.mrf.mxu1 }
0x104b   :  { %v3246_v21 = vadd.f32 %v1072_v43, %v3207_v8  ;;  %v1398_v8 = vsel %vm450_vm2, %v1393_v52, 0  ;;  %v3294_v52 = vld [vmem:[%s3504_s4 + $0x8] sm:$0xff] }
0x104c   :  { %v2556_v44 = vpop.f32.mrf.mxu1 }
0x104e   :  { %v1075_v45 = vpop.f32.mrf.mxu1 }
0x1050   :  { %v2557_v48 = vpop.f32.mrf.mxu1 }
0x10f2   :  { %v1184_v39 = vpop.f32.mrf.mxu1 }
0x10f3   :  { %v1190_v49 = vpack.c.bf16 %v1184_v39, %v1184_v39 }
0x10f4   :  { %v2568_v47 = vpop.f32.mrf.mxu1 }
0x10f5   :  { %2591 = vmatmul.mubr.msk.bf16.vlgmr.msra.gmra.mxu1 %vm450_vm2, %v1190_v49 }
0x10f6   :  { %v1187_v51 = vpop.f32.mrf.mxu1  ;;  %2602 = vmatprep.mubr.msk.bf16.mxu1 %vm2834_vm1, %v2833_v14 }
0x10f8   :  { %v2569_v46 = vpop.f32.mrf.mxu1 }
0x10fa   :  { %v1297_v53 = vpop.f32.mrf.mxu1 }
0x10fb   :  { %v1303_v55 = vpack.c.bf16 %v1297_v53, %v1297_v53  ;;  %v1700_v53 = vadd.f32 %v3246_v21, %v2979_v13 }
0x10fc   :  { %v2580_v56 = vpop.f32.mrf.mxu1 }
0x10fd   :  { %2585 = vmatmul.mubr.msk.bf16.vlgmr.msra.gmra.mxu0 %vm450_vm2, %v1303_v55 }
0x10fe   :  { %2595 = vmatpush3.bf16.xpose.msra.mxu0 %v1398_v8  ;;  %v1300_v57 = vpop.f32.mrf.mxu1  ;;  %2596 = vmatprep.mubr.msk.bf16.mxu0 %vm2834_vm1, %v2833_v14 }
0x10ff   :  { %2606 = vmatprep.subr.bf16.mxu0 %v2833_v14 }
0x1100   :  { %v2581_v61 = vpop.f32.mrf.mxu1 }
0x1105   :  { %2597 = vmatmul.mubr.msk.bf16.vlgmr.msra.gmra.mxu0 %vm450_vm2, %v1391_v26 }
0x1106   :  { %2607 = vmatpush3.bf16.msra.mxu0 %v3176_v31  ;;  %2608 = vmatprep.mubr.msk.bf16.mxu0 %vm2834_vm1, %v2833_v14 }
0x1107   :  { %2618 = vmatprep.subr.bf16.mxu0 %v2833_v14 }
0x11b5   :  { %v1384_v59 = vpop.f32.mrf.mxu1 }
0x11b7   :  { %v2592_v60 = vpop.f32.mrf.mxu1 }
0x11b9   :  { %v1387_v62 = vpop.f32.mrf.mxu1 }
0x11bb   :  { %v2593_v29 = vpop.f32.mrf.mxu1 }
0x11bd   :  { %v1341_v58 = vpop.f32.mrf.mxu0 }
0x11be   :  { %v3261_v37 = vadd.f32 %v1384_v59, %v1341_v58 }
0x11bf   :  { %v2586_v3 = vpop.f32.mrf.mxu0 }
0x11c1   :  { %v1344_v4 = vpop.f32.mrf.mxu0 }
0x11c3   :  { %v2587_v5 = vpop.f32.mrf.mxu0 }
0x11c5   :  { %v1434_v7 = vpop.f32.mrf.mxu0 }
0x11c6   :  { %v1440_v15 = vsel %vm497_vm4, %v1434_v7, -inf }
0x11c7   :  { %1441 = vmax.xlane.f32.xlu1 %v1440_v15  ;;  %v2598_v31 = vpop.f32.mrf.mxu0 }
0x11c9   :  { %v1437_v33 = vpop.f32.mrf.mxu0 }
0x11cb   :  { %v2599_v18 = vpop.f32.mrf.mxu0 }
0x11d8   :  { %1547 = vrot.lane.b32.xlu1 %v3168_v23, %s2841_s24 }
0x11dc   :  { %1545 = vrot.lane.b32.xlu1 %v3172_v0, %s2842_s0 }
0x1250   :  { %v1442_v20 = vpop.xlane.xlu1 %1441 }
0x1251   :  { %v1443_v12 = vsub.f32 %v1434_v7, %v1442_v20 }
0x1253   :  { %v1444_v22 = vmul.f32 1.442695, %v1443_v12 }
0x1254   :  { %v1548_v63 = vpop.permute.xlu1 %1547 }
0x1255   :  { %2780 = vpow2.f32 %v1444_v22  ;;  %v1553_v10 = vsel %vm450_vm2, %v1548_v63, 0 }
0x1258   :  { %v1546_v1 = vpop.permute.xlu1 %1545 }
0x1262   :  { %v2781_v28 = vpop.eup %2780 }
0x1263   :  { %v1446_v24 = vsel %vm497_vm4, %v2781_v28, 0.0 }
0x1264   :  { %1447 = vadd.xlane.f32.xlu0 %v1446_v24 }
0x127a   :  { %1452 = vrot.lane.b32.xlu0 %v3219_v16, %s2840_s23 }
0x12ed   :  { %v1448_v25 = vpop.xlane.xlu0 %1447 }
0x12ee   :  { %2782 = vrcp.f32 %v1448_v25 }
0x12f1   :  { %v1453_v30 = vpop.permute.xlu0 %1452 }
0x12f2   :  { %v1458_v35 = vsel %vm513_vm3, %v1453_v30, 0 }
0x12f3   :  { %2601 = vmatpush3.bf16.msra.mxu1 %v1458_v35 }
0x12f4   :  { %2612 = vmatprep.subr.bf16.mxu1 %v2833_v14 }
0x12fb   :  { %v2783_v23 = vpop.eup %2782 }
0x12fc   :  { %v1450_v0 = vmul.f32 %v2783_v23, %v2781_v28 }
0x12fe   :  { %v1451_v9 = vpack.c.bf16 %v1450_v0, %v1450_v0 }
0x1300   :  { %2603 = vmatmul.mubr.msk.bf16.vlgmr.msra.gmra.mxu1 %vm497_vm4, %v1451_v9 }
0x1301   :  { %2613 = vmatpush3.bf16.xpose.msra.mxu1 %v1553_v10  ;;  %2614 = vmatprep.mubr.msk.bf16.mxu1 %vm2834_vm1, %v2833_v14 }
0x1302   :  { %2624 = vmatprep.subr.bf16.mxu1 %v2833_v14 }
0x1308   :  { %2615 = vmatmul.mubr.msk.bf16.vlgmr.msra.gmra.mxu1 %vm450_vm2, %v1546_v1 }
0x1309   :  { %2625 = vmatpush3.bf16.msra.mxu1 %v3221_v17  ;;  %2626 = vmatprep.mubr.msk.bf16.mxu1 %vm2834_vm1, %v2833_v14 }
0x130a   :  { %2642 = vmatprep.subr.bf16.mxu1 %v2833_v14 }
0x13c0   :  { %v1494_v34 = vpop.f32.mrf.mxu1 }
0x13c1   :  { %v1500_v36 = vpack.c.bf16 %v1494_v34, %v1494_v34  ;;  %v2730_v34 = vld [vmem:[%s3507_s1 + $0x48] ss:$16 sps:$4 sm:$0xff]  }
0x13c2   :  { %v2604_v38 = vpop.f32.mrf.mxu1 }
0x13c3   :  { %2609 = vmatmul.mubr.msk.bf16.vlgmr.msra.gmra.mxu0 %vm450_vm2, %v1500_v36  ;;  %v2732_v36 = vld [vmem:[%s3507_s1 + $0x28] ss:$16 sps:$4 sm:$0xff]  }
0x13c4   :  { %v1497_v40 = vpop.f32.mrf.mxu1  ;;  %2620 = vmatprep.mubr.msk.bf16.mxu0 %vm2834_vm1, %v2833_v14  ;;  %v2734_v38 = vld [vmem:[%s3507_s1 + $0x8] ss:$16 sps:$4 sm:$0xff]  }
0x13c5   :  { %v1824_v40 = vrot.slane %v3294_v52, %v3041_v54 }
0x13c6   :  { %v2605_v41 = vpop.f32.mrf.mxu1 }
0x13c8   :  { %v1589_v43 = vpop.f32.mrf.mxu1 }
0x13c9   :  { %v1595_v44 = vsel %vm497_vm4, %v1589_v43, -inf }
0x13ca   :  { %1596 = vmax.xlane.f32.xlu0 %v1595_v44  ;;  %v2616_v17 = vpop.f32.mrf.mxu1 }
0x13cc   :  { %v1592_v45 = vpop.f32.mrf.mxu1 }
0x13ce   :  { %v2617_v48 = vpop.f32.mrf.mxu1 }
0x13e0   :  { %1607 = vrot.lane.b32.xlu0 %v3219_v16, %s2842_s0  ;;  %v1705_v16 = vrot.slane %v3294_v52, %v2920_v27 }
0x13e2   :  { %v3300_v56 = vadd.f32 %v1705_v16, %v1700_v53 }
0x13e4   :  { %v1708_v57 = vsel %vm71_vm0, %v3300_v56, 0.0  ;;  %1826 = vrot.lane.b32.xlu0 %v1824_v40, %s2836_s19 }
0x1453   :  { %v1597_v39 = vpop.xlane.xlu0 %1596 }
0x1454   :  { %v1598_v49 = vsub.f32 %v1589_v43, %v1597_v39 }
0x1456   :  { %v1599_v47 = vmul.f32 1.442695, %v1598_v49 }
0x1457   :  { %v1608_v51 = vpop.permute.xlu0 %1607 }
0x1458   :  { %2784 = vpow2.f32 %v1599_v47  ;;  %v1613_v46 = vsel %vm513_vm3, %v1608_v51, 0  ;;  %v1737_v47 = vrot.slane %v3294_v52, %v2930_v32 }
0x1459   :  { %2619 = vmatpush3.bf16.msra.mxu0 %v1613_v46 }
0x145a   :  { %2630 = vmatprep.subr.bf16.mxu0 %v2833_v14 }
0x1465   :  { %v2785_v55 = vpop.eup %2784 }
0x1466   :  { %v1601_v8 = vsel %vm497_vm4, %v2785_v55, 0.0 }
0x1467   :  { %1602 = vadd.xlane.f32.xlu1 %v1601_v8 }
0x146b   :  { %1709 = vadd.xlane.f32.xlu1 %v1708_v57 }
0x1483   :  { %v1538_v61 = vpop.f32.mrf.mxu0 }
0x1484   :  { %v1544_v26 = vadd.f32 %v1538_v61, %v3261_v37  ;;  %v2698_v61 = vld [vmem:[%s3503_s2 + $0x34] ss:$8 sps:$4 sm:$0xff]  }
0x1485   :  { %v2610_v59 = vpop.f32.mrf.mxu0 }
0x1486   :  { %v2701_v59 = vld [vmem:[%s3503_s2 + $0x24] ss:$8 sps:$4 sm:$0xff]  }
0x1487   :  { %v1541_v60 = vpop.f32.mrf.mxu0 }
0x1488   :  { %v2704_v60 = vld [vmem:[%s3503_s2 + $0x14] ss:$8 sps:$4 sm:$0xff]  }
0x1489   :  { %v2611_v62 = vpop.f32.mrf.mxu0 }
0x148a   :  { %v2707_v62 = vld [vmem:[%s3503_s2 + $0x4] ss:$8 sps:$4 sm:$0xff]  }
0x14f0   :  { %v1603_v13 = vpop.xlane.xlu1 %1602 }
0x14f1   :  { %2786 = vrcp.f32 %v1603_v13  ;;  %v1827_v13 = vpop.permute.xlu0 %1826 }
0x14f4   :  { %v1710_v15 = vpop.xlane.xlu1 %1709 }
0x14f5   :  { %v1714_v31 = vmul.f32 0.015625, %v1710_v15 }
0x14f7   :  { %v1716_v12 = vsub.f32 %v3300_v56, %v1714_v31 }
0x14f9   :  { %v1718_v35 = vmul.f32 %v1716_v12, %v1716_v12 }
0x14fb   :  { %v1720_v23 = vsel %vm71_vm0, %v1718_v35, 0.0  ;;  %v1818_v35 = vrot.slane %v3294_v52, %v3036_v50 }
0x14fe   :  { %v2787_v21 = vpop.eup %2786 }
0x14ff   :  { %v1605_v29 = vmul.f32 %v2787_v21, %v2785_v55 }
0x1501   :  { %v1606_v58 = vpack.c.bf16 %v1605_v29, %v1605_v29 }
0x1503   :  { %2621 = vmatmul.mubr.msk.bf16.vlgmr.msra.gmra.mxu0 %vm497_vm4, %v1606_v58 }
0x1504   :  { %2638 = vmatprep.mubr.msk.bf16.mxu0 %vm2834_vm1, %v2833_v14 }
0x15c3   :  { %v1649_v3 = vpop.f32.mrf.mxu0 }
0x15c4   :  { %v1655_v4 = vpack.c.bf16 %v1649_v3, %v1649_v3 }
0x15c5   :  { %v2622_v5 = vpop.f32.mrf.mxu0 }
0x15c6   :  { %2627 = vmatmul.mubr.msk.bf16.vlgmr.msra.gmra.mxu1 %vm450_vm2, %v1655_v4 }
0x15c7   :  { %v1652_v7 = vpop.f32.mrf.mxu0  ;;  %2650 = vmatprep.mubr.msk.bf16.mxu1 %vm2834_vm1, %v2833_v14 }
0x15c9   :  { %v2623_v37 = vpop.f32.mrf.mxu0 }
0x1686   :  { %v1693_v33 = vpop.f32.mrf.mxu1 }
0x1687   :  { %v1699_v18 = vadd.f32 %v1693_v33, %v1544_v26 }
0x1688   :  { %v2628_v20 = vpop.f32.mrf.mxu1 }
0x1689   :  { %v1701_v22 = vadd.f32 %v1699_v18, %v2984_v19  ;;  %v2728_v19 = vld [vmem:[%s3507_s1 + $0x68] ss:$16 sps:$4 sm:$0xff]  }
0x168a   :  { %v1696_v28 = vpop.f32.mrf.mxu1  ;;  %2631 = vmatpush3.bf16.msra.mxu0 %v2728_v19 }
0x168b   :  { %v3314_v24 = vadd.f32 %v1705_v16, %v1701_v22  ;;  %2632 = vmatprep.subr.bf16.mxu0 %v2833_v14  ;;  %v1743_v16 = vrot.slane %v3294_v52, %v2974_v6  ;;  %v2736_v22 = vld [vmem:[%s3507_s1 + $0x6c] ss:$16 sps:$4 sm:$0xff]  }
0x168c   :  { %v2629_v25 = vpop.f32.mrf.mxu1  ;;  %2643 = vmatpush3.bf16.msra.mxu1 %v2736_v22  ;;  %v2737_v28 = vld [vmem:[%s3507_s1 + $0x4c] ss:$16 sps:$4 sm:$0xff]  }
0x168d   :  { %v1711_v30 = vsel %vm71_vm0, %v3314_v24, 0.0  ;;  %2644 = vmatprep.subr.bf16.mxu1 %v2833_v14  ;;  %v2738_v25 = vld [vmem:[%s3507_s1 + $0x2c] ss:$16 sps:$4 sm:$0xff]  }
0x168e   :  { %1712 = vadd.xlane.f32.xlu1 %v1711_v30  ;;  %2633 = vmatpush3.bf16.msra.mxu0 %v2730_v34  ;;  %v2739_v30 = vld [vmem:[%s3507_s1 + $0xc] ss:$16 sps:$4 sm:$0xff]  }
0x168f   :  { %2634 = vmatprep.subr.bf16.mxu0 %v2833_v14 }
0x1690   :  { %2645 = vmatpush3.bf16.msra.mxu1 %v2737_v28 }
0x1691   :  { %2646 = vmatprep.subr.bf16.mxu1 %v2833_v14 }
0x1692   :  { %1721 = vadd.xlane.f32.xlu1 %v1720_v23  ;;  %2635 = vmatpush3.bf16.msra.mxu0 %v2732_v36  ;;  %v3385_v23 = vld [vmem:[%s3504_s4 + $0x10] sm:$0xff] }
0x1693   :  { %2636 = vmatprep.subr.bf16.mxu0 %v2833_v14  ;;  %v1862_v19 = vrot.slane %v3385_v23, %v3030_v42 }
0x1694   :  { %2647 = vmatpush3.bf16.msra.mxu1 %v2738_v25 }
0x1695   :  { %2648 = vmatprep.subr.bf16.mxu1 %v2833_v14 }
0x1696   :  { %2637 = vmatpush3.bf16.msra.mxu0 %v2734_v38 }
0x1697   :  { %2654 = vmatprep.subr.bf16.mxu0 %v2833_v14 }
0x1698   :  { %2649 = vmatpush3.bf16.msra.mxu1 %v2739_v30 }
0x1699   :  { %2666 = vmatprep.subr.bf16.mxu1 %v2833_v14 }
0x1717   :  { %v1713_v0 = vpop.xlane.xlu1 %1712 }
0x1718   :  { %v1715_v63 = vmul.f32 0.015625, %v1713_v0 }
0x171a   :  { %v1717_v9 = vsub.f32 %v3314_v24, %v1715_v63  ;;  %v69_v63 = vld [vmem:[%s3504_s4 + $0x18] sm:$0x7] }
0x171b   :  { %v1722_v41 = vpop.xlane.xlu1 %1721  ;;  %v1882_v34 = vrot.slane %v69_v63, %v2920_v27  ;;  %v1896_v38 = vrot.slane %v69_v63, %v2930_v32  ;;  %v1910_v40 = vrot.slane %v69_v63, %v2974_v6 }
0x171c   :  { %v1719_v10 = vmul.f32 %v1717_v9, %v1717_v9  ;;  %v1726_v43 = vmul.f32 0.015625, %v1722_v41 }
0x171e   :  { %v1723_v1 = vsel %vm71_vm0, %v1719_v10, 0.0  ;;  %v1728_v44 = vadd.f32 1e-05, %v1726_v43 }
0x171f   :  { %1724 = vadd.xlane.f32.xlu1 %v1723_v1  ;;  %v1868_v1 = vrot.slane %v3385_v23, %v3066_v11 }
0x1720   :  { %2788 = vrsqrt.f32 %v1728_v44 }
0x172d   :  { %v2789_v39 = vpop.eup %2788 }
0x172e   :  { %v1732_v49 = vmul.f32 %v2789_v39, %v1716_v12 }
0x1730   :  { %v1738_v53 = vmul.f32 %v1737_v47, %v1732_v49 }
0x1732   :  { %v1744_v8 = vadd.f32 %v1743_v16, %v1738_v53 }
0x17a8   :  { %v1725_v17 = vpop.xlane.xlu1 %1724 }
0x17a9   :  { %v1727_v45 = vmul.f32 0.015625, %v1725_v17 }
0x17ab   :  { %v1729_v48 = vadd.f32 1e-05, %v1727_v45 }
0x17ad   :  { %2790 = vrsqrt.f32 %v1729_v48 }
0x17ba   :  { %v2791_v51 = vpop.eup %2790 }
0x17bb   :  { %v1733_v46 = vmul.f32 %v2791_v51, %v1717_v9 }
0x17bd   :  { %v1739_v55 = vmul.f32 %v1737_v47, %v1733_v46 }
0x17bf   :  { %v1745_v57 = vadd.f32 %v1743_v16, %v1739_v55 }
0x17c1   :  { %v1746_v26 = vpack.c.bf16 %v1745_v57, %v1744_v8 }
0x17c3   :  { %2639 = vmatmul.mubr.msk.bf16.vlgmr.msra.gmra.mxu0 %vm71_vm0, %v1746_v26 }
0x17c4   :  { %2655 = vmatpush3.bf16.msra.mxu0 %v2698_v61  ;;  %2662 = vmatprep.mubr.msk.bf16.mxu0 %vm2834_vm1, %v2833_v14 }
0x17c5   :  { %2656 = vmatprep.subr.bf16.mxu0 %v2833_v14 }
0x17c8   :  { %2657 = vmatpush3.bf16.msra.mxu0 %v2701_v59 }
0x17c9   :  { %2658 = vmatprep.subr.bf16.mxu0 %v2833_v14 }
0x17cc   :  { %2659 = vmatpush3.bf16.msra.mxu0 %v2704_v60 }
0x17cd   :  { %2660 = vmatprep.subr.bf16.mxu0 %v2833_v14 }
0x17d0   :  { %2661 = vmatpush3.bf16.msra.mxu0 %v2707_v62 }
0x1883   :  { %v1808_v21 = vpop.f32.mrf.mxu0 }
0x1884   :  { %v1829_v29 = vadd.f32 %v1827_v13, %v1808_v21  ;;  %v1819_v0 = vadd.f32 %v1818_v35, %v1808_v21 }
0x1885   :  { %v2640_v58 = vpop.f32.mrf.mxu0 }
0x1886   :  { %v2352_v3 = vmul.f32 -1.442695, %v1829_v29  ;;  %v1972_v58 = vrot.slane %v3294_v52, %v3030_v42 }
0x1887   :  { %v1811_v4 = vpop.f32.mrf.mxu0 }
0x1888   :  { %2792 = vpow2.f32 %v2352_v3  ;;  %v1830_v5 = vadd.f32 %v1827_v13, %v1811_v4  ;;  %v1820_v36 = vadd.f32 %v1818_v35, %v1811_v4  ;;  %v1966_v3 = vrot.slane %v3294_v52, %v3051_v2 }
0x1889   :  { %v2641_v7 = vpop.f32.mrf.mxu0 }
0x188a   :  { %v2353_v37 = vmul.f32 -1.442695, %v1830_v5 }
0x188c   :  { %2794 = vpow2.f32 %v2353_v37 }
0x1895   :  { %v2793_v15 = vpop.eup %2792 }
0x1896   :  { %v1837_v31 = vadd.f32 1.0, %v2793_v15 }
0x1898   :  { %2796 = vrcp.f32 %v1837_v31 }
0x1899   :  { %v2795_v33 = vpop.eup %2794 }
0x189a   :  { %v1838_v18 = vadd.f32 1.0, %v2795_v33 }
0x189c   :  { %2798 = vrcp.f32 %v1838_v18 }
0x18a5   :  { %v2797_v20 = vpop.eup %2796 }
0x18a6   :  { %1845 = vrot.lane.b32.xlu1 %v2797_v20, %s2836_s19 }
0x18a9   :  { %v2799_v12 = vpop.eup %2798 }
0x18aa   :  { %1847 = vrot.lane.b32.xlu0 %v2799_v12, %s2836_s19 }
0x1918   :  { %v1846_v9 = vpop.permute.xlu1 %1845 }
0x1919   :  { %v1851_v10 = vmul.f32 %v1846_v9, %v1819_v0 }
0x191b   :  { %v1854_v41 = vrot.slane %v1851_v10, 6 }
0x191c   :  { %v1848_v43 = vpop.permute.xlu0 %1847 }
0x191d   :  { %v1857_v44 = vsel %vm1856_vm5, 0.0, %v1854_v41  ;;  %v1858_v17 = vsel %vm1856_vm5, %v1854_v41, 0.0  ;;  %v1852_v45 = vmul.f32 %v1848_v43, %v1820_v36 }
0x191e   :  { %v1863_v48 = vmul.f32 %v1862_v19, %v1857_v44  ;;  %v1869_v39 = vmul.f32 %v1868_v1, %v1857_v44  ;;  %v1870_v49 = vmul.f32 %v1868_v1, %v1858_v17  ;;  %v1883_v47 = vmul.f32 %v1882_v34, %v1857_v44 }
0x191f   :  { %v1884_v51 = vmul.f32 %v1882_v34, %v1858_v17  ;;  %v1897_v46 = vmul.f32 %v1896_v38, %v1857_v44  ;;  %v1898_v53 = vmul.f32 %v1896_v38, %v1858_v17  ;;  %v1911_v16 = vmul.f32 %v1910_v40, %v1857_v44 }
0x1920   :  { %v1874_v55 = vrot.slane %v1869_v39, 1  ;;  %v1875_v8 = vrot.slane %v1870_v49, 1  ;;  %v1888_v57 = vrot.slane %v1883_v47, 2  ;;  %v1912_v61 = vmul.f32 %v1910_v40, %v1858_v17 }
0x1921   :  { %v1889_v26 = vrot.slane %v1884_v51, 2  ;;  %v1902_v59 = vrot.slane %v1897_v46, 3  ;;  %v1903_v60 = vrot.slane %v1898_v53, 3  ;;  %v1915_v62 = vrot.slane %v1911_v16, 4 }
0x1922   :  { %v1876_v13 = vsel %vm1873_vm6, %v1874_v55, %v1875_v8  ;;  %v1916_v21 = vrot.slane %v1912_v61, 4  ;;  %v1921_v29 = vrot.slane %v1852_v45, 6 }
0x1923   :  { %v1878_v4 = vadd.f32 %v1876_v13, %v1863_v48  ;;  %v1890_v5 = vsel %vm1887_vm7, %v1888_v57, %v1889_v26  ;;  %v1904_v7 = vsel %vm1901_vm8, %v1902_v59, %v1903_v60 }
0x1924   :  { %v1923_v37 = vsel %vm1856_vm5, 0.0, %v1921_v29  ;;  %v1924_v15 = vsel %vm1856_vm5, %v1921_v29, 0.0  ;;  %v1917_v33 = vsel %vm513_vm3, %v1915_v62, %v1916_v21 }
0x1925   :  { %v1892_v31 = vadd.f32 %v1890_v5, %v1878_v4  ;;  %v1927_v18 = vmul.f32 %v1923_v37, %v1868_v1  ;;  %v1928_v20 = vmul.f32 %v1924_v15, %v1868_v1  ;;  %v1936_v12 = vmul.f32 %v1923_v37, %v1882_v34 }
0x1926   :  { %v1937_v22 = vmul.f32 %v1924_v15, %v1882_v34  ;;  %v1945_v42 = vmul.f32 %v1923_v37, %v1896_v38  ;;  %v1946_v28 = vmul.f32 %v1924_v15, %v1896_v38  ;;  %v1954_v0 = vmul.f32 %v1923_v37, %v1910_v40 }
0x1927   :  { %v1906_v25 = vadd.f32 %v1904_v7, %v1892_v31  ;;  %v1931_v30 = vrot.slane %v1927_v18, 1  ;;  %v1932_v35 = vrot.slane %v1928_v20, 1  ;;  %v1925_v63 = vmul.f32 %v1923_v37, %v1862_v19 }
0x1928   :  { %v1940_v9 = vrot.slane %v1936_v12, 2  ;;  %v1941_v10 = vrot.slane %v1937_v22, 2  ;;  %v1949_v36 = vrot.slane %v1945_v42, 3  ;;  %v1950_v44 = vrot.slane %v1946_v28, 3  ;;  %v2827_v12 = vld [vmem:[%s3505_s3] sm:$0xff]  }
0x1929   :  { %v1919_v41 = vadd.f32 %v1917_v33, %v1906_v25  ;;  %v1933_v43 = vsel %vm1873_vm6, %v1931_v30, %v1932_v35  ;;  %v1955_v17 = vmul.f32 %v1924_v15, %v1910_v40  ;;  %v1978_v1 = vrot.slane %v3294_v52, %v3066_v11 }
0x192a   :  { %v1935_v45 = vadd.f32 %v1933_v43, %v1925_v63  ;;  %v1942_v38 = vsel %vm1887_vm7, %v1940_v9, %v1941_v10  ;;  %v1958_v48 = vrot.slane %v1954_v0, 4  ;;  %v1951_v19 = vsel %vm1901_vm8, %v1949_v36, %v1950_v44  ;;  %v2828_v36 = vld [vmem:[%s3505_s3 + $0x38] sm:$0xff]   ;;  %v2831_v44 = vld [vmem:[%s3505_s3 + $0x8] sm:$0xff]  }
0x192b   :  { %v1967_v34 = vadd.f32 %v1966_v3, %v1919_v41  ;;  %v1959_v39 = vrot.slane %v1955_v17, 4  ;;  %v2829_v41 = vld [vmem:[%s3505_s3 + $0x28] sm:$0xff]   ;;  %v2830_v43 = vld [vmem:[%s3505_s3 + $0x18] sm:$0xff]  }
0x192c   :  { %v1944_v49 = vadd.f32 %v1942_v38, %v1935_v45 }
0x192d   :  { %v1973_v47 = vmul.f32 %v1972_v58, %v1967_v34  ;;  %v1960_v46 = vsel %vm513_vm3, %v1958_v48, %v1959_v39 }
0x192e   :  { %v1953_v51 = vadd.f32 %v1951_v19, %v1944_v49 }
0x192f   :  { %v1979_v53 = vadd.f32 %v1978_v1, %v1973_v47  ;;  %v2093_v47 = vrot.slane %v3385_v23, %v2930_v32 }
0x1930   :  { %v1962_v16 = vadd.f32 %v1960_v46, %v1953_v51 }
0x1931   :  { %v2354_v55 = vmul.f32 -1.442695, %v1979_v53 }
0x1932   :  { %v1968_v40 = vadd.f32 %v1966_v3, %v1962_v16 }
0x1933   :  { %2800 = vpow2.f32 %v2354_v55 }
0x1934   :  { %v1974_v8 = vmul.f32 %v1972_v58, %v1968_v40  ;;  %v2061_v58 = vrot.slane %v3385_v23, %v2920_v27  ;;  %v2824_v27 = vld [vmem:[%s3505_s3 + $0x30] sm:$0xff]  }
0x1936   :  { %v1980_v11 = vadd.f32 %v1978_v1, %v1974_v8 }
0x1938   :  { %v2355_v52 = vmul.f32 -1.442695, %v1980_v11 }
0x193a   :  { %2802 = vpow2.f32 %v2355_v52 }
0x1940   :  { %v2801_v57 = vpop.eup %2800 }
0x1941   :  { %v1987_v61 = vadd.f32 1.0, %v2801_v57 }
0x1943   :  { %2804 = vrcp.f32 %v1987_v61 }
0x1947   :  { %v2803_v26 = vpop.eup %2802 }
0x1948   :  { %v1988_v59 = vadd.f32 1.0, %v2803_v26 }
0x194a   :  { %2806 = vrcp.f32 %v1988_v59 }
0x1950   :  { %v2805_v60 = vpop.eup %2804 }
0x1951   :  { %v1993_v13 = vmul.f32 %v2805_v60, %v1979_v53  ;;  %v2099_v53 = vrot.slane %v3385_v23, %v2974_v6 }
0x1957   :  { %v2807_v62 = vpop.eup %2806 }
0x1958   :  { %v1994_v21 = vmul.f32 %v2807_v62, %v1980_v11  ;;  %v2832_v62 = vld [vmem:[%s3506_s5] sm:$0x3] }
0x195a   :  { %v1995_v29 = vpack.c.bf16 %v1994_v21, %v1993_v13  ;;  %v2106_v13 = vrot.slane %v2832_v62, %v2930_v32 }
0x195c   :  { %2651 = vmatmul.mubr.msk.bf16.vlgmr.msra.gmra.mxu1 %vm71_vm0, %v1995_v29 }
0x195d   :  { %2682 = vmatprep.mubr.msk.bf16.mxu1 %vm2834_vm1, %v2833_v14 }
0x1a1c   :  { %v2049_v3 = vpop.f32.mrf.mxu1 }
0x1a1d   :  { %v2056_v4 = vadd.f32 %v2049_v3, %v3300_v56  ;;  %v2825_v56 = vld [vmem:[%s3505_s3 + $0x20] sm:$0xff]  }
0x1a1e   :  { %v2652_v5 = vpop.f32.mrf.mxu1 }
0x1a1f   :  { %v3421_v7 = vadd.f32 %v2061_v58, %v2056_v4 }
0x1a20   :  { %v2052_v37 = vpop.f32.mrf.mxu1 }
0x1a21   :  { %v2057_v15 = vadd.f32 %v2052_v37, %v3314_v24  ;;  %v2064_v31 = vsel %vm71_vm0, %v3421_v7, 0.0  ;;  %v2826_v24 = vld [vmem:[%s3505_s3 + $0x10] sm:$0xff]  }
0x1a22   :  { %2065 = vadd.xlane.f32.xlu0 %v2064_v31  ;;  %v2653_v33 = vpop.f32.mrf.mxu1 }
0x1a23   :  { %v3426_v18 = vadd.f32 %v2061_v58, %v2057_v15 }
0x1a25   :  { %v2067_v20 = vsel %vm71_vm0, %v3426_v18, 0.0 }
0x1a26   :  { %2068 = vadd.xlane.f32.xlu1 %v2067_v20 }
0x1a37   :  { %2198 = vrot.lane.b32.xlu1 %v2824_v27, %s2836_s19 }
0x1a3b   :  { %2194 = vrot.lane.b32.xlu1 %v2825_v56, %s2836_s19 }
0x1a3f   :  { %2190 = vrot.lane.b32.xlu1 %v2826_v24, %s2836_s19 }
0x1a43   :  { %2186 = vrot.lane.b32.xlu1 %v2827_v12, %s2836_s19 }
0x1aab   :  { %v2066_v22 = vpop.xlane.xlu0 %2065 }
0x1aac   :  { %v2070_v42 = vmul.f32 0.015625, %v2066_v22  ;;  %v2185_v22 = vrot.slane %v3385_v23, %v3036_v50 }
0x1aae   :  { %v2072_v28 = vsub.f32 %v3421_v7, %v2070_v42 }
0x1aaf   :  { %v2069_v25 = vpop.xlane.xlu1 %2068 }
0x1ab0   :  { %v2071_v30 = vmul.f32 0.015625, %v2069_v25  ;;  %v2074_v35 = vmul.f32 %v2072_v28, %v2072_v28 }
0x1ab2   :  { %v2073_v0 = vsub.f32 %v3426_v18, %v2071_v30  ;;  %v2076_v63 = vsel %vm71_vm0, %v2074_v35, 0.0 }
0x1ab3   :  { %2077 = vadd.xlane.f32.xlu0 %v2076_v63  ;;  %v2199_v52 = vpop.permute.xlu1 %2198 }
0x1ab4   :  { %v2075_v9 = vmul.f32 %v2073_v0, %v2073_v0 }
0x1ab6   :  { %v2079_v10 = vsel %vm71_vm0, %v2075_v9, 0.0 }
0x1ab7   :  { %2080 = vadd.xlane.f32.xlu0 %v2079_v10  ;;  %v2195_v61 = vpop.permute.xlu1 %2194 }
0x1abb   :  { %v2191_v26 = vpop.permute.xlu1 %2190 }
0x1abf   :  { %v2187_v60 = vpop.permute.xlu1 %2186 }
0x1acd   :  { %2200 = vrot.lane.b32.xlu0 %v2828_v36, %s2836_s19 }
0x1ad1   :  { %2196 = vrot.lane.b32.xlu0 %v2829_v41, %s2836_s19 }
0x1ad5   :  { %2192 = vrot.lane.b32.xlu0 %v2830_v43, %s2836_s19 }
0x1ad9   :  { %2188 = vrot.lane.b32.xlu0 %v2831_v44, %s2836_s19 }
0x1b3c   :  { %v2078_v17 = vpop.xlane.xlu0 %2077 }
0x1b3d   :  { %v2082_v1 = vmul.f32 0.015625, %v2078_v17 }
0x1b3f   :  { %v2084_v45 = vadd.f32 1e-05, %v2082_v1 }
0x1b40   :  { %v2081_v34 = vpop.xlane.xlu0 %2080 }
0x1b41   :  { %2808 = vrsqrt.f32 %v2084_v45  ;;  %v2083_v38 = vmul.f32 0.015625, %v2081_v34 }
0x1b43   :  { %v2085_v48 = vadd.f32 1e-05, %v2083_v38 }
0x1b44   :  { %v2201_v11 = vpop.permute.xlu0 %2200 }
0x1b45   :  { %2810 = vrsqrt.f32 %v2085_v48  ;;  %2667 = vmatpush3.bf16.msra.mxu1 %v2201_v11 }
0x1b46   :  { %2668 = vmatprep.subr.bf16.mxu1 %v2833_v14 }
0x1b48   :  { %v2197_v57 = vpop.permute.xlu0 %2196 }
0x1b49   :  { %2669 = vmatpush3.bf16.msra.mxu1 %v2199_v52 }
0x1b4a   :  { %2670 = vmatprep.subr.bf16.mxu1 %v2833_v14 }
0x1b4c   :  { %v2193_v6 = vpop.permute.xlu0 %2192 }
0x1b4d   :  { %2671 = vmatpush3.bf16.msra.mxu1 %v2197_v57 }
0x1b4e   :  { %v2809_v39 = vpop.eup %2808  ;;  %2672 = vmatprep.subr.bf16.mxu1 %v2833_v14 }
0x1b4f   :  { %v2088_v49 = vmul.f32 %v2809_v39, %v2072_v28 }
0x1b50   :  { %v2189_v59 = vpop.permute.xlu0 %2188 }
0x1b51   :  { %v2094_v46 = vmul.f32 %v2093_v47, %v2088_v49  ;;  %2673 = vmatpush3.bf16.msra.mxu1 %v2195_v61 }
0x1b52   :  { %v2811_v19 = vpop.eup %2810  ;;  %2674 = vmatprep.subr.bf16.mxu1 %v2833_v14 }
0x1b53   :  { %v2089_v51 = vmul.f32 %v2811_v19, %v2073_v0  ;;  %v2100_v55 = vadd.f32 %v2099_v53, %v2094_v46 }
0x1b55   :  { %v2095_v16 = vmul.f32 %v2093_v47, %v2089_v51  ;;  %2675 = vmatpush3.bf16.msra.mxu1 %v2193_v6 }
0x1b56   :  { %2676 = vmatprep.subr.bf16.mxu1 %v2833_v14 }
0x1b57   :  { %v2101_v40 = vadd.f32 %v2099_v53, %v2095_v16  ;;  %v2284_v53 = vrot.slane %v3385_v23, %v3041_v54 }
0x1b59   :  { %v2102_v8 = vpack.c.bf16 %v2101_v40, %v2100_v55  ;;  %2677 = vmatpush3.bf16.msra.mxu1 %v2191_v26  ;;  %v2290_v55 = vrot.slane %v3385_v23, %v3051_v2 }
0x1b5a   :  { %2678 = vmatprep.subr.bf16.mxu1 %v2833_v14 }
0x1b5b   :  { %2663 = vmatmul.mubr.msk.bf16.vlgmr.msra.gmra.mxu0 %vm71_vm0, %v2102_v8 }
0x1b5d   :  { %2679 = vmatpush3.bf16.msra.mxu1 %v2189_v59 }
0x1b5e   :  { %2680 = vmatprep.subr.bf16.mxu1 %v2833_v14 }
0x1b61   :  { %2681 = vmatpush3.bf16.msra.mxu1 %v2187_v60 }
0x1c1b   :  { %v2160_v21 = vpop.f32.mrf.mxu0 }
0x1c1c   :  { %v2161_v29 = vadd.f32 %v2160_v21, %v2106_v13 }
0x1c1d   :  { %v2664_v58 = vpop.f32.mrf.mxu0 }
0x1c1e   :  { %v2366_v3 = vmul.f32 -1.442695, %v2161_v29 }
0x1c1f   :  { %v2163_v4 = vpop.f32.mrf.mxu0 }
0x1c20   :  { %2812 = vpow2.f32 %v2366_v3  ;;  %v2164_v5 = vadd.f32 %v2163_v4, %v2106_v13 }
0x1c21   :  { %v2665_v37 = vpop.f32.mrf.mxu0 }
0x1c22   :  { %v2367_v15 = vmul.f32 -1.442695, %v2164_v5 }
0x1c24   :  { %2814 = vpow2.f32 %v2367_v15 }
0x1c2d   :  { %v2813_v31 = vpop.eup %2812 }
0x1c2e   :  { %v2173_v14 = vadd.f32 1.0, %v2813_v31 }
0x1c30   :  { %2816 = vrcp.f32 %v2173_v14 }
0x1c31   :  { %v2815_v33 = vpop.eup %2814 }
0x1c32   :  { %v2174_v20 = vadd.f32 1.0, %v2815_v33 }
0x1c34   :  { %2818 = vrcp.f32 %v2174_v20 }
0x1c3d   :  { %v2817_v27 = vpop.eup %2816 }
0x1c3e   :  { %v2179_v24 = vmul.f32 %v2817_v27, %v2161_v29 }
0x1c41   :  { %v2819_v56 = vpop.eup %2818 }
0x1c42   :  { %v2180_v32 = vmul.f32 %v2819_v56, %v2164_v5 }
0x1c44   :  { %v2181_v12 = vpack.c.bf16 %v2180_v32, %v2179_v24 }
0x1c46   :  { %2683 = vmatmul.mubr.bf16.vlgmr.msra.gmra.mxu1 %v2181_v12 }
0x1d06   :  { %v2244_v42 = vpop.f32.mrf.mxu1 }
0x1d07   :  { %v2245_v28 = vadd.f32 %v2244_v42, %v2185_v22 }
0x1d08   :  { %v2684_v25 = vpop.f32.mrf.mxu1 }
0x1d09   :  { %v2251_v30 = vmul.f32 0.5, %v2245_v28 }
0x1d0a   :  { %v2247_v35 = vpop.f32.mrf.mxu1 }
0x1d0b   :  { %v2248_v0 = vadd.f32 %v2247_v35, %v2185_v22  ;;  %v2253_v63 = vadd.f32 %v2251_v30, %v3421_v7 }
0x1d0c   :  { %v2685_v9 = vpop.f32.mrf.mxu1 }
0x1d0d   :  { %v2252_v10 = vmul.f32 0.5, %v2248_v0  ;;  %v2255_v36 = vsel %vm71_vm0, %v2253_v63, 0.0 }
0x1d0e   :  { %2256 = vadd.xlane.f32.xlu0 %v2255_v36 }
0x1d0f   :  { %v2254_v41 = vadd.f32 %v2252_v10, %v3426_v18 }
0x1d11   :  { %v2258_v43 = vsel %vm71_vm0, %v2254_v41, 0.0 }
0x1d12   :  { %2259 = vadd.xlane.f32.xlu1 %v2258_v43 }
0x1d97   :  { %v2257_v44 = vpop.xlane.xlu0 %2256 }
0x1d98   :  { %v2261_v50 = vmul.f32 0.015625, %v2257_v44 }
0x1d9a   :  { %v2263_v17 = vsub.f32 %v2253_v63, %v2261_v50 }
0x1d9b   :  { %v2260_v1 = vpop.xlane.xlu1 %2259 }
0x1d9c   :  { %v2262_v45 = vmul.f32 0.015625, %v2260_v1  ;;  %v2265_v34 = vmul.f32 %v2263_v17, %v2263_v17 }
0x1d9e   :  { %v2264_v38 = vsub.f32 %v2254_v41, %v2262_v45  ;;  %v2267_v48 = vsel %vm71_vm0, %v2265_v34, 0.0 }
0x1d9f   :  { %2268 = vadd.xlane.f32.xlu0 %v2267_v48 }
0x1da0   :  { %v2266_v7 = vmul.f32 %v2264_v38, %v2264_v38 }
0x1da2   :  { %v2270_v39 = vsel %vm71_vm0, %v2266_v7, 0.0 }
0x1da3   :  { %2271 = vadd.xlane.f32.xlu0 %v2270_v39 }
0x1e28   :  { %v2269_v49 = vpop.xlane.xlu0 %2268 }
0x1e29   :  { %v2273_v47 = vmul.f32 0.015625, %v2269_v49 }
0x1e2b   :  { %v2275_v18 = vadd.f32 1e-05, %v2273_v47 }
0x1e2c   :  { %v2272_v19 = vpop.xlane.xlu0 %2271 }
0x1e2d   :  { %2820 = vrsqrt.f32 %v2275_v18  ;;  %v2274_v51 = vmul.f32 0.015625, %v2272_v19 }
0x1e2f   :  { %v2276_v46 = vadd.f32 1e-05, %v2274_v51 }
0x1e31   :  { %2822 = vrsqrt.f32 %v2276_v46 }
0x1e3a   :  { %v2821_v16 = vpop.eup %2820 }
0x1e3b   :  { %v2279_v40 = vmul.f32 %v2821_v16, %v2263_v17 }
0x1e3d   :  { %v2285_v8 = vmul.f32 %v2284_v53, %v2279_v40 }
0x1e3e   :  { %v2823_v11 = vpop.eup %2822 }
0x1e3f   :  { %v2291_v52 = vadd.f32 %v2290_v55, %v2285_v8  ;;  %v2280_v57 = vmul.f32 %v2823_v11, %v2264_v38 }
0x1e41   :  { %2293 = vst.msk [vmem:[%s3508_s6] sm:$0xff] %vm71_vm0, %v2291_v52  ;;  %v2286_v61 = vmul.f32 %v2284_v53, %v2280_v57 }
0x1e43   :  { %v2292_v6 = vadd.f32 %v2290_v55, %v2286_v61 }
0x1e45   :  { %2294 = vst.msk [vmem:[%s3508_s6 + $0x8] sm:$0xff] %vm71_vm0, %v2292_v6 }

</bundles_post_ra>
